<compile_context>
chip_gen: v7x
topology: tpu7x:2x2x1
jax: 0.10.0
libtpu: 0.0.40
codegen_flags: <defaults>
</compile_context>

<pallas_src>
import functools
import numpy as np
import jax
import jax.numpy as jnp
from jax.experimental import pallas as pl
from jax.experimental.pallas import tpu as pltpu


# ------------------------------- helpers -------------------------------------

def _layer_norm(x, g, b, eps=1e-5):
    mu = jnp.mean(x, axis=-1, keepdims=True)
    var = jnp.mean((x - mu) ** 2, axis=-1, keepdims=True)
    return (x - mu) / jnp.sqrt(var + eps) * g + b


# ----------------------------- fused Pallas kernel ---------------------------

def fused_forward_kernel(*refs, n_heads, e_layers, num_patch, blk):
    """One chunk of BLK series through the whole PatchTST trunk.

    Row layout inside the chunk is p-major: row r = p*BLK + local_series, so
    the FlattenHead per-patch slices are sublane-tile aligned and the series
    id of a row is simply r % BLK.

    Inputs (in order):
      patches (ROWS, PL) bf16     pre-unfolded patches for this chunk
      pe_blk  (ROWS, D)  f32      positional embedding tiled for one chunk
      emb_w   (PL, D)    bf16     value embedding
      per layer (x e_layers):
        wqkv (D,3D) bf16 (q part pre-scaled by 1/sqrt(E)), bqkv (1,3D) f32,
        wo_h (H,E,D) bf16, bo (1,D), ln1_g (1,D), ln1_b (1,D),
        w1 (D,F) bf16, b1 (1,F), w2 (F,D) bf16, b2 (1,D), ln2_g (1,D), ln2_b (1,D)
      bn_scale (1,D), bn_shift (1,D)       folded eval-mode BatchNorm1d
      head_w_k (P, D, T) bf16, head_b (1,T)  FlattenHead linear (re-packed)
      std_col (BLK,1), mean_col (BLK,1)    instance de-normalization
    Output:
      out (BLK, T) f32
    """
    n_fixed = 3
    patch_ref, pe_ref, emb_w_ref = refs[:n_fixed]
    layer_refs = refs[n_fixed:n_fixed + 12 * e_layers]
    (bn_scale_ref, bn_shift_ref, head_w_ref, head_b_ref,
     std_ref, mean_ref, out_ref) = refs[n_fixed + 12 * e_layers:]

    P = num_patch
    BLK = blk
    ROWS = BLK * P
    D = emb_w_ref.shape[1]
    H = n_heads
    E = D // H

    # ---- patch embedding + positional embedding -----------------------------
    x = jnp.dot(patch_ref[...], emb_w_ref[...],
                preferred_element_type=jnp.float32) + pe_ref[...]      # (ROWS, D) f32

    # ---- block-diagonal additive mask, generated in-kernel -------------------
    rid = jax.lax.broadcasted_iota(jnp.int32, (ROWS, ROWS), 0) % BLK
    cid = jax.lax.broadcasted_iota(jnp.int32, (ROWS, ROWS), 1) % BLK
    mask = jnp.where(rid == cid, jnp.float32(0.0), jnp.float32(-1e30))  # (ROWS, ROWS)

    # ---- encoder layers ------------------------------------------------------
    for l in range(e_layers):
        (wqkv, bqkv, wo_h, bo, ln1_g, ln1_b,
         w1, b1, w2, b2, ln2_g, ln2_b) = layer_refs[12 * l: 12 * (l + 1)]

        xb = x.astype(jnp.bfloat16)
        proj = None
        for h in range(H):
            qo, ko, vo = h * E, D + h * E, 2 * D + h * E
            # per-head projections straight off the MXU (static weight-ref slices)
            qh = jnp.dot(xb, wqkv[:, qo:qo + E],
                         preferred_element_type=jnp.float32) + bqkv[:, qo:qo + E]
            kh = jnp.dot(xb, wqkv[:, ko:ko + E],
                         preferred_element_type=jnp.float32) + bqkv[:, ko:ko + E]
            vh = jnp.dot(xb, wqkv[:, vo:vo + E],
                         preferred_element_type=jnp.float32) + bqkv[:, vo:vo + E]

            # scores over the chunk, block-diagonal mask keeps series separate
            s = jax.lax.dot_general(qh.astype(jnp.bfloat16), kh.astype(jnp.bfloat16),
                                    (((1,), (1,)), ((), ())),
                                    preferred_element_type=jnp.float32)
            s = s + mask
            s = s - jnp.max(s, axis=-1, keepdims=True)
            p_ = jnp.exp(s)
            a = p_ * pl.reciprocal(jnp.sum(p_, axis=-1, keepdims=True), approx=True)

            oh = jnp.dot(a.astype(jnp.bfloat16), vh.astype(jnp.bfloat16),
                         preferred_element_type=jnp.float32)            # (ROWS, E)
            # fold head output directly into the output projection
            contrib = jnp.dot(oh.astype(jnp.bfloat16), wo_h[h],
                              preferred_element_type=jnp.float32)       # (ROWS, D)
            proj = contrib if proj is None else proj + contrib
        attn = proj + bo[...]

        x1 = _layer_norm(x + attn, ln1_g[...], ln1_b[...])
        y = jnp.dot(x1.astype(jnp.bfloat16), w1[...],
                    preferred_element_type=jnp.float32) + b1[...]
        y = jnp.maximum(y, 0.0)                                         # activation = relu
        y = jnp.dot(y.astype(jnp.bfloat16), w2[...],
                    preferred_element_type=jnp.float32) + b2[...]
        x = _layer_norm(x1 + y, ln2_g[...], ln2_b[...])

    # ---- Encoder norm layer: eval-mode BatchNorm1d folded to scale/shift ----
    x = x * bn_scale_ref[...] + bn_shift_ref[...]                       # (ROWS, D)

    # ---- FlattenHead: out[b] = sum_p enc[(p,b)] @ W_p + bias -----------------
    T = head_b_ref.shape[-1]
    z = jnp.zeros((BLK, T), jnp.float32)
    for p in range(P):
        z = z + jnp.dot(x[p * BLK:(p + 1) * BLK, :].astype(jnp.bfloat16),
                        head_w_ref[p], preferred_element_type=jnp.float32)
    z = z + head_b_ref[...]

    # ---- de-normalization ----------------------------------------------------
    z = z * std_ref[...] + mean_ref[...]
    out_ref[...] = z.astype(out_ref.dtype)


# ------------------------------ full forward ----------------------------------

def patchtst_forecast(x_enc, params, cfg, blk=8):
    B, L, C = x_enc.shape
    stride, patch_len = cfg['stride'], cfg['patch_len']
    D, P, H, T = cfg['d_model'], cfg['num_patch'], cfg['n_heads'], cfg['pred_len']
    F = cfg['d_ff']
    e_layers = cfg['e_layers']
    BN = B * C
    E = D // H

    # chunking over series: BLK must be a sublane multiple (8)
    BLK = max(8, ((blk + 7) // 8) * 8)
    NC = -(-BN // BLK)                   # ceil-div
    BN_pad = NC * BLK
    ROWS = BLK * P

    # ---- instance normalization (tiny XLA glue) -----------------------------
    means = jnp.mean(x_enc, axis=1, keepdims=True)
    xc = x_enc - means
    stdev = jnp.sqrt(jnp.var(xc, axis=1, keepdims=True) + 1e-5)   # biased var
    xn = xc / stdev

    # channel-major series + replication pad right by `stride`, unfold in XLA
    x = jnp.transpose(xn, (0, 2, 1)).reshape(BN, L)                       # (BN, L)
    xp = jnp.concatenate([x, jnp.repeat(x[:, -1:], stride, axis=-1)], axis=-1)
    patches = jnp.stack(
        [xp[:, p * stride: p * stride + patch_len] for p in range(P)], axis=1)  # (BN,P,PL)

    std_col = jnp.transpose(stdev, (0, 2, 1)).reshape(BN, 1)
    mean_col = jnp.transpose(means, (0, 2, 1)).reshape(BN, 1)

    if BN_pad > BN:
        pad = BN_pad - BN
        patches = jnp.concatenate(
            [patches, jnp.zeros((pad, P, patch_len), patches.dtype)], axis=0)
        std_col = jnp.concatenate([std_col, jnp.ones((pad, 1), std_col.dtype)], axis=0)
        mean_col = jnp.concatenate([mean_col, jnp.zeros((pad, 1), mean_col.dtype)], axis=0)

    # chunked, p-major row layout: row = chunk*ROWS + p*BLK + local_series
    patches_flat = (patches.reshape(NC, BLK, P, patch_len)
                    .transpose(0, 2, 1, 3)
                    .reshape(NC * ROWS, patch_len)
                    .astype(jnp.bfloat16))

    # ---- constant (parameter) packing: constant-folded under jit ------------
    pe_blk = jnp.repeat(params['pe'], BLK, axis=0).astype(jnp.float32)    # (ROWS, D)
    emb_w = params['emb_w'].astype(jnp.bfloat16)
    qk_scale = 1.0 / float(np.sqrt(E))

    layer_inputs = []
    for lp in params['layers']:
        wqkv = jnp.concatenate([lp['wq'] * qk_scale, lp['wk'], lp['wv']], axis=1)
        bqkv = jnp.concatenate([lp['bq'] * qk_scale, lp['bk'], lp['bv']], axis=1)
        wo_heads = lp['wo'].reshape(H, E, D)
        layer_inputs += [
            wqkv.astype(jnp.bfloat16), bqkv.astype(jnp.float32),
            wo_heads.astype(jnp.bfloat16), lp['bo'],
            lp['ln1_g'], lp['ln1_b'],
            lp['w1'].astype(jnp.bfloat16), lp['b1'],
            lp['w2'].astype(jnp.bfloat16), lp['b2'],
            lp['ln2_g'], lp['ln2_b'],
        ]

    inv_std = params['bn_gamma'] / jnp.sqrt(params['bn_var'] + 1e-5)
    bn_scale = inv_std
    bn_shift = params['bn_beta'] - params['bn_mean'] * inv_std
    # head_w is (D*P, T) with flat index d*P + p  ->  repack to (P, D, T)
    head_w_k = jnp.transpose(params['head_w'].reshape(D, P, T), (1, 0, 2)).astype(jnp.bfloat16)
    head_b = params['head_b'].astype(jnp.float32)

    inputs = [patches_flat, pe_blk, emb_w, *layer_inputs,
              bn_scale, bn_shift, head_w_k, head_b, std_col, mean_col]

    # ---- block specs ---------------------------------------------------------
    def const_spec(a):
        shape = tuple(int(d) for d in a.shape)
        nd = len(shape)
        return pl.BlockSpec(shape, lambda i, _nd=nd: (0,) * _nd)

    in_specs = [
        pl.BlockSpec((ROWS, patch_len), lambda i: (i, 0)),      # patches (per chunk)
        const_spec(pe_blk),
        const_spec(emb_w),
    ]
    in_specs += [const_spec(a) for a in layer_inputs]
    in_specs += [const_spec(bn_scale), const_spec(bn_shift),
                 const_spec(head_w_k), const_spec(head_b),
                 pl.BlockSpec((BLK, 1), lambda i: (i, 0)),      # std (per chunk)
                 pl.BlockSpec((BLK, 1), lambda i: (i, 0))]      # mean (per chunk)
    out_spec = pl.BlockSpec((BLK, T), lambda i: (i, 0))

    # ---- VMEM budget and cost estimate from the actual working set ----------
    def nbytes(a):
        return int(np.prod(a.shape)) * np.dtype(a.dtype).itemsize

    total_in_bytes = sum(nbytes(a) for a in inputs)
    act_bytes = 4 * ROWS * ROWS * 4 + 12 * ROWS * max(3 * D, F, D) * 4
    vmem_limit = int(min(56 << 20,
                         max(4 << 20, 2 * total_in_bytes + act_bytes + (1 << 20))))

    per_chunk_flops = 2 * ROWS * patch_len * D
    per_chunk_flops += e_layers * (2 * ROWS * D * 3 * D          # qkv projections
                                   + 4 * H * ROWS * ROWS * E     # scores + AV
                                   + 2 * ROWS * D * D            # output projection
                                   + 4 * ROWS * D * F)           # FFN
    per_chunk_flops += 2 * BLK * P * D * T                        # head
    cost = pl.CostEstimate(
        flops=int(NC * per_chunk_flops),
        transcendentals=int(NC * e_layers * H * ROWS * ROWS),
        bytes_accessed=int(total_in_bytes + BN_pad * T * 4))

    kernel = functools.partial(
        fused_forward_kernel,
        n_heads=H, e_layers=e_layers, num_patch=P, blk=BLK)

    out_full = pl.pallas_call(
        kernel,
        out_shape=jax.ShapeDtypeStruct((BN_pad, T), jnp.float32),
        grid=(NC,),
        in_specs=in_specs,
        out_specs=out_spec,
        compiler_params=pltpu.CompilerParams(
            dimension_semantics=("parallel",),
            vmem_limit_bytes=vmem_limit),
        cost_estimate=cost,
    )(*inputs)

    out = out_full[:BN]
    dec = out.reshape(B, C, T).transpose(0, 2, 1)                  # (B, pred_len, C)
    return dec                                                     # == dec_out[:, -pred_len:, :]


# ----------------------- pure-JAX reference (check) ---------------------------

def patchtst_forecast_ref(x_enc, params, cfg):
    B, L, C = x_enc.shape
    stride, patch_len = cfg['stride'], cfg['patch_len']
    D, P, H = cfg['d_model'], cfg['num_patch'], cfg['n_heads']
    E = D // H

    means = jnp.mean(x_enc, axis=1, keepdims=True)
    xc = x_enc - means
    stdev = jnp.sqrt(jnp.var(xc, axis=1, keepdims=True) + 1e-5)
    xn = xc / stdev
    x = jnp.transpose(xn, (0, 2, 1))
    xp = jnp.concatenate([x, jnp.repeat(x[:, :, -1:], stride, axis=-1)], axis=-1)
    patches = jnp.stack(
        [xp[:, :, i * stride: i * stride + patch_len] for i in range(P)], axis=2)
    patches = patches.reshape(B * C, P, patch_len)

    enc = patches @ params['emb_w'] + params['pe']
    for lp in params['layers']:
        q = (enc @ lp['wq'] + lp['bq']).reshape(B * C, P, H, E)
        k = (enc @ lp['wk'] + lp['bk']).reshape(B * C, P, H, E)
        v = (enc @ lp['wv'] + lp['bv']).reshape(B * C, P, H, E)
        s = jnp.einsum('bphe,bqhe->bhpq', q, k) / np.sqrt(E)
        a = jax.nn.softmax(s, axis=-1)
        o = jnp.einsum('bhpq,bqhe->bphe', a, v).reshape(B * C, P, D)
        x1 = _layer_norm(enc + (o @ lp['wo'] + lp['bo']), lp['ln1_g'], lp['ln1_b'])
        y = jnp.maximum(x1 @ lp['w1'] + lp['b1'], 0.0) @ lp['w2'] + lp['b2']
        enc = _layer_norm(x1 + y, lp['ln2_g'], lp['ln2_b'])

    enc = ((enc - params['bn_mean']) / jnp.sqrt(params['bn_var'] + 1e-5)
           * params['bn_gamma'] + params['bn_beta'])
    enc = enc.reshape(B, C, P, D).transpose(0, 1, 3, 2).reshape(B, C, D * P)
    dec = (enc @ params['head_w'] + params['head_b']).transpose(0, 2, 1)
    return dec * stdev + means


# ------------------------------ param init ------------------------------------

def _linear(key, fan_in, fan_out, bias=True):
    kw, kb = jax.random.split(key)
    bound = 1.0 / np.sqrt(fan_in)
    w = jax.random.uniform(kw, (fan_in, fan_out), jnp.float32, -bound, bound)
    if not bias:
        return w, None
    b = jax.random.uniform(kb, (1, fan_out), jnp.float32, -bound, bound)
    return w, b


def make_params(key, cfg):
    D, P, PL = cfg['d_model'], cfg['num_patch'], cfg['patch_len']
    d_ff, T = cfg['d_ff'], cfg['pred_len']
    keys = jax.random.split(key, 4 + cfg['e_layers'])

    emb_w, _ = _linear(keys[0], PL, D, bias=False)   # value_embedding (no bias)

    # fixed sinusoidal positional embedding
    position = jnp.arange(P, dtype=jnp.float32)[:, None]
    div_term = jnp.exp(jnp.arange(0, D, 2, dtype=jnp.float32)
                       * -(np.log(10000.0) / D))
    pe = jnp.zeros((P, D), jnp.float32)
    pe = pe.at[:, 0::2].set(jnp.sin(position * div_term))
    pe = pe.at[:, 1::2].set(jnp.cos(position * div_term))

    layers = []
    for l in range(cfg['e_layers']):
        lk = jax.random.split(keys[2 + l], 6)
        wq, bq = _linear(lk[0], D, D)
        wk, bk = _linear(lk[1], D, D)
        wv, bv = _linear(lk[2], D, D)
        wo, bo = _linear(lk[3], D, D)
        w1, b1 = _linear(lk[4], D, d_ff)     # conv1d k=1  (d_model -> d_ff)
        w2, b2 = _linear(lk[5], d_ff, D)     # conv1d k=1  (d_ff -> d_model)
        layers.append(dict(
            wq=wq, bq=bq, wk=wk, bk=bk, wv=wv, bv=bv, wo=wo, bo=bo,
            ln1_g=jnp.ones((1, D), jnp.float32), ln1_b=jnp.zeros((1, D), jnp.float32),
            w1=w1, b1=b1, w2=w2, b2=b2,
            ln2_g=jnp.ones((1, D), jnp.float32), ln2_b=jnp.zeros((1, D), jnp.float32)))

    head_w, head_b = _linear(keys[1], D * P, T)

    return dict(
        emb_w=emb_w, pe=pe, layers=layers,
        bn_gamma=jnp.ones((1, D), jnp.float32), bn_beta=jnp.zeros((1, D), jnp.float32),
        bn_mean=jnp.zeros((1, D), jnp.float32), bn_var=jnp.ones((1, D), jnp.float32),
        head_w=head_w, head_b=head_b)


# --------------------------------- main ----------------------------------------

if __name__ == "__main__":
    cfg = dict(seq_len=32, pred_len=16, patch_len=8, stride=8,
               d_model=32, n_heads=4, d_ff=64, e_layers=2, enc_in=4)
    cfg['num_patch'] = (cfg['seq_len'] - cfg['patch_len']) // cfg['stride'] + 2

    key = jax.random.PRNGKey(0)
    k_x, k_p = jax.random.split(key)
    B = 3   # BN = 12 series -> padded to 16, grid of 2 chunks of 8 series
    x_enc = jax.random.normal(k_x, (B, cfg['seq_len'], cfg['enc_in']), jnp.float32)
    params = make_params(k_p, cfg)

    out = jax.jit(lambda x: patchtst_forecast(x, params, cfg))(x_enc)
    out = jax.block_until_ready(out)

    ref = jax.block_until_ready(patchtst_forecast_ref(x_enc, params, cfg))
    np.testing.assert_allclose(np.asarray(out), np.asarray(ref), rtol=3e-2, atol=3e-2)
    assert out.shape == (B, cfg['pred_len'], cfg['enc_in'])

    # TODO(synk): only the forecast task branch is implemented (imputation /
    # anomaly_detection / classification heads are not exercised here).
    print("KERNEL_OK")
</pallas_src>

<mosaic_0001>
module attributes {stable_mosaic.version = 11 : i64} {
  func.func @fused_forward_kernel(%arg0: i32, %arg1: memref<40x8xbf16, #tpu.memory_space<vmem>>, %arg2: memref<40x32xf32, #tpu.memory_space<vmem>>, %arg3: memref<8x32xbf16, #tpu.memory_space<vmem>>, %arg4: memref<32x96xbf16, #tpu.memory_space<vmem>>, %arg5: memref<1x96xf32, #tpu.memory_space<vmem>>, %arg6: memref<4x8x32xbf16, #tpu.memory_space<vmem>>, %arg7: memref<1x32xf32, #tpu.memory_space<vmem>>, %arg8: memref<1x32xf32, #tpu.memory_space<vmem>>, %arg9: memref<1x32xf32, #tpu.memory_space<vmem>>, %arg10: memref<32x64xbf16, #tpu.memory_space<vmem>>, %arg11: memref<1x64xf32, #tpu.memory_space<vmem>>, %arg12: memref<64x32xbf16, #tpu.memory_space<vmem>>, %arg13: memref<1x32xf32, #tpu.memory_space<vmem>>, %arg14: memref<1x32xf32, #tpu.memory_space<vmem>>, %arg15: memref<1x32xf32, #tpu.memory_space<vmem>>, %arg16: memref<32x96xbf16, #tpu.memory_space<vmem>>, %arg17: memref<1x96xf32, #tpu.memory_space<vmem>>, %arg18: memref<4x8x32xbf16, #tpu.memory_space<vmem>>, %arg19: memref<1x32xf32, #tpu.memory_space<vmem>>, %arg20: memref<1x32xf32, #tpu.memory_space<vmem>>, %arg21: memref<1x32xf32, #tpu.memory_space<vmem>>, %arg22: memref<32x64xbf16, #tpu.memory_space<vmem>>, %arg23: memref<1x64xf32, #tpu.memory_space<vmem>>, %arg24: memref<64x32xbf16, #tpu.memory_space<vmem>>, %arg25: memref<1x32xf32, #tpu.memory_space<vmem>>, %arg26: memref<1x32xf32, #tpu.memory_space<vmem>>, %arg27: memref<1x32xf32, #tpu.memory_space<vmem>>, %arg28: memref<1x32xf32, #tpu.memory_space<vmem>>, %arg29: memref<1x32xf32, #tpu.memory_space<vmem>>, %arg30: memref<5x32x16xbf16, #tpu.memory_space<vmem>>, %arg31: memref<1x16xf32, #tpu.memory_space<vmem>>, %arg32: memref<8x1xf32, #tpu.memory_space<vmem>>, %arg33: memref<8x1xf32, #tpu.memory_space<vmem>>, %arg34: memref<8x16xf32, #tpu.memory_space<vmem>>) attributes {dimension_semantics = [#tpu.dimension_semantics<parallel>], iteration_bounds = array<i64: 2>, scalar_prefetch = 0 : i64, scratch_operands = 0 : i64, tpu.core_type = #tpu.core_type<tc>, window_params = [{transform_indices = @transform_0, window_bounds = array<i64: 40, 8>}, {pipeline_mode = #tpu.pipeline_mode<synchronous>, transform_indices = @transform_1, window_bounds = array<i64: 40, 32>}, {pipeline_mode = #tpu.pipeline_mode<synchronous>, transform_indices = @transform_2, window_bounds = array<i64: 8, 32>}, {pipeline_mode = #tpu.pipeline_mode<synchronous>, transform_indices = @transform_3, window_bounds = array<i64: 32, 96>}, {pipeline_mode = #tpu.pipeline_mode<synchronous>, transform_indices = @transform_4, window_bounds = array<i64: 1, 96>}, {pipeline_mode = #tpu.pipeline_mode<synchronous>, transform_indices = @transform_5, window_bounds = array<i64: 4, 8, 32>}, {pipeline_mode = #tpu.pipeline_mode<synchronous>, transform_indices = @transform_6, window_bounds = array<i64: 1, 32>}, {pipeline_mode = #tpu.pipeline_mode<synchronous>, transform_indices = @transform_7, window_bounds = array<i64: 1, 32>}, {pipeline_mode = #tpu.pipeline_mode<synchronous>, transform_indices = @transform_8, window_bounds = array<i64: 1, 32>}, {pipeline_mode = #tpu.pipeline_mode<synchronous>, transform_indices = @transform_9, window_bounds = array<i64: 32, 64>}, {pipeline_mode = #tpu.pipeline_mode<synchronous>, transform_indices = @transform_10, window_bounds = array<i64: 1, 64>}, {pipeline_mode = #tpu.pipeline_mode<synchronous>, transform_indices = @transform_11, window_bounds = array<i64: 64, 32>}, {pipeline_mode = #tpu.pipeline_mode<synchronous>, transform_indices = @transform_12, window_bounds = array<i64: 1, 32>}, {pipeline_mode = #tpu.pipeline_mode<synchronous>, transform_indices = @transform_13, window_bounds = array<i64: 1, 32>}, {pipeline_mode = #tpu.pipeline_mode<synchronous>, transform_indices = @transform_14, window_bounds = array<i64: 1, 32>}, {pipeline_mode = #tpu.pipeline_mode<synchronous>, transform_indices = @transform_15, window_bounds = array<i64: 32, 96>}, {pipeline_mode = #tpu.pipeline_mode<synchronous>, transform_indices = @transform_16, window_bounds = array<i64: 1, 96>}, {pipeline_mode = #tpu.pipeline_mode<synchronous>, transform_indices = @transform_17, window_bounds = array<i64: 4, 8, 32>}, {pipeline_mode = #tpu.pipeline_mode<synchronous>, transform_indices = @transform_18, window_bounds = array<i64: 1, 32>}, {pipeline_mode = #tpu.pipeline_mode<synchronous>, transform_indices = @transform_19, window_bounds = array<i64: 1, 32>}, {pipeline_mode = #tpu.pipeline_mode<synchronous>, transform_indices = @transform_20, window_bounds = array<i64: 1, 32>}, {pipeline_mode = #tpu.pipeline_mode<synchronous>, transform_indices = @transform_21, window_bounds = array<i64: 32, 64>}, {pipeline_mode = #tpu.pipeline_mode<synchronous>, transform_indices = @transform_22, window_bounds = array<i64: 1, 64>}, {pipeline_mode = #tpu.pipeline_mode<synchronous>, transform_indices = @transform_23, window_bounds = array<i64: 64, 32>}, {pipeline_mode = #tpu.pipeline_mode<synchronous>, transform_indices = @transform_24, window_bounds = array<i64: 1, 32>}, {pipeline_mode = #tpu.pipeline_mode<synchronous>, transform_indices = @transform_25, window_bounds = array<i64: 1, 32>}, {pipeline_mode = #tpu.pipeline_mode<synchronous>, transform_indices = @transform_26, window_bounds = array<i64: 1, 32>}, {pipeline_mode = #tpu.pipeline_mode<synchronous>, transform_indices = @transform_27, window_bounds = array<i64: 1, 32>}, {pipeline_mode = #tpu.pipeline_mode<synchronous>, transform_indices = @transform_28, window_bounds = array<i64: 1, 32>}, {pipeline_mode = #tpu.pipeline_mode<synchronous>, transform_indices = @transform_29, window_bounds = array<i64: 5, 32, 16>}, {pipeline_mode = #tpu.pipeline_mode<synchronous>, transform_indices = @transform_30, window_bounds = array<i64: 1, 16>}, {transform_indices = @transform_31, window_bounds = array<i64: 8, 1>}, {transform_indices = @transform_32, window_bounds = array<i64: 8, 1>}, {transform_indices = @transform_33, window_bounds = array<i64: 8, 16>}]} {
    %c0 = arith.constant 0 : index
    %c0_0 = arith.constant 0 : index
    %0 = vector.load %arg1[%c0, %c0_0] : memref<40x8xbf16, #tpu.memory_space<vmem>>, vector<40x8xbf16>
    %c0_1 = arith.constant 0 : index
    %c0_2 = arith.constant 0 : index
    %1 = vector.load %arg3[%c0_1, %c0_2] : memref<8x32xbf16, #tpu.memory_space<vmem>>, vector<8x32xbf16>
    %cst = arith.constant dense<0.000000e+00> : vector<40x32xf32>
    %2 = tpu.matmul %0, %1, %cst {dimension_numbers = #tpu.dot_dimension_numbers<[1], [0], [0], [1], [0, 0, 1, 1], [], []>} : vector<40x8xbf16>, vector<8x32xbf16>, vector<40x32xf32> -> vector<40x32xf32>
    %c0_3 = arith.constant 0 : index
    %c0_4 = arith.constant 0 : index
    %3 = vector.load %arg2[%c0_3, %c0_4] : memref<40x32xf32, #tpu.memory_space<vmem>>, vector<40x32xf32>
    %4 = arith.addf %2, %3 : vector<40x32xf32>
    %5 = tpu.iota {dimensions = array<i32: 0>} : vector<40x40xi32>
    %c8_i32 = arith.constant 8 : i32
    %c0_i32 = arith.constant 0 : i32
    %6 = arith.cmpi eq, %c8_i32, %c0_i32 : i32
    %c1_i32 = arith.constant 1 : i32
    %7 = arith.select %6, %c1_i32, %c8_i32 : i32
    %8 = vector.broadcast %7 : i32 to vector<40x40xi32>
    %9 = arith.remsi %5, %8 : vector<40x40xi32>
    %c0_i32_5 = arith.constant 0 : i32
    %10 = vector.broadcast %c0_i32_5 : i32 to vector<40x40xi32>
    %11 = arith.cmpi ne, %9, %10 : vector<40x40xi32>
    %c0_i32_6 = arith.constant 0 : i32
    %12 = vector.broadcast %c0_i32_6 : i32 to vector<40x40xi32>
    %13 = arith.cmpi slt, %9, %12 : vector<40x40xi32>
    %c0_i32_7 = arith.constant 0 : i32
    %14 = arith.cmpi slt, %7, %c0_i32_7 : i32
    %15 = vector.broadcast %14 : i1 to vector<40x40xi1>
    %16 = vector.broadcast %15 : vector<40x40xi1> to vector<40x40xi1>
    %17 = arith.xori %13, %16 : vector<40x40xi1>
    %18 = arith.andi %17, %11 : vector<40x40xi1>
    %19 = vector.broadcast %7 : i32 to vector<40x40xi32>
    %20 = arith.addi %9, %19 : vector<40x40xi32>
    %21 = arith.select %18, %20, %9 : vector<40x40xi1>, vector<40x40xi32>
    %22 = tpu.iota {dimensions = array<i32: 1>} : vector<40x40xi32>
    %c8_i32_8 = arith.constant 8 : i32
    %c0_i32_9 = arith.constant 0 : i32
    %23 = arith.cmpi eq, %c8_i32_8, %c0_i32_9 : i32
    %c1_i32_10 = arith.constant 1 : i32
    %24 = arith.select %23, %c1_i32_10, %c8_i32_8 : i32
    %25 = vector.broadcast %24 : i32 to vector<40x40xi32>
    %26 = arith.remsi %22, %25 : vector<40x40xi32>
    %c0_i32_11 = arith.constant 0 : i32
    %27 = vector.broadcast %c0_i32_11 : i32 to vector<40x40xi32>
    %28 = arith.cmpi ne, %26, %27 : vector<40x40xi32>
    %c0_i32_12 = arith.constant 0 : i32
    %29 = vector.broadcast %c0_i32_12 : i32 to vector<40x40xi32>
    %30 = arith.cmpi slt, %26, %29 : vector<40x40xi32>
    %c0_i32_13 = arith.constant 0 : i32
    %31 = arith.cmpi slt, %24, %c0_i32_13 : i32
    %32 = vector.broadcast %31 : i1 to vector<40x40xi1>
    %33 = vector.broadcast %32 : vector<40x40xi1> to vector<40x40xi1>
    %34 = arith.xori %30, %33 : vector<40x40xi1>
    %35 = arith.andi %34, %28 : vector<40x40xi1>
    %36 = vector.broadcast %24 : i32 to vector<40x40xi32>
    %37 = arith.addi %26, %36 : vector<40x40xi32>
    %38 = arith.select %35, %37, %26 : vector<40x40xi1>, vector<40x40xi32>
    %39 = arith.cmpi eq, %21, %38 : vector<40x40xi32>
    %cst_14 = arith.constant 0.000000e+00 : f32
    %cst_15 = arith.constant -1.000000e+30 : f32
    %40 = vector.broadcast %cst_14 : f32 to vector<40x40xf32>
    %41 = vector.broadcast %cst_15 : f32 to vector<40x40xf32>
    %42 = arith.select %39, %40, %41 : vector<40x40xi1>, vector<40x40xf32>
    %43 = arith.truncf %4 : vector<40x32xf32> to vector<40x32xbf16>
    %c0_16 = arith.constant 0 : index
    %c0_17 = arith.constant 0 : index
    %44 = vector.load %arg4[%c0_16, %c0_17] : memref<32x96xbf16, #tpu.memory_space<vmem>>, vector<32x8xbf16>
    %cst_18 = arith.constant dense<0.000000e+00> : vector<40x8xf32>
    %45 = tpu.matmul %43, %44, %cst_18 {dimension_numbers = #tpu.dot_dimension_numbers<[1], [0], [0], [1], [0, 0, 1, 1], [], []>} : vector<40x32xbf16>, vector<32x8xbf16>, vector<40x8xf32> -> vector<40x8xf32>
    %c0_19 = arith.constant 0 : index
    %c0_20 = arith.constant 0 : index
    %46 = vector.load %arg5[%c0_19, %c0_20] : memref<1x96xf32, #tpu.memory_space<vmem>>, vector<1x8xf32>
    %47 = vector.broadcast %46 : vector<1x8xf32> to vector<40x8xf32>
    %48 = arith.addf %45, %47 : vector<40x8xf32>
    %c0_21 = arith.constant 0 : index
    %c32 = arith.constant 32 : index
    %49 = vector.load %arg4[%c0_21, %c32] : memref<32x96xbf16, #tpu.memory_space<vmem>>, vector<32x8xbf16>
    %cst_22 = arith.constant dense<0.000000e+00> : vector<40x8xf32>
    %50 = tpu.matmul %43, %49, %cst_22 {dimension_numbers = #tpu.dot_dimension_numbers<[1], [0], [0], [1], [0, 0, 1, 1], [], []>} : vector<40x32xbf16>, vector<32x8xbf16>, vector<40x8xf32> -> vector<40x8xf32>
    %c0_23 = arith.constant 0 : index
    %c32_24 = arith.constant 32 : index
    %51 = vector.load %arg5[%c0_23, %c32_24] : memref<1x96xf32, #tpu.memory_space<vmem>>, vector<1x8xf32>
    %52 = vector.broadcast %51 : vector<1x8xf32> to vector<40x8xf32>
    %53 = arith.addf %50, %52 : vector<40x8xf32>
    %c0_25 = arith.constant 0 : index
    %c64 = arith.constant 64 : index
    %54 = vector.load %arg4[%c0_25, %c64] : memref<32x96xbf16, #tpu.memory_space<vmem>>, vector<32x8xbf16>
    %cst_26 = arith.constant dense<0.000000e+00> : vector<40x8xf32>
    %55 = tpu.matmul %43, %54, %cst_26 {dimension_numbers = #tpu.dot_dimension_numbers<[1], [0], [0], [1], [0, 0, 1, 1], [], []>} : vector<40x32xbf16>, vector<32x8xbf16>, vector<40x8xf32> -> vector<40x8xf32>
    %c0_27 = arith.constant 0 : index
    %c64_28 = arith.constant 64 : index
    %56 = vector.load %arg5[%c0_27, %c64_28] : memref<1x96xf32, #tpu.memory_space<vmem>>, vector<1x8xf32>
    %57 = vector.broadcast %56 : vector<1x8xf32> to vector<40x8xf32>
    %58 = arith.addf %55, %57 : vector<40x8xf32>
    %59 = arith.truncf %48 : vector<40x8xf32> to vector<40x8xbf16>
    %60 = arith.truncf %53 : vector<40x8xf32> to vector<40x8xbf16>
    %cst_29 = arith.constant dense<0.000000e+00> : vector<40x40xf32>
    %61 = tpu.matmul %59, %60, %cst_29 {dimension_numbers = #tpu.dot_dimension_numbers<[1], [1], [0], [0], [0, 0, 1, 0], [], []>} : vector<40x8xbf16>, vector<40x8xbf16>, vector<40x40xf32> -> vector<40x40xf32>
    %62 = arith.addf %61, %42 : vector<40x40xf32>
    %cst_30 = arith.constant dense<0xFF800000> : vector<40xf32>
    %63 = vector.multi_reduction <maximumf>, %62, %cst_30 [1] : vector<40x40xf32> to vector<40xf32>
    %64 = vector.shape_cast %63 : vector<40xf32> to vector<40x1xf32>
    %65 = vector.broadcast %64 : vector<40x1xf32> to vector<40x40xf32>
    %66 = arith.subf %62, %65 : vector<40x40xf32>
    %67 = math.exp %66 : vector<40x40xf32>
    %cst_31 = arith.constant dense<0.000000e+00> : vector<40xf32>
    %68 = vector.multi_reduction <add>, %67, %cst_31 [1] : vector<40x40xf32> to vector<40xf32>
    %69 = vector.shape_cast %68 : vector<40xf32> to vector<40x1xf32>
    %70 = tpu.reciprocal %69 {approx = true} : vector<40x1xf32> -> vector<40x1xf32>
    %71 = vector.broadcast %70 : vector<40x1xf32> to vector<40x40xf32>
    %72 = arith.mulf %67, %71 : vector<40x40xf32>
    %73 = arith.truncf %72 : vector<40x40xf32> to vector<40x40xbf16>
    %74 = arith.truncf %58 : vector<40x8xf32> to vector<40x8xbf16>
    %cst_32 = arith.constant dense<0.000000e+00> : vector<40x8xf32>
    %75 = tpu.matmul %73, %74, %cst_32 {dimension_numbers = #tpu.dot_dimension_numbers<[1], [0], [0], [1], [0, 0, 1, 1], [], []>} : vector<40x40xbf16>, vector<40x8xbf16>, vector<40x8xf32> -> vector<40x8xf32>
    %76 = arith.truncf %75 : vector<40x8xf32> to vector<40x8xbf16>
    %c0_33 = arith.constant 0 : index
    %c0_34 = arith.constant 0 : index
    %c0_35 = arith.constant 0 : index
    %77 = vector.load %arg6[%c0_33, %c0_34, %c0_35] : memref<4x8x32xbf16, #tpu.memory_space<vmem>>, vector<1x8x32xbf16>
    %78 = vector.shape_cast %77 : vector<1x8x32xbf16> to vector<8x32xbf16>
    %cst_36 = arith.constant dense<0.000000e+00> : vector<40x32xf32>
    %79 = tpu.matmul %76, %78, %cst_36 {dimension_numbers = #tpu.dot_dimension_numbers<[1], [0], [0], [1], [0, 0, 1, 1], [], []>} : vector<40x8xbf16>, vector<8x32xbf16>, vector<40x32xf32> -> vector<40x32xf32>
    %c0_37 = arith.constant 0 : index
    %c8 = arith.constant 8 : index
    %80 = vector.load %arg4[%c0_37, %c8] : memref<32x96xbf16, #tpu.memory_space<vmem>>, vector<32x8xbf16>
    %cst_38 = arith.constant dense<0.000000e+00> : vector<40x8xf32>
    %81 = tpu.matmul %43, %80, %cst_38 {dimension_numbers = #tpu.dot_dimension_numbers<[1], [0], [0], [1], [0, 0, 1, 1], [], []>} : vector<40x32xbf16>, vector<32x8xbf16>, vector<40x8xf32> -> vector<40x8xf32>
    %c0_39 = arith.constant 0 : index
    %c8_40 = arith.constant 8 : index
    %82 = vector.load %arg5[%c0_39, %c8_40] : memref<1x96xf32, #tpu.memory_space<vmem>>, vector<1x8xf32>
    %83 = vector.broadcast %82 : vector<1x8xf32> to vector<40x8xf32>
    %84 = arith.addf %81, %83 : vector<40x8xf32>
    %c0_41 = arith.constant 0 : index
    %c40 = arith.constant 40 : index
    %85 = vector.load %arg4[%c0_41, %c40] : memref<32x96xbf16, #tpu.memory_space<vmem>>, vector<32x8xbf16>
    %cst_42 = arith.constant dense<0.000000e+00> : vector<40x8xf32>
    %86 = tpu.matmul %43, %85, %cst_42 {dimension_numbers = #tpu.dot_dimension_numbers<[1], [0], [0], [1], [0, 0, 1, 1], [], []>} : vector<40x32xbf16>, vector<32x8xbf16>, vector<40x8xf32> -> vector<40x8xf32>
    %c0_43 = arith.constant 0 : index
    %c40_44 = arith.constant 40 : index
    %87 = vector.load %arg5[%c0_43, %c40_44] : memref<1x96xf32, #tpu.memory_space<vmem>>, vector<1x8xf32>
    %88 = vector.broadcast %87 : vector<1x8xf32> to vector<40x8xf32>
    %89 = arith.addf %86, %88 : vector<40x8xf32>
    %c0_45 = arith.constant 0 : index
    %c72 = arith.constant 72 : index
    %90 = vector.load %arg4[%c0_45, %c72] : memref<32x96xbf16, #tpu.memory_space<vmem>>, vector<32x8xbf16>
    %cst_46 = arith.constant dense<0.000000e+00> : vector<40x8xf32>
    %91 = tpu.matmul %43, %90, %cst_46 {dimension_numbers = #tpu.dot_dimension_numbers<[1], [0], [0], [1], [0, 0, 1, 1], [], []>} : vector<40x32xbf16>, vector<32x8xbf16>, vector<40x8xf32> -> vector<40x8xf32>
    %c0_47 = arith.constant 0 : index
    %c72_48 = arith.constant 72 : index
    %92 = vector.load %arg5[%c0_47, %c72_48] : memref<1x96xf32, #tpu.memory_space<vmem>>, vector<1x8xf32>
    %93 = vector.broadcast %92 : vector<1x8xf32> to vector<40x8xf32>
    %94 = arith.addf %91, %93 : vector<40x8xf32>
    %95 = arith.truncf %84 : vector<40x8xf32> to vector<40x8xbf16>
    %96 = arith.truncf %89 : vector<40x8xf32> to vector<40x8xbf16>
    %cst_49 = arith.constant dense<0.000000e+00> : vector<40x40xf32>
    %97 = tpu.matmul %95, %96, %cst_49 {dimension_numbers = #tpu.dot_dimension_numbers<[1], [1], [0], [0], [0, 0, 1, 0], [], []>} : vector<40x8xbf16>, vector<40x8xbf16>, vector<40x40xf32> -> vector<40x40xf32>
    %98 = arith.addf %97, %42 : vector<40x40xf32>
    %cst_50 = arith.constant dense<0xFF800000> : vector<40xf32>
    %99 = vector.multi_reduction <maximumf>, %98, %cst_50 [1] : vector<40x40xf32> to vector<40xf32>
    %100 = vector.shape_cast %99 : vector<40xf32> to vector<40x1xf32>
    %101 = vector.broadcast %100 : vector<40x1xf32> to vector<40x40xf32>
    %102 = arith.subf %98, %101 : vector<40x40xf32>
    %103 = math.exp %102 : vector<40x40xf32>
    %cst_51 = arith.constant dense<0.000000e+00> : vector<40xf32>
    %104 = vector.multi_reduction <add>, %103, %cst_51 [1] : vector<40x40xf32> to vector<40xf32>
    %105 = vector.shape_cast %104 : vector<40xf32> to vector<40x1xf32>
    %106 = tpu.reciprocal %105 {approx = true} : vector<40x1xf32> -> vector<40x1xf32>
    %107 = vector.broadcast %106 : vector<40x1xf32> to vector<40x40xf32>
    %108 = arith.mulf %103, %107 : vector<40x40xf32>
    %109 = arith.truncf %108 : vector<40x40xf32> to vector<40x40xbf16>
    %110 = arith.truncf %94 : vector<40x8xf32> to vector<40x8xbf16>
    %cst_52 = arith.constant dense<0.000000e+00> : vector<40x8xf32>
    %111 = tpu.matmul %109, %110, %cst_52 {dimension_numbers = #tpu.dot_dimension_numbers<[1], [0], [0], [1], [0, 0, 1, 1], [], []>} : vector<40x40xbf16>, vector<40x8xbf16>, vector<40x8xf32> -> vector<40x8xf32>
    %112 = arith.truncf %111 : vector<40x8xf32> to vector<40x8xbf16>
    %c1 = arith.constant 1 : index
    %c0_53 = arith.constant 0 : index
    %c0_54 = arith.constant 0 : index
    %113 = vector.load %arg6[%c1, %c0_53, %c0_54] : memref<4x8x32xbf16, #tpu.memory_space<vmem>>, vector<1x8x32xbf16>
    %114 = vector.shape_cast %113 : vector<1x8x32xbf16> to vector<8x32xbf16>
    %cst_55 = arith.constant dense<0.000000e+00> : vector<40x32xf32>
    %115 = tpu.matmul %112, %114, %cst_55 {dimension_numbers = #tpu.dot_dimension_numbers<[1], [0], [0], [1], [0, 0, 1, 1], [], []>} : vector<40x8xbf16>, vector<8x32xbf16>, vector<40x32xf32> -> vector<40x32xf32>
    %116 = arith.addf %79, %115 : vector<40x32xf32>
    %c0_56 = arith.constant 0 : index
    %c16 = arith.constant 16 : index
    %117 = vector.load %arg4[%c0_56, %c16] : memref<32x96xbf16, #tpu.memory_space<vmem>>, vector<32x8xbf16>
    %cst_57 = arith.constant dense<0.000000e+00> : vector<40x8xf32>
    %118 = tpu.matmul %43, %117, %cst_57 {dimension_numbers = #tpu.dot_dimension_numbers<[1], [0], [0], [1], [0, 0, 1, 1], [], []>} : vector<40x32xbf16>, vector<32x8xbf16>, vector<40x8xf32> -> vector<40x8xf32>
    %c0_58 = arith.constant 0 : index
    %c16_59 = arith.constant 16 : index
    %119 = vector.load %arg5[%c0_58, %c16_59] : memref<1x96xf32, #tpu.memory_space<vmem>>, vector<1x8xf32>
    %120 = vector.broadcast %119 : vector<1x8xf32> to vector<40x8xf32>
    %121 = arith.addf %118, %120 : vector<40x8xf32>
    %c0_60 = arith.constant 0 : index
    %c48 = arith.constant 48 : index
    %122 = vector.load %arg4[%c0_60, %c48] : memref<32x96xbf16, #tpu.memory_space<vmem>>, vector<32x8xbf16>
    %cst_61 = arith.constant dense<0.000000e+00> : vector<40x8xf32>
    %123 = tpu.matmul %43, %122, %cst_61 {dimension_numbers = #tpu.dot_dimension_numbers<[1], [0], [0], [1], [0, 0, 1, 1], [], []>} : vector<40x32xbf16>, vector<32x8xbf16>, vector<40x8xf32> -> vector<40x8xf32>
    %c0_62 = arith.constant 0 : index
    %c48_63 = arith.constant 48 : index
    %124 = vector.load %arg5[%c0_62, %c48_63] : memref<1x96xf32, #tpu.memory_space<vmem>>, vector<1x8xf32>
    %125 = vector.broadcast %124 : vector<1x8xf32> to vector<40x8xf32>
    %126 = arith.addf %123, %125 : vector<40x8xf32>
    %c0_64 = arith.constant 0 : index
    %c80 = arith.constant 80 : index
    %127 = vector.load %arg4[%c0_64, %c80] : memref<32x96xbf16, #tpu.memory_space<vmem>>, vector<32x8xbf16>
    %cst_65 = arith.constant dense<0.000000e+00> : vector<40x8xf32>
    %128 = tpu.matmul %43, %127, %cst_65 {dimension_numbers = #tpu.dot_dimension_numbers<[1], [0], [0], [1], [0, 0, 1, 1], [], []>} : vector<40x32xbf16>, vector<32x8xbf16>, vector<40x8xf32> -> vector<40x8xf32>
    %c0_66 = arith.constant 0 : index
    %c80_67 = arith.constant 80 : index
    %129 = vector.load %arg5[%c0_66, %c80_67] : memref<1x96xf32, #tpu.memory_space<vmem>>, vector<1x8xf32>
    %130 = vector.broadcast %129 : vector<1x8xf32> to vector<40x8xf32>
    %131 = arith.addf %128, %130 : vector<40x8xf32>
    %132 = arith.truncf %121 : vector<40x8xf32> to vector<40x8xbf16>
    %133 = arith.truncf %126 : vector<40x8xf32> to vector<40x8xbf16>
    %cst_68 = arith.constant dense<0.000000e+00> : vector<40x40xf32>
    %134 = tpu.matmul %132, %133, %cst_68 {dimension_numbers = #tpu.dot_dimension_numbers<[1], [1], [0], [0], [0, 0, 1, 0], [], []>} : vector<40x8xbf16>, vector<40x8xbf16>, vector<40x40xf32> -> vector<40x40xf32>
    %135 = arith.addf %134, %42 : vector<40x40xf32>
    %cst_69 = arith.constant dense<0xFF800000> : vector<40xf32>
    %136 = vector.multi_reduction <maximumf>, %135, %cst_69 [1] : vector<40x40xf32> to vector<40xf32>
    %137 = vector.shape_cast %136 : vector<40xf32> to vector<40x1xf32>
    %138 = vector.broadcast %137 : vector<40x1xf32> to vector<40x40xf32>
    %139 = arith.subf %135, %138 : vector<40x40xf32>
    %140 = math.exp %139 : vector<40x40xf32>
    %cst_70 = arith.constant dense<0.000000e+00> : vector<40xf32>
    %141 = vector.multi_reduction <add>, %140, %cst_70 [1] : vector<40x40xf32> to vector<40xf32>
    %142 = vector.shape_cast %141 : vector<40xf32> to vector<40x1xf32>
    %143 = tpu.reciprocal %142 {approx = true} : vector<40x1xf32> -> vector<40x1xf32>
    %144 = vector.broadcast %143 : vector<40x1xf32> to vector<40x40xf32>
    %145 = arith.mulf %140, %144 : vector<40x40xf32>
    %146 = arith.truncf %145 : vector<40x40xf32> to vector<40x40xbf16>
    %147 = arith.truncf %131 : vector<40x8xf32> to vector<40x8xbf16>
    %cst_71 = arith.constant dense<0.000000e+00> : vector<40x8xf32>
    %148 = tpu.matmul %146, %147, %cst_71 {dimension_numbers = #tpu.dot_dimension_numbers<[1], [0], [0], [1], [0, 0, 1, 1], [], []>} : vector<40x40xbf16>, vector<40x8xbf16>, vector<40x8xf32> -> vector<40x8xf32>
    %149 = arith.truncf %148 : vector<40x8xf32> to vector<40x8xbf16>
    %c2 = arith.constant 2 : index
    %c0_72 = arith.constant 0 : index
    %c0_73 = arith.constant 0 : index
    %150 = vector.load %arg6[%c2, %c0_72, %c0_73] : memref<4x8x32xbf16, #tpu.memory_space<vmem>>, vector<1x8x32xbf16>
    %151 = vector.shape_cast %150 : vector<1x8x32xbf16> to vector<8x32xbf16>
    %cst_74 = arith.constant dense<0.000000e+00> : vector<40x32xf32>
    %152 = tpu.matmul %149, %151, %cst_74 {dimension_numbers = #tpu.dot_dimension_numbers<[1], [0], [0], [1], [0, 0, 1, 1], [], []>} : vector<40x8xbf16>, vector<8x32xbf16>, vector<40x32xf32> -> vector<40x32xf32>
    %153 = arith.addf %116, %152 : vector<40x32xf32>
    %c0_75 = arith.constant 0 : index
    %c24 = arith.constant 24 : index
    %154 = vector.load %arg4[%c0_75, %c24] : memref<32x96xbf16, #tpu.memory_space<vmem>>, vector<32x8xbf16>
    %cst_76 = arith.constant dense<0.000000e+00> : vector<40x8xf32>
    %155 = tpu.matmul %43, %154, %cst_76 {dimension_numbers = #tpu.dot_dimension_numbers<[1], [0], [0], [1], [0, 0, 1, 1], [], []>} : vector<40x32xbf16>, vector<32x8xbf16>, vector<40x8xf32> -> vector<40x8xf32>
    %c0_77 = arith.constant 0 : index
    %c24_78 = arith.constant 24 : index
    %156 = vector.load %arg5[%c0_77, %c24_78] : memref<1x96xf32, #tpu.memory_space<vmem>>, vector<1x8xf32>
    %157 = vector.broadcast %156 : vector<1x8xf32> to vector<40x8xf32>
    %158 = arith.addf %155, %157 : vector<40x8xf32>
    %c0_79 = arith.constant 0 : index
    %c56 = arith.constant 56 : index
    %159 = vector.load %arg4[%c0_79, %c56] : memref<32x96xbf16, #tpu.memory_space<vmem>>, vector<32x8xbf16>
    %cst_80 = arith.constant dense<0.000000e+00> : vector<40x8xf32>
    %160 = tpu.matmul %43, %159, %cst_80 {dimension_numbers = #tpu.dot_dimension_numbers<[1], [0], [0], [1], [0, 0, 1, 1], [], []>} : vector<40x32xbf16>, vector<32x8xbf16>, vector<40x8xf32> -> vector<40x8xf32>
    %c0_81 = arith.constant 0 : index
    %c56_82 = arith.constant 56 : index
    %161 = vector.load %arg5[%c0_81, %c56_82] : memref<1x96xf32, #tpu.memory_space<vmem>>, vector<1x8xf32>
    %162 = vector.broadcast %161 : vector<1x8xf32> to vector<40x8xf32>
    %163 = arith.addf %160, %162 : vector<40x8xf32>
    %c0_83 = arith.constant 0 : index
    %c88 = arith.constant 88 : index
    %164 = vector.load %arg4[%c0_83, %c88] : memref<32x96xbf16, #tpu.memory_space<vmem>>, vector<32x8xbf16>
    %cst_84 = arith.constant dense<0.000000e+00> : vector<40x8xf32>
    %165 = tpu.matmul %43, %164, %cst_84 {dimension_numbers = #tpu.dot_dimension_numbers<[1], [0], [0], [1], [0, 0, 1, 1], [], []>} : vector<40x32xbf16>, vector<32x8xbf16>, vector<40x8xf32> -> vector<40x8xf32>
    %c0_85 = arith.constant 0 : index
    %c88_86 = arith.constant 88 : index
    %166 = vector.load %arg5[%c0_85, %c88_86] : memref<1x96xf32, #tpu.memory_space<vmem>>, vector<1x8xf32>
    %167 = vector.broadcast %166 : vector<1x8xf32> to vector<40x8xf32>
    %168 = arith.addf %165, %167 : vector<40x8xf32>
    %169 = arith.truncf %158 : vector<40x8xf32> to vector<40x8xbf16>
    %170 = arith.truncf %163 : vector<40x8xf32> to vector<40x8xbf16>
    %cst_87 = arith.constant dense<0.000000e+00> : vector<40x40xf32>
    %171 = tpu.matmul %169, %170, %cst_87 {dimension_numbers = #tpu.dot_dimension_numbers<[1], [1], [0], [0], [0, 0, 1, 0], [], []>} : vector<40x8xbf16>, vector<40x8xbf16>, vector<40x40xf32> -> vector<40x40xf32>
    %172 = arith.addf %171, %42 : vector<40x40xf32>
    %cst_88 = arith.constant dense<0xFF800000> : vector<40xf32>
    %173 = vector.multi_reduction <maximumf>, %172, %cst_88 [1] : vector<40x40xf32> to vector<40xf32>
    %174 = vector.shape_cast %173 : vector<40xf32> to vector<40x1xf32>
    %175 = vector.broadcast %174 : vector<40x1xf32> to vector<40x40xf32>
    %176 = arith.subf %172, %175 : vector<40x40xf32>
    %177 = math.exp %176 : vector<40x40xf32>
    %cst_89 = arith.constant dense<0.000000e+00> : vector<40xf32>
    %178 = vector.multi_reduction <add>, %177, %cst_89 [1] : vector<40x40xf32> to vector<40xf32>
    %179 = vector.shape_cast %178 : vector<40xf32> to vector<40x1xf32>
    %180 = tpu.reciprocal %179 {approx = true} : vector<40x1xf32> -> vector<40x1xf32>
    %181 = vector.broadcast %180 : vector<40x1xf32> to vector<40x40xf32>
    %182 = arith.mulf %177, %181 : vector<40x40xf32>
    %183 = arith.truncf %182 : vector<40x40xf32> to vector<40x40xbf16>
    %184 = arith.truncf %168 : vector<40x8xf32> to vector<40x8xbf16>
    %cst_90 = arith.constant dense<0.000000e+00> : vector<40x8xf32>
    %185 = tpu.matmul %183, %184, %cst_90 {dimension_numbers = #tpu.dot_dimension_numbers<[1], [0], [0], [1], [0, 0, 1, 1], [], []>} : vector<40x40xbf16>, vector<40x8xbf16>, vector<40x8xf32> -> vector<40x8xf32>
    %186 = arith.truncf %185 : vector<40x8xf32> to vector<40x8xbf16>
    %c3 = arith.constant 3 : index
    %c0_91 = arith.constant 0 : index
    %c0_92 = arith.constant 0 : index
    %187 = vector.load %arg6[%c3, %c0_91, %c0_92] : memref<4x8x32xbf16, #tpu.memory_space<vmem>>, vector<1x8x32xbf16>
    %188 = vector.shape_cast %187 : vector<1x8x32xbf16> to vector<8x32xbf16>
    %cst_93 = arith.constant dense<0.000000e+00> : vector<40x32xf32>
    %189 = tpu.matmul %186, %188, %cst_93 {dimension_numbers = #tpu.dot_dimension_numbers<[1], [0], [0], [1], [0, 0, 1, 1], [], []>} : vector<40x8xbf16>, vector<8x32xbf16>, vector<40x32xf32> -> vector<40x32xf32>
    %190 = arith.addf %153, %189 : vector<40x32xf32>
    %c0_94 = arith.constant 0 : index
    %c0_95 = arith.constant 0 : index
    %191 = vector.load %arg7[%c0_94, %c0_95] : memref<1x32xf32, #tpu.memory_space<vmem>>, vector<1x32xf32>
    %192 = vector.broadcast %191 : vector<1x32xf32> to vector<40x32xf32>
    %193 = arith.addf %190, %192 : vector<40x32xf32>
    %194 = arith.addf %4, %193 : vector<40x32xf32>
    %c0_96 = arith.constant 0 : index
    %c0_97 = arith.constant 0 : index
    %195 = vector.load %arg8[%c0_96, %c0_97] : memref<1x32xf32, #tpu.memory_space<vmem>>, vector<1x32xf32>
    %c0_98 = arith.constant 0 : index
    %c0_99 = arith.constant 0 : index
    %196 = vector.load %arg9[%c0_98, %c0_99] : memref<1x32xf32, #tpu.memory_space<vmem>>, vector<1x32xf32>
    %cst_100 = arith.constant dense<0.000000e+00> : vector<40xf32>
    %197 = vector.multi_reduction <add>, %194, %cst_100 [1] : vector<40x32xf32> to vector<40xf32>
    %198 = vector.shape_cast %197 : vector<40xf32> to vector<40x1xf32>
    %cst_101 = arith.constant 3.200000e+01 : f32
    %199 = vector.broadcast %cst_101 : f32 to vector<40x1xf32>
    %200 = arith.divf %198, %199 : vector<40x1xf32>
    %201 = vector.broadcast %200 : vector<40x1xf32> to vector<40x32xf32>
    %202 = arith.subf %194, %201 : vector<40x32xf32>
    %203 = arith.mulf %202, %202 : vector<40x32xf32>
    %cst_102 = arith.constant dense<0.000000e+00> : vector<40xf32>
    %204 = vector.multi_reduction <add>, %203, %cst_102 [1] : vector<40x32xf32> to vector<40xf32>
    %205 = vector.shape_cast %204 : vector<40xf32> to vector<40x1xf32>
    %cst_103 = arith.constant 3.200000e+01 : f32
    %206 = vector.broadcast %cst_103 : f32 to vector<40x1xf32>
    %207 = arith.divf %205, %206 : vector<40x1xf32>
    %208 = vector.broadcast %200 : vector<40x1xf32> to vector<40x32xf32>
    %209 = arith.subf %194, %208 : vector<40x32xf32>
    %cst_104 = arith.constant 9.99999974E-6 : f32
    %210 = vector.broadcast %cst_104 : f32 to vector<40x1xf32>
    %211 = arith.addf %207, %210 : vector<40x1xf32>
    %212 = math.sqrt %211 : vector<40x1xf32>
    %213 = vector.broadcast %212 : vector<40x1xf32> to vector<40x32xf32>
    %214 = arith.divf %209, %213 : vector<40x32xf32>
    %215 = vector.broadcast %195 : vector<1x32xf32> to vector<40x32xf32>
    %216 = arith.mulf %214, %215 : vector<40x32xf32>
    %217 = vector.broadcast %196 : vector<1x32xf32> to vector<40x32xf32>
    %218 = arith.addf %216, %217 : vector<40x32xf32>
    %219 = arith.truncf %218 : vector<40x32xf32> to vector<40x32xbf16>
    %c0_105 = arith.constant 0 : index
    %c0_106 = arith.constant 0 : index
    %220 = vector.load %arg10[%c0_105, %c0_106] : memref<32x64xbf16, #tpu.memory_space<vmem>>, vector<32x64xbf16>
    %cst_107 = arith.constant dense<0.000000e+00> : vector<40x64xf32>
    %221 = tpu.matmul %219, %220, %cst_107 {dimension_numbers = #tpu.dot_dimension_numbers<[1], [0], [0], [1], [0, 0, 1, 1], [], []>} : vector<40x32xbf16>, vector<32x64xbf16>, vector<40x64xf32> -> vector<40x64xf32>
    %c0_108 = arith.constant 0 : index
    %c0_109 = arith.constant 0 : index
    %222 = vector.load %arg11[%c0_108, %c0_109] : memref<1x64xf32, #tpu.memory_space<vmem>>, vector<1x64xf32>
    %223 = vector.broadcast %222 : vector<1x64xf32> to vector<40x64xf32>
    %224 = arith.addf %221, %223 : vector<40x64xf32>
    %cst_110 = arith.constant 0.000000e+00 : f32
    %225 = vector.broadcast %cst_110 : f32 to vector<40x64xf32>
    %226 = arith.maximumf %224, %225 : vector<40x64xf32>
    %227 = arith.truncf %226 : vector<40x64xf32> to vector<40x64xbf16>
    %c0_111 = arith.constant 0 : index
    %c0_112 = arith.constant 0 : index
    %228 = vector.load %arg12[%c0_111, %c0_112] : memref<64x32xbf16, #tpu.memory_space<vmem>>, vector<64x32xbf16>
    %cst_113 = arith.constant dense<0.000000e+00> : vector<40x32xf32>
    %229 = tpu.matmul %227, %228, %cst_113 {dimension_numbers = #tpu.dot_dimension_numbers<[1], [0], [0], [1], [0, 0, 1, 1], [], []>} : vector<40x64xbf16>, vector<64x32xbf16>, vector<40x32xf32> -> vector<40x32xf32>
    %c0_114 = arith.constant 0 : index
    %c0_115 = arith.constant 0 : index
    %230 = vector.load %arg13[%c0_114, %c0_115] : memref<1x32xf32, #tpu.memory_space<vmem>>, vector<1x32xf32>
    %231 = vector.broadcast %230 : vector<1x32xf32> to vector<40x32xf32>
    %232 = arith.addf %229, %231 : vector<40x32xf32>
    %233 = arith.addf %218, %232 : vector<40x32xf32>
    %c0_116 = arith.constant 0 : index
    %c0_117 = arith.constant 0 : index
    %234 = vector.load %arg14[%c0_116, %c0_117] : memref<1x32xf32, #tpu.memory_space<vmem>>, vector<1x32xf32>
    %c0_118 = arith.constant 0 : index
    %c0_119 = arith.constant 0 : index
    %235 = vector.load %arg15[%c0_118, %c0_119] : memref<1x32xf32, #tpu.memory_space<vmem>>, vector<1x32xf32>
    %cst_120 = arith.constant dense<0.000000e+00> : vector<40xf32>
    %236 = vector.multi_reduction <add>, %233, %cst_120 [1] : vector<40x32xf32> to vector<40xf32>
    %237 = vector.shape_cast %236 : vector<40xf32> to vector<40x1xf32>
    %cst_121 = arith.constant 3.200000e+01 : f32
    %238 = vector.broadcast %cst_121 : f32 to vector<40x1xf32>
    %239 = arith.divf %237, %238 : vector<40x1xf32>
    %240 = vector.broadcast %239 : vector<40x1xf32> to vector<40x32xf32>
    %241 = arith.subf %233, %240 : vector<40x32xf32>
    %242 = arith.mulf %241, %241 : vector<40x32xf32>
    %cst_122 = arith.constant dense<0.000000e+00> : vector<40xf32>
    %243 = vector.multi_reduction <add>, %242, %cst_122 [1] : vector<40x32xf32> to vector<40xf32>
    %244 = vector.shape_cast %243 : vector<40xf32> to vector<40x1xf32>
    %cst_123 = arith.constant 3.200000e+01 : f32
    %245 = vector.broadcast %cst_123 : f32 to vector<40x1xf32>
    %246 = arith.divf %244, %245 : vector<40x1xf32>
    %247 = vector.broadcast %239 : vector<40x1xf32> to vector<40x32xf32>
    %248 = arith.subf %233, %247 : vector<40x32xf32>
    %cst_124 = arith.constant 9.99999974E-6 : f32
    %249 = vector.broadcast %cst_124 : f32 to vector<40x1xf32>
    %250 = arith.addf %246, %249 : vector<40x1xf32>
    %251 = math.sqrt %250 : vector<40x1xf32>
    %252 = vector.broadcast %251 : vector<40x1xf32> to vector<40x32xf32>
    %253 = arith.divf %248, %252 : vector<40x32xf32>
    %254 = vector.broadcast %234 : vector<1x32xf32> to vector<40x32xf32>
    %255 = arith.mulf %253, %254 : vector<40x32xf32>
    %256 = vector.broadcast %235 : vector<1x32xf32> to vector<40x32xf32>
    %257 = arith.addf %255, %256 : vector<40x32xf32>
    %258 = arith.truncf %257 : vector<40x32xf32> to vector<40x32xbf16>
    %c0_125 = arith.constant 0 : index
    %c0_126 = arith.constant 0 : index
    %259 = vector.load %arg16[%c0_125, %c0_126] : memref<32x96xbf16, #tpu.memory_space<vmem>>, vector<32x8xbf16>
    %cst_127 = arith.constant dense<0.000000e+00> : vector<40x8xf32>
    %260 = tpu.matmul %258, %259, %cst_127 {dimension_numbers = #tpu.dot_dimension_numbers<[1], [0], [0], [1], [0, 0, 1, 1], [], []>} : vector<40x32xbf16>, vector<32x8xbf16>, vector<40x8xf32> -> vector<40x8xf32>
    %c0_128 = arith.constant 0 : index
    %c0_129 = arith.constant 0 : index
    %261 = vector.load %arg17[%c0_128, %c0_129] : memref<1x96xf32, #tpu.memory_space<vmem>>, vector<1x8xf32>
    %262 = vector.broadcast %261 : vector<1x8xf32> to vector<40x8xf32>
    %263 = arith.addf %260, %262 : vector<40x8xf32>
    %c0_130 = arith.constant 0 : index
    %c32_131 = arith.constant 32 : index
    %264 = vector.load %arg16[%c0_130, %c32_131] : memref<32x96xbf16, #tpu.memory_space<vmem>>, vector<32x8xbf16>
    %cst_132 = arith.constant dense<0.000000e+00> : vector<40x8xf32>
    %265 = tpu.matmul %258, %264, %cst_132 {dimension_numbers = #tpu.dot_dimension_numbers<[1], [0], [0], [1], [0, 0, 1, 1], [], []>} : vector<40x32xbf16>, vector<32x8xbf16>, vector<40x8xf32> -> vector<40x8xf32>
    %c0_133 = arith.constant 0 : index
    %c32_134 = arith.constant 32 : index
    %266 = vector.load %arg17[%c0_133, %c32_134] : memref<1x96xf32, #tpu.memory_space<vmem>>, vector<1x8xf32>
    %267 = vector.broadcast %266 : vector<1x8xf32> to vector<40x8xf32>
    %268 = arith.addf %265, %267 : vector<40x8xf32>
    %c0_135 = arith.constant 0 : index
    %c64_136 = arith.constant 64 : index
    %269 = vector.load %arg16[%c0_135, %c64_136] : memref<32x96xbf16, #tpu.memory_space<vmem>>, vector<32x8xbf16>
    %cst_137 = arith.constant dense<0.000000e+00> : vector<40x8xf32>
    %270 = tpu.matmul %258, %269, %cst_137 {dimension_numbers = #tpu.dot_dimension_numbers<[1], [0], [0], [1], [0, 0, 1, 1], [], []>} : vector<40x32xbf16>, vector<32x8xbf16>, vector<40x8xf32> -> vector<40x8xf32>
    %c0_138 = arith.constant 0 : index
    %c64_139 = arith.constant 64 : index
    %271 = vector.load %arg17[%c0_138, %c64_139] : memref<1x96xf32, #tpu.memory_space<vmem>>, vector<1x8xf32>
    %272 = vector.broadcast %271 : vector<1x8xf32> to vector<40x8xf32>
    %273 = arith.addf %270, %272 : vector<40x8xf32>
    %274 = arith.truncf %263 : vector<40x8xf32> to vector<40x8xbf16>
    %275 = arith.truncf %268 : vector<40x8xf32> to vector<40x8xbf16>
    %cst_140 = arith.constant dense<0.000000e+00> : vector<40x40xf32>
    %276 = tpu.matmul %274, %275, %cst_140 {dimension_numbers = #tpu.dot_dimension_numbers<[1], [1], [0], [0], [0, 0, 1, 0], [], []>} : vector<40x8xbf16>, vector<40x8xbf16>, vector<40x40xf32> -> vector<40x40xf32>
    %277 = arith.addf %276, %42 : vector<40x40xf32>
    %cst_141 = arith.constant dense<0xFF800000> : vector<40xf32>
    %278 = vector.multi_reduction <maximumf>, %277, %cst_141 [1] : vector<40x40xf32> to vector<40xf32>
    %279 = vector.shape_cast %278 : vector<40xf32> to vector<40x1xf32>
    %280 = vector.broadcast %279 : vector<40x1xf32> to vector<40x40xf32>
    %281 = arith.subf %277, %280 : vector<40x40xf32>
    %282 = math.exp %281 : vector<40x40xf32>
    %cst_142 = arith.constant dense<0.000000e+00> : vector<40xf32>
    %283 = vector.multi_reduction <add>, %282, %cst_142 [1] : vector<40x40xf32> to vector<40xf32>
    %284 = vector.shape_cast %283 : vector<40xf32> to vector<40x1xf32>
    %285 = tpu.reciprocal %284 {approx = true} : vector<40x1xf32> -> vector<40x1xf32>
    %286 = vector.broadcast %285 : vector<40x1xf32> to vector<40x40xf32>
    %287 = arith.mulf %282, %286 : vector<40x40xf32>
    %288 = arith.truncf %287 : vector<40x40xf32> to vector<40x40xbf16>
    %289 = arith.truncf %273 : vector<40x8xf32> to vector<40x8xbf16>
    %cst_143 = arith.constant dense<0.000000e+00> : vector<40x8xf32>
    %290 = tpu.matmul %288, %289, %cst_143 {dimension_numbers = #tpu.dot_dimension_numbers<[1], [0], [0], [1], [0, 0, 1, 1], [], []>} : vector<40x40xbf16>, vector<40x8xbf16>, vector<40x8xf32> -> vector<40x8xf32>
    %291 = arith.truncf %290 : vector<40x8xf32> to vector<40x8xbf16>
    %c0_144 = arith.constant 0 : index
    %c0_145 = arith.constant 0 : index
    %c0_146 = arith.constant 0 : index
    %292 = vector.load %arg18[%c0_144, %c0_145, %c0_146] : memref<4x8x32xbf16, #tpu.memory_space<vmem>>, vector<1x8x32xbf16>
    %293 = vector.shape_cast %292 : vector<1x8x32xbf16> to vector<8x32xbf16>
    %cst_147 = arith.constant dense<0.000000e+00> : vector<40x32xf32>
    %294 = tpu.matmul %291, %293, %cst_147 {dimension_numbers = #tpu.dot_dimension_numbers<[1], [0], [0], [1], [0, 0, 1, 1], [], []>} : vector<40x8xbf16>, vector<8x32xbf16>, vector<40x32xf32> -> vector<40x32xf32>
    %c0_148 = arith.constant 0 : index
    %c8_149 = arith.constant 8 : index
    %295 = vector.load %arg16[%c0_148, %c8_149] : memref<32x96xbf16, #tpu.memory_space<vmem>>, vector<32x8xbf16>
    %cst_150 = arith.constant dense<0.000000e+00> : vector<40x8xf32>
    %296 = tpu.matmul %258, %295, %cst_150 {dimension_numbers = #tpu.dot_dimension_numbers<[1], [0], [0], [1], [0, 0, 1, 1], [], []>} : vector<40x32xbf16>, vector<32x8xbf16>, vector<40x8xf32> -> vector<40x8xf32>
    %c0_151 = arith.constant 0 : index
    %c8_152 = arith.constant 8 : index
    %297 = vector.load %arg17[%c0_151, %c8_152] : memref<1x96xf32, #tpu.memory_space<vmem>>, vector<1x8xf32>
    %298 = vector.broadcast %297 : vector<1x8xf32> to vector<40x8xf32>
    %299 = arith.addf %296, %298 : vector<40x8xf32>
    %c0_153 = arith.constant 0 : index
    %c40_154 = arith.constant 40 : index
    %300 = vector.load %arg16[%c0_153, %c40_154] : memref<32x96xbf16, #tpu.memory_space<vmem>>, vector<32x8xbf16>
    %cst_155 = arith.constant dense<0.000000e+00> : vector<40x8xf32>
    %301 = tpu.matmul %258, %300, %cst_155 {dimension_numbers = #tpu.dot_dimension_numbers<[1], [0], [0], [1], [0, 0, 1, 1], [], []>} : vector<40x32xbf16>, vector<32x8xbf16>, vector<40x8xf32> -> vector<40x8xf32>
    %c0_156 = arith.constant 0 : index
    %c40_157 = arith.constant 40 : index
    %302 = vector.load %arg17[%c0_156, %c40_157] : memref<1x96xf32, #tpu.memory_space<vmem>>, vector<1x8xf32>
    %303 = vector.broadcast %302 : vector<1x8xf32> to vector<40x8xf32>
    %304 = arith.addf %301, %303 : vector<40x8xf32>
    %c0_158 = arith.constant 0 : index
    %c72_159 = arith.constant 72 : index
    %305 = vector.load %arg16[%c0_158, %c72_159] : memref<32x96xbf16, #tpu.memory_space<vmem>>, vector<32x8xbf16>
    %cst_160 = arith.constant dense<0.000000e+00> : vector<40x8xf32>
    %306 = tpu.matmul %258, %305, %cst_160 {dimension_numbers = #tpu.dot_dimension_numbers<[1], [0], [0], [1], [0, 0, 1, 1], [], []>} : vector<40x32xbf16>, vector<32x8xbf16>, vector<40x8xf32> -> vector<40x8xf32>
    %c0_161 = arith.constant 0 : index
    %c72_162 = arith.constant 72 : index
    %307 = vector.load %arg17[%c0_161, %c72_162] : memref<1x96xf32, #tpu.memory_space<vmem>>, vector<1x8xf32>
    %308 = vector.broadcast %307 : vector<1x8xf32> to vector<40x8xf32>
    %309 = arith.addf %306, %308 : vector<40x8xf32>
    %310 = arith.truncf %299 : vector<40x8xf32> to vector<40x8xbf16>
    %311 = arith.truncf %304 : vector<40x8xf32> to vector<40x8xbf16>
    %cst_163 = arith.constant dense<0.000000e+00> : vector<40x40xf32>
    %312 = tpu.matmul %310, %311, %cst_163 {dimension_numbers = #tpu.dot_dimension_numbers<[1], [1], [0], [0], [0, 0, 1, 0], [], []>} : vector<40x8xbf16>, vector<40x8xbf16>, vector<40x40xf32> -> vector<40x40xf32>
    %313 = arith.addf %312, %42 : vector<40x40xf32>
    %cst_164 = arith.constant dense<0xFF800000> : vector<40xf32>
    %314 = vector.multi_reduction <maximumf>, %313, %cst_164 [1] : vector<40x40xf32> to vector<40xf32>
    %315 = vector.shape_cast %314 : vector<40xf32> to vector<40x1xf32>
    %316 = vector.broadcast %315 : vector<40x1xf32> to vector<40x40xf32>
    %317 = arith.subf %313, %316 : vector<40x40xf32>
    %318 = math.exp %317 : vector<40x40xf32>
    %cst_165 = arith.constant dense<0.000000e+00> : vector<40xf32>
    %319 = vector.multi_reduction <add>, %318, %cst_165 [1] : vector<40x40xf32> to vector<40xf32>
    %320 = vector.shape_cast %319 : vector<40xf32> to vector<40x1xf32>
    %321 = tpu.reciprocal %320 {approx = true} : vector<40x1xf32> -> vector<40x1xf32>
    %322 = vector.broadcast %321 : vector<40x1xf32> to vector<40x40xf32>
    %323 = arith.mulf %318, %322 : vector<40x40xf32>
    %324 = arith.truncf %323 : vector<40x40xf32> to vector<40x40xbf16>
    %325 = arith.truncf %309 : vector<40x8xf32> to vector<40x8xbf16>
    %cst_166 = arith.constant dense<0.000000e+00> : vector<40x8xf32>
    %326 = tpu.matmul %324, %325, %cst_166 {dimension_numbers = #tpu.dot_dimension_numbers<[1], [0], [0], [1], [0, 0, 1, 1], [], []>} : vector<40x40xbf16>, vector<40x8xbf16>, vector<40x8xf32> -> vector<40x8xf32>
    %327 = arith.truncf %326 : vector<40x8xf32> to vector<40x8xbf16>
    %c1_167 = arith.constant 1 : index
    %c0_168 = arith.constant 0 : index
    %c0_169 = arith.constant 0 : index
    %328 = vector.load %arg18[%c1_167, %c0_168, %c0_169] : memref<4x8x32xbf16, #tpu.memory_space<vmem>>, vector<1x8x32xbf16>
    %329 = vector.shape_cast %328 : vector<1x8x32xbf16> to vector<8x32xbf16>
    %cst_170 = arith.constant dense<0.000000e+00> : vector<40x32xf32>
    %330 = tpu.matmul %327, %329, %cst_170 {dimension_numbers = #tpu.dot_dimension_numbers<[1], [0], [0], [1], [0, 0, 1, 1], [], []>} : vector<40x8xbf16>, vector<8x32xbf16>, vector<40x32xf32> -> vector<40x32xf32>
    %331 = arith.addf %294, %330 : vector<40x32xf32>
    %c0_171 = arith.constant 0 : index
    %c16_172 = arith.constant 16 : index
    %332 = vector.load %arg16[%c0_171, %c16_172] : memref<32x96xbf16, #tpu.memory_space<vmem>>, vector<32x8xbf16>
    %cst_173 = arith.constant dense<0.000000e+00> : vector<40x8xf32>
    %333 = tpu.matmul %258, %332, %cst_173 {dimension_numbers = #tpu.dot_dimension_numbers<[1], [0], [0], [1], [0, 0, 1, 1], [], []>} : vector<40x32xbf16>, vector<32x8xbf16>, vector<40x8xf32> -> vector<40x8xf32>
    %c0_174 = arith.constant 0 : index
    %c16_175 = arith.constant 16 : index
    %334 = vector.load %arg17[%c0_174, %c16_175] : memref<1x96xf32, #tpu.memory_space<vmem>>, vector<1x8xf32>
    %335 = vector.broadcast %334 : vector<1x8xf32> to vector<40x8xf32>
    %336 = arith.addf %333, %335 : vector<40x8xf32>
    %c0_176 = arith.constant 0 : index
    %c48_177 = arith.constant 48 : index
    %337 = vector.load %arg16[%c0_176, %c48_177] : memref<32x96xbf16, #tpu.memory_space<vmem>>, vector<32x8xbf16>
    %cst_178 = arith.constant dense<0.000000e+00> : vector<40x8xf32>
    %338 = tpu.matmul %258, %337, %cst_178 {dimension_numbers = #tpu.dot_dimension_numbers<[1], [0], [0], [1], [0, 0, 1, 1], [], []>} : vector<40x32xbf16>, vector<32x8xbf16>, vector<40x8xf32> -> vector<40x8xf32>
    %c0_179 = arith.constant 0 : index
    %c48_180 = arith.constant 48 : index
    %339 = vector.load %arg17[%c0_179, %c48_180] : memref<1x96xf32, #tpu.memory_space<vmem>>, vector<1x8xf32>
    %340 = vector.broadcast %339 : vector<1x8xf32> to vector<40x8xf32>
    %341 = arith.addf %338, %340 : vector<40x8xf32>
    %c0_181 = arith.constant 0 : index
    %c80_182 = arith.constant 80 : index
    %342 = vector.load %arg16[%c0_181, %c80_182] : memref<32x96xbf16, #tpu.memory_space<vmem>>, vector<32x8xbf16>
    %cst_183 = arith.constant dense<0.000000e+00> : vector<40x8xf32>
    %343 = tpu.matmul %258, %342, %cst_183 {dimension_numbers = #tpu.dot_dimension_numbers<[1], [0], [0], [1], [0, 0, 1, 1], [], []>} : vector<40x32xbf16>, vector<32x8xbf16>, vector<40x8xf32> -> vector<40x8xf32>
    %c0_184 = arith.constant 0 : index
    %c80_185 = arith.constant 80 : index
    %344 = vector.load %arg17[%c0_184, %c80_185] : memref<1x96xf32, #tpu.memory_space<vmem>>, vector<1x8xf32>
    %345 = vector.broadcast %344 : vector<1x8xf32> to vector<40x8xf32>
    %346 = arith.addf %343, %345 : vector<40x8xf32>
    %347 = arith.truncf %336 : vector<40x8xf32> to vector<40x8xbf16>
    %348 = arith.truncf %341 : vector<40x8xf32> to vector<40x8xbf16>
    %cst_186 = arith.constant dense<0.000000e+00> : vector<40x40xf32>
    %349 = tpu.matmul %347, %348, %cst_186 {dimension_numbers = #tpu.dot_dimension_numbers<[1], [1], [0], [0], [0, 0, 1, 0], [], []>} : vector<40x8xbf16>, vector<40x8xbf16>, vector<40x40xf32> -> vector<40x40xf32>
    %350 = arith.addf %349, %42 : vector<40x40xf32>
    %cst_187 = arith.constant dense<0xFF800000> : vector<40xf32>
    %351 = vector.multi_reduction <maximumf>, %350, %cst_187 [1] : vector<40x40xf32> to vector<40xf32>
    %352 = vector.shape_cast %351 : vector<40xf32> to vector<40x1xf32>
    %353 = vector.broadcast %352 : vector<40x1xf32> to vector<40x40xf32>
    %354 = arith.subf %350, %353 : vector<40x40xf32>
    %355 = math.exp %354 : vector<40x40xf32>
    %cst_188 = arith.constant dense<0.000000e+00> : vector<40xf32>
    %356 = vector.multi_reduction <add>, %355, %cst_188 [1] : vector<40x40xf32> to vector<40xf32>
    %357 = vector.shape_cast %356 : vector<40xf32> to vector<40x1xf32>
    %358 = tpu.reciprocal %357 {approx = true} : vector<40x1xf32> -> vector<40x1xf32>
    %359 = vector.broadcast %358 : vector<40x1xf32> to vector<40x40xf32>
    %360 = arith.mulf %355, %359 : vector<40x40xf32>
    %361 = arith.truncf %360 : vector<40x40xf32> to vector<40x40xbf16>
    %362 = arith.truncf %346 : vector<40x8xf32> to vector<40x8xbf16>
    %cst_189 = arith.constant dense<0.000000e+00> : vector<40x8xf32>
    %363 = tpu.matmul %361, %362, %cst_189 {dimension_numbers = #tpu.dot_dimension_numbers<[1], [0], [0], [1], [0, 0, 1, 1], [], []>} : vector<40x40xbf16>, vector<40x8xbf16>, vector<40x8xf32> -> vector<40x8xf32>
    %364 = arith.truncf %363 : vector<40x8xf32> to vector<40x8xbf16>
    %c2_190 = arith.constant 2 : index
    %c0_191 = arith.constant 0 : index
    %c0_192 = arith.constant 0 : index
    %365 = vector.load %arg18[%c2_190, %c0_191, %c0_192] : memref<4x8x32xbf16, #tpu.memory_space<vmem>>, vector<1x8x32xbf16>
    %366 = vector.shape_cast %365 : vector<1x8x32xbf16> to vector<8x32xbf16>
    %cst_193 = arith.constant dense<0.000000e+00> : vector<40x32xf32>
    %367 = tpu.matmul %364, %366, %cst_193 {dimension_numbers = #tpu.dot_dimension_numbers<[1], [0], [0], [1], [0, 0, 1, 1], [], []>} : vector<40x8xbf16>, vector<8x32xbf16>, vector<40x32xf32> -> vector<40x32xf32>
    %368 = arith.addf %331, %367 : vector<40x32xf32>
    %c0_194 = arith.constant 0 : index
    %c24_195 = arith.constant 24 : index
    %369 = vector.load %arg16[%c0_194, %c24_195] : memref<32x96xbf16, #tpu.memory_space<vmem>>, vector<32x8xbf16>
    %cst_196 = arith.constant dense<0.000000e+00> : vector<40x8xf32>
    %370 = tpu.matmul %258, %369, %cst_196 {dimension_numbers = #tpu.dot_dimension_numbers<[1], [0], [0], [1], [0, 0, 1, 1], [], []>} : vector<40x32xbf16>, vector<32x8xbf16>, vector<40x8xf32> -> vector<40x8xf32>
    %c0_197 = arith.constant 0 : index
    %c24_198 = arith.constant 24 : index
    %371 = vector.load %arg17[%c0_197, %c24_198] : memref<1x96xf32, #tpu.memory_space<vmem>>, vector<1x8xf32>
    %372 = vector.broadcast %371 : vector<1x8xf32> to vector<40x8xf32>
    %373 = arith.addf %370, %372 : vector<40x8xf32>
    %c0_199 = arith.constant 0 : index
    %c56_200 = arith.constant 56 : index
    %374 = vector.load %arg16[%c0_199, %c56_200] : memref<32x96xbf16, #tpu.memory_space<vmem>>, vector<32x8xbf16>
    %cst_201 = arith.constant dense<0.000000e+00> : vector<40x8xf32>
    %375 = tpu.matmul %258, %374, %cst_201 {dimension_numbers = #tpu.dot_dimension_numbers<[1], [0], [0], [1], [0, 0, 1, 1], [], []>} : vector<40x32xbf16>, vector<32x8xbf16>, vector<40x8xf32> -> vector<40x8xf32>
    %c0_202 = arith.constant 0 : index
    %c56_203 = arith.constant 56 : index
    %376 = vector.load %arg17[%c0_202, %c56_203] : memref<1x96xf32, #tpu.memory_space<vmem>>, vector<1x8xf32>
    %377 = vector.broadcast %376 : vector<1x8xf32> to vector<40x8xf32>
    %378 = arith.addf %375, %377 : vector<40x8xf32>
    %c0_204 = arith.constant 0 : index
    %c88_205 = arith.constant 88 : index
    %379 = vector.load %arg16[%c0_204, %c88_205] : memref<32x96xbf16, #tpu.memory_space<vmem>>, vector<32x8xbf16>
    %cst_206 = arith.constant dense<0.000000e+00> : vector<40x8xf32>
    %380 = tpu.matmul %258, %379, %cst_206 {dimension_numbers = #tpu.dot_dimension_numbers<[1], [0], [0], [1], [0, 0, 1, 1], [], []>} : vector<40x32xbf16>, vector<32x8xbf16>, vector<40x8xf32> -> vector<40x8xf32>
    %c0_207 = arith.constant 0 : index
    %c88_208 = arith.constant 88 : index
    %381 = vector.load %arg17[%c0_207, %c88_208] : memref<1x96xf32, #tpu.memory_space<vmem>>, vector<1x8xf32>
    %382 = vector.broadcast %381 : vector<1x8xf32> to vector<40x8xf32>
    %383 = arith.addf %380, %382 : vector<40x8xf32>
    %384 = arith.truncf %373 : vector<40x8xf32> to vector<40x8xbf16>
    %385 = arith.truncf %378 : vector<40x8xf32> to vector<40x8xbf16>
    %cst_209 = arith.constant dense<0.000000e+00> : vector<40x40xf32>
    %386 = tpu.matmul %384, %385, %cst_209 {dimension_numbers = #tpu.dot_dimension_numbers<[1], [1], [0], [0], [0, 0, 1, 0], [], []>} : vector<40x8xbf16>, vector<40x8xbf16>, vector<40x40xf32> -> vector<40x40xf32>
    %387 = arith.addf %386, %42 : vector<40x40xf32>
    %cst_210 = arith.constant dense<0xFF800000> : vector<40xf32>
    %388 = vector.multi_reduction <maximumf>, %387, %cst_210 [1] : vector<40x40xf32> to vector<40xf32>
    %389 = vector.shape_cast %388 : vector<40xf32> to vector<40x1xf32>
    %390 = vector.broadcast %389 : vector<40x1xf32> to vector<40x40xf32>
    %391 = arith.subf %387, %390 : vector<40x40xf32>
    %392 = math.exp %391 : vector<40x40xf32>
    %cst_211 = arith.constant dense<0.000000e+00> : vector<40xf32>
    %393 = vector.multi_reduction <add>, %392, %cst_211 [1] : vector<40x40xf32> to vector<40xf32>
    %394 = vector.shape_cast %393 : vector<40xf32> to vector<40x1xf32>
    %395 = tpu.reciprocal %394 {approx = true} : vector<40x1xf32> -> vector<40x1xf32>
    %396 = vector.broadcast %395 : vector<40x1xf32> to vector<40x40xf32>
    %397 = arith.mulf %392, %396 : vector<40x40xf32>
    %398 = arith.truncf %397 : vector<40x40xf32> to vector<40x40xbf16>
    %399 = arith.truncf %383 : vector<40x8xf32> to vector<40x8xbf16>
    %cst_212 = arith.constant dense<0.000000e+00> : vector<40x8xf32>
    %400 = tpu.matmul %398, %399, %cst_212 {dimension_numbers = #tpu.dot_dimension_numbers<[1], [0], [0], [1], [0, 0, 1, 1], [], []>} : vector<40x40xbf16>, vector<40x8xbf16>, vector<40x8xf32> -> vector<40x8xf32>
    %401 = arith.truncf %400 : vector<40x8xf32> to vector<40x8xbf16>
    %c3_213 = arith.constant 3 : index
    %c0_214 = arith.constant 0 : index
    %c0_215 = arith.constant 0 : index
    %402 = vector.load %arg18[%c3_213, %c0_214, %c0_215] : memref<4x8x32xbf16, #tpu.memory_space<vmem>>, vector<1x8x32xbf16>
    %403 = vector.shape_cast %402 : vector<1x8x32xbf16> to vector<8x32xbf16>
    %cst_216 = arith.constant dense<0.000000e+00> : vector<40x32xf32>
    %404 = tpu.matmul %401, %403, %cst_216 {dimension_numbers = #tpu.dot_dimension_numbers<[1], [0], [0], [1], [0, 0, 1, 1], [], []>} : vector<40x8xbf16>, vector<8x32xbf16>, vector<40x32xf32> -> vector<40x32xf32>
    %405 = arith.addf %368, %404 : vector<40x32xf32>
    %c0_217 = arith.constant 0 : index
    %c0_218 = arith.constant 0 : index
    %406 = vector.load %arg19[%c0_217, %c0_218] : memref<1x32xf32, #tpu.memory_space<vmem>>, vector<1x32xf32>
    %407 = vector.broadcast %406 : vector<1x32xf32> to vector<40x32xf32>
    %408 = arith.addf %405, %407 : vector<40x32xf32>
    %409 = arith.addf %257, %408 : vector<40x32xf32>
    %c0_219 = arith.constant 0 : index
    %c0_220 = arith.constant 0 : index
    %410 = vector.load %arg20[%c0_219, %c0_220] : memref<1x32xf32, #tpu.memory_space<vmem>>, vector<1x32xf32>
    %c0_221 = arith.constant 0 : index
    %c0_222 = arith.constant 0 : index
    %411 = vector.load %arg21[%c0_221, %c0_222] : memref<1x32xf32, #tpu.memory_space<vmem>>, vector<1x32xf32>
    %cst_223 = arith.constant dense<0.000000e+00> : vector<40xf32>
    %412 = vector.multi_reduction <add>, %409, %cst_223 [1] : vector<40x32xf32> to vector<40xf32>
    %413 = vector.shape_cast %412 : vector<40xf32> to vector<40x1xf32>
    %cst_224 = arith.constant 3.200000e+01 : f32
    %414 = vector.broadcast %cst_224 : f32 to vector<40x1xf32>
    %415 = arith.divf %413, %414 : vector<40x1xf32>
    %416 = vector.broadcast %415 : vector<40x1xf32> to vector<40x32xf32>
    %417 = arith.subf %409, %416 : vector<40x32xf32>
    %418 = arith.mulf %417, %417 : vector<40x32xf32>
    %cst_225 = arith.constant dense<0.000000e+00> : vector<40xf32>
    %419 = vector.multi_reduction <add>, %418, %cst_225 [1] : vector<40x32xf32> to vector<40xf32>
    %420 = vector.shape_cast %419 : vector<40xf32> to vector<40x1xf32>
    %cst_226 = arith.constant 3.200000e+01 : f32
    %421 = vector.broadcast %cst_226 : f32 to vector<40x1xf32>
    %422 = arith.divf %420, %421 : vector<40x1xf32>
    %423 = vector.broadcast %415 : vector<40x1xf32> to vector<40x32xf32>
    %424 = arith.subf %409, %423 : vector<40x32xf32>
    %cst_227 = arith.constant 9.99999974E-6 : f32
    %425 = vector.broadcast %cst_227 : f32 to vector<40x1xf32>
    %426 = arith.addf %422, %425 : vector<40x1xf32>
    %427 = math.sqrt %426 : vector<40x1xf32>
    %428 = vector.broadcast %427 : vector<40x1xf32> to vector<40x32xf32>
    %429 = arith.divf %424, %428 : vector<40x32xf32>
    %430 = vector.broadcast %410 : vector<1x32xf32> to vector<40x32xf32>
    %431 = arith.mulf %429, %430 : vector<40x32xf32>
    %432 = vector.broadcast %411 : vector<1x32xf32> to vector<40x32xf32>
    %433 = arith.addf %431, %432 : vector<40x32xf32>
    %434 = arith.truncf %433 : vector<40x32xf32> to vector<40x32xbf16>
    %c0_228 = arith.constant 0 : index
    %c0_229 = arith.constant 0 : index
    %435 = vector.load %arg22[%c0_228, %c0_229] : memref<32x64xbf16, #tpu.memory_space<vmem>>, vector<32x64xbf16>
    %cst_230 = arith.constant dense<0.000000e+00> : vector<40x64xf32>
    %436 = tpu.matmul %434, %435, %cst_230 {dimension_numbers = #tpu.dot_dimension_numbers<[1], [0], [0], [1], [0, 0, 1, 1], [], []>} : vector<40x32xbf16>, vector<32x64xbf16>, vector<40x64xf32> -> vector<40x64xf32>
    %c0_231 = arith.constant 0 : index
    %c0_232 = arith.constant 0 : index
    %437 = vector.load %arg23[%c0_231, %c0_232] : memref<1x64xf32, #tpu.memory_space<vmem>>, vector<1x64xf32>
    %438 = vector.broadcast %437 : vector<1x64xf32> to vector<40x64xf32>
    %439 = arith.addf %436, %438 : vector<40x64xf32>
    %cst_233 = arith.constant 0.000000e+00 : f32
    %440 = vector.broadcast %cst_233 : f32 to vector<40x64xf32>
    %441 = arith.maximumf %439, %440 : vector<40x64xf32>
    %442 = arith.truncf %441 : vector<40x64xf32> to vector<40x64xbf16>
    %c0_234 = arith.constant 0 : index
    %c0_235 = arith.constant 0 : index
    %443 = vector.load %arg24[%c0_234, %c0_235] : memref<64x32xbf16, #tpu.memory_space<vmem>>, vector<64x32xbf16>
    %cst_236 = arith.constant dense<0.000000e+00> : vector<40x32xf32>
    %444 = tpu.matmul %442, %443, %cst_236 {dimension_numbers = #tpu.dot_dimension_numbers<[1], [0], [0], [1], [0, 0, 1, 1], [], []>} : vector<40x64xbf16>, vector<64x32xbf16>, vector<40x32xf32> -> vector<40x32xf32>
    %c0_237 = arith.constant 0 : index
    %c0_238 = arith.constant 0 : index
    %445 = vector.load %arg25[%c0_237, %c0_238] : memref<1x32xf32, #tpu.memory_space<vmem>>, vector<1x32xf32>
    %446 = vector.broadcast %445 : vector<1x32xf32> to vector<40x32xf32>
    %447 = arith.addf %444, %446 : vector<40x32xf32>
    %448 = arith.addf %433, %447 : vector<40x32xf32>
    %c0_239 = arith.constant 0 : index
    %c0_240 = arith.constant 0 : index
    %449 = vector.load %arg26[%c0_239, %c0_240] : memref<1x32xf32, #tpu.memory_space<vmem>>, vector<1x32xf32>
    %c0_241 = arith.constant 0 : index
    %c0_242 = arith.constant 0 : index
    %450 = vector.load %arg27[%c0_241, %c0_242] : memref<1x32xf32, #tpu.memory_space<vmem>>, vector<1x32xf32>
    %cst_243 = arith.constant dense<0.000000e+00> : vector<40xf32>
    %451 = vector.multi_reduction <add>, %448, %cst_243 [1] : vector<40x32xf32> to vector<40xf32>
    %452 = vector.shape_cast %451 : vector<40xf32> to vector<40x1xf32>
    %cst_244 = arith.constant 3.200000e+01 : f32
    %453 = vector.broadcast %cst_244 : f32 to vector<40x1xf32>
    %454 = arith.divf %452, %453 : vector<40x1xf32>
    %455 = vector.broadcast %454 : vector<40x1xf32> to vector<40x32xf32>
    %456 = arith.subf %448, %455 : vector<40x32xf32>
    %457 = arith.mulf %456, %456 : vector<40x32xf32>
    %cst_245 = arith.constant dense<0.000000e+00> : vector<40xf32>
    %458 = vector.multi_reduction <add>, %457, %cst_245 [1] : vector<40x32xf32> to vector<40xf32>
    %459 = vector.shape_cast %458 : vector<40xf32> to vector<40x1xf32>
    %cst_246 = arith.constant 3.200000e+01 : f32
    %460 = vector.broadcast %cst_246 : f32 to vector<40x1xf32>
    %461 = arith.divf %459, %460 : vector<40x1xf32>
    %462 = vector.broadcast %454 : vector<40x1xf32> to vector<40x32xf32>
    %463 = arith.subf %448, %462 : vector<40x32xf32>
    %cst_247 = arith.constant 9.99999974E-6 : f32
    %464 = vector.broadcast %cst_247 : f32 to vector<40x1xf32>
    %465 = arith.addf %461, %464 : vector<40x1xf32>
    %466 = math.sqrt %465 : vector<40x1xf32>
    %467 = vector.broadcast %466 : vector<40x1xf32> to vector<40x32xf32>
    %468 = arith.divf %463, %467 : vector<40x32xf32>
    %469 = vector.broadcast %449 : vector<1x32xf32> to vector<40x32xf32>
    %470 = arith.mulf %468, %469 : vector<40x32xf32>
    %471 = vector.broadcast %450 : vector<1x32xf32> to vector<40x32xf32>
    %472 = arith.addf %470, %471 : vector<40x32xf32>
    %c0_248 = arith.constant 0 : index
    %c0_249 = arith.constant 0 : index
    %473 = vector.load %arg28[%c0_248, %c0_249] : memref<1x32xf32, #tpu.memory_space<vmem>>, vector<1x32xf32>
    %474 = vector.broadcast %473 : vector<1x32xf32> to vector<40x32xf32>
    %475 = arith.mulf %472, %474 : vector<40x32xf32>
    %c0_250 = arith.constant 0 : index
    %c0_251 = arith.constant 0 : index
    %476 = vector.load %arg29[%c0_250, %c0_251] : memref<1x32xf32, #tpu.memory_space<vmem>>, vector<1x32xf32>
    %477 = vector.broadcast %476 : vector<1x32xf32> to vector<40x32xf32>
    %478 = arith.addf %475, %477 : vector<40x32xf32>
    %cst_252 = arith.constant 0.000000e+00 : f32
    %479 = vector.broadcast %cst_252 : f32 to vector<8x16xf32>
    %480 = vector.extract_strided_slice %478 {offsets = [0, 0], sizes = [8, 32], strides = [1, 1]} : vector<40x32xf32> to vector<8x32xf32>
    %481 = arith.truncf %480 : vector<8x32xf32> to vector<8x32xbf16>
    %c0_253 = arith.constant 0 : index
    %c0_254 = arith.constant 0 : index
    %c0_255 = arith.constant 0 : index
    %482 = vector.load %arg30[%c0_253, %c0_254, %c0_255] : memref<5x32x16xbf16, #tpu.memory_space<vmem>>, vector<1x32x16xbf16>
    %483 = vector.shape_cast %482 : vector<1x32x16xbf16> to vector<32x16xbf16>
    %cst_256 = arith.constant dense<0.000000e+00> : vector<8x16xf32>
    %484 = tpu.matmul %481, %483, %cst_256 {dimension_numbers = #tpu.dot_dimension_numbers<[1], [0], [0], [1], [0, 0, 1, 1], [], []>} : vector<8x32xbf16>, vector<32x16xbf16>, vector<8x16xf32> -> vector<8x16xf32>
    %485 = arith.addf %479, %484 : vector<8x16xf32>
    %486 = vector.extract_strided_slice %478 {offsets = [8, 0], sizes = [8, 32], strides = [1, 1]} : vector<40x32xf32> to vector<8x32xf32>
    %487 = arith.truncf %486 : vector<8x32xf32> to vector<8x32xbf16>
    %c1_257 = arith.constant 1 : index
    %c0_258 = arith.constant 0 : index
    %c0_259 = arith.constant 0 : index
    %488 = vector.load %arg30[%c1_257, %c0_258, %c0_259] : memref<5x32x16xbf16, #tpu.memory_space<vmem>>, vector<1x32x16xbf16>
    %489 = vector.shape_cast %488 : vector<1x32x16xbf16> to vector<32x16xbf16>
    %cst_260 = arith.constant dense<0.000000e+00> : vector<8x16xf32>
    %490 = tpu.matmul %487, %489, %cst_260 {dimension_numbers = #tpu.dot_dimension_numbers<[1], [0], [0], [1], [0, 0, 1, 1], [], []>} : vector<8x32xbf16>, vector<32x16xbf16>, vector<8x16xf32> -> vector<8x16xf32>
    %491 = arith.addf %485, %490 : vector<8x16xf32>
    %492 = vector.extract_strided_slice %478 {offsets = [16, 0], sizes = [8, 32], strides = [1, 1]} : vector<40x32xf32> to vector<8x32xf32>
    %493 = arith.truncf %492 : vector<8x32xf32> to vector<8x32xbf16>
    %c2_261 = arith.constant 2 : index
    %c0_262 = arith.constant 0 : index
    %c0_263 = arith.constant 0 : index
    %494 = vector.load %arg30[%c2_261, %c0_262, %c0_263] : memref<5x32x16xbf16, #tpu.memory_space<vmem>>, vector<1x32x16xbf16>
    %495 = vector.shape_cast %494 : vector<1x32x16xbf16> to vector<32x16xbf16>
    %cst_264 = arith.constant dense<0.000000e+00> : vector<8x16xf32>
    %496 = tpu.matmul %493, %495, %cst_264 {dimension_numbers = #tpu.dot_dimension_numbers<[1], [0], [0], [1], [0, 0, 1, 1], [], []>} : vector<8x32xbf16>, vector<32x16xbf16>, vector<8x16xf32> -> vector<8x16xf32>
    %497 = arith.addf %491, %496 : vector<8x16xf32>
    %498 = vector.extract_strided_slice %478 {offsets = [24, 0], sizes = [8, 32], strides = [1, 1]} : vector<40x32xf32> to vector<8x32xf32>
    %499 = arith.truncf %498 : vector<8x32xf32> to vector<8x32xbf16>
    %c3_265 = arith.constant 3 : index
    %c0_266 = arith.constant 0 : index
    %c0_267 = arith.constant 0 : index
    %500 = vector.load %arg30[%c3_265, %c0_266, %c0_267] : memref<5x32x16xbf16, #tpu.memory_space<vmem>>, vector<1x32x16xbf16>
    %501 = vector.shape_cast %500 : vector<1x32x16xbf16> to vector<32x16xbf16>
    %cst_268 = arith.constant dense<0.000000e+00> : vector<8x16xf32>
    %502 = tpu.matmul %499, %501, %cst_268 {dimension_numbers = #tpu.dot_dimension_numbers<[1], [0], [0], [1], [0, 0, 1, 1], [], []>} : vector<8x32xbf16>, vector<32x16xbf16>, vector<8x16xf32> -> vector<8x16xf32>
    %503 = arith.addf %497, %502 : vector<8x16xf32>
    %504 = vector.extract_strided_slice %478 {offsets = [32, 0], sizes = [8, 32], strides = [1, 1]} : vector<40x32xf32> to vector<8x32xf32>
    %505 = arith.truncf %504 : vector<8x32xf32> to vector<8x32xbf16>
    %c4 = arith.constant 4 : index
    %c0_269 = arith.constant 0 : index
    %c0_270 = arith.constant 0 : index
    %506 = vector.load %arg30[%c4, %c0_269, %c0_270] : memref<5x32x16xbf16, #tpu.memory_space<vmem>>, vector<1x32x16xbf16>
    %507 = vector.shape_cast %506 : vector<1x32x16xbf16> to vector<32x16xbf16>
    %cst_271 = arith.constant dense<0.000000e+00> : vector<8x16xf32>
    %508 = tpu.matmul %505, %507, %cst_271 {dimension_numbers = #tpu.dot_dimension_numbers<[1], [0], [0], [1], [0, 0, 1, 1], [], []>} : vector<8x32xbf16>, vector<32x16xbf16>, vector<8x16xf32> -> vector<8x16xf32>
    %509 = arith.addf %503, %508 : vector<8x16xf32>
    %c0_272 = arith.constant 0 : index
    %c0_273 = arith.constant 0 : index
    %510 = vector.load %arg31[%c0_272, %c0_273] : memref<1x16xf32, #tpu.memory_space<vmem>>, vector<1x16xf32>
    %511 = vector.broadcast %510 : vector<1x16xf32> to vector<8x16xf32>
    %512 = arith.addf %509, %511 : vector<8x16xf32>
    %c0_274 = arith.constant 0 : index
    %c0_275 = arith.constant 0 : index
    %513 = vector.load %arg32[%c0_274, %c0_275] : memref<8x1xf32, #tpu.memory_space<vmem>>, vector<8x1xf32>
    %514 = vector.broadcast %513 : vector<8x1xf32> to vector<8x16xf32>
    %515 = arith.mulf %512, %514 : vector<8x16xf32>
    %c0_276 = arith.constant 0 : index
    %c0_277 = arith.constant 0 : index
    %516 = vector.load %arg33[%c0_276, %c0_277] : memref<8x1xf32, #tpu.memory_space<vmem>>, vector<8x1xf32>
    %517 = vector.broadcast %516 : vector<8x1xf32> to vector<8x16xf32>
    %518 = arith.addf %515, %517 : vector<8x16xf32>
    %c0_278 = arith.constant 0 : index
    %c0_279 = arith.constant 0 : index
    %519 = vector.load %arg34[%c0_278, %c0_279] : memref<8x16xf32, #tpu.memory_space<vmem>>, vector<8x16xf32>
    tpu.vector_store %arg34[%c0_278, %c0_279], %518 {strides = array<i32>} : memref<8x16xf32, #tpu.memory_space<vmem>>, vector<8x16xf32>,
    return
  }
  func.func @transform_0(%arg0: i32) -> (i32, i32) {
    %c0_i32 = arith.constant 0 : i32
    %c0_i32_0 = arith.constant 0 : i32
    return %arg0, %c0_i32 : i32, i32
  }
  func.func @transform_1(%arg0: i32) -> (i32, i32) {
    %c0_i32 = arith.constant 0 : i32
    %c0_i32_0 = arith.constant 0 : i32
    %c0_i32_1 = arith.constant 0 : i32
    return %c0_i32, %c0_i32_0 : i32, i32
  }
  func.func @transform_2(%arg0: i32) -> (i32, i32) {
    %c0_i32 = arith.constant 0 : i32
    %c0_i32_0 = arith.constant 0 : i32
    %c0_i32_1 = arith.constant 0 : i32
    return %c0_i32, %c0_i32_0 : i32, i32
  }
  func.func @transform_3(%arg0: i32) -> (i32, i32) {
    %c0_i32 = arith.constant 0 : i32
    %c0_i32_0 = arith.constant 0 : i32
    %c0_i32_1 = arith.constant 0 : i32
    return %c0_i32, %c0_i32_0 : i32, i32
  }
  func.func @transform_4(%arg0: i32) -> (i32, i32) {
    %c0_i32 = arith.constant 0 : i32
    %c0_i32_0 = arith.constant 0 : i32
    %c0_i32_1 = arith.constant 0 : i32
    return %c0_i32, %c0_i32_0 : i32, i32
  }
  func.func @transform_5(%arg0: i32) -> (i32, i32, i32) {
    %c0_i32 = arith.constant 0 : i32
    %c0_i32_0 = arith.constant 0 : i32
    %c0_i32_1 = arith.constant 0 : i32
    %c0_i32_2 = arith.constant 0 : i32
    return %c0_i32, %c0_i32_0, %c0_i32_1 : i32, i32, i32
  }
  func.func @transform_6(%arg0: i32) -> (i32, i32) {
    %c0_i32 = arith.constant 0 : i32
    %c0_i32_0 = arith.constant 0 : i32
    %c0_i32_1 = arith.constant 0 : i32
    return %c0_i32, %c0_i32_0 : i32, i32
  }
  func.func @transform_7(%arg0: i32) -> (i32, i32) {
    %c0_i32 = arith.constant 0 : i32
    %c0_i32_0 = arith.constant 0 : i32
    %c0_i32_1 = arith.constant 0 : i32
    return %c0_i32, %c0_i32_0 : i32, i32
  }
  func.func @transform_8(%arg0: i32) -> (i32, i32) {
    %c0_i32 = arith.constant 0 : i32
    %c0_i32_0 = arith.constant 0 : i32
    %c0_i32_1 = arith.constant 0 : i32
    return %c0_i32, %c0_i32_0 : i32, i32
  }
  func.func @transform_9(%arg0: i32) -> (i32, i32) {
    %c0_i32 = arith.constant 0 : i32
    %c0_i32_0 = arith.constant 0 : i32
    %c0_i32_1 = arith.constant 0 : i32
    return %c0_i32, %c0_i32_0 : i32, i32
  }
  func.func @transform_10(%arg0: i32) -> (i32, i32) {
    %c0_i32 = arith.constant 0 : i32
    %c0_i32_0 = arith.constant 0 : i32
    %c0_i32_1 = arith.constant 0 : i32
    return %c0_i32, %c0_i32_0 : i32, i32
  }
  func.func @transform_11(%arg0: i32) -> (i32, i32) {
    %c0_i32 = arith.constant 0 : i32
    %c0_i32_0 = arith.constant 0 : i32
    %c0_i32_1 = arith.constant 0 : i32
    return %c0_i32, %c0_i32_0 : i32, i32
  }
  func.func @transform_12(%arg0: i32) -> (i32, i32) {
    %c0_i32 = arith.constant 0 : i32
    %c0_i32_0 = arith.constant 0 : i32
    %c0_i32_1 = arith.constant 0 : i32
    return %c0_i32, %c0_i32_0 : i32, i32
  }
  func.func @transform_13(%arg0: i32) -> (i32, i32) {
    %c0_i32 = arith.constant 0 : i32
    %c0_i32_0 = arith.constant 0 : i32
    %c0_i32_1 = arith.constant 0 : i32
    return %c0_i32, %c0_i32_0 : i32, i32
  }
  func.func @transform_14(%arg0: i32) -> (i32, i32) {
    %c0_i32 = arith.constant 0 : i32
    %c0_i32_0 = arith.constant 0 : i32
    %c0_i32_1 = arith.constant 0 : i32
    return %c0_i32, %c0_i32_0 : i32, i32
  }
  func.func @transform_15(%arg0: i32) -> (i32, i32) {
    %c0_i32 = arith.constant 0 : i32
    %c0_i32_0 = arith.constant 0 : i32
    %c0_i32_1 = arith.constant 0 : i32
    return %c0_i32, %c0_i32_0 : i32, i32
  }
  func.func @transform_16(%arg0: i32) -> (i32, i32) {
    %c0_i32 = arith.constant 0 : i32
    %c0_i32_0 = arith.constant 0 : i32
    %c0_i32_1 = arith.constant 0 : i32
    return %c0_i32, %c0_i32_0 : i32, i32
  }
  func.func @transform_17(%arg0: i32) -> (i32, i32, i32) {
    %c0_i32 = arith.constant 0 : i32
    %c0_i32_0 = arith.constant 0 : i32
    %c0_i32_1 = arith.constant 0 : i32
    %c0_i32_2 = arith.constant 0 : i32
    return %c0_i32, %c0_i32_0, %c0_i32_1 : i32, i32, i32
  }
  func.func @transform_18(%arg0: i32) -> (i32, i32) {
    %c0_i32 = arith.constant 0 : i32
    %c0_i32_0 = arith.constant 0 : i32
    %c0_i32_1 = arith.constant 0 : i32
    return %c0_i32, %c0_i32_0 : i32, i32
  }
  func.func @transform_19(%arg0: i32) -> (i32, i32) {
    %c0_i32 = arith.constant 0 : i32
    %c0_i32_0 = arith.constant 0 : i32
    %c0_i32_1 = arith.constant 0 : i32
    return %c0_i32, %c0_i32_0 : i32, i32
  }
  func.func @transform_20(%arg0: i32) -> (i32, i32) {
    %c0_i32 = arith.constant 0 : i32
    %c0_i32_0 = arith.constant 0 : i32
    %c0_i32_1 = arith.constant 0 : i32
    return %c0_i32, %c0_i32_0 : i32, i32
  }
  func.func @transform_21(%arg0: i32) -> (i32, i32) {
    %c0_i32 = arith.constant 0 : i32
    %c0_i32_0 = arith.constant 0 : i32
    %c0_i32_1 = arith.constant 0 : i32
    return %c0_i32, %c0_i32_0 : i32, i32
  }
  func.func @transform_22(%arg0: i32) -> (i32, i32) {
    %c0_i32 = arith.constant 0 : i32
    %c0_i32_0 = arith.constant 0 : i32
    %c0_i32_1 = arith.constant 0 : i32
    return %c0_i32, %c0_i32_0 : i32, i32
  }
  func.func @transform_23(%arg0: i32) -> (i32, i32) {
    %c0_i32 = arith.constant 0 : i32
    %c0_i32_0 = arith.constant 0 : i32
    %c0_i32_1 = arith.constant 0 : i32
    return %c0_i32, %c0_i32_0 : i32, i32
  }
  func.func @transform_24(%arg0: i32) -> (i32, i32) {
    %c0_i32 = arith.constant 0 : i32
    %c0_i32_0 = arith.constant 0 : i32
    %c0_i32_1 = arith.constant 0 : i32
    return %c0_i32, %c0_i32_0 : i32, i32
  }
  func.func @transform_25(%arg0: i32) -> (i32, i32) {
    %c0_i32 = arith.constant 0 : i32
    %c0_i32_0 = arith.constant 0 : i32
    %c0_i32_1 = arith.constant 0 : i32
    return %c0_i32, %c0_i32_0 : i32, i32
  }
  func.func @transform_26(%arg0: i32) -> (i32, i32) {
    %c0_i32 = arith.constant 0 : i32
    %c0_i32_0 = arith.constant 0 : i32
    %c0_i32_1 = arith.constant 0 : i32
    return %c0_i32, %c0_i32_0 : i32, i32
  }
  func.func @transform_27(%arg0: i32) -> (i32, i32) {
    %c0_i32 = arith.constant 0 : i32
    %c0_i32_0 = arith.constant 0 : i32
    %c0_i32_1 = arith.constant 0 : i32
    return %c0_i32, %c0_i32_0 : i32, i32
  }
  func.func @transform_28(%arg0: i32) -> (i32, i32) {
    %c0_i32 = arith.constant 0 : i32
    %c0_i32_0 = arith.constant 0 : i32
    %c0_i32_1 = arith.constant 0 : i32
    return %c0_i32, %c0_i32_0 : i32, i32
  }
  func.func @transform_29(%arg0: i32) -> (i32, i32, i32) {
    %c0_i32 = arith.constant 0 : i32
    %c0_i32_0 = arith.constant 0 : i32
    %c0_i32_1 = arith.constant 0 : i32
    %c0_i32_2 = arith.constant 0 : i32
    return %c0_i32, %c0_i32_0, %c0_i32_1 : i32, i32, i32
  }
  func.func @transform_30(%arg0: i32) -> (i32, i32) {
    %c0_i32 = arith.constant 0 : i32
    %c0_i32_0 = arith.constant 0 : i32
    %c0_i32_1 = arith.constant 0 : i32
    return %c0_i32, %c0_i32_0 : i32, i32
  }
  func.func @transform_31(%arg0: i32) -> (i32, i32) {
    %c0_i32 = arith.constant 0 : i32
    %c0_i32_0 = arith.constant 0 : i32
    return %arg0, %c0_i32 : i32, i32
  }
  func.func @transform_32(%arg0: i32) -> (i32, i32) {
    %c0_i32 = arith.constant 0 : i32
    %c0_i32_0 = arith.constant 0 : i32
    return %arg0, %c0_i32 : i32, i32
  }
  func.func @transform_33(%arg0: i32) -> (i32, i32) {
    %c0_i32 = arith.constant 0 : i32
    %c0_i32_0 = arith.constant 0 : i32
    return %arg0, %c0_i32 : i32, i32
  }
}

</mosaic_0001>

<bundles_post_ra>
// kernel: div.12
= control target key start
LH: loop header
LB: loop body
LE: loop exit
PB: predicated region body
PF: predicated region fallthrough
CT: control target
= control target key end

     0   :  { %s20_s0 = inlined_call_operand.<no memory space> [shape: f32[], index: 0, kind: input, shape index: {}]   ;;  %s21_s1 = inlined_call_operand.vmem [shape: f32[1,32], index: 1, kind: output, shape index: {}]  }
   0x1   :  { %v2_v0 = vstv %s20_s0 }
   0x2   :  { %3 = vst [vmem:[%s21_s1] sm:$0x1] %v2_v0 }

// kernel: _lambda_.1
= control target key start
LH: loop header
LB: loop body
LE: loop exit
PB: predicated region body
PF: predicated region fallthrough
CT: control target
= control target key end

     0   :  { %s8323_s6 = smov 1   ;;  %s8324_s10 = smov 2   ;;  %s10332_s0 = inlined_call_operand.smem [shape: u32[34], index: -1, kind: input, shape index: {}] }
   0x1   :  { %s8379_s5 = sld [smem:[%s10332_s0]]   ;;  %s8325_s14 = smov 3  }
   0x2   :  { %s8384_s9 = sld [smem:[%s10332_s0 + %s8323_s6]]   ;;  %s8326_s18 = smov 4  }
   0x3   :  { %s8389_s13 = sld [smem:[%s10332_s0 + %s8324_s10]]   ;;  %s8327_s22 = smov 5  }
   0x4   :  { %s8394_s17 = sld [smem:[%s10332_s0 + %s8325_s14]]   ;;  %s8328_s26 = smov 6  }
   0x5   :  { %s8399_s21 = sld [smem:[%s10332_s0 + %s8326_s18]]   ;;  %s8329_s30 = smov 7  }
   0x6   :  { %s8404_s25 = sld [smem:[%s10332_s0 + %s8327_s22]]   ;;  %s8330_s4 = smov 8  }
   0x7   :  { %s8409_s29 = sld [smem:[%s10332_s0 + %s8328_s26]]   ;;  %s8331_s10 = smov 9  }
   0x8   :  { %s8414_s3 = sld [smem:[%s10332_s0 + %s8329_s30]]   ;;  %s8332_s15 = smov 10  }
   0x9   :  { %s8419_s8 = sld [smem:[%s10332_s0 + %s8330_s4]]   ;;  %s8333_s20 = smov 11  }
   0xa   :  { %s8424_s14 = sld [smem:[%s10332_s0 + %s8331_s10]]   ;;  %s8334_s26 = smov 12  }
   0xb   :  { %s8429_s19 = sld [smem:[%s10332_s0 + %s8332_s15]]   ;;  %s8335_s1 = smov 13  }
   0xc   :  { %s8434_s24 = sld [smem:[%s10332_s0 + %s8333_s20]]   ;;  %s8336_s7 = smov 14  }
   0xd   :  { %s8439_s30 = sld [smem:[%s10332_s0 + %s8334_s26]]   ;;  %s8337_s15 = smov 15  }
   0xe   :  { %s8444_s6 = sld [smem:[%s10332_s0 + %s8335_s1]]   ;;  %s8338_s22 = smov 16  }
   0xf   :  { %s8449_s12 = sld [smem:[%s10332_s0 + %s8336_s7]]   ;;  %s8339_s28 = smov 17  }
  0x10   :  { %s8454_s20 = sld [smem:[%s10332_s0 + %s8337_s15]]   ;;  %s8340_s7 = smov 18  }
  0x11   :  { %s8459_s27 = sld [smem:[%s10332_s0 + %s8338_s22]]   ;;  %s8341_s15 = smov 19  }
  0x12   :  { %s8464_s4 = sld [smem:[%s10332_s0 + %s8339_s28]]   ;;  %s8342_s22 = smov 20  }
  0x13   :  { %s8343_s28 = smov 21  }
  0x14   :  { %10342 = sst [smem:[#allocation2_spill]] %s8444_s6 }
  0x15   :  { %10343 = sst [smem:[#allocation3_spill]] %s8449_s12 }
  0x16   :  { %s8469_s12 = sld [smem:[%s10332_s0 + %s8340_s7]]   ;;  %s8344_s7 = smov 22  }
  0x17   :  { %10344 = sst [smem:[#allocation4_spill]] %s8459_s27 }
  0x18   :  { %10345 = sst [smem:[#allocation5_spill]] %s8464_s4 }
  0x19   :  { %s8474_s6 = sld [smem:[%s10332_s0 + %s8341_s15]]   ;;  %s8345_s15 = smov 23  }
  0x1a   :  { %s8479_s27 = sld [smem:[%s10332_s0 + %s8342_s22]]   ;;  %s8346_s22 = smov 24  }
  0x1b   :  { %s8484_s4 = sld [smem:[%s10332_s0 + %s8343_s28]]   ;;  %s8347_s28 = smov 25  }
  0x1c   :  { %10346 = sst [smem:[#allocation6_spill]] %s8469_s12 }
  0x1d   :  { %s8489_s12 = sld [smem:[%s10332_s0 + %s8344_s7]]   ;;  %s8348_s7 = smov 26  }
  0x1f   :  { %10347 = sst [smem:[#allocation7_spill]] %s8474_s6 }
  0x20   :  { %10348 = sst [smem:[#allocation8_spill]] %s8479_s27 }
  0x21   :  { %10349 = sst [smem:[#allocation9_spill]] %s8484_s4 }
  0x22   :  { %s8494_s6 = sld [smem:[%s10332_s0 + %s8345_s15]]   ;;  %s8349_s15 = smov 27  }
  0x23   :  { %10350 = sst [smem:[#allocation10_spill]] %s8489_s12 }
  0x24   :  { %s8499_s27 = sld [smem:[%s10332_s0 + %s8346_s22]]   ;;  %s8350_s22 = smov 28  }
  0x25   :  { %s8504_s4 = sld [smem:[%s10332_s0 + %s8347_s28]]   ;;  %s8351_s28 = smov 29  }
  0x26   :  { %s8509_s12 = sld [smem:[%s10332_s0 + %s8348_s7]]   ;;  %s8352_s7 = smov 30  }
  0x28   :  { %10351 = sst [smem:[#allocation11_spill]] %s8494_s6 }
  0x29   :  { %s8514_s6 = sld [smem:[%s10332_s0 + %s8349_s15]]   ;;  %s8353_s15 = smov 31  }
  0x2a   :  { %10352 = sst [smem:[#allocation12_spill]] %s8499_s27 }
  0x2b   :  { %10353 = sst [smem:[#allocation13_spill]] %s8504_s4 }
  0x2c   :  { %10354 = sst [smem:[#allocation14_spill]] %s8509_s12 }
  0x2d   :  { %s8519_s27 = sld [smem:[%s10332_s0 + %s8350_s22]]   ;;  %s8354_s22 = smov 32  }
  0x2e   :  { %s8524_s4 = sld [smem:[%s10332_s0 + %s8351_s28]]   ;;  %s8355_s28 = smov 33  }
  0x2f   :  { %10355 = sst [smem:[#allocation15_spill]] %s8514_s6 }
  0x30   :  { %s8529_s12 = sld [smem:[%s10332_s0 + %s8352_s7]]   ;;  %s8546_s7 = smov 0  }
  0x31   :  { %s8534_s6 = sld [smem:[%s10332_s0 + %s8353_s15]]  }
  0x33   :  { %10356 = sst [smem:[#allocation16_spill]] %s8519_s27 }
  0x34   :  { %10357 = sst [smem:[#allocation17_spill]] %s8524_s4 }
  0x35   :  { %s8539_s27 = sld [smem:[%s10332_s0 + %s8354_s22]]  }
  0x36   :  { %s8544_s4 = sld [smem:[%s10332_s0 + %s8355_s28]]  }
  0x37 LB: > { %s8552_s10 = sadd.s32 4294967295, %s8321_s7   ;;  %p6539_p0 = scmp.ge.s32.totalorder %s8321_s7, 1  ;;  %s8321_s7 = sphi %s8546_s7, %s77_s7  }
  0x38   : > { %p940_p1 = scmp.lt.s32.totalorder %s8321_s7, 3 }
  0x3a   : > { %p941_p2 = pnand %p6539_p0, %p940_p1 }
  0x3b   : > { %v1055_v0 = vld [vmem:[%s8389_s13] sm:$0xf] (!%p941_p2)  ;;  %vm1084_vm0 = vcmask (!%p941_p2), 1043456   ;;  %s1031_s0 = smul.u32 (!%p941_p2), 5, %s8552_s10  ;;  %v8356_v1 = vmov (!%p941_p2), 0.0   ;;  %vm8357_vm1 = vmmov (!%p941_p2), 0  }
  0x3c   : > { %944 = sbr.rel (%p941_p2) target bundleno = 10836 (0x2a54), region = 152  ;;  %7071 = vmatprep.subr.bf16.mxu0 (!%p941_p2), %v8356_v1  ;;  %v1086_v2 = vsel (!%p941_p2), %vm1084_vm0, %v1055_v0, 0  ;;  %7073 = vmatprep.mubr.msk.bf16.mxu0 (!%p941_p2), %vm8357_vm1, %v8356_v1  ;;  %v8563_v3 = vld [vmem:[%s8394_s17] sm:$0xff] (!%p941_p2)   ;;  %v8567_v4 = vld [vmem:[%s8394_s17 + $0x8] sm:$0xff] (!%p941_p2)   ;;  %vm1074_vm2 = vcmask (!%p941_p2), 64512   ;;  %s8358_s11 = smov (!%p941_p2), 96  }
  0x3d   : > { %7072 = vmatpush3.bf16.msra.mxu0 (!%p941_p2), %v1086_v2  ;;  %p1032_p3 = scmp.lt.s32.totalorder (!%p941_p2), %s1031_s0, 9  ;;  %7085 = vmatprep.subr.bf16.mxu1 (!%p941_p2), %v8356_v1  ;;  %v8570_v5 = vld [vmem:[%s8399_s21] ss:$0 sm:$0xff] (!%p941_p2)  ;;  %s8359_s18 = smov (!%p941_p2), 64   ;;  %v1057_v13 = vld [vmem:[%s8384_s9 + $0x8] sm:$0xff] (!%p941_p2)  ;;  %vm1260_vm3 = vcmask (!%p941_p2), 261120  }
  0x3e   : > { %7101 = vmatprep.subr.bf16.mxu0 (!%p941_p2), %v8356_v1  ;;  %7089 = vmatprep.mubr.msk.bf16.mxu1 (!%p941_p2), %vm8357_vm1, %v8356_v1  ;;  %v1056_v11 = vld [vmem:[%s8384_s9] sm:$0xff] (!%p941_p2)  ;;  %v1058_v22 = vld [vmem:[%s8384_s9 + $0x10] sm:$0xff] (!%p941_p2)  ;;  %v1059_v24 = vld [vmem:[%s8384_s9 + $0x18] sm:$0xff] (!%p941_p2)  ;;  %vm1536_vm6 = vcmask (!%p941_p2), 326656   ;;  %s8361_s22 = smov (!%p941_p2), 88   ;;  %s8362_s23 = smov (!%p941_p2), 120  }
  0x3f   : > { %1326 = vrot.lane.b32.xlu0 (!%p941_p2), %v8563_v3, %s8358_s11  ;;  %1332 = vrot.lane.b32.xlu1 (!%p941_p2), %v8570_v5, %s8358_s11  ;;  %v1060_v32 = vld [vmem:[%s8384_s9 + $0x20] sm:$0xff] (!%p941_p2)  ;;  %s8363_s26 = smov (!%p941_p2), 56   ;;  %s8364_s28 = smov (!%p941_p2), 80  }
  0x40   : > { %7086 = vmatpush3.bf16.msra.mxu1 (!%p941_p2), %v8563_v3  ;;  %s8365_s1 = smov (!%p941_p2), 112   ;;  %s8366_s2 = smov (!%p941_p2), 48  }
  0x41   : > { %7087 = vmatprep.subr.bf16.mxu1 (!%p941_p2), %v8356_v1  ;;  %p1037_p4 = scmp.lt.s32.totalorder (!%p941_p2), %s8552_s10, 1 }
  0x43   : > { %s10377_s0 = smov (!%p1032_p3, %s1031_s0), 9  ;;  %1328 = vrot.lane.b32.xlu0 %v8567_v4, %s8358_s11  ;;  %1391 = vrot.lane.b32.xlu1 %v8563_v3, %s8359_s18  ;;  %s10379_s10 = smov (!%p1037_p4, %s8552_s10), 1 }
  0x44   : > { %s6540_s15 = sshll.u32 %s10377_s0, 2  ;;  %7088 = vmatpush3.bf16.msra.mxu1 %v8567_v4  ;;  %s8367_s0 = smov 72  }
  0x45   : > { %s1035_s16 = scalar_lea.vmem %s8379_s5, %s6540_s15  ;;  %7117 = vmatprep.subr.bf16.mxu1 %v8356_v1  ;;  %s10340_s15 = smov 104  }
  0x46   : > { %v8039_v6 = vld [vmem:[%s1035_s16] sm:$0xff]   ;;  %v8040_v7 = vld [vmem:[%s1035_s16 + $0x8] sm:$0xff]   ;;  %v8041_v8 = vld [vmem:[%s1035_s16 + $0x10] ss:$0 sps:$4 sm:$0xff]   ;;  %s10338_s16 = smov 40  }
  0x47   : > { %7074 = vmatmul.mubr.msk.bf16.vlgmr.msra.gmra.mrb[0].mxu0 %vm1074_vm2, %v8039_v6  ;;  %1393 = vrot.lane.b32.xlu0 %v8567_v4, %s8359_s18 }
  0x48   : > { %7077 = vmatprep.mubr.msk.bf16.mxu0 %vm8357_vm1, %v8356_v1 }
  0x4f   : > { %7078 = vmatmul.mubr.msk.bf16.gmra.mrb[4].mxu0 %vm1074_vm2, %v8040_v7 }
  0x50   : > { %7081 = vmatprep.mubr.msk.bf16.mxu0 %vm8357_vm1, %v8356_v1 }
  0x57   : > { %7082 = vmatmul.mubr.msk.bf16.gmra.mrb[8].mxu0 %vm1074_vm2, %v8041_v8 }
  0x58   : > { %7105 = vmatprep.mubr.msk.bf16.mxu0 %vm8357_vm1, %v8356_v1 }
  0xb1   : > { %v1327_v9 = vpop.permute.xlu0 %1326  ;;  %v8603_v14 = vpop.permute.xlu1 %1332 }
  0xb2   : > { %7102 = vmatpush3.bf16.msra.mxu0 %v1327_v9 }
  0xb3   : > { %7103 = vmatprep.subr.bf16.mxu0 %v8356_v1 }
  0xb5   : > { %v1329_v10 = vpop.permute.xlu0 %1328  ;;  %v1392_v21 = vpop.permute.xlu1 %1391 }
  0xb6   : > { %7104 = vmatpush3.bf16.msra.mxu0 %v1329_v10 }
  0xb7   : > { %7133 = vmatprep.subr.bf16.mxu0 %v8356_v1 }
  0xb9   : > { %v1394_v27 = vpop.permute.xlu0 %1393 }
 0x11a   : > { %v1122_v12 = vpop.f32.mrb[0].mxu0 }
 0x11b   : > { %v7075_v15 = vpop.f32.mrb[1].mxu0  ;;  %v8605_v17 = vadd.f32 %v1122_v12, %v1056_v11 }
 0x11c   : > { %v1125_v16 = vpop.f32.mrb[2].mxu0 }
 0x11d   : > { %v8607_v18 = vadd.f32 %v1125_v16, %v1057_v13  ;;  %v7076_v19 = vpop.f32.mrb[3].mxu0 }
 0x11f   : > { %v8611_v20 = vpack.c.bf16 %v8607_v18, %v8605_v17 }
 0x121   : > { %7090 = vmatmul.mubr.msk.bf16.vlgmr.msra.gmra.mrb[0].mxu1 %vm1260_vm3, %v8611_v20  ;;  %7106 = vmatmul.mubr.msk.bf16.vlgmr.msra.gmra.mrb[12].mxu0 %vm1260_vm3, %v8611_v20 }
 0x122   : > { %v1130_v23 = vpop.f32.mrb[4].mxu0  ;;  %7093 = vmatprep.mubr.msk.bf16.mxu1 %vm8357_vm1, %v8356_v1  ;;  %7109 = vmatprep.mubr.msk.bf16.mxu0 %vm8357_vm1, %v8356_v1 }
 0x123   : > { %v7079_v25 = vpop.f32.mrb[5].mxu0  ;;  %7118 = vmatpush3.bf16.msra.mxu1 %v1392_v21  ;;  %v8624_v28 = vadd.f32 %v1130_v23, %v1058_v22 }
 0x124   : > { %v1133_v26 = vpop.f32.mrb[6].mxu0  ;;  %7119 = vmatprep.subr.bf16.mxu1 %v8356_v1 }
 0x125   : > { %v8626_v29 = vadd.f32 %v1133_v26, %v1059_v24  ;;  %v7080_v30 = vpop.f32.mrb[7].mxu0 }
 0x127   : > { %v8630_v31 = vpack.c.bf16 %v8626_v29, %v8624_v28  ;;  %7120 = vmatpush3.bf16.msra.mxu1 %v1394_v27 }
 0x128   : > { %7151 = vmatprep.subr.bf16.mxu1 %v8356_v1 }
 0x129   : > { %7094 = vmatmul.mubr.msk.bf16.gmra.mrb[4].mxu1 %vm1260_vm3, %v8630_v31  ;;  %7110 = vmatmul.mubr.msk.bf16.gmra.mrb[16].mxu0 %vm1260_vm3, %v8630_v31 }
 0x12a   : > { %v1138_v33 = vpop.f32.mrb[8].mxu0  ;;  %7097 = vmatprep.mubr.msk.bf16.mxu1 %vm8357_vm1, %v8356_v1  ;;  %7113 = vmatprep.mubr.msk.bf16.mxu0 %vm8357_vm1, %v8356_v1 }
 0x12b   : > { %v8642_v34 = vadd.f32 %v1138_v33, %v1060_v32  ;;  %v7083_v35 = vpop.f32.mrb[9].mxu0 }
 0x12c   : > { %v1141_v36 = vpop.f32.mrb[10].mxu0 }
 0x12d   : > { %v8646_v37 = vpack.c.bf16 %v8642_v34, %v8642_v34  ;;  %v7084_v38 = vpop.f32.mrb[11].mxu0 }
 0x131   : > { %7098 = vmatmul.mubr.msk.bf16.gmra.mrb[8].mxu1 %vm1260_vm3, %v8646_v37  ;;  %7114 = vmatmul.mubr.msk.bf16.gmra.mrb[20].mxu0 %vm1260_vm3, %v8646_v37 }
 0x132   : > { %7121 = vmatprep.mubr.msk.bf16.mxu1 %vm8357_vm1, %v8356_v1  ;;  %7139 = vmatprep.mubr.msk.bf16.mxu0 %vm8357_vm1, %v8356_v1 }
 0x139   : > { %7122 = vmatmul.mubr.msk.bf16.vlgmr.msra.gmra.mrb[12].mxu1 %vm1260_vm3, %v8611_v20 }
 0x13a   : > { %7125 = vmatprep.mubr.msk.bf16.mxu1 %vm8357_vm1, %v8356_v1 }
 0x141   : > { %7126 = vmatmul.mubr.msk.bf16.gmra.mrb[16].mxu1 %vm1260_vm3, %v8630_v31 }
 0x142   : > { %7129 = vmatprep.mubr.msk.bf16.mxu1 %vm8357_vm1, %v8356_v1 }
 0x149   : > { %7130 = vmatmul.mubr.msk.bf16.gmra.mrb[20].mxu1 %vm1260_vm3, %v8646_v37 }
 0x14a   : > { %7157 = vmatprep.mubr.msk.bf16.mxu1 %vm8357_vm1, %v8356_v1 }
 0x1f4   : > { %v1304_v39 = vpop.f32.mrb[0].mxu1  ;;  %v1369_v40 = vpop.f32.mrb[12].mxu0 }
 0x1f5   : > { %v7091_v41 = vpop.f32.mrb[1].mxu1  ;;  %v7107_v42 = vpop.f32.mrb[13].mxu0  ;;  %v1305_v45 = vadd.f32 %v8570_v5, %v1304_v39  ;;  %v1370_v46 = vadd.f32 %v1369_v40, %v8603_v14 }
 0x1f6   : > { %v1307_v43 = vpop.f32.mrb[2].mxu1  ;;  %v1372_v44 = vpop.f32.mrb[14].mxu0  ;;  %v1144_v42 = vlaneseq }
 0x1f7   : > { %v1308_v47 = vadd.f32 %v8570_v5, %v1307_v43  ;;  %v1373_v48 = vadd.f32 %v1372_v44, %v8603_v14  ;;  %v7092_v49 = vpop.f32.mrb[3].mxu1  ;;  %v7108_v50 = vpop.f32.mrb[15].mxu0 }
 0x1f8   : > { %v1145_v43 = vshrl.u32 %v1144_v42, 7  ;;  %v1211_v44 = vand.u32 127, %v1144_v42 }
 0x1f9   : > { %v1456_v51 = vpack.c.bf16 %v1308_v47, %v1305_v45  ;;  %v1459_v52 = vpack.c.bf16 %v1373_v48, %v1370_v46 }
 0x1fa   : > { %v1146_v45 = vadd.s32 8, %v1145_v43  ;;  %v1154_v46 = vand.u32 7, %v1145_v43  ;;  %v1216_v47 = vand.u32 7, %v1211_v44  ;;  %v1147_v49 = vadd.s32 16, %v1145_v43 }
 0x1fb   : > { %v1472_v53 = vsel %vm1074_vm2, %v1459_v52, 0  ;;  %v1148_v50 = vadd.s32 24, %v1145_v43 }
 0x1fc   : > { %v1312_v54 = vpop.f32.mrb[4].mxu1  ;;  %v1377_v55 = vpop.f32.mrb[16].mxu0  ;;  %7134 = vmatpush3.bf16.xpose.msra.mxu0 %v1472_v53  ;;  %v1161_v48 = vand.u32 7, %v1146_v45  ;;  %vm1224_vm4 = vcmp.eq.s32.totalorder %v1154_v46, %v1216_v47  ;;  %v1168_v53 = vand.u32 7, %v1147_v49 }
 0x1fd   : > { %v7095_v56 = vpop.f32.mrb[5].mxu1  ;;  %v7111_v57 = vpop.f32.mrb[17].mxu0  ;;  %7135 = vmatprep.subr.bf16.mxu0 %v8356_v1  ;;  %v1313_v60 = vadd.f32 %v8570_v5, %v1312_v54  ;;  %v1378_v61 = vadd.f32 %v1377_v55, %v8603_v14 }
 0x1fe   : > { %v1315_v58 = vpop.f32.mrb[6].mxu1  ;;  %v1380_v59 = vpop.f32.mrb[18].mxu0  ;;  %vm1225_vm5 = vcmp.eq.s32.totalorder %v1161_v48, %v1216_v47  ;;  %vm1226_vm7 = vcmp.eq.s32.totalorder %v1168_v53, %v1216_v47 }
 0x1ff   : > { %v1316_v62 = vadd.f32 %v8570_v5, %v1315_v58  ;;  %v1381_v63 = vadd.f32 %v1380_v59, %v8603_v14  ;;  %v7096_v0 = vpop.f32.mrb[7].mxu1  ;;  %v7112_v2 = vpop.f32.mrb[19].mxu0  ;;  %v1175_v58 = vand.u32 7, %v1148_v50 }
 0x201   : > { %v1457_v6 = vpack.c.bf16 %v1316_v62, %v1313_v60  ;;  %v1460_v7 = vpack.c.bf16 %v1381_v63, %v1378_v61  ;;  %v1149_v63 = vadd.s32 32, %v1145_v43  ;;  %vm1227_vm8 = vcmp.eq.s32.totalorder %v1175_v58, %v1216_v47 }
 0x203   : > { %v1475_v8 = vsel %vm1074_vm2, %v1460_v7, 0 }
 0x204   : > { %v1320_v9 = vpop.f32.mrb[8].mxu1  ;;  %v1385_v10 = vpop.f32.mrb[20].mxu0  ;;  %7136 = vmatpush3.bf16.xpose.msra.mxu0 %v1475_v8 }
 0x205   : > { %v1386_v11 = vadd.f32 %v1385_v10, %v8603_v14  ;;  %v7099_v12 = vpop.f32.mrb[9].mxu1  ;;  %v7115_v13 = vpop.f32.mrb[21].mxu0  ;;  %7137 = vmatprep.subr.bf16.mxu0 %v8356_v1  ;;  %v1321_v36 = vadd.f32 %v8570_v5, %v1320_v9 }
 0x206   : > { %v1323_v15 = vpop.f32.mrb[10].mxu1  ;;  %v1388_v16 = vpop.f32.mrb[22].mxu0 }
 0x207   : > { %v1461_v19 = vpack.c.bf16 %v1386_v11, %v1386_v11  ;;  %v7100_v21 = vpop.f32.mrb[11].mxu1  ;;  %v7116_v22 = vpop.f32.mrb[23].mxu0  ;;  %v1458_v41 = vpack.c.bf16 %v1321_v36, %v1321_v36 }
 0x209   : > { %v1478_v23 = vsel %vm1074_vm2, %v1461_v19, 0 }
 0x20c   : > { %v8682_v24 = vpop.f32.mrb[12].mxu1  ;;  %7138 = vmatpush3.bf16.xpose.msra.mxu0 %v1478_v23 }
 0x20d   : > { %v7123_v25 = vpop.f32.mrb[13].mxu1  ;;  %7169 = vmatprep.subr.bf16.mxu0 %v8356_v1 }
 0x20e   : > { %v8685_v26 = vpop.f32.mrb[14].mxu1 }
 0x20f   : > { %v7124_v14 = vpop.f32.mrb[15].mxu1 }
 0x213   : > { %7140 = vmatmul.mubr.msk.bf16.vlgmr.msra.gmra.mrb[24].mxu0 %vm1074_vm2, %v1456_v51  ;;  %v8360_v51 = vmov -1e+30  }
 0x214   : > { %v8688_v27 = vpop.f32.mrb[16].mxu1  ;;  %7143 = vmatprep.mubr.msk.bf16.mxu0 %vm8357_vm1, %v8356_v1  ;;  %v8703_v52 = vsel %vm1224_vm4, 0.0, %v8360_v51  ;;  %v8705_v55 = vsel %vm1225_vm5, 0.0, %v8360_v51  ;;  %v8711_v2 = vsel %vm1226_vm7, 0.0, %v8360_v51  ;;  %v8713_v8 = vsel %vm1227_vm8, 0.0, %v8360_v51 }
 0x215   : > { %v7127_v30 = vpop.f32.mrb[17].mxu1 }
 0x216   : > { %v8692_v32 = vpop.f32.mrb[18].mxu1 }
 0x217   : > { %v7128_v33 = vpop.f32.mrb[19].mxu1 }
 0x21b   : > { %7144 = vmatmul.mubr.msk.bf16.gmra.mrb[28].mxu0 %vm1074_vm2, %v1457_v6  ;;  %v1182_v6 = vand.u32 7, %v1149_v63 }
 0x21c   : > { %v8695_v35 = vpop.f32.mrb[20].mxu1  ;;  %7147 = vmatprep.mubr.msk.bf16.mxu0 %vm8357_vm1, %v8356_v1 }
 0x21d   : > { %v7131_v38 = vpop.f32.mrb[21].mxu1  ;;  %vm1228_vm9 = vcmp.eq.s32.totalorder %v1182_v6, %v1216_v47 }
 0x21e   : > { %v1453_v39 = vpop.f32.mrb[22].mxu1  ;;  %v8719_v19 = vsel %vm1228_vm9, 0.0, %v8360_v51  ;;  %vm3459_vm9 = vcmask 523264  }
 0x21f   : > { %v7132_v40 = vpop.f32.mrb[23].mxu1 }
 0x223   : > { %7148 = vmatmul.mubr.msk.bf16.gmra.mrb[32].mxu0 %vm1074_vm2, %v1458_v41 }
 0x224   : > { %7173 = vmatprep.mubr.msk.bf16.mxu0 %vm8357_vm1, %v8356_v1 }
 0x2e6   : > { %v1514_v54 = vpop.f32.mrb[24].mxu0 }
 0x2e7   : > { %v7141_v56 = vpop.f32.mrb[25].mxu0  ;;  %v1515_v57 = vadd.f32 %v1514_v54, %v8703_v52 }
 0x2e8   : > { %v1517_v59 = vpop.f32.mrb[26].mxu0 }
 0x2e9   : > { %v7142_v60 = vpop.f32.mrb[27].mxu0  ;;  %v1537_v61 = vsel %vm1536_vm6, %v1515_v57, -inf  ;;  %v1518_v62 = vadd.f32 %v1517_v59, %v8705_v55 }
 0x2ea   : > { %1538 = vmax.xlane.f32.xlu1 %v1537_v61 }
 0x2eb   : > { %v1540_v0 = vsel %vm1536_vm6, %v1518_v62, -inf }
 0x2ec   : > { %1541 = vmax.xlane.f32.xlu0 %v1540_v0 }
 0x2ee   : > { %v1522_v7 = vpop.f32.mrb[28].mxu0 }
 0x2ef   : > { %v7145_v9 = vpop.f32.mrb[29].mxu0  ;;  %v1523_v10 = vadd.f32 %v1522_v7, %v8711_v2 }
 0x2f0   : > { %v1525_v11 = vpop.f32.mrb[30].mxu0 }
 0x2f1   : > { %v7146_v12 = vpop.f32.mrb[31].mxu0  ;;  %v1543_v13 = vsel %vm1536_vm6, %v1523_v10, -inf  ;;  %v1526_v15 = vadd.f32 %v1525_v11, %v8713_v8 }
 0x2f2   : > { %1544 = vmax.xlane.f32.xlu0 %v1543_v13 }
 0x2f3   : > { %v1546_v16 = vsel %vm1536_vm6, %v1526_v15, -inf }
 0x2f4   : > { %1547 = vmax.xlane.f32.xlu1 %v1546_v16 }
 0x2f6   : > { %v1530_v21 = vpop.f32.mrb[32].mxu0 }
 0x2f7   : > { %v7149_v22 = vpop.f32.mrb[33].mxu0  ;;  %v1531_v23 = vadd.f32 %v1530_v21, %v8719_v19 }
 0x2f8   : > { %v1533_v25 = vpop.f32.mrb[34].mxu0 }
 0x2f9   : > { %v7150_v14 = vpop.f32.mrb[35].mxu0  ;;  %v1549_v30 = vsel %vm1536_vm6, %v1531_v23, -inf }
 0x2fa   : > { %1550 = vmax.xlane.f32.xlu0 %v1549_v30 }
 0x377   : > { %v1539_v33 = vpop.xlane.xlu1 %1538 }
 0x378   : > { %v1552_v36 = vsub.f32 %v1515_v57, %v1539_v33 }
 0x379   : > { %v1542_v38 = vpop.xlane.xlu0 %1541 }
 0x37a   : > { %v1557_v39 = vmul.f32 1.442695, %v1552_v36  ;;  %v1553_v40 = vsub.f32 %v1518_v62, %v1542_v38 }
 0x37c   : > { %8068 = vpow2.f32 %v1557_v39  ;;  %v1559_v41 = vmul.f32 1.442695, %v1553_v40 }
 0x37e   : > { %8070 = vpow2.f32 %v1559_v41 }
 0x37f   : > { %v1545_v42 = vpop.xlane.xlu0 %1544 }
 0x380   : > { %v1554_v43 = vsub.f32 %v1523_v10, %v1545_v42 }
 0x381   : > { %v1548_v44 = vpop.xlane.xlu1 %1547 }
 0x382   : > { %v1561_v45 = vmul.f32 1.442695, %v1554_v43  ;;  %v1555_v46 = vsub.f32 %v1526_v15, %v1548_v44 }
 0x384   : > { %8072 = vpow2.f32 %v1561_v45  ;;  %v1563_v47 = vmul.f32 1.442695, %v1555_v46 }
 0x386   : > { %v8069_v48 = vpop.eup %8068  ;;  %8074 = vpow2.f32 %v1563_v47 }
 0x387   : > { %v1551_v49 = vpop.xlane.xlu0 %1550  ;;  %v1567_v50 = vsel %vm1536_vm6, %v8069_v48, 0.0 }
 0x388   : > { %v8071_v51 = vpop.eup %8070  ;;  %v1556_v53 = vsub.f32 %v1531_v23, %v1551_v49  ;;  %1568 = vadd.xlane.f32.xlu1 %v1567_v50 }
 0x389   : > { %v1570_v54 = vsel %vm1536_vm6, %v8071_v51, 0.0 }
 0x38a   : > { %v1565_v56 = vmul.f32 1.442695, %v1556_v53  ;;  %1571 = vadd.xlane.f32.xlu0 %v1570_v54 }
 0x38c   : > { %8076 = vpow2.f32 %v1565_v56 }
 0x38e   : > { %v8725_v57 = vpop.eup %8072 }
 0x38f   : > { %v1573_v58 = vsel %vm1536_vm6, %v8725_v57, 0.0 }
 0x390   : > { %v8729_v59 = vpop.eup %8074  ;;  %1574 = vadd.xlane.f32.xlu1 %v1573_v58 }
 0x391   : > { %v1576_v60 = vsel %vm1536_vm6, %v8729_v59, 0.0 }
 0x392   : > { %1577 = vadd.xlane.f32.xlu0 %v1576_v60 }
 0x396   : > { %v8733_v61 = vpop.eup %8076 }
 0x397   : > { %v1579_v62 = vsel %vm1536_vm6, %v8733_v61, 0.0 }
 0x398   : > { %1580 = vadd.xlane.f32.xlu0 %v1579_v62 }
 0x3a1   : > { %1397 = vrot.lane.b32.xlu1 %v8570_v5, %s8359_s18 }
 0x3a5   : > { %1737 = vrot.lane.b32.xlu1 %v8567_v4, %s8361_s22 }
 0x3a9   : > { %1670 = vrot.lane.b32.xlu1 %v8563_v3, %s8362_s23 }
 0x3ad   : > { %1672 = vrot.lane.b32.xlu1 %v8567_v4, %s8362_s23 }
 0x3ae   : > { %1735 = vrot.lane.b32.xlu0 %v8563_v3, %s8361_s22 }
 0x3b1   : > { %1676 = vrot.lane.b32.xlu1 %v8570_v5, %s8362_s23 }
 0x3b2   : > { %1741 = vrot.lane.b32.xlu0 %v8570_v5, %s8361_s22 }
 0x3b5   : > { %1802 = vrot.lane.b32.xlu1 %v8567_v4, %s8363_s26 }
 0x3b6   : > { %1800 = vrot.lane.b32.xlu0 %v8563_v3, %s8363_s26 }
 0x415   : > { %v1569_v63 = vpop.xlane.xlu1 %1568 }
 0x417   : > { %v1572_v0 = vpop.xlane.xlu0 %1571 }
 0x418   : > { %8078 = vrcp.f32 %v1572_v0 }
 0x419   : > { %8080 = vrcp.f32 %v1569_v63 }
 0x41d   : > { %v1575_v6 = vpop.xlane.xlu1 %1574 }
 0x41f   : > { %v1578_v7 = vpop.xlane.xlu0 %1577 }
 0x420   : > { %8082 = vrcp.f32 %v1578_v7 }
 0x421   : > { %v1398_v9 = vpop.permute.xlu1 %1397  ;;  %8084 = vrcp.f32 %v1575_v6 }
 0x422   : > { %v1435_v10 = vadd.f32 %v8682_v24, %v1398_v9  ;;  %v1438_v11 = vadd.f32 %v8685_v26, %v1398_v9  ;;  %v1443_v5 = vadd.f32 %v8688_v27, %v1398_v9  ;;  %v1446_v12 = vadd.f32 %v8692_v32, %v1398_v9  ;;  %v8079_v21 = vpop.eup %8078 }
 0x423   : > { %v1451_v3 = vadd.f32 %v8695_v35, %v1398_v9  ;;  %v8081_v26 = vpop.eup %8080  ;;  %v1588_v27 = vmul.f32 %v8079_v21, %v8071_v51 }
 0x424   : > { %v1595_v13 = vpack.c.bf16 %v1438_v11, %v1435_v10  ;;  %v1596_v4 = vpack.c.bf16 %v1446_v12, %v1443_v5  ;;  %v1587_v32 = vmul.f32 %v8081_v26, %v8069_v48 }
 0x425   : > { %v1738_v15 = vpop.permute.xlu1 %1737  ;;  %v1581_v16 = vpop.xlane.xlu0 %1580  ;;  %v1597_v24 = vpack.c.bf16 %v1451_v3, %v1451_v3 }
 0x426   : > { %7152 = vmatpush3.bf16.msra.mxu1 %v1595_v13  ;;  %8086 = vrcp.f32 %v1581_v16  ;;  %v1592_v30 = vpack.c.bf16 %v1588_v27, %v1587_v32 }
 0x427   : > { %7153 = vmatprep.subr.bf16.mxu1 %v8356_v1  ;;  %v1608_v35 = vsel %vm1084_vm0, %v1597_v24, 0 }
 0x429   : > { %v1671_v22 = vpop.permute.xlu1 %1670  ;;  %v1736_v23 = vpop.permute.xlu0 %1735 }
 0x42a   : > { %7154 = vmatpush3.bf16.msra.mxu1 %v1596_v4  ;;  %7170 = vmatpush3.bf16.msra.mxu0 %v1671_v22  ;;  %v8083_v33 = vpop.eup %8082 }
 0x42b   : > { %7155 = vmatprep.subr.bf16.mxu1 %v8356_v1  ;;  %7171 = vmatprep.subr.bf16.mxu0 %v8356_v1  ;;  %v8085_v39 = vpop.eup %8084  ;;  %v1590_v40 = vmul.f32 %v8083_v33, %v8729_v59 }
 0x42c   : > { %v1589_v41 = vmul.f32 %v8085_v39, %v8725_v57 }
 0x42d   : > { %v1673_v25 = vpop.permute.xlu1 %1672  ;;  %v8764_v14 = vpop.permute.xlu0 %1741 }
 0x42e   : > { %7156 = vmatpush3.bf16.msra.mxu1 %v1608_v35  ;;  %7172 = vmatpush3.bf16.msra.mxu0 %v1673_v25  ;;  %v1593_v43 = vpack.c.bf16 %v1590_v40, %v1589_v41 }
 0x42f   : > { %7185 = vmatprep.subr.bf16.mxu1 %v8356_v1  ;;  %7201 = vmatprep.subr.bf16.mxu0 %v8356_v1 }
 0x430   : > { %v8087_v44 = vpop.eup %8086 }
 0x431   : > { %7158 = vmatmul.mubr.msk.bf16.vlgmr.msra.gmra.mrb[24].mxu1 %vm1536_vm6, %v1592_v30  ;;  %7174 = vmatmul.mubr.msk.bf16.vlgmr.msra.gmra.mrb[36].mxu0 %vm1260_vm3, %v8611_v20  ;;  %v8771_v36 = vpop.permute.xlu1 %1676  ;;  %v1801_v38 = vpop.permute.xlu0 %1800  ;;  %v1591_v45 = vmul.f32 %v8087_v44, %v8733_v61 }
 0x432   : > { %7161 = vmatprep.mubr.msk.bf16.mxu1 %vm8357_vm1, %v8356_v1  ;;  %7177 = vmatprep.mubr.msk.bf16.mxu0 %vm8357_vm1, %v8356_v1 }
 0x433   : > { %7186 = vmatpush3.bf16.msra.mxu1 %v1736_v23  ;;  %7202 = vmatpush3.bf16.msra.mxu0 %v1801_v38  ;;  %v1594_v46 = vpack.c.bf16 %v1591_v45, %v1591_v45 }
 0x434   : > { %7187 = vmatprep.subr.bf16.mxu1 %v8356_v1  ;;  %7203 = vmatprep.subr.bf16.mxu0 %v8356_v1 }
 0x435   : > { %v1803_v42 = vpop.permute.xlu1 %1802 }
 0x437   : > { %7188 = vmatpush3.bf16.msra.mxu1 %v1738_v15  ;;  %7204 = vmatpush3.bf16.msra.mxu0 %v1803_v42 }
 0x438   : > { %7217 = vmatprep.subr.bf16.mxu1 %v8356_v1  ;;  %7235 = vmatprep.subr.bf16.mxu0 %v8356_v1 }
 0x439   : > { %7162 = vmatmul.mubr.msk.bf16.gmra.mrb[28].mxu1 %vm1536_vm6, %v1593_v43  ;;  %7178 = vmatmul.mubr.msk.bf16.gmra.mrb[40].mxu0 %vm1260_vm3, %v8630_v31 }
 0x43a   : > { %7165 = vmatprep.mubr.msk.bf16.mxu1 %vm8357_vm1, %v8356_v1  ;;  %7181 = vmatprep.mubr.msk.bf16.mxu0 %vm8357_vm1, %v8356_v1 }
 0x441   : > { %7182 = vmatmul.mubr.msk.bf16.gmra.mrb[44].mxu0 %vm1260_vm3, %v8646_v37  ;;  %7166 = vmatmul.mubr.msk.bf16.gmra.mrb[32].mxu1 %vm1536_vm6, %v1594_v46 }
 0x442   : > { %7189 = vmatprep.mubr.msk.bf16.mxu1 %vm8357_vm1, %v8356_v1  ;;  %7205 = vmatprep.mubr.msk.bf16.mxu0 %vm8357_vm1, %v8356_v1 }
 0x449   : > { %7190 = vmatmul.mubr.msk.bf16.vlgmr.msra.gmra.mrb[36].mxu1 %vm1260_vm3, %v8611_v20  ;;  %7206 = vmatmul.mubr.msk.bf16.vlgmr.msra.gmra.mrb[48].mxu0 %vm1260_vm3, %v8611_v20 }
 0x44a   : > { %7193 = vmatprep.mubr.msk.bf16.mxu1 %vm8357_vm1, %v8356_v1  ;;  %7209 = vmatprep.mubr.msk.bf16.mxu0 %vm8357_vm1, %v8356_v1 }
 0x451   : > { %7194 = vmatmul.mubr.msk.bf16.gmra.mrb[40].mxu1 %vm1260_vm3, %v8630_v31  ;;  %7210 = vmatmul.mubr.msk.bf16.gmra.mrb[52].mxu0 %vm1260_vm3, %v8630_v31 }
 0x452   : > { %7197 = vmatprep.mubr.msk.bf16.mxu1 %vm8357_vm1, %v8356_v1  ;;  %7213 = vmatprep.mubr.msk.bf16.mxu0 %vm8357_vm1, %v8356_v1 }
 0x459   : > { %7198 = vmatmul.mubr.msk.bf16.gmra.mrb[44].mxu1 %vm1260_vm3, %v8646_v37  ;;  %7214 = vmatmul.mubr.msk.bf16.gmra.mrb[56].mxu0 %vm1260_vm3, %v8646_v37 }
 0x45a   : > { %7223 = vmatprep.mubr.msk.bf16.mxu1 %vm8357_vm1, %v8356_v1  ;;  %7241 = vmatprep.mubr.msk.bf16.mxu0 %vm8357_vm1, %v8356_v1 }
 0x504   : > { %v8822_v47 = vpop.f32.mrb[24].mxu1  ;;  %v1713_v48 = vpop.f32.mrb[36].mxu0 }
 0x505   : > { %v7159_v49 = vpop.f32.mrb[25].mxu1  ;;  %v7175_v50 = vpop.f32.mrb[37].mxu0  ;;  %v8827_v54 = vadd.f32 %v1713_v48, %v8771_v36 }
 0x506   : > { %v8824_v51 = vpop.f32.mrb[26].mxu1  ;;  %v1716_v53 = vpop.f32.mrb[38].mxu0 }
 0x507   : > { %v1666_v56 = vpack.c.bf16 %v8824_v51, %v8822_v47  ;;  %v8832_v57 = vadd.f32 %v1716_v53, %v8771_v36  ;;  %v7160_v58 = vpop.f32.mrb[27].mxu1  ;;  %v7176_v59 = vpop.f32.mrb[39].mxu0 }
 0x509   : > { %v1865_v60 = vpack.c.bf16 %v8832_v57, %v8827_v54 }
 0x50c   : > { %v8836_v61 = vpop.f32.mrb[28].mxu1  ;;  %v1721_v62 = vpop.f32.mrb[40].mxu0 }
 0x50d   : > { %v7163_v63 = vpop.f32.mrb[29].mxu1  ;;  %v7179_v0 = vpop.f32.mrb[41].mxu0  ;;  %v1722_v9 = vadd.f32 %v1721_v62, %v8771_v36 }
 0x50e   : > { %v8838_v6 = vpop.f32.mrb[30].mxu1  ;;  %v1724_v7 = vpop.f32.mrb[42].mxu0 }
 0x50f   : > { %v1667_v10 = vpack.c.bf16 %v8838_v6, %v8836_v61  ;;  %v1725_v11 = vadd.f32 %v1724_v7, %v8771_v36  ;;  %v7164_v5 = vpop.f32.mrb[31].mxu1  ;;  %v7180_v12 = vpop.f32.mrb[43].mxu0 }
 0x511   : > { %v1866_v13 = vpack.c.bf16 %v1725_v11, %v1722_v9 }
 0x514   : > { %v8844_v4 = vpop.f32.mrb[32].mxu1  ;;  %v1729_v15 = vpop.f32.mrb[44].mxu0 }
 0x515   : > { %v7167_v16 = vpop.f32.mrb[33].mxu1  ;;  %v7183_v3 = vpop.f32.mrb[45].mxu0  ;;  %v1668_v47 = vpack.c.bf16 %v8844_v4, %v8844_v4 }
 0x516   : > { %v1663_v21 = vpop.f32.mrb[34].mxu1  ;;  %v1732_v22 = vpop.f32.mrb[46].mxu0 }
 0x517   : > { %v7168_v24 = vpop.f32.mrb[35].mxu1  ;;  %v7184_v23 = vpop.f32.mrb[47].mxu0 }
 0x51c   : > { %v1778_v26 = vpop.f32.mrb[36].mxu1  ;;  %v8846_v27 = vpop.f32.mrb[48].mxu0 }
 0x51d   : > { %v7191_v32 = vpop.f32.mrb[37].mxu1  ;;  %v7207_v25 = vpop.f32.mrb[49].mxu0  ;;  %v1779_v33 = vadd.f32 %v1778_v26, %v8764_v14 }
 0x51e   : > { %v1781_v35 = vpop.f32.mrb[38].mxu1  ;;  %v8848_v30 = vpop.f32.mrb[50].mxu0 }
 0x51f   : > { %v1782_v38 = vadd.f32 %v1781_v35, %v8764_v14  ;;  %v7192_v39 = vpop.f32.mrb[39].mxu1  ;;  %v7208_v40 = vpop.f32.mrb[51].mxu0 }
 0x521   : > { %v1868_v41 = vpack.c.bf16 %v1782_v38, %v1779_v33 }
 0x523   : > { %v1881_v42 = vsel %vm1074_vm2, %v1868_v41, 0 }
 0x524   : > { %v1786_v43 = vpop.f32.mrb[40].mxu1  ;;  %v8853_v44 = vpop.f32.mrb[52].mxu0  ;;  %7218 = vmatpush3.bf16.xpose.msra.mxu1 %v1881_v42 }
 0x525   : > { %v7195_v45 = vpop.f32.mrb[41].mxu1  ;;  %v7211_v46 = vpop.f32.mrb[53].mxu0  ;;  %7219 = vmatprep.subr.bf16.mxu1 %v8356_v1  ;;  %v1787_v50 = vadd.f32 %v1786_v43, %v8764_v14 }
 0x526   : > { %v1789_v48 = vpop.f32.mrb[42].mxu1  ;;  %v8856_v49 = vpop.f32.mrb[54].mxu0 }
 0x527   : > { %v1790_v53 = vadd.f32 %v1789_v48, %v8764_v14  ;;  %v7196_v54 = vpop.f32.mrb[43].mxu1  ;;  %v7212_v57 = vpop.f32.mrb[55].mxu0 }
 0x529   : > { %v1869_v58 = vpack.c.bf16 %v1790_v53, %v1787_v50 }
 0x52b   : > { %v1884_v59 = vsel %vm1074_vm2, %v1869_v58, 0 }
 0x52c   : > { %v1794_v62 = vpop.f32.mrb[44].mxu1  ;;  %v8861_v63 = vpop.f32.mrb[56].mxu0  ;;  %7220 = vmatpush3.bf16.xpose.msra.mxu1 %v1884_v59 }
 0x52d   : > { %v1795_v0 = vadd.f32 %v1794_v62, %v8764_v14  ;;  %v7199_v7 = vpop.f32.mrb[45].mxu1  ;;  %v7215_v9 = vpop.f32.mrb[57].mxu0  ;;  %7221 = vmatprep.subr.bf16.mxu1 %v8356_v1  ;;  %v1730_v14 = vadd.f32 %v1729_v15, %v8771_v36 }
 0x52e   : > { %v1797_v11 = vpop.f32.mrb[46].mxu1  ;;  %v1862_v5 = vpop.f32.mrb[58].mxu0 }
 0x52f   : > { %v1870_v12 = vpack.c.bf16 %v1795_v0, %v1795_v0  ;;  %v7200_v16 = vpop.f32.mrb[47].mxu1  ;;  %v7216_v3 = vpop.f32.mrb[59].mxu0  ;;  %v1867_v22 = vpack.c.bf16 %v1730_v14, %v1730_v14 }
 0x531   : > { %v1887_v21 = vsel %vm1074_vm2, %v1870_v12, 0 }
 0x534   : > { %7222 = vmatpush3.bf16.xpose.msra.mxu1 %v1887_v21 }
 0x535   : > { %7253 = vmatprep.subr.bf16.mxu1 %v8356_v1 }
 0x53b   : > { %7224 = vmatmul.mubr.msk.bf16.vlgmr.msra.gmra.mrb[48].mxu1 %vm1074_vm2, %v1865_v60 }
 0x53c   : > { %7227 = vmatprep.mubr.msk.bf16.mxu1 %vm8357_vm1, %v8356_v1 }
 0x543   : > { %7228 = vmatmul.mubr.msk.bf16.gmra.mrb[52].mxu1 %vm1074_vm2, %v1866_v13 }
 0x544   : > { %7231 = vmatprep.mubr.msk.bf16.mxu1 %vm8357_vm1, %v8356_v1 }
 0x54b   : > { %7232 = vmatmul.mubr.msk.bf16.gmra.mrb[56].mxu1 %vm1074_vm2, %v1867_v22 }
 0x54c   : > { %7255 = vmatprep.mubr.msk.bf16.mxu1 %vm8357_vm1, %v8356_v1 }
 0x60e   : > { %v1923_v24 = vpop.f32.mrb[48].mxu1 }
 0x60f   : > { %v7225_v23 = vpop.f32.mrb[49].mxu1  ;;  %v1924_v60 = vadd.f32 %v1923_v24, %v8703_v52 }
 0x610   : > { %v1926_v26 = vpop.f32.mrb[50].mxu1 }
 0x611   : > { %v7226_v32 = vpop.f32.mrb[51].mxu1  ;;  %v1945_v25 = vsel %vm1536_vm6, %v1924_v60, -inf  ;;  %v1927_v13 = vadd.f32 %v1926_v26, %v8705_v55 }
 0x612   : > { %1946 = vmax.xlane.f32.xlu0 %v1945_v25 }
 0x613   : > { %v1948_v35 = vsel %vm1536_vm6, %v1927_v13, -inf }
 0x614   : > { %1949 = vmax.xlane.f32.xlu1 %v1948_v35 }
 0x616   : > { %v1931_v36 = vpop.f32.mrb[52].mxu1 }
 0x617   : > { %v7229_v15 = vpop.f32.mrb[53].mxu1  ;;  %v1932_v33 = vadd.f32 %v1931_v36, %v8711_v2 }
 0x618   : > { %v1934_v38 = vpop.f32.mrb[54].mxu1  ;;  %v8905_v15 = vld [vmem:[%s8399_s21] ss:$0 sm:$0xff] }
 0x619   : > { %v7230_v39 = vpop.f32.mrb[55].mxu1  ;;  %v1951_v40 = vsel %vm1536_vm6, %v1932_v33, -inf  ;;  %v1935_v41 = vadd.f32 %v1934_v38, %v8713_v8  ;;  %v8915_v38 = vld [vmem:[%s8394_s17 + $0x8] sm:$0xff]  }
 0x61a   : > { %1952 = vmax.xlane.f32.xlu0 %v1951_v40  ;;  %v6583_v39 = vld [vmem:[%s8404_s25 + $0x4] sm:$0xf] }
 0x61b   : > { %v1954_v42 = vsel %vm1536_vm6, %v1935_v41, -inf  ;;  %v2089_v40 = vsel %vm1084_vm0, %v6583_v39, 0 }
 0x61c   : > { %7254 = vmatpush3.bf16.msra.mxu1 %v2089_v40 }
 0x61d   : > { %7281 = vmatprep.subr.bf16.mxu1 %v8356_v1 }
 0x61e   : > { %1955 = vmax.xlane.f32.xlu0 %v1954_v42  ;;  %v1939_v43 = vpop.f32.mrb[56].mxu1 }
 0x61f   : > { %v7233_v45 = vpop.f32.mrb[57].mxu1  ;;  %v1940_v46 = vadd.f32 %v1939_v43, %v8719_v19 }
 0x620   : > { %v1942_v48 = vpop.f32.mrb[58].mxu1 }
 0x621   : > { %v7234_v50 = vpop.f32.mrb[59].mxu1  ;;  %v1957_v53 = vsel %vm1536_vm6, %v1940_v46, -inf }
 0x622   : > { %1958 = vmax.xlane.f32.xlu1 %v1957_v53 }
 0x69f   : > { %v1947_v54 = vpop.xlane.xlu0 %1946 }
 0x6a0   : > { %v1960_v57 = vsub.f32 %v1924_v60, %v1947_v54 }
 0x6a1   : > { %v1950_v58 = vpop.xlane.xlu1 %1949 }
 0x6a2   : > { %v1965_v59 = vmul.f32 1.442695, %v1960_v57  ;;  %v1961_v62 = vsub.f32 %v1927_v13, %v1950_v58 }
 0x6a4   : > { %8088 = vpow2.f32 %v1965_v59  ;;  %v1967_v0 = vmul.f32 1.442695, %v1961_v62 }
 0x6a6   : > { %8090 = vpow2.f32 %v1967_v0 }
 0x6a7   : > { %v1953_v7 = vpop.xlane.xlu0 %1952 }
 0x6a8   : > { %v1962_v9 = vsub.f32 %v1932_v33, %v1953_v7  ;;  %v8910_v33 = vld [vmem:[%s8394_s17] sm:$0xff]  }
 0x6aa   : > { %v1969_v11 = vmul.f32 1.442695, %v1962_v9 }
 0x6ab   : > { %v1956_v5 = vpop.xlane.xlu0 %1955 }
 0x6ac   : > { %8092 = vpow2.f32 %v1969_v11  ;;  %v1963_v12 = vsub.f32 %v1935_v41, %v1956_v5 }
 0x6ae   : > { %v8887_v16 = vpop.eup %8088  ;;  %v1971_v3 = vmul.f32 1.442695, %v1963_v12 }
 0x6af   : > { %v1959_v21 = vpop.xlane.xlu1 %1958  ;;  %v1975_v14 = vsel %vm1536_vm6, %v8887_v16, 0.0 }
 0x6b0   : > { %v8091_v22 = vpop.eup %8090  ;;  %8094 = vpow2.f32 %v1971_v3  ;;  %v1964_v24 = vsub.f32 %v1940_v46, %v1959_v21  ;;  %1976 = vadd.xlane.f32.xlu0 %v1975_v14 }
 0x6b1   : > { %v1978_v23 = vsel %vm1536_vm6, %v8091_v22, 0.0 }
 0x6b2   : > { %v1973_v60 = vmul.f32 1.442695, %v1964_v24  ;;  %1979 = vadd.xlane.f32.xlu1 %v1978_v23 }
 0x6b4   : > { %8096 = vpow2.f32 %v1973_v60 }
 0x6b6   : > { %v8892_v26 = vpop.eup %8092 }
 0x6b7   : > { %v1981_v32 = vsel %vm1536_vm6, %v8892_v26, 0.0 }
 0x6b8   : > { %1982 = vadd.xlane.f32.xlu0 %v1981_v32 }
 0x6ba   : > { %v8896_v25 = vpop.eup %8094 }
 0x6bb   : > { %v1984_v13 = vsel %vm1536_vm6, %v8896_v25, 0.0 }
 0x6bc   : > { %1985 = vadd.xlane.f32.xlu1 %v1984_v13 }
 0x6be   : > { %v8900_v35 = vpop.eup %8096 }
 0x6bf   : > { %v1987_v36 = vsel %vm1536_vm6, %v8900_v35, 0.0 }
 0x6c0   : > { %1988 = vadd.xlane.f32.xlu1 %v1987_v36 }
 0x6ce   : > { %1806 = vrot.lane.b32.xlu0 %v8905_v15, %s8363_s26 }
 0x6d1   : > { %2280 = vrot.lane.b32.xlu1 %v8910_v33, %s8364_s28 }
 0x6d2   : > { %2282 = vrot.lane.b32.xlu0 %v8915_v38, %s8364_s28 }
 0x6d5   : > { %2215 = vrot.lane.b32.xlu1 %v8910_v33, %s8365_s1 }
 0x6d6   : > { %2217 = vrot.lane.b32.xlu0 %v8915_v38, %s8365_s1 }
 0x6d9   : > { %2286 = vrot.lane.b32.xlu1 %v8905_v15, %s8364_s28 }
 0x6da   : > { %2221 = vrot.lane.b32.xlu0 %v8905_v15, %s8365_s1 }
 0x6dd   : > { %2345 = vrot.lane.b32.xlu1 %v8910_v33, %s8366_s2 }
 0x6de   : > { %2347 = vrot.lane.b32.xlu0 %v8915_v38, %s8366_s2 }
 0x73d   : > { %v1977_v41 = vpop.xlane.xlu0 %1976 }
 0x73f   : > { %v1980_v42 = vpop.xlane.xlu1 %1979 }
 0x740   : > { %8098 = vrcp.f32 %v1980_v42 }
 0x741   : > { %8100 = vrcp.f32 %v1977_v41 }
 0x745   : > { %v1983_v43 = vpop.xlane.xlu0 %1982 }
 0x749   : > { %v1807_v45 = vpop.permute.xlu0 %1806  ;;  %v1986_v53 = vpop.xlane.xlu1 %1985 }
 0x74a   : > { %v1844_v46 = vadd.f32 %v8846_v27, %v1807_v45  ;;  %v1847_v48 = vadd.f32 %v8848_v30, %v1807_v45  ;;  %v1852_v50 = vadd.f32 %v8853_v44, %v1807_v45  ;;  %v1855_v54 = vadd.f32 %v8856_v49, %v1807_v45  ;;  %v8099_v62 = vpop.eup %8098  ;;  %v1669_v44 = vld [vmem:[%s8404_s25] sm:$0xf] }
 0x74b   : > { %v1860_v59 = vadd.f32 %v8861_v63, %v1807_v45  ;;  %8102 = vrcp.f32 %v1986_v53  ;;  %v8101_v27 = vpop.eup %8100  ;;  %v1996_v30 = vmul.f32 %v8099_v62, %v8091_v22  ;;  %v2157_v11 = vsel %vm1084_vm0, %v1669_v44, 0 }
 0x74c   : > { %v2003_v57 = vpack.c.bf16 %v1847_v48, %v1844_v46  ;;  %v2004_v58 = vpack.c.bf16 %v1855_v54, %v1852_v50  ;;  %8104 = vrcp.f32 %v1983_v43  ;;  %v1995_v49 = vmul.f32 %v8101_v27, %v8887_v16 }
 0x74d   : > { %v2005_v0 = vpack.c.bf16 %v1860_v59, %v1860_v59  ;;  %v1989_v7 = vpop.xlane.xlu1 %1988  ;;  %v2283_v60 = vpop.permute.xlu0 %2282 }
 0x74e   : > { %7236 = vmatpush3.bf16.msra.mxu0 %v2003_v57  ;;  %8106 = vrcp.f32 %v1989_v7  ;;  %v2000_v63 = vpack.c.bf16 %v1996_v30, %v1995_v49 }
 0x74f   : > { %7237 = vmatprep.subr.bf16.mxu0 %v8356_v1  ;;  %v2016_v9 = vsel %vm1084_vm0, %v2005_v0, 0 }
 0x751   : > { %v2281_v23 = vpop.permute.xlu1 %2280 }
 0x752   : > { %7238 = vmatpush3.bf16.msra.mxu0 %v2004_v58 }
 0x753   : > { %7239 = vmatprep.subr.bf16.mxu0 %v8356_v1 }
 0x755   : > { %v8103_v5 = vpop.eup %8102  ;;  %v2216_v4 = vpop.permute.xlu1 %2215 }
 0x756   : > { %7240 = vmatpush3.bf16.msra.mxu0 %v2016_v9  ;;  %v8105_v12 = vpop.eup %8104  ;;  %v1998_v3 = vmul.f32 %v8103_v5, %v8896_v25 }
 0x757   : > { %7267 = vmatprep.subr.bf16.mxu0 %v8356_v1  ;;  %v1997_v16 = vmul.f32 %v8105_v12, %v8892_v26  ;;  %v2218_v26 = vpop.permute.xlu0 %2217 }
 0x758   : > { %v8107_v14 = vpop.eup %8106 }
 0x759   : > { %7242 = vmatmul.mubr.msk.bf16.vlgmr.msra.gmra.mrb[60].mxu0 %vm1536_vm6, %v2000_v63  ;;  %v2001_v21 = vpack.c.bf16 %v1998_v3, %v1997_v16  ;;  %v1999_v22 = vmul.f32 %v8107_v14, %v8900_v35  ;;  %v2287_v45 = vpop.permute.xlu1 %2286 }
 0x75a   : > { %7245 = vmatprep.mubr.msk.bf16.mxu0 %vm8357_vm1, %v8356_v1  ;;  %7268 = vmatpush3.bf16.msra.mxu0 %v2157_v11 }
 0x75b   : > { %7297 = vmatprep.subr.bf16.mxu0 %v8356_v1  ;;  %v2002_v24 = vpack.c.bf16 %v1999_v22, %v1999_v22  ;;  %v9001_v50 = vpop.permute.xlu0 %2221 }
 0x75d   : > { %v2346_v57 = vpop.permute.xlu1 %2345 }
 0x75f   : > { %v2348_v58 = vpop.permute.xlu0 %2347 }
 0x761   : > { %7246 = vmatmul.mubr.msk.bf16.gmra.mrb[64].mxu0 %vm1536_vm6, %v2001_v21 }
 0x762   : > { %7249 = vmatprep.mubr.msk.bf16.mxu0 %vm8357_vm1, %v8356_v1 }
 0x769   : > { %7250 = vmatmul.mubr.msk.bf16.gmra.mrb[68].mxu0 %vm1536_vm6, %v2002_v24 }
 0x76a   : > { %7269 = vmatprep.mubr.msk.bf16.mxu0 %vm8357_vm1, %v8356_v1 }
 0x771   : > { %7270 = vmatmul.mubr.msk.bf16.vlgmr.msra.gmra.mrb[72].mxu0 %vm1074_vm2, %v1666_v56 }
 0x772   : > { %7273 = vmatprep.mubr.msk.bf16.mxu0 %vm8357_vm1, %v8356_v1  ;;  %7298 = vmatpush3.bf16.msra.mxu0 %v2281_v23 }
 0x773   : > { %7299 = vmatprep.subr.bf16.mxu0 %v8356_v1 }
 0x776   : > { %7300 = vmatpush3.bf16.msra.mxu0 %v2283_v60 }
 0x777   : > { %7329 = vmatprep.subr.bf16.mxu0 %v8356_v1 }
 0x779   : > { %7274 = vmatmul.mubr.msk.bf16.gmra.mrb[76].mxu0 %vm1074_vm2, %v1667_v10 }
 0x77a   : > { %7277 = vmatprep.mubr.msk.bf16.mxu0 %vm8357_vm1, %v8356_v1 }
 0x781   : > { %7278 = vmatmul.mubr.msk.bf16.gmra.mrb[80].mxu0 %vm1074_vm2, %v1668_v47 }
 0x782   : > { %7301 = vmatprep.mubr.msk.bf16.mxu0 %vm8357_vm1, %v8356_v1 }
 0x789   : > { %7302 = vmatmul.mubr.msk.bf16.vlgmr.msra.gmra.mrb[84].mxu0 %vm1260_vm3, %v8611_v20 }
 0x78a   : > { %7305 = vmatprep.mubr.msk.bf16.mxu0 %vm8357_vm1, %v8356_v1 }
 0x791   : > { %7306 = vmatmul.mubr.msk.bf16.gmra.mrb[88].mxu0 %vm1260_vm3, %v8630_v31 }
 0x792   : > { %7309 = vmatprep.mubr.msk.bf16.mxu0 %vm8357_vm1, %v8356_v1 }
 0x799   : > { %7310 = vmatmul.mubr.msk.bf16.gmra.mrb[92].mxu0 %vm1260_vm3, %v8646_v37 }
 0x79a   : > { %7335 = vmatprep.mubr.msk.bf16.mxu0 %vm8357_vm1, %v8356_v1 }
 0x82c   : > { %v2052_v51 = vpop.f32.mrb[60].mxu0 }
 0x82d   : > { %v7243_v56 = vpop.f32.mrb[61].mxu0 }
 0x82e   : > { %v2055_v61 = vpop.f32.mrb[62].mxu0 }
 0x82f   : > { %v2074_v6 = vpack.c.bf16 %v2055_v61, %v2052_v51  ;;  %v7244_v10 = vpop.f32.mrb[63].mxu0 }
 0x831   : > { %7256 = vmatmul.mubr.msk.bf16.vlgmr.msra.gmra.mrb[60].mxu1 %vm1074_vm2, %v2074_v6 }
 0x832   : > { %7259 = vmatprep.mubr.msk.bf16.mxu1 %vm8357_vm1, %v8356_v1  ;;  %7282 = vmatpush3.bf16.msra.mxu1 %v2216_v4 }
 0x833   : > { %7283 = vmatprep.subr.bf16.mxu1 %v8356_v1 }
 0x834   : > { %v2060_v32 = vpop.f32.mrb[64].mxu0 }
 0x835   : > { %v7247_v25 = vpop.f32.mrb[65].mxu0 }
 0x836   : > { %v2063_v13 = vpop.f32.mrb[66].mxu0  ;;  %7284 = vmatpush3.bf16.msra.mxu1 %v2218_v26 }
 0x837   : > { %v2075_v35 = vpack.c.bf16 %v2063_v13, %v2060_v32  ;;  %v7248_v36 = vpop.f32.mrb[67].mxu0  ;;  %7313 = vmatprep.subr.bf16.mxu1 %v8356_v1 }
 0x839   : > { %7260 = vmatmul.mubr.msk.bf16.gmra.mrb[64].mxu1 %vm1074_vm2, %v2075_v35 }
 0x83a   : > { %7263 = vmatprep.mubr.msk.bf16.mxu1 %vm8357_vm1, %v8356_v1 }
 0x83c   : > { %v2068_v39 = vpop.f32.mrb[68].mxu0 }
 0x83d   : > { %v7251_v40 = vpop.f32.mrb[69].mxu0  ;;  %v2076_v42 = vpack.c.bf16 %v2068_v39, %v2068_v39 }
 0x83e   : > { %v2071_v41 = vpop.f32.mrb[70].mxu0 }
 0x83f   : > { %v7252_v43 = vpop.f32.mrb[71].mxu0 }
 0x841   : > { %7264 = vmatmul.mubr.msk.bf16.gmra.mrb[68].mxu1 %vm1074_vm2, %v2076_v42 }
 0x842   : > { %7285 = vmatprep.mubr.msk.bf16.mxu1 %vm8357_vm1, %v8356_v1 }
 0x844   : > { %v2193_v46 = vpop.f32.mrb[72].mxu0 }
 0x845   : > { %v7271_v48 = vpop.f32.mrb[73].mxu0 }
 0x846   : > { %v2196_v53 = vpop.f32.mrb[74].mxu0 }
 0x847   : > { %v7272_v54 = vpop.f32.mrb[75].mxu0 }
 0x849   : > { %7286 = vmatmul.mubr.msk.bf16.vlgmr.msra.gmra.mrb[72].mxu1 %vm1260_vm3, %v8611_v20 }
 0x84a   : > { %7289 = vmatprep.mubr.msk.bf16.mxu1 %vm8357_vm1, %v8356_v1  ;;  %7314 = vmatpush3.bf16.msra.mxu1 %v2346_v57 }
 0x84b   : > { %7315 = vmatprep.subr.bf16.mxu1 %v8356_v1 }
 0x84c   : > { %v2201_v59 = vpop.f32.mrb[76].mxu0 }
 0x84d   : > { %v7275_v62 = vpop.f32.mrb[77].mxu0 }
 0x84e   : > { %v2204_v0 = vpop.f32.mrb[78].mxu0  ;;  %7316 = vmatpush3.bf16.msra.mxu1 %v2348_v58 }
 0x84f   : > { %v7276_v27 = vpop.f32.mrb[79].mxu0  ;;  %7347 = vmatprep.subr.bf16.mxu1 %v8356_v1 }
 0x851   : > { %7290 = vmatmul.mubr.msk.bf16.gmra.mrb[76].mxu1 %vm1260_vm3, %v8630_v31 }
 0x852   : > { %7293 = vmatprep.mubr.msk.bf16.mxu1 %vm8357_vm1, %v8356_v1 }
 0x854   : > { %v2209_v30 = vpop.f32.mrb[80].mxu0 }
 0x855   : > { %v7279_v7 = vpop.f32.mrb[81].mxu0 }
 0x856   : > { %v2212_v44 = vpop.f32.mrb[82].mxu0 }
 0x857   : > { %v7280_v49 = vpop.f32.mrb[83].mxu0 }
 0x859   : > { %7294 = vmatmul.mubr.msk.bf16.gmra.mrb[80].mxu1 %vm1260_vm3, %v8646_v37 }
 0x85a   : > { %7317 = vmatprep.mubr.msk.bf16.mxu1 %vm8357_vm1, %v8356_v1 }
 0x85c   : > { %v2323_v9 = vpop.f32.mrb[84].mxu0 }
 0x85d   : > { %v7303_v63 = vpop.f32.mrb[85].mxu0  ;;  %v2324_v5 = vadd.f32 %v2323_v9, %v2287_v45 }
 0x85e   : > { %v2326_v11 = vpop.f32.mrb[86].mxu0 }
 0x85f   : > { %v2327_v12 = vadd.f32 %v2326_v11, %v2287_v45  ;;  %v7304_v3 = vpop.f32.mrb[87].mxu0 }
 0x861   : > { %v2413_v16 = vpack.c.bf16 %v2327_v12, %v2324_v5  ;;  %7318 = vmatmul.mubr.msk.bf16.vlgmr.msra.gmra.mrb[84].mxu1 %vm1260_vm3, %v8611_v20 }
 0x862   : > { %7321 = vmatprep.mubr.msk.bf16.mxu1 %vm8357_vm1, %v8356_v1 }
 0x863   : > { %v2426_v21 = vsel %vm1074_vm2, %v2413_v16, 0 }
 0x864   : > { %v2331_v14 = vpop.f32.mrb[88].mxu0  ;;  %7330 = vmatpush3.bf16.xpose.msra.mxu0 %v2426_v21 }
 0x865   : > { %v7307_v22 = vpop.f32.mrb[89].mxu0  ;;  %7331 = vmatprep.subr.bf16.mxu0 %v8356_v1  ;;  %v2332_v23 = vadd.f32 %v2331_v14, %v2287_v45 }
 0x866   : > { %v2334_v24 = vpop.f32.mrb[90].mxu0 }
 0x867   : > { %v2335_v60 = vadd.f32 %v2334_v24, %v2287_v45  ;;  %v7308_v47 = vpop.f32.mrb[91].mxu0 }
 0x869   : > { %v2414_v51 = vpack.c.bf16 %v2335_v60, %v2332_v23  ;;  %7322 = vmatmul.mubr.msk.bf16.gmra.mrb[88].mxu1 %vm1260_vm3, %v8630_v31 }
 0x86a   : > { %7325 = vmatprep.mubr.msk.bf16.mxu1 %vm8357_vm1, %v8356_v1 }
 0x86b   : > { %v2429_v56 = vsel %vm1074_vm2, %v2414_v51, 0 }
 0x86c   : > { %v2339_v61 = vpop.f32.mrb[92].mxu0  ;;  %7332 = vmatpush3.bf16.xpose.msra.mxu0 %v2429_v56 }
 0x86d   : > { %v2340_v6 = vadd.f32 %v2339_v61, %v2287_v45  ;;  %v7311_v10 = vpop.f32.mrb[93].mxu0  ;;  %7333 = vmatprep.subr.bf16.mxu0 %v8356_v1 }
 0x86e   : > { %v2342_v4 = vpop.f32.mrb[94].mxu0 }
 0x86f   : > { %v2415_v26 = vpack.c.bf16 %v2340_v6, %v2340_v6  ;;  %v7312_v32 = vpop.f32.mrb[95].mxu0 }
 0x871   : > { %7326 = vmatmul.mubr.msk.bf16.gmra.mrb[92].mxu1 %vm1260_vm3, %v8646_v37  ;;  %v2432_v25 = vsel %vm1074_vm2, %v2415_v26, 0 }
 0x872   : > { %7353 = vmatprep.mubr.msk.bf16.mxu1 %vm8357_vm1, %v8356_v1 }
 0x874   : > { %7334 = vmatpush3.bf16.xpose.msra.mxu0 %v2432_v25 }
 0x875   : > { %7365 = vmatprep.subr.bf16.mxu0 %v8356_v1 }
 0x904   : > { %v2125_v13 = vpop.f32.mrb[60].mxu1 }
 0x905   : > { %v7257_v35 = vpop.f32.mrb[61].mxu1  ;;  %v9035_v36 = vadd.f32 %v2193_v46, %v2125_v13 }
 0x906   : > { %v2128_v39 = vpop.f32.mrb[62].mxu1 }
 0x907   : > { %v7258_v40 = vpop.f32.mrb[63].mxu1  ;;  %v9037_v41 = vadd.f32 %v2196_v53, %v2128_v39 }
 0x90c   : > { %v2133_v42 = vpop.f32.mrb[64].mxu1 }
 0x90d   : > { %v7261_v43 = vpop.f32.mrb[65].mxu1  ;;  %v9039_v45 = vadd.f32 %v2201_v59, %v2133_v42 }
 0x90e   : > { %v2136_v48 = vpop.f32.mrb[66].mxu1 }
 0x90f   : > { %v7262_v54 = vpop.f32.mrb[67].mxu1  ;;  %v9041_v57 = vadd.f32 %v2204_v0, %v2136_v48 }
 0x914   : > { %v2141_v58 = vpop.f32.mrb[68].mxu1 }
 0x915   : > { %v7265_v62 = vpop.f32.mrb[69].mxu1  ;;  %v9043_v27 = vadd.f32 %v2209_v30, %v2141_v58 }
 0x916   : > { %v2144_v7 = vpop.f32.mrb[70].mxu1 }
 0x917   : > { %v7266_v44 = vpop.f32.mrb[71].mxu1 }
 0x91c   : > { %v2258_v46 = vpop.f32.mrb[72].mxu1 }
 0x91d   : > { %v7287_v49 = vpop.f32.mrb[73].mxu1  ;;  %v2259_v53 = vadd.f32 %v2258_v46, %v9001_v50 }
 0x91e   : > { %v2261_v9 = vpop.f32.mrb[74].mxu1 }
 0x91f   : > { %v2262_v63 = vadd.f32 %v2261_v9, %v9001_v50  ;;  %v7288_v11 = vpop.f32.mrb[75].mxu1 }
 0x921   : > { %v2410_v59 = vpack.c.bf16 %v2262_v63, %v2259_v53 }
 0x923   : > { %7336 = vmatmul.mubr.msk.bf16.vlgmr.msra.gmra.mrb[96].mxu0 %vm1074_vm2, %v2410_v59 }
 0x924   : > { %v2266_v5 = vpop.f32.mrb[76].mxu1  ;;  %7339 = vmatprep.mubr.msk.bf16.mxu0 %vm8357_vm1, %v8356_v1 }
 0x925   : > { %v7291_v0 = vpop.f32.mrb[77].mxu1  ;;  %v2267_v12 = vadd.f32 %v2266_v5, %v9001_v50 }
 0x926   : > { %v2269_v30 = vpop.f32.mrb[78].mxu1 }
 0x927   : > { %v2270_v3 = vadd.f32 %v2269_v30, %v9001_v50  ;;  %v7292_v16 = vpop.f32.mrb[79].mxu1 }
 0x929   : > { %v2411_v21 = vpack.c.bf16 %v2270_v3, %v2267_v12 }
 0x92b   : > { %7340 = vmatmul.mubr.msk.bf16.gmra.mrb[100].mxu0 %vm1074_vm2, %v2411_v21 }
 0x92c   : > { %v2274_v14 = vpop.f32.mrb[80].mxu1  ;;  %7343 = vmatprep.mubr.msk.bf16.mxu0 %vm8357_vm1, %v8356_v1 }
 0x92d   : > { %v2275_v22 = vadd.f32 %v2274_v14, %v9001_v50  ;;  %v7295_v24 = vpop.f32.mrb[81].mxu1 }
 0x92e   : > { %v2277_v23 = vpop.f32.mrb[82].mxu1 }
 0x92f   : > { %v7296_v60 = vpop.f32.mrb[83].mxu1  ;;  %v2412_v47 = vpack.c.bf16 %v2275_v22, %v2275_v22 }
 0x933   : > { %7344 = vmatmul.mubr.msk.bf16.gmra.mrb[104].mxu0 %vm1074_vm2, %v2412_v47 }
 0x934   : > { %v9057_v51 = vpop.f32.mrb[84].mxu1  ;;  %7367 = vmatprep.mubr.msk.bf16.mxu0 %vm8357_vm1, %v8356_v1 }
 0x935   : > { %v7319_v56 = vpop.f32.mrb[85].mxu1 }
 0x936   : > { %v9061_v61 = vpop.f32.mrb[86].mxu1 }
 0x937   : > { %v7320_v6 = vpop.f32.mrb[87].mxu1 }
 0x93c   : > { %v9063_v10 = vpop.f32.mrb[88].mxu1 }
 0x93d   : > { %v7323_v4 = vpop.f32.mrb[89].mxu1 }
 0x93e   : > { %v9065_v26 = vpop.f32.mrb[90].mxu1 }
 0x93f   : > { %v7324_v50 = vpop.f32.mrb[91].mxu1 }
 0x944   : > { %v9067_v32 = vpop.f32.mrb[92].mxu1 }
 0x945   : > { %v7327_v25 = vpop.f32.mrb[93].mxu1 }
 0x946   : > { %v2407_v13 = vpop.f32.mrb[94].mxu1 }
 0x947   : > { %v7328_v35 = vpop.f32.mrb[95].mxu1 }
 0x9f6   : > { %v2468_v39 = vpop.f32.mrb[96].mxu0 }
 0x9f7   : > { %v2469_v40 = vadd.f32 %v2468_v39, %v8703_v52  ;;  %v7337_v42 = vpop.f32.mrb[97].mxu0 }
 0x9f8   : > { %v2471_v43 = vpop.f32.mrb[98].mxu0 }
 0x9f9   : > { %v2472_v48 = vadd.f32 %v2471_v43, %v8705_v55  ;;  %v7338_v54 = vpop.f32.mrb[99].mxu0  ;;  %v2490_v58 = vsel %vm1536_vm6, %v2469_v40, -inf }
 0x9fa   : > { %2491 = vmax.xlane.f32.xlu1 %v2490_v58 }
 0x9fb   : > { %v2493_v62 = vsel %vm1536_vm6, %v2472_v48, -inf }
 0x9fc   : > { %2494 = vmax.xlane.f32.xlu0 %v2493_v62 }
 0x9fe   : > { %v2476_v7 = vpop.f32.mrb[100].mxu0 }
 0x9ff   : > { %v2477_v44 = vadd.f32 %v2476_v7, %v8711_v2  ;;  %v7341_v46 = vpop.f32.mrb[101].mxu0 }
 0xa00   : > { %v2479_v49 = vpop.f32.mrb[102].mxu0  ;;  %v6605_v46 = vld [vmem:[%s8404_s25 + $0x8] sm:$0xf] }
 0xa01   : > { %v2480_v9 = vadd.f32 %v2479_v49, %v8713_v8  ;;  %v7342_v53 = vpop.f32.mrb[103].mxu0  ;;  %v2496_v63 = vsel %vm1536_vm6, %v2477_v44, -inf  ;;  %v2634_v49 = vsel %vm1084_vm0, %v6605_v46, 0 }
 0xa02   : > { %2497 = vmax.xlane.f32.xlu0 %v2496_v63  ;;  %7366 = vmatpush3.bf16.msra.mxu0 %v2634_v49 }
 0xa03   : > { %v2499_v11 = vsel %vm1536_vm6, %v2480_v9, -inf  ;;  %7395 = vmatprep.subr.bf16.mxu0 %v8356_v1 }
 0xa04   : > { %2500 = vmax.xlane.f32.xlu1 %v2499_v11 }
 0xa06   : > { %v2484_v59 = vpop.f32.mrb[104].mxu0 }
 0xa07   : > { %v2485_v5 = vadd.f32 %v2484_v59, %v8719_v19  ;;  %v7345_v0 = vpop.f32.mrb[105].mxu0 }
 0xa08   : > { %v2487_v30 = vpop.f32.mrb[106].mxu0 }
 0xa09   : > { %v7346_v12 = vpop.f32.mrb[107].mxu0  ;;  %v2502_v3 = vsel %vm1536_vm6, %v2485_v5, -inf }
 0xa0a   : > { %2503 = vmax.xlane.f32.xlu0 %v2502_v3 }
 0xa87   : > { %v2492_v16 = vpop.xlane.xlu1 %2491 }
 0xa88   : > { %v2505_v21 = vsub.f32 %v2469_v40, %v2492_v16 }
 0xa89   : > { %v2495_v14 = vpop.xlane.xlu0 %2494 }
 0xa8a   : > { %v2510_v22 = vmul.f32 1.442695, %v2505_v21  ;;  %v2506_v24 = vsub.f32 %v2472_v48, %v2495_v14 }
 0xa8c   : > { %8108 = vpow2.f32 %v2510_v22  ;;  %v2512_v23 = vmul.f32 1.442695, %v2506_v24 }
 0xa8e   : > { %8110 = vpow2.f32 %v2512_v23 }
 0xa8f   : > { %v2498_v60 = vpop.xlane.xlu0 %2497 }
 0xa90   : > { %v2507_v47 = vsub.f32 %v2477_v44, %v2498_v60 }
 0xa91   : > { %v2501_v56 = vpop.xlane.xlu1 %2500 }
 0xa92   : > { %v2514_v6 = vmul.f32 1.442695, %v2507_v47  ;;  %v2508_v4 = vsub.f32 %v2480_v9, %v2501_v56 }
 0xa94   : > { %8112 = vpow2.f32 %v2514_v6  ;;  %v2516_v50 = vmul.f32 1.442695, %v2508_v4 }
 0xa96   : > { %v8109_v25 = vpop.eup %8108  ;;  %8114 = vpow2.f32 %v2516_v50 }
 0xa97   : > { %v2504_v13 = vpop.xlane.xlu0 %2503  ;;  %v2520_v35 = vsel %vm1536_vm6, %v8109_v25, 0.0 }
 0xa98   : > { %v8111_v39 = vpop.eup %8110  ;;  %v2509_v40 = vsub.f32 %v2485_v5, %v2504_v13  ;;  %2521 = vadd.xlane.f32.xlu1 %v2520_v35 }
 0xa99   : > { %v2523_v42 = vsel %vm1536_vm6, %v8111_v39, 0.0 }
 0xa9a   : > { %v2518_v43 = vmul.f32 1.442695, %v2509_v40  ;;  %2524 = vadd.xlane.f32.xlu0 %v2523_v42 }
 0xa9c   : > { %8116 = vpow2.f32 %v2518_v43 }
 0xa9e   : > { %v9081_v48 = vpop.eup %8112 }
 0xa9f   : > { %v2526_v54 = vsel %vm1536_vm6, %v9081_v48, 0.0 }
 0xaa0   : > { %v8115_v58 = vpop.eup %8114  ;;  %2527 = vadd.xlane.f32.xlu1 %v2526_v54 }
 0xaa1   : > { %v2529_v62 = vsel %vm1536_vm6, %v8115_v58, 0.0 }
 0xaa2   : > { %2530 = vadd.xlane.f32.xlu0 %v2529_v62 }
 0xaa6   : > { %v9086_v7 = vpop.eup %8116 }
 0xaa7   : > { %v2532_v44 = vsel %vm1536_vm6, %v9086_v7, 0.0 }
 0xaa8   : > { %2533 = vadd.xlane.f32.xlu0 %v2532_v44 }
 0xab1   : > { %2351 = vrot.lane.b32.xlu1 %v8905_v15, %s8366_s2 }
 0xab5   : > { %2764 = vrot.lane.b32.xlu1 %v8915_v38, %s8367_s0 }
 0xab9   : > { %2697 = vrot.lane.b32.xlu1 %v8910_v33, %s10340_s15 }
 0xabd   : > { %2699 = vrot.lane.b32.xlu1 %v8915_v38, %s10340_s15 }
 0xabe   : > { %2762 = vrot.lane.b32.xlu0 %v8910_v33, %s8367_s0 }
 0xac1   : > { %2703 = vrot.lane.b32.xlu1 %v8905_v15, %s10340_s15  ;;  %s10360_s15 = sld [smem:[#allocation3_spill]] }
 0xac2   : > { %2768 = vrot.lane.b32.xlu0 %v8905_v15, %s8367_s0 }
 0xac5   : > { %2829 = vrot.lane.b32.xlu1 %v8915_v38, %s10338_s16 }
 0xac6   : > { %2827 = vrot.lane.b32.xlu0 %v8910_v33, %s10338_s16 }
 0xb25   : > { %v2522_v9 = vpop.xlane.xlu1 %2521 }
 0xb27   : > { %v2525_v53 = vpop.xlane.xlu0 %2524 }
 0xb28   : > { %8118 = vrcp.f32 %v2525_v53 }
 0xb29   : > { %8120 = vrcp.f32 %v2522_v9 }
 0xb2d   : > { %v2528_v63 = vpop.xlane.xlu1 %2527 }
 0xb2f   : > { %v2531_v5 = vpop.xlane.xlu0 %2530 }
 0xb30   : > { %8122 = vrcp.f32 %v2531_v5 }
 0xb31   : > { %v2352_v11 = vpop.permute.xlu1 %2351  ;;  %8124 = vrcp.f32 %v2528_v63 }
 0xb32   : > { %v2389_v15 = vadd.f32 %v9057_v51, %v2352_v11  ;;  %v2392_v59 = vadd.f32 %v9061_v61, %v2352_v11  ;;  %v2397_v38 = vadd.f32 %v9063_v10, %v2352_v11  ;;  %v2400_v33 = vadd.f32 %v9065_v26, %v2352_v11  ;;  %v8119_v16 = vpop.eup %8118 }
 0xb33   : > { %v2405_v12 = vadd.f32 %v9067_v32, %v2352_v11  ;;  %v8121_v21 = vpop.eup %8120  ;;  %v2541_v61 = vmul.f32 %v8119_v16, %v8111_v39 }
 0xb34   : > { %v2548_v0 = vpack.c.bf16 %v2392_v59, %v2389_v15  ;;  %v2549_v30 = vpack.c.bf16 %v2400_v33, %v2397_v38  ;;  %v2540_v26 = vmul.f32 %v8121_v21, %v8109_v25 }
 0xb35   : > { %v9117_v3 = vpop.permute.xlu1 %2764  ;;  %v2550_v51 = vpack.c.bf16 %v2405_v12, %v2405_v12  ;;  %v2534_v10 = vpop.xlane.xlu0 %2533 }
 0xb36   : > { %7348 = vmatpush3.bf16.msra.mxu1 %v2548_v0  ;;  %8126 = vrcp.f32 %v2534_v10  ;;  %v2545_v32 = vpack.c.bf16 %v2541_v61, %v2540_v26 }
 0xb37   : > { %7349 = vmatprep.subr.bf16.mxu1 %v8356_v1  ;;  %v2561_v14 = vsel %vm1084_vm0, %v2550_v51, 0 }
 0xb39   : > { %v2698_v22 = vpop.permute.xlu1 %2697  ;;  %v2763_v25 = vpop.permute.xlu0 %2762 }
 0xb3a   : > { %7350 = vmatpush3.bf16.msra.mxu1 %v2549_v30  ;;  %v8123_v24 = vpop.eup %8122 }
 0xb3b   : > { %7351 = vmatprep.subr.bf16.mxu1 %v8356_v1  ;;  %v8125_v23 = vpop.eup %8124  ;;  %v2543_v60 = vmul.f32 %v8123_v24, %v8115_v58 }
 0xb3c   : > { %v2542_v56 = vmul.f32 %v8125_v23, %v9081_v48 }
 0xb3d   : > { %v2700_v47 = vpop.permute.xlu1 %2699  ;;  %v9133_v35 = vpop.permute.xlu0 %2768 }
 0xb3e   : > { %7352 = vmatpush3.bf16.msra.mxu1 %v2561_v14  ;;  %v2546_v6 = vpack.c.bf16 %v2543_v60, %v2542_v56 }
 0xb3f   : > { %7379 = vmatprep.subr.bf16.mxu1 %v8356_v1 }
 0xb40   : > { %v8127_v4 = vpop.eup %8126 }
 0xb41   : > { %7354 = vmatmul.mubr.msk.bf16.vlgmr.msra.gmra.mrb[96].mxu1 %vm1536_vm6, %v2545_v32  ;;  %v2544_v50 = vmul.f32 %v8127_v4, %v9086_v7  ;;  %v9137_v39 = vpop.permute.xlu1 %2703  ;;  %v2828_v40 = vpop.permute.xlu0 %2827 }
 0xb42   : > { %7357 = vmatprep.mubr.msk.bf16.mxu1 %vm8357_vm1, %v8356_v1  ;;  %7380 = vmatpush3.bf16.msra.mxu1 %v2698_v22 }
 0xb43   : > { %7381 = vmatprep.subr.bf16.mxu1 %v8356_v1  ;;  %v2547_v13 = vpack.c.bf16 %v2544_v50, %v2544_v50 }
 0xb45   : > { %v2830_v42 = vpop.permute.xlu1 %2829 }
 0xb46   : > { %7382 = vmatpush3.bf16.msra.mxu1 %v2700_v47 }
 0xb47   : > { %7411 = vmatprep.subr.bf16.mxu1 %v8356_v1 }
 0xb49   : > { %7358 = vmatmul.mubr.msk.bf16.gmra.mrb[100].mxu1 %vm1536_vm6, %v2546_v6 }
 0xb4a   : > { %7361 = vmatprep.mubr.msk.bf16.mxu1 %vm8357_vm1, %v8356_v1 }
 0xb51   : > { %7362 = vmatmul.mubr.msk.bf16.gmra.mrb[104].mxu1 %vm1536_vm6, %v2547_v13 }
 0xb52   : > { %7383 = vmatprep.mubr.msk.bf16.mxu1 %vm8357_vm1, %v8356_v1 }
 0xb59   : > { %7384 = vmatmul.mubr.msk.bf16.vlgmr.msra.gmra.mrb[108].mxu1 %vm1260_vm3, %v8611_v20 }
 0xb5a   : > { %7387 = vmatprep.mubr.msk.bf16.mxu1 %vm8357_vm1, %v8356_v1  ;;  %7412 = vmatpush3.bf16.msra.mxu1 %v2828_v40 }
 0xb5b   : > { %7413 = vmatprep.subr.bf16.mxu1 %v8356_v1 }
 0xb5e   : > { %7414 = vmatpush3.bf16.msra.mxu1 %v2830_v42 }
 0xb5f   : > { %7445 = vmatprep.subr.bf16.mxu1 %v8356_v1 }
 0xb61   : > { %7388 = vmatmul.mubr.msk.bf16.gmra.mrb[112].mxu1 %vm1260_vm3, %v8630_v31 }
 0xb62   : > { %7391 = vmatprep.mubr.msk.bf16.mxu1 %vm8357_vm1, %v8356_v1 }
 0xb69   : > { %7392 = vmatmul.mubr.msk.bf16.gmra.mrb[116].mxu1 %vm1260_vm3, %v8646_v37 }
 0xb6a   : > { %7415 = vmatprep.mubr.msk.bf16.mxu1 %vm8357_vm1, %v8356_v1 }
 0xb71   : > { %7416 = vmatmul.mubr.msk.bf16.vlgmr.msra.gmra.mrb[120].mxu1 %vm1260_vm3, %v8611_v20 }
 0xb72   : > { %7419 = vmatprep.mubr.msk.bf16.mxu1 %vm8357_vm1, %v8356_v1 }
 0xb79   : > { %7420 = vmatmul.mubr.msk.bf16.gmra.mrb[124].mxu1 %vm1260_vm3, %v8630_v31 }
 0xb7a   : > { %7423 = vmatprep.mubr.msk.bf16.mxu1 %vm8357_vm1, %v8356_v1 }
 0xb81   : > { %7424 = vmatmul.mubr.msk.bf16.gmra.mrb[128].mxu1 %vm1260_vm3, %v8646_v37 }
 0xb82   : > { %7451 = vmatprep.mubr.msk.bf16.mxu1 %vm8357_vm1, %v8356_v1 }
 0xc14   : > { %v2597_v43 = vpop.f32.mrb[96].mxu1 }
 0xc15   : > { %v7355_v48 = vpop.f32.mrb[97].mxu1 }
 0xc16   : > { %v2600_v54 = vpop.f32.mrb[98].mxu1 }
 0xc17   : > { %v2619_v58 = vpack.c.bf16 %v2600_v54, %v2597_v43  ;;  %v7356_v62 = vpop.f32.mrb[99].mxu1 }
 0xc19   : > { %7368 = vmatmul.mubr.msk.bf16.vlgmr.msra.gmra.mrb[108].mxu0 %vm1074_vm2, %v2619_v58 }
 0xc1a   : > { %7371 = vmatprep.mubr.msk.bf16.mxu0 %vm8357_vm1, %v8356_v1  ;;  %7396 = vmatpush3.bf16.msra.mxu0 %v2763_v25 }
 0xc1b   : > { %7397 = vmatprep.subr.bf16.mxu0 %v8356_v1 }
 0xc1c   : > { %v2605_v7 = vpop.f32.mrb[100].mxu1 }
 0xc1d   : > { %v7359_v44 = vpop.f32.mrb[101].mxu1 }
 0xc1e   : > { %v2608_v46 = vpop.f32.mrb[102].mxu1  ;;  %7398 = vmatpush3.bf16.msra.mxu0 %v9117_v3 }
 0xc1f   : > { %v2620_v49 = vpack.c.bf16 %v2608_v46, %v2605_v7  ;;  %v7360_v9 = vpop.f32.mrb[103].mxu1  ;;  %7427 = vmatprep.subr.bf16.mxu0 %v8356_v1 }
 0xc21   : > { %7372 = vmatmul.mubr.msk.bf16.gmra.mrb[112].mxu0 %vm1074_vm2, %v2620_v49 }
 0xc22   : > { %7375 = vmatprep.mubr.msk.bf16.mxu0 %vm8357_vm1, %v8356_v1 }
 0xc24   : > { %v2613_v53 = vpop.f32.mrb[104].mxu1 }
 0xc25   : > { %v7363_v63 = vpop.f32.mrb[105].mxu1  ;;  %v2621_v15 = vpack.c.bf16 %v2613_v53, %v2613_v53 }
 0xc26   : > { %v2616_v11 = vpop.f32.mrb[106].mxu1 }
 0xc27   : > { %v7364_v59 = vpop.f32.mrb[107].mxu1 }
 0xc29   : > { %7376 = vmatmul.mubr.msk.bf16.gmra.mrb[116].mxu0 %vm1074_vm2, %v2621_v15 }
 0xc2a   : > { %7399 = vmatprep.mubr.msk.bf16.mxu0 %vm8357_vm1, %v8356_v1 }
 0xc2c   : > { %v2740_v38 = vpop.f32.mrb[108].mxu1 }
 0xc2d   : > { %v7385_v33 = vpop.f32.mrb[109].mxu1  ;;  %v9178_v0 = vadd.f32 %v2740_v38, %v9137_v39 }
 0xc2e   : > { %v2743_v5 = vpop.f32.mrb[110].mxu1 }
 0xc2f   : > { %v9181_v30 = vadd.f32 %v2743_v5, %v9137_v39  ;;  %v7386_v12 = vpop.f32.mrb[111].mxu1 }
 0xc31   : > { %v2892_v3 = vpack.c.bf16 %v9181_v30, %v9178_v0  ;;  %7400 = vmatmul.mubr.msk.bf16.vlgmr.msra.gmra.mrb[120].mxu0 %vm1260_vm3, %v8611_v20 }
 0xc32   : > { %7403 = vmatprep.mubr.msk.bf16.mxu0 %vm8357_vm1, %v8356_v1 }
 0xc34   : > { %v2748_v16 = vpop.f32.mrb[112].mxu1 }
 0xc35   : > { %v7389_v51 = vpop.f32.mrb[113].mxu1  ;;  %v9190_v61 = vadd.f32 %v2748_v16, %v9137_v39 }
 0xc36   : > { %v2751_v21 = vpop.f32.mrb[114].mxu1 }
 0xc37   : > { %v9193_v10 = vadd.f32 %v2751_v21, %v9137_v39  ;;  %v7390_v26 = vpop.f32.mrb[115].mxu1 }
 0xc39   : > { %v2893_v14 = vpack.c.bf16 %v9193_v10, %v9190_v61  ;;  %7404 = vmatmul.mubr.msk.bf16.gmra.mrb[124].mxu0 %vm1260_vm3, %v8630_v31 }
 0xc3a   : > { %7407 = vmatprep.mubr.msk.bf16.mxu0 %vm8357_vm1, %v8356_v1 }
 0xc3c   : > { %v9201_v20 = vpop.f32.mrb[116].mxu1 }
 0xc3d   : > { %v7393_v22 = vpop.f32.mrb[117].mxu1 }
 0xc3e   : > { %v2759_v32 = vpop.f32.mrb[118].mxu1 }
 0xc3f   : > { %v7394_v24 = vpop.f32.mrb[119].mxu1 }
 0xc41   : > { %7408 = vmatmul.mubr.msk.bf16.gmra.mrb[128].mxu0 %vm1260_vm3, %v8646_v37 }
 0xc42   : > { %7433 = vmatprep.mubr.msk.bf16.mxu0 %vm8357_vm1, %v8356_v1 }
 0xc44   : > { %v9207_v23 = vpop.f32.mrb[120].mxu1 }
 0xc45   : > { %v7417_v60 = vpop.f32.mrb[121].mxu1 }
 0xc46   : > { %v9209_v47 = vpop.f32.mrb[122].mxu1 }
 0xc47   : > { %v7418_v31 = vpop.f32.mrb[123].mxu1 }
 0xc4c   : > { %v9211_v56 = vpop.f32.mrb[124].mxu1 }
 0xc4d   : > { %v7421_v6 = vpop.f32.mrb[125].mxu1 }
 0xc4e   : > { %v9213_v4 = vpop.f32.mrb[126].mxu1 }
 0xc4f   : > { %v7422_v50 = vpop.f32.mrb[127].mxu1 }
 0xc54   : > { %v9215_v25 = vpop.f32.mrb[128].mxu1 }
 0xc55   : > { %v7425_v13 = vpop.f32.mrb[129].mxu1 }
 0xc56   : > { %v2889_v40 = vpop.f32.mrb[130].mxu1 }
 0xc57   : > { %v7426_v37 = vpop.f32.mrb[131].mxu1 }
 0xcec   : > { %v2670_v42 = vpop.f32.mrb[108].mxu0 }
 0xced   : > { %v9218_v43 = vadd.f32 %v2670_v42, %v9035_v36  ;;  %v7369_v48 = vpop.f32.mrb[109].mxu0 }
 0xcee   : > { %v2673_v54 = vpop.f32.mrb[110].mxu0 }
 0xcef   : > { %v9221_v58 = vadd.f32 %v2673_v54, %v9037_v41  ;;  %v7370_v62 = vpop.f32.mrb[111].mxu0 }
 0xcf4   : > { %v2678_v7 = vpop.f32.mrb[112].mxu0 }
 0xcf5   : > { %v9224_v44 = vadd.f32 %v2678_v7, %v9039_v45  ;;  %v7373_v46 = vpop.f32.mrb[113].mxu0 }
 0xcf6   : > { %v2681_v49 = vpop.f32.mrb[114].mxu0 }
 0xcf7   : > { %v9227_v9 = vadd.f32 %v2681_v49, %v9041_v57  ;;  %v7374_v53 = vpop.f32.mrb[115].mxu0 }
 0xcfc   : > { %v2686_v63 = vpop.f32.mrb[116].mxu0 }
 0xcfd   : > { %v9230_v36 = vadd.f32 %v2686_v63, %v9043_v27  ;;  %v7377_v11 = vpop.f32.mrb[117].mxu0 }
 0xcfe   : > { %v2689_v15 = vpop.f32.mrb[118].mxu0 }
 0xcff   : > { %v7378_v59 = vpop.f32.mrb[119].mxu0 }
 0xd04   : > { %v2805_v41 = vpop.f32.mrb[120].mxu0 }
 0xd05   : > { %v7401_v38 = vpop.f32.mrb[121].mxu0  ;;  %v2806_v5 = vadd.f32 %v2805_v41, %v9133_v35 }
 0xd06   : > { %v2808_v33 = vpop.f32.mrb[122].mxu0 }
 0xd07   : > { %v2809_v45 = vadd.f32 %v2808_v33, %v9133_v35  ;;  %v7402_v12 = vpop.f32.mrb[123].mxu0 }
 0xd09   : > { %v2895_v16 = vpack.c.bf16 %v2809_v45, %v2806_v5 }
 0xd0b   : > { %v2908_v57 = vsel %vm1074_vm2, %v2895_v16, 0 }
 0xd0c   : > { %v2813_v51 = vpop.f32.mrb[124].mxu0  ;;  %7428 = vmatpush3.bf16.xpose.msra.mxu0 %v2908_v57 }
 0xd0d   : > { %v7405_v21 = vpop.f32.mrb[125].mxu0  ;;  %7429 = vmatprep.subr.bf16.mxu0 %v8356_v1  ;;  %v2814_v26 = vadd.f32 %v2813_v51, %v9133_v35 }
 0xd0e   : > { %v2816_v27 = vpop.f32.mrb[126].mxu0 }
 0xd0f   : > { %v2817_v22 = vadd.f32 %v2816_v27, %v9133_v35  ;;  %v7406_v32 = vpop.f32.mrb[127].mxu0 }
 0xd11   : > { %v2896_v24 = vpack.c.bf16 %v2817_v22, %v2814_v26 }
 0xd13   : > { %v2911_v60 = vsel %vm1074_vm2, %v2896_v24, 0 }
 0xd14   : > { %v2821_v31 = vpop.f32.mrb[128].mxu0  ;;  %7430 = vmatpush3.bf16.xpose.msra.mxu0 %v2911_v60 }
 0xd15   : > { %v2822_v6 = vadd.f32 %v2821_v31, %v9133_v35  ;;  %v7409_v50 = vpop.f32.mrb[129].mxu0  ;;  %7431 = vmatprep.subr.bf16.mxu0 %v8356_v1  ;;  %v2757_v35 = vadd.f32 %v9201_v20, %v9137_v39 }
 0xd16   : > { %v2824_v13 = vpop.f32.mrb[130].mxu0 }
 0xd17   : > { %v2897_v40 = vpack.c.bf16 %v2822_v6, %v2822_v6  ;;  %v7410_v37 = vpop.f32.mrb[131].mxu0  ;;  %v2894_v48 = vpack.c.bf16 %v2757_v35, %v2757_v35 }
 0xd19   : > { %v2914_v42 = vsel %vm1074_vm2, %v2897_v40, 0 }
 0xd1c   : > { %7432 = vmatpush3.bf16.xpose.msra.mxu0 %v2914_v42 }
 0xd1d   : > { %7463 = vmatprep.subr.bf16.mxu0 %v8356_v1 }
 0xd23   : > { %7434 = vmatmul.mubr.msk.bf16.vlgmr.msra.gmra.mrb[132].mxu0 %vm1074_vm2, %v2892_v3 }
 0xd24   : > { %7437 = vmatprep.mubr.msk.bf16.mxu0 %vm8357_vm1, %v8356_v1 }
 0xd2b   : > { %7438 = vmatmul.mubr.msk.bf16.gmra.mrb[136].mxu0 %vm1074_vm2, %v2893_v14 }
 0xd2c   : > { %7441 = vmatprep.mubr.msk.bf16.mxu0 %vm8357_vm1, %v8356_v1 }
 0xd33   : > { %7442 = vmatmul.mubr.msk.bf16.gmra.mrb[140].mxu0 %vm1074_vm2, %v2894_v48 }
 0xd34   : > { %7465 = vmatprep.mubr.msk.bf16.mxu0 %vm8357_vm1, %v8356_v1 }
 0xdf6   : > { %v2950_v0 = vpop.f32.mrb[132].mxu0 }
 0xdf7   : > { %v2951_v30 = vadd.f32 %v2950_v0, %v8703_v52  ;;  %v7435_v3 = vpop.f32.mrb[133].mxu0 }
 0xdf8   : > { %v2953_v54 = vpop.f32.mrb[134].mxu0 }
 0xdf9   : > { %v2954_v61 = vadd.f32 %v2953_v54, %v8705_v55  ;;  %v7436_v10 = vpop.f32.mrb[135].mxu0  ;;  %v2972_v14 = vsel %vm1536_vm6, %v2951_v30, -inf }
 0xdfa   : > { %2973 = vmax.xlane.f32.xlu0 %v2972_v14  ;;  %v6624_v10 = vld [vmem:[%s8404_s25 + $0xc] sm:$0xf] }
 0xdfb   : > { %v2975_v62 = vsel %vm1536_vm6, %v2954_v61, -inf  ;;  %v3116_v14 = vsel %vm1084_vm0, %v6624_v10, 0 }
 0xdfc   : > { %2976 = vmax.xlane.f32.xlu1 %v2975_v62  ;;  %7464 = vmatpush3.bf16.msra.mxu0 %v3116_v14 }
 0xdfd   : > { %7493 = vmatprep.subr.bf16.mxu0 %v8356_v1 }
 0xdfe   : > { %v2958_v39 = vpop.f32.mrb[136].mxu0 }
 0xdff   : > { %v2959_v20 = vadd.f32 %v2958_v39, %v8711_v2  ;;  %v7439_v7 = vpop.f32.mrb[137].mxu0 }
 0xe00   : > { %v2961_v46 = vpop.f32.mrb[138].mxu0 }
 0xe01   : > { %v2962_v49 = vadd.f32 %v2961_v46, %v8713_v8  ;;  %v7440_v53 = vpop.f32.mrb[139].mxu0  ;;  %v2978_v63 = vsel %vm1536_vm6, %v2959_v20, -inf }
 0xe02   : > { %2979 = vmax.xlane.f32.xlu0 %v2978_v63 }
 0xe03   : > { %v2981_v11 = vsel %vm1536_vm6, %v2962_v49, -inf }
 0xe06   : > { %2982 = vmax.xlane.f32.xlu0 %v2981_v11  ;;  %v2966_v15 = vpop.f32.mrb[140].mxu0 }
 0xe07   : > { %v2967_v59 = vadd.f32 %v2966_v15, %v8719_v19  ;;  %v7443_v41 = vpop.f32.mrb[141].mxu0 }
 0xe08   : > { %v2969_v38 = vpop.f32.mrb[142].mxu0 }
 0xe09   : > { %v7444_v33 = vpop.f32.mrb[143].mxu0  ;;  %v2984_v5 = vsel %vm1536_vm6, %v2967_v59, -inf }
 0xe0a   : > { %2985 = vmax.xlane.f32.xlu1 %v2984_v5 }
 0xe87   : > { %v2974_v45 = vpop.xlane.xlu0 %2973 }
 0xe88   : > { %v2987_v12 = vsub.f32 %v2951_v30, %v2974_v45 }
 0xe89   : > { %v2977_v16 = vpop.xlane.xlu1 %2976 }
 0xe8a   : > { %v2992_v57 = vmul.f32 1.442695, %v2987_v12  ;;  %v2988_v51 = vsub.f32 %v2954_v61, %v2977_v16  ;;  %v8311_v61 = vld [vmem:[%s8399_s21] ss:$0 sm:$0xff] }
 0xe8c   : > { %8128 = vpow2.f32 %v2992_v57  ;;  %v2994_v21 = vmul.f32 1.442695, %v2988_v51 }
 0xe8e   : > { %8130 = vpow2.f32 %v2994_v21 }
 0xe8f   : > { %v2980_v27 = vpop.xlane.xlu0 %2979 }
 0xe90   : > { %v2989_v26 = vsub.f32 %v2959_v20, %v2980_v27 }
 0xe92   : > { %v2996_v22 = vmul.f32 1.442695, %v2989_v26 }
 0xe93   : > { %v2983_v32 = vpop.xlane.xlu0 %2982 }
 0xe94   : > { %8132 = vpow2.f32 %v2996_v22  ;;  %v2990_v24 = vsub.f32 %v2962_v49, %v2983_v32 }
 0xe96   : > { %v8129_v60 = vpop.eup %8128  ;;  %v2998_v31 = vmul.f32 1.442695, %v2990_v24 }
 0xe97   : > { %v2986_v6 = vpop.xlane.xlu1 %2985  ;;  %v3002_v50 = vsel %vm1536_vm6, %v8129_v60, 0.0 }
 0xe98   : > { %v8131_v13 = vpop.eup %8130  ;;  %8134 = vpow2.f32 %v2998_v31  ;;  %v2991_v40 = vsub.f32 %v2967_v59, %v2986_v6  ;;  %3003 = vadd.xlane.f32.xlu0 %v3002_v50 }
 0xe99   : > { %v3005_v37 = vsel %vm1536_vm6, %v8131_v13, 0.0 }
 0xe9a   : > { %v3000_v42 = vmul.f32 1.442695, %v2991_v40  ;;  %3006 = vadd.xlane.f32.xlu1 %v3005_v37 }
 0xe9c   : > { %8136 = vpow2.f32 %v3000_v42 }
 0xe9e   : > { %v8133_v35 = vpop.eup %8132 }
 0xe9f   : > { %v3008_v48 = vsel %vm1536_vm6, %v8133_v35, 0.0 }
 0xea0   : > { %3009 = vadd.xlane.f32.xlu0 %v3008_v48 }
 0xea2   : > { %v8135_v0 = vpop.eup %8134 }
 0xea3   : > { %v3011_v30 = vsel %vm1536_vm6, %v8135_v0, 0.0 }
 0xea4   : > { %3012 = vadd.xlane.f32.xlu1 %v3011_v30 }
 0xea6   : > { %v8137_v3 = vpop.eup %8136 }
 0xea7   : > { %v3014_v54 = vsel %vm1536_vm6, %v8137_v3, 0.0 }
 0xea8   : > { %3015 = vadd.xlane.f32.xlu1 %v3014_v54  ;;  %v6628_v54 = vld [vmem:[%s8409_s29] ss:$0 sm:$0xff] }
 0xeb6   : > { %2833 = vrot.lane.b32.xlu0 %v8311_v61, %s10338_s16  ;;  %s10358_s16 = sld [smem:[#allocation4_spill]] }
 0xf25   : > { %v3004_v62 = vpop.xlane.xlu0 %3003 }
 0xf27   : > { %v3007_v39 = vpop.xlane.xlu1 %3006 }
 0xf28   : > { %8138 = vrcp.f32 %v3007_v39 }
 0xf29   : > { %8140 = vrcp.f32 %v3004_v62 }
 0xf2d   : > { %v3010_v20 = vpop.xlane.xlu0 %3009 }
 0xf31   : > { %v2834_v7 = vpop.permute.xlu0 %2833  ;;  %v3013_v11 = vpop.xlane.xlu1 %3012 }
 0xf32   : > { %v2871_v46 = vadd.f32 %v9207_v23, %v2834_v7  ;;  %v2874_v49 = vadd.f32 %v9209_v47, %v2834_v7  ;;  %v2879_v53 = vadd.f32 %v9211_v56, %v2834_v7  ;;  %v2882_v63 = vadd.f32 %v9213_v4, %v2834_v7  ;;  %v8139_v38 = vpop.eup %8138 }
 0xf33   : > { %v2887_v41 = vadd.f32 %v9215_v25, %v2834_v7  ;;  %8142 = vrcp.f32 %v3013_v11  ;;  %v8141_v5 = vpop.eup %8140  ;;  %v3023_v23 = vmul.f32 %v8139_v38, %v8131_v13 }
 0xf34   : > { %v3030_v15 = vpack.c.bf16 %v2874_v49, %v2871_v46  ;;  %v3031_v59 = vpack.c.bf16 %v2882_v63, %v2879_v53  ;;  %8144 = vrcp.f32 %v3010_v20  ;;  %v3022_v56 = vmul.f32 %v8141_v5, %v8129_v60 }
 0xf35   : > { %v3032_v33 = vpack.c.bf16 %v2887_v41, %v2887_v41  ;;  %v3016_v47 = vpop.xlane.xlu1 %3015 }
 0xf36   : > { %7446 = vmatpush3.bf16.msra.mxu1 %v3030_v15  ;;  %8146 = vrcp.f32 %v3016_v47  ;;  %v3027_v45 = vpack.c.bf16 %v3023_v23, %v3022_v56 }
 0xf37   : > { %7447 = vmatprep.subr.bf16.mxu1 %v8356_v1  ;;  %v3043_v4 = vsel %vm1084_vm0, %v3032_v33, 0 }
 0xf3a   : > { %7448 = vmatpush3.bf16.msra.mxu1 %v3031_v59 }
 0xf3b   : > { %7449 = vmatprep.subr.bf16.mxu1 %v8356_v1 }
 0xf3d   : > { %v8143_v25 = vpop.eup %8142 }
 0xf3e   : > { %7450 = vmatpush3.bf16.msra.mxu1 %v3043_v4  ;;  %v8145_v12 = vpop.eup %8144  ;;  %v3025_v16 = vmul.f32 %v8143_v25, %v8135_v0 }
 0xf3f   : > { %7477 = vmatprep.subr.bf16.mxu1 %v8356_v1  ;;  %v3024_v57 = vmul.f32 %v8145_v12, %v8133_v35 }
 0xf40   : > { %v8147_v21 = vpop.eup %8146 }
 0xf41   : > { %7452 = vmatmul.mubr.msk.bf16.vlgmr.msra.gmra.mrb[132].mxu1 %vm1536_vm6, %v3027_v45  ;;  %v3028_v51 = vpack.c.bf16 %v3025_v16, %v3024_v57  ;;  %v3026_v27 = vmul.f32 %v8147_v21, %v8137_v3 }
 0xf42   : > { %7455 = vmatprep.mubr.msk.bf16.mxu1 %vm8357_vm1, %v8356_v1 }
 0xf43   : > { %v3029_v26 = vpack.c.bf16 %v3026_v27, %v3026_v27 }
 0xf49   : > { %7456 = vmatmul.mubr.msk.bf16.gmra.mrb[136].mxu1 %vm1536_vm6, %v3028_v51 }
 0xf4a   : > { %7459 = vmatprep.mubr.msk.bf16.mxu1 %vm8357_vm1, %v8356_v1 }
 0xf51   : > { %7460 = vmatmul.mubr.msk.bf16.gmra.mrb[140].mxu1 %vm1536_vm6, %v3029_v26 }
 0xf52   : > { %7481 = vmatprep.mubr.msk.bf16.mxu1 %vm8357_vm1, %v8356_v1 }
0x1014   : > { %v3079_v22 = vpop.f32.mrb[132].mxu1 }
0x1015   : > { %v7453_v32 = vpop.f32.mrb[133].mxu1 }
0x1016   : > { %v3082_v24 = vpop.f32.mrb[134].mxu1 }
0x1017   : > { %v3101_v60 = vpack.c.bf16 %v3082_v24, %v3079_v22  ;;  %v7454_v31 = vpop.f32.mrb[135].mxu1 }
0x1019   : > { %7466 = vmatmul.mubr.msk.bf16.vlgmr.msra.gmra.mrb[144].mxu0 %vm1074_vm2, %v3101_v60 }
0x101a   : > { %7469 = vmatprep.mubr.msk.bf16.mxu0 %vm8357_vm1, %v8356_v1 }
0x101c   : > { %v3087_v6 = vpop.f32.mrb[136].mxu1 }
0x101d   : > { %v7457_v50 = vpop.f32.mrb[137].mxu1 }
0x101e   : > { %v3090_v13 = vpop.f32.mrb[138].mxu1 }
0x101f   : > { %v3102_v40 = vpack.c.bf16 %v3090_v13, %v3087_v6  ;;  %v7458_v37 = vpop.f32.mrb[139].mxu1 }
0x1021   : > { %7470 = vmatmul.mubr.msk.bf16.gmra.mrb[148].mxu0 %vm1074_vm2, %v3102_v40 }
0x1022   : > { %7473 = vmatprep.mubr.msk.bf16.mxu0 %vm8357_vm1, %v8356_v1 }
0x1024   : > { %v3095_v42 = vpop.f32.mrb[140].mxu1 }
0x1025   : > { %v7461_v35 = vpop.f32.mrb[141].mxu1  ;;  %v3103_v0 = vpack.c.bf16 %v3095_v42, %v3095_v42 }
0x1026   : > { %v3098_v48 = vpop.f32.mrb[142].mxu1 }
0x1027   : > { %v7462_v30 = vpop.f32.mrb[143].mxu1 }
0x1029   : > { %7474 = vmatmul.mubr.msk.bf16.gmra.mrb[152].mxu0 %vm1074_vm2, %v3103_v0 }
0x102a   : > { %7501 = vmatprep.mubr.msk.bf16.mxu0 %vm8357_vm1, %v8356_v1 }
0x10ec   : > { %v3152_v3 = vpop.f32.mrb[144].mxu0 }
0x10ed   : > { %v3174_v61 = vadd.f32 %v3152_v3, %v9218_v43  ;;  %v7467_v10 = vpop.f32.mrb[145].mxu0  ;;  %v8044_v3 = vld [vmem:[%s8424_s14] sm:$0xff]  }
0x10ee   : > { %v3155_v14 = vpop.f32.mrb[146].mxu0  ;;  %7478 = vmatpush3.bf16.msra.mxu1 %v8044_v3  ;;  %v8047_v10 = vld [vmem:[%s8434_s24 + $0x8] sm:$0xff]  }
0x10ef   : > { %v3186_v62 = vadd.f32 %v6628_v54, %v3174_v61  ;;  %v3175_v39 = vadd.f32 %v3155_v14, %v9221_v58  ;;  %v7468_v20 = vpop.f32.mrb[147].mxu0  ;;  %7479 = vmatprep.subr.bf16.mxu1 %v8356_v1  ;;  %v8046_v61 = vld [vmem:[%s8434_s24] sm:$0xff]  }
0x10f0   : > { %7494 = vmatpush3.bf16.msra.mxu0 %v8046_v61 }
0x10f1   : > { %v3187_v7 = vadd.f32 %v6628_v54, %v3175_v39  ;;  %v3191_v46 = vadd.f32 %v3186_v62, %v8605_v17  ;;  %7495 = vmatprep.subr.bf16.mxu0 %v8356_v1 }
0x10f3   : > { %v3198_v49 = vsel %vm1260_vm3, %v3191_v46, 0.0  ;;  %v3192_v53 = vadd.f32 %v3187_v7, %v8607_v18 }
0x10f4   : > { %3199 = vadd.xlane.f32.xlu1 %v3198_v49  ;;  %v3160_v63 = vpop.f32.mrb[148].mxu0  ;;  %7496 = vmatpush3.bf16.msra.mxu0 %v8047_v10 }
0x10f5   : > { %v3176_v11 = vadd.f32 %v3160_v63, %v9224_v44  ;;  %v7471_v15 = vpop.f32.mrb[149].mxu0  ;;  %v3201_v58 = vsel %vm1260_vm3, %v3192_v53, 0.0  ;;  %7497 = vmatprep.subr.bf16.mxu0 %v8356_v1 }
0x10f6   : > { %v3163_v59 = vpop.f32.mrb[150].mxu0 }
0x10f7   : > { %v3188_v43 = vadd.f32 %v6628_v54, %v3176_v11  ;;  %v3177_v41 = vadd.f32 %v3163_v59, %v9227_v9  ;;  %v7472_v38 = vpop.f32.mrb[151].mxu0 }
0x10f8   : > { %3202 = vadd.xlane.f32.xlu1 %v3201_v58 }
0x10f9   : > { %v3189_v33 = vadd.f32 %v6628_v54, %v3177_v41  ;;  %v3193_v17 = vadd.f32 %v3188_v43, %v8624_v28 }
0x10fb   : > { %v3204_v5 = vsel %vm1260_vm3, %v3193_v17, 0.0  ;;  %v3194_v18 = vadd.f32 %v3189_v33, %v8626_v29 }
0x10fc   : > { %3205 = vadd.xlane.f32.xlu1 %v3204_v5  ;;  %v3168_v23 = vpop.f32.mrb[152].mxu0 }
0x10fd   : > { %v3178_v44 = vadd.f32 %v3168_v23, %v9230_v36  ;;  %v7475_v47 = vpop.f32.mrb[153].mxu0  ;;  %v3207_v9 = vsel %vm1260_vm3, %v3194_v18, 0.0 }
0x10fe   : > { %v3171_v56 = vpop.f32.mrb[154].mxu0 }
0x10ff   : > { %v3190_v4 = vadd.f32 %v6628_v54, %v3178_v44  ;;  %v7476_v45 = vpop.f32.mrb[155].mxu0  ;;  %v8045_v54 = vld [vmem:[%s8424_s14 + $0x8] sm:$0xff]  }
0x1100   : > { %3208 = vadd.xlane.f32.xlu1 %v3207_v9  ;;  %7480 = vmatpush3.bf16.msra.mxu1 %v8045_v54 }
0x1101   : > { %v3195_v25 = vadd.f32 %v3190_v4, %v8642_v34  ;;  %7513 = vmatprep.subr.bf16.mxu1 %v8356_v1 }
0x1103   : > { %v3210_v12 = vsel %vm1260_vm3, %v3195_v25, 0.0 }
0x1104   : > { %3211 = vadd.xlane.f32.xlu1 %v3210_v12 }
0x1181   : > { %v3200_v28 = vpop.xlane.xlu1 %3199 }
0x1182   : > { %v3214_v16 = vmul.f32 0.03125, %v3200_v28 }
0x1184   : > { %v9323_v57 = vsub.f32 %v3191_v46, %v3214_v16 }
0x1185   : > { %v3203_v29 = vpop.xlane.xlu1 %3202 }
0x1186   : > { %v3215_v51 = vmul.f32 0.03125, %v3203_v29  ;;  %v3224_v36 = vmul.f32 %v9323_v57, %v9323_v57 }
0x1188   : > { %v9327_v21 = vsub.f32 %v3192_v53, %v3215_v51  ;;  %v3229_v27 = vsel %vm1260_vm3, %v3224_v36, 0.0 }
0x1189   : > { %3230 = vadd.xlane.f32.xlu0 %v3229_v27  ;;  %v3206_v26 = vpop.xlane.xlu1 %3205 }
0x118a   : > { %v3216_v22 = vmul.f32 0.03125, %v3206_v26  ;;  %v3225_v34 = vmul.f32 %v9327_v21, %v9327_v21 }
0x118c   : > { %v9332_v32 = vsub.f32 %v3193_v17, %v3216_v22  ;;  %v3232_v24 = vsel %vm1260_vm3, %v3225_v34, 0.0 }
0x118d   : > { %v3209_v60 = vpop.xlane.xlu1 %3208  ;;  %3233 = vadd.xlane.f32.xlu1 %v3232_v24 }
0x118e   : > { %v3217_v31 = vmul.f32 0.03125, %v3209_v60  ;;  %v3226_v6 = vmul.f32 %v9332_v32, %v9332_v32 }
0x1190   : > { %v9337_v50 = vsub.f32 %v3194_v18, %v3217_v31  ;;  %v3235_v13 = vsel %vm1260_vm3, %v3226_v6, 0.0  ;;  %v6629_v31 = vld [vmem:[%s8414_s3] ss:$0 sm:$0xff] }
0x1191   : > { %3236 = vadd.xlane.f32.xlu1 %v3235_v13  ;;  %v3212_v40 = vpop.xlane.xlu1 %3211 }
0x1192   : > { %v3218_v37 = vmul.f32 0.03125, %v3212_v40  ;;  %v3227_v42 = vmul.f32 %v9337_v50, %v9337_v50 }
0x1194   : > { %v9342_v35 = vsub.f32 %v3195_v25, %v3218_v37  ;;  %v3238_v48 = vsel %vm1260_vm3, %v3227_v42, 0.0 }
0x1195   : > { %3239 = vadd.xlane.f32.xlu1 %v3238_v48  ;;  %v6630_v48 = vld [vmem:[%s8419_s8] ss:$0 sm:$0xff] }
0x1196   : > { %v3228_v0 = vmul.f32 %v9342_v35, %v9342_v35 }
0x1198   : > { %v3241_v30 = vsel %vm1260_vm3, %v3228_v0, 0.0 }
0x1199   : > { %3242 = vadd.xlane.f32.xlu1 %v3241_v30 }
0x1216   : > { %v3231_v14 = vpop.xlane.xlu0 %3230 }
0x1217   : > { %v3244_v62 = vmul.f32 0.03125, %v3231_v14 }
0x1219   : > { %v3249_v39 = vadd.f32 1e-05, %v3244_v62 }
0x121a   : > { %v3234_v20 = vpop.xlane.xlu1 %3233 }
0x121b   : > { %8148 = vrsqrt.f32 %v3249_v39  ;;  %v3245_v7 = vmul.f32 0.03125, %v3234_v20  ;;  %vm3256_vm10 = vcmp.eq.f32.partialorder %v3249_v39, inf  ;;  %v3259_v58 = vand.u32 2147483648, %v3249_v39 }
0x121c   : > { %vm3258_vm11 = vcmp.eq.f32.partialorder %v3249_v39, 0.0 }
0x121d   : > { %v3250_v46 = vadd.f32 1e-05, %v3245_v7 }
0x121e   : > { %v3237_v49 = vpop.xlane.xlu1 %3236 }
0x121f   : > { %v3246_v53 = vmul.f32 0.03125, %v3237_v49  ;;  %8150 = vrsqrt.f32 %v3250_v46  ;;  %vm3263_vm12 = vcmp.eq.f32.partialorder %v3250_v46, inf  ;;  %v3266_v47 = vand.u32 2147483648, %v3250_v46 }
0x1220   : > { %vm3265_vm13 = vcmp.eq.f32.partialorder %v3250_v46, 0.0 }
0x1221   : > { %v3251_v63 = vadd.f32 1e-05, %v3246_v53 }
0x1222   : > { %v3240_v11 = vpop.xlane.xlu1 %3239 }
0x1223   : > { %8152 = vrsqrt.f32 %v3251_v63  ;;  %v3247_v15 = vmul.f32 0.03125, %v3240_v11  ;;  %vm3270_vm14 = vcmp.eq.f32.partialorder %v3251_v63, inf  ;;  %v3273_v25 = vand.u32 2147483648, %v3251_v63  ;;  %v6631_v11 = vld [vmem:[%s8429_s19] ss:$0 sm:$0xff] }
0x1224   : > { %vm3272_vm15 = vcmp.eq.f32.partialorder %v3251_v63, 0.0 }
0x1225   : > { %v8149_v59 = vpop.eup %8148  ;;  %v3252_v41 = vadd.f32 1e-05, %v3247_v15 }
0x1226   : > { %v3255_v43 = vmul.f32 %v8149_v59, %v3249_v39  ;;  %v3243_v38 = vpop.xlane.xlu1 %3242 }
0x1227   : > { %v3248_v33 = vmul.f32 0.03125, %v3243_v38  ;;  %8154 = vrsqrt.f32 %v3252_v41  ;;  %vm3277_vm4 = vcmp.eq.f32.partialorder %v3252_v41, inf  ;;  %v3280_v36 = vand.u32 2147483648, %v3252_v41 }
0x1228   : > { %v3257_v17 = vsel %vm3256_vm10, %v3249_v39, %v3255_v43  ;;  %vm3279_vm5 = vcmp.eq.f32.partialorder %v3252_v41, 0.0 }
0x1229   : > { %v3260_v5 = vsel %vm3258_vm11, %v3259_v58, %v3257_v17  ;;  %v3253_v18 = vadd.f32 1e-05, %v3248_v33  ;;  %v8151_v23 = vpop.eup %8150 }
0x122a   : > { %8156 = vrcp.f32 %v3260_v5  ;;  %v3262_v44 = vmul.f32 %v8151_v23, %v3250_v46 }
0x122b   : > { %8158 = vrsqrt.f32 %v3253_v18  ;;  %vm3284_vm7 = vcmp.eq.f32.partialorder %v3253_v18, inf  ;;  %v3287_v60 = vand.u32 2147483648, %v3253_v18  ;;  %vm3286_vm8 = vcmp.eq.f32.partialorder %v3253_v18, 0.0 }
0x122c   : > { %v3264_v4 = vsel %vm3263_vm12, %v3250_v46, %v3262_v44 }
0x122d   : > { %v8153_v56 = vpop.eup %8152  ;;  %v3267_v45 = vsel %vm3265_vm13, %v3266_v47, %v3264_v4 }
0x122e   : > { %v3269_v9 = vmul.f32 %v8153_v56, %v3251_v63  ;;  %8160 = vrcp.f32 %v3267_v45 }
0x1230   : > { %v3271_v12 = vsel %vm3270_vm14, %v3251_v63, %v3269_v9  ;;  %v8049_v63 = vld [vmem:[%s8434_s24 + $0x18] sm:$0xff]  }
0x1231   : > { %v3274_v28 = vsel %vm3272_vm15, %v3273_v25, %v3271_v12  ;;  %v8155_v16 = vpop.eup %8154 }
0x1232   : > { %8162 = vrcp.f32 %v3274_v28  ;;  %v3276_v29 = vmul.f32 %v8155_v16, %v3252_v41 }
0x1234   : > { %v8157_v51 = vpop.eup %8156  ;;  %v3278_v26 = vsel %vm3277_vm4, %v3252_v41, %v3276_v29 }
0x1235   : > { %v8159_v27 = vpop.eup %8158  ;;  %v3281_v22 = vsel %vm3279_vm5, %v3280_v36, %v3278_v26  ;;  %v3290_v24 = vmul.f32 %v8157_v51, %v9323_v57  ;;  %v6637_v26 = vld [vmem:[%s8439_s30] ss:$0 sm:$0xff] }
0x1236   : > { %v3283_v34 = vmul.f32 %v8159_v27, %v3253_v18  ;;  %8164 = vrcp.f32 %v3281_v22 }
0x1237   : > { %v3305_v42 = vmul.f32 %v6629_v31, %v3290_v24 }
0x1238   : > { %v3285_v6 = vsel %vm3284_vm7, %v3253_v18, %v3283_v34  ;;  %v8161_v13 = vpop.eup %8160 }
0x1239   : > { %v3288_v40 = vsel %vm3286_vm8, %v3287_v60, %v3285_v6  ;;  %v3292_v37 = vmul.f32 %v8161_v13, %v9327_v21  ;;  %v9360_v3 = vadd.f32 %v6630_v48, %v3305_v42 }
0x123a   : > { %8166 = vrcp.f32 %v3288_v40 }
0x123b   : > { %v3306_v30 = vmul.f32 %v6629_v31, %v3292_v37 }
0x123c   : > { %v8163_v0 = vpop.eup %8162 }
0x123d   : > { %v9362_v54 = vadd.f32 %v6630_v48, %v3306_v30  ;;  %v3294_v57 = vmul.f32 %v8163_v0, %v9332_v32 }
0x123f   : > { %v3321_v61 = vpack.c.bf16 %v9362_v54, %v9360_v3  ;;  %v3307_v21 = vmul.f32 %v6629_v31, %v3294_v57 }
0x1240   : > { %v8165_v10 = vpop.eup %8164 }
0x1241   : > { %7482 = vmatmul.mubr.msk.bf16.vlgmr.msra.gmra.mrb[144].mxu1 %vm1260_vm3, %v3321_v61  ;;  %v3296_v14 = vmul.f32 %v8165_v10, %v9337_v50  ;;  %v9372_v7 = vadd.f32 %v6630_v48, %v3307_v21 }
0x1242   : > { %7485 = vmatprep.mubr.msk.bf16.mxu1 %vm8357_vm1, %v8356_v1 }
0x1243   : > { %v3308_v39 = vmul.f32 %v6629_v31, %v3296_v14 }
0x1244   : > { %v8167_v62 = vpop.eup %8166 }
0x1245   : > { %v3298_v20 = vmul.f32 %v8167_v62, %v9342_v35  ;;  %v9374_v32 = vadd.f32 %v6630_v48, %v3308_v39  ;;  %v8048_v35 = vld [vmem:[%s8434_s24 + $0x10] sm:$0xff]  }
0x1246   : > { %7498 = vmatpush3.bf16.msra.mxu0 %v8048_v35 }
0x1247   : > { %v3322_v46 = vpack.c.bf16 %v9374_v32, %v9372_v7  ;;  %v3309_v49 = vmul.f32 %v6629_v31, %v3298_v20  ;;  %7499 = vmatprep.subr.bf16.mxu0 %v8356_v1 }
0x1249   : > { %7486 = vmatmul.mubr.msk.bf16.gmra.mrb[148].mxu1 %vm1260_vm3, %v3322_v46  ;;  %v9381_v50 = vadd.f32 %v6630_v48, %v3309_v49 }
0x124a   : > { %7489 = vmatprep.mubr.msk.bf16.mxu1 %vm8357_vm1, %v8356_v1  ;;  %7500 = vmatpush3.bf16.msra.mxu0 %v8049_v63 }
0x124b   : > { %v3323_v53 = vpack.c.bf16 %v9381_v50, %v9381_v50  ;;  %7529 = vmatprep.subr.bf16.mxu0 %v8356_v1 }
0x1251   : > { %7490 = vmatmul.mubr.msk.bf16.gmra.mrb[152].mxu1 %vm1260_vm3, %v3323_v53 }
0x1252   : > { %7517 = vmatprep.mubr.msk.bf16.mxu1 %vm8357_vm1, %v8356_v1 }
0x1314   : > { %v3390_v15 = vpop.f32.mrb[144].mxu1 }
0x1315   : > { %v3391_v59 = vadd.f32 %v6631_v11, %v3390_v15  ;;  %v7483_v43 = vpop.f32.mrb[145].mxu1 }
0x1316   : > { %v3393_v41 = vpop.f32.mrb[146].mxu1 }
0x1317   : > { %v3394_v38 = vadd.f32 %v6631_v11, %v3393_v41  ;;  %v7484_v58 = vpop.f32.mrb[147].mxu1  ;;  %v3412_v33 = vmax.f32 %v3391_v59, 0.0 }
0x1319   : > { %v3413_v17 = vmax.f32 %v3394_v38, 0.0 }
0x131b   : > { %v3417_v5 = vpack.c.bf16 %v3413_v17, %v3412_v33 }
0x131c   : > { %v3398_v18 = vpop.f32.mrb[148].mxu1 }
0x131d   : > { %v3399_v23 = vadd.f32 %v6631_v11, %v3398_v18  ;;  %v7487_v44 = vpop.f32.mrb[149].mxu1  ;;  %7502 = vmatmul.mubr.msk.bf16.vlgmr.msra.gmra.mrb[156].mxu0 %vm3459_vm9, %v3417_v5 }
0x131e   : > { %v3401_v47 = vpop.f32.mrb[150].mxu1  ;;  %7505 = vmatprep.mubr.msk.bf16.mxu0 %vm8357_vm1, %v8356_v1 }
0x131f   : > { %v3402_v56 = vadd.f32 %v6631_v11, %v3401_v47  ;;  %v7488_v4 = vpop.f32.mrb[151].mxu1  ;;  %v3414_v45 = vmax.f32 %v3399_v23, 0.0 }
0x1321   : > { %v3415_v9 = vmax.f32 %v3402_v56, 0.0 }
0x1323   : > { %v3418_v25 = vpack.c.bf16 %v3415_v9, %v3414_v45 }
0x1324   : > { %v3406_v12 = vpop.f32.mrb[152].mxu1 }
0x1325   : > { %v3407_v28 = vadd.f32 %v6631_v11, %v3406_v12  ;;  %v7491_v16 = vpop.f32.mrb[153].mxu1  ;;  %7506 = vmatmul.mubr.msk.bf16.gmra.mrb[160].mxu0 %vm3459_vm9, %v3418_v25 }
0x1326   : > { %v3409_v29 = vpop.f32.mrb[154].mxu1  ;;  %7509 = vmatprep.mubr.msk.bf16.mxu0 %vm8357_vm1, %v8356_v1 }
0x1327   : > { %v3416_v51 = vmax.f32 %v3407_v28, 0.0  ;;  %v7492_v36 = vpop.f32.mrb[155].mxu1 }
0x1329   : > { %v3419_v27 = vpack.c.bf16 %v3416_v51, %v3416_v51  ;;  %v9451_v51 = vld [vmem:[%s10358_s16] ss:$0 sm:$0xff] }
0x132d   : > { %7510 = vmatmul.mubr.msk.bf16.gmra.mrb[164].mxu0 %vm3459_vm9, %v3419_v27 }
0x132e   : > { %7533 = vmatprep.mubr.msk.bf16.mxu0 %vm8357_vm1, %v8356_v1 }
0x13f0   : > { %v3503_v22 = vpop.f32.mrb[156].mxu0 }
0x13f1   : > { %v3504_v34 = vadd.f32 %v6637_v26, %v3503_v22  ;;  %v7503_v24 = vpop.f32.mrb[157].mxu0 }
0x13f2   : > { %v3506_v60 = vpop.f32.mrb[158].mxu0 }
0x13f3   : > { %v3507_v31 = vadd.f32 %v6637_v26, %v3506_v60  ;;  %v7504_v6 = vpop.f32.mrb[159].mxu0  ;;  %v3525_v13 = vadd.f32 %v3504_v34, %v9360_v3 }
0x13f5   : > { %v3532_v40 = vsel %vm1260_vm3, %v3525_v13, 0.0  ;;  %v3526_v37 = vadd.f32 %v3507_v31, %v9362_v54 }
0x13f6   : > { %3533 = vadd.xlane.f32.xlu1 %v3532_v40 }
0x13f7   : > { %v3535_v30 = vsel %vm1260_vm3, %v3526_v37, 0.0 }
0x13f8   : > { %v3511_v42 = vpop.f32.mrb[160].mxu0 }
0x13f9   : > { %v3512_v48 = vadd.f32 %v6637_v26, %v3511_v42  ;;  %v7507_v0 = vpop.f32.mrb[161].mxu0 }
0x13fa   : > { %3536 = vadd.xlane.f32.xlu1 %v3535_v30  ;;  %v3514_v57 = vpop.f32.mrb[162].mxu0 }
0x13fb   : > { %v3515_v61 = vadd.f32 %v6637_v26, %v3514_v57  ;;  %v7508_v10 = vpop.f32.mrb[163].mxu0  ;;  %v3527_v14 = vadd.f32 %v3512_v48, %v9372_v7  ;;  %v9414_v7 = vld [vmem:[%s8454_s20] sm:$0xff]  }
0x13fc   : > { %7514 = vmatpush3.bf16.msra.mxu1 %v9414_v7 }
0x13fd   : > { %v3538_v21 = vsel %vm1260_vm3, %v3527_v14, 0.0  ;;  %v3528_v3 = vadd.f32 %v3515_v61, %v9374_v32  ;;  %7515 = vmatprep.subr.bf16.mxu1 %v8356_v1  ;;  %v9419_v32 = vld [vmem:[%s8454_s20 + $0x8] sm:$0xff]  }
0x13fe   : > { %3539 = vadd.xlane.f32.xlu1 %v3538_v21 }
0x13ff   : > { %v3541_v54 = vsel %vm1260_vm3, %v3528_v3, 0.0 }
0x1400   : > { %3542 = vadd.xlane.f32.xlu0 %v3541_v54  ;;  %v3519_v62 = vpop.f32.mrb[164].mxu0  ;;  %7516 = vmatpush3.bf16.msra.mxu1 %v9419_v32 }
0x1401   : > { %v3520_v39 = vadd.f32 %v6637_v26, %v3519_v62  ;;  %v7511_v20 = vpop.f32.mrb[165].mxu0  ;;  %7545 = vmatprep.subr.bf16.mxu1 %v8356_v1 }
0x1402   : > { %v3522_v46 = vpop.f32.mrb[166].mxu0 }
0x1403   : > { %v7512_v49 = vpop.f32.mrb[167].mxu0  ;;  %v3529_v53 = vadd.f32 %v3520_v39, %v9381_v50 }
0x1405   : > { %v3544_v35 = vsel %vm1260_vm3, %v3529_v53, 0.0 }
0x1406   : > { %3545 = vadd.xlane.f32.xlu1 %v3544_v35 }
0x1483   : > { %v3534_v63 = vpop.xlane.xlu1 %3533 }
0x1484   : > { %v3547_v11 = vmul.f32 0.03125, %v3534_v63 }
0x1486   : > { %v9423_v15 = vsub.f32 %v3525_v13, %v3547_v11 }
0x1487   : > { %v3537_v50 = vpop.xlane.xlu1 %3536 }
0x1488   : > { %v3548_v59 = vmul.f32 0.03125, %v3537_v50  ;;  %v3557_v43 = vmul.f32 %v9423_v15, %v9423_v15 }
0x148a   : > { %v9427_v41 = vsub.f32 %v3526_v37, %v3548_v59  ;;  %v3562_v38 = vsel %vm1260_vm3, %v3557_v43, 0.0 }
0x148b   : > { %v3540_v58 = vpop.xlane.xlu1 %3539  ;;  %3563 = vadd.xlane.f32.xlu0 %v3562_v38 }
0x148c   : > { %v3549_v33 = vmul.f32 0.03125, %v3540_v58  ;;  %v3558_v17 = vmul.f32 %v9427_v41, %v9427_v41 }
0x148d   : > { %v3543_v5 = vpop.xlane.xlu0 %3542 }
0x148e   : > { %v9432_v18 = vsub.f32 %v3527_v14, %v3549_v33  ;;  %v3550_v23 = vmul.f32 0.03125, %v3543_v5  ;;  %v3565_v44 = vsel %vm1260_vm3, %v3558_v17, 0.0 }
0x148f   : > { %3566 = vadd.xlane.f32.xlu1 %v3565_v44 }
0x1490   : > { %v9435_v47 = vsub.f32 %v3528_v3, %v3550_v23  ;;  %v3559_v56 = vmul.f32 %v9432_v18, %v9432_v18 }
0x1492   : > { %v3568_v4 = vsel %vm1260_vm3, %v3559_v56, 0.0  ;;  %v3560_v45 = vmul.f32 %v9435_v47, %v9435_v47 }
0x1493   : > { %3569 = vadd.xlane.f32.xlu0 %v3568_v4  ;;  %v3546_v9 = vpop.xlane.xlu1 %3545 }
0x1494   : > { %v3551_v25 = vmul.f32 0.03125, %v3546_v9  ;;  %v3571_v12 = vsel %vm1260_vm3, %v3560_v45, 0.0 }
0x1495   : > { %3572 = vadd.xlane.f32.xlu1 %v3571_v12 }
0x1496   : > { %v9443_v28 = vsub.f32 %v3529_v53, %v3551_v25 }
0x1498   : > { %v3561_v16 = vmul.f32 %v9443_v28, %v9443_v28 }
0x149a   : > { %v3574_v29 = vsel %vm1260_vm3, %v3561_v16, 0.0 }
0x149b   : > { %3575 = vadd.xlane.f32.xlu0 %v3574_v29  ;;  %v6646_v29 = vld [vmem:[%s10360_s15] ss:$0 sm:$0xff]  ;;  %s10369_s15 = sld [smem:[#allocation10_spill]] }
0x14a6   : > { %3745 = vrot.lane.b32.xlu1 %v9414_v7, %s8358_s11 }
0x14aa   : > { %3751 = vrot.lane.b32.xlu1 %v9451_v51, %s8358_s11 }
0x14ae   : > { %3810 = vrot.lane.b32.xlu1 %v9414_v7, %s8359_s18 }
0x14b1   : > { %3747 = vrot.lane.b32.xlu0 %v9419_v32, %s8358_s11  ;;  %s10359_s11 = sld [smem:[#allocation2_spill]] }
0x14b2   : > { %3812 = vrot.lane.b32.xlu1 %v9419_v32, %s8359_s18 }
0x14b7   : > { %v6645_v44 = vld [vmem:[%s10359_s11] ss:$0 sm:$0xff]  ;;  %s10370_s11 = sld [smem:[#allocation12_spill]] }
0x1518   : > { %v3564_v36 = vpop.xlane.xlu0 %3563 }
0x1519   : > { %v3577_v27 = vmul.f32 0.03125, %v3564_v36 }
0x151b   : > { %v3582_v26 = vadd.f32 1e-05, %v3577_v27 }
0x151c   : > { %v3567_v22 = vpop.xlane.xlu1 %3566 }
0x151d   : > { %8168 = vrsqrt.f32 %v3582_v26  ;;  %v3578_v34 = vmul.f32 0.03125, %v3567_v22  ;;  %vm3589_vm10 = vcmp.eq.f32.partialorder %v3582_v26, inf  ;;  %v3592_v57 = vand.u32 2147483648, %v3582_v26 }
0x151e   : > { %vm3591_vm11 = vcmp.eq.f32.partialorder %v3582_v26, 0.0 }
0x151f   : > { %v3583_v24 = vadd.f32 1e-05, %v3578_v34 }
0x1520   : > { %v3570_v60 = vpop.xlane.xlu0 %3569 }
0x1521   : > { %v3579_v31 = vmul.f32 0.03125, %v3570_v60  ;;  %8170 = vrsqrt.f32 %v3583_v24  ;;  %vm3596_vm12 = vcmp.eq.f32.partialorder %v3583_v24, inf  ;;  %v3599_v39 = vand.u32 2147483648, %v3583_v24 }
0x1522   : > { %v3573_v6 = vpop.xlane.xlu1 %3572  ;;  %vm3598_vm13 = vcmp.eq.f32.partialorder %v3583_v24, 0.0 }
0x1523   : > { %v3584_v13 = vadd.f32 1e-05, %v3579_v31  ;;  %v3580_v40 = vmul.f32 0.03125, %v3573_v6 }
0x1525   : > { %8172 = vrsqrt.f32 %v3584_v13  ;;  %v3585_v37 = vadd.f32 1e-05, %v3580_v40  ;;  %vm3603_vm14 = vcmp.eq.f32.partialorder %v3584_v13, inf  ;;  %v3606_v35 = vand.u32 2147483648, %v3584_v13 }
0x1526   : > { %v3746_v42 = vpop.permute.xlu1 %3745  ;;  %vm3605_vm15 = vcmp.eq.f32.partialorder %v3584_v13, 0.0 }
0x1527   : > { %v8169_v48 = vpop.eup %8168  ;;  %7530 = vmatpush3.bf16.msra.mxu0 %v3746_v42  ;;  %8174 = vrsqrt.f32 %v3585_v37  ;;  %vm3610_vm4 = vcmp.eq.f32.partialorder %v3585_v37, inf  ;;  %v3613_v43 = vand.u32 2147483648, %v3585_v37  ;;  %vm3612_vm5 = vcmp.eq.f32.partialorder %v3585_v37, 0.0 }
0x1528   : > { %v3588_v0 = vmul.f32 %v8169_v48, %v3582_v26  ;;  %v3576_v30 = vpop.xlane.xlu0 %3575  ;;  %7531 = vmatprep.subr.bf16.mxu0 %v8356_v1 }
0x1529   : > { %v3581_v61 = vmul.f32 0.03125, %v3576_v30 }
0x152a   : > { %v3590_v10 = vsel %vm3589_vm10, %v3582_v26, %v3588_v0  ;;  %v9465_v25 = vpop.permute.xlu1 %3751 }
0x152b   : > { %v3593_v14 = vsel %vm3591_vm11, %v3592_v57, %v3590_v10  ;;  %v3586_v21 = vadd.f32 1e-05, %v3581_v61  ;;  %v8171_v3 = vpop.eup %8170 }
0x152c   : > { %8176 = vrcp.f32 %v3593_v14  ;;  %v3748_v54 = vpop.permute.xlu0 %3747  ;;  %v3595_v62 = vmul.f32 %v8171_v3, %v3583_v24 }
0x152d   : > { %8178 = vrsqrt.f32 %v3586_v21  ;;  %7532 = vmatpush3.bf16.msra.mxu0 %v3748_v54  ;;  %vm3617_vm7 = vcmp.eq.f32.partialorder %v3586_v21, inf  ;;  %v3620_v56 = vand.u32 2147483648, %v3586_v21  ;;  %vm3619_vm8 = vcmp.eq.f32.partialorder %v3586_v21, 0.0 }
0x152e   : > { %7561 = vmatprep.subr.bf16.mxu0 %v8356_v1  ;;  %v3597_v46 = vsel %vm3596_vm12, %v3583_v24, %v3595_v62  ;;  %v3811_v24 = vpop.permute.xlu1 %3810 }
0x152f   : > { %v8173_v20 = vpop.eup %8172  ;;  %v3600_v49 = vsel %vm3598_vm13, %v3599_v39, %v3597_v46 }
0x1530   : > { %v3602_v53 = vmul.f32 %v8173_v20, %v3584_v13  ;;  %8180 = vrcp.f32 %v3600_v49 }
0x1531   : > { %v8175_v63 = vpop.eup %8174 }
0x1532   : > { %v3604_v11 = vsel %vm3603_vm14, %v3584_v13, %v3602_v53  ;;  %v3609_v59 = vmul.f32 %v8175_v63, %v3585_v37  ;;  %v3813_v40 = vpop.permute.xlu1 %3812 }
0x1533   : > { %v3607_v50 = vsel %vm3605_vm15, %v3606_v35, %v3604_v11 }
0x1534   : > { %8182 = vrcp.f32 %v3607_v50  ;;  %v3611_v38 = vsel %vm3610_vm4, %v3585_v37, %v3609_v59 }
0x1535   : > { %v3614_v33 = vsel %vm3612_vm5, %v3613_v43, %v3611_v38 }
0x1536   : > { %v8177_v58 = vpop.eup %8176  ;;  %8184 = vrcp.f32 %v3614_v33 }
0x1537   : > { %v8179_v17 = vpop.eup %8178  ;;  %v3623_v5 = vmul.f32 %v8177_v58, %v9423_v15 }
0x1538   : > { %v3616_v23 = vmul.f32 %v8179_v17, %v3586_v21 }
0x1539   : > { %v3638_v12 = vmul.f32 %v6645_v44, %v3623_v5 }
0x153a   : > { %v3618_v4 = vsel %vm3617_vm7, %v3586_v21, %v3616_v23  ;;  %v8181_v45 = vpop.eup %8180 }
0x153b   : > { %v3621_v9 = vsel %vm3619_vm8, %v3620_v56, %v3618_v4  ;;  %v3625_v16 = vmul.f32 %v8181_v45, %v9427_v41  ;;  %v9469_v26 = vadd.f32 %v6646_v29, %v3638_v12 }
0x153c   : > { %8186 = vrcp.f32 %v3621_v9 }
0x153d   : > { %v3639_v27 = vmul.f32 %v6645_v44, %v3625_v16 }
0x153e   : > { %v8183_v36 = vpop.eup %8182 }
0x153f   : > { %v9471_v15 = vadd.f32 %v6646_v29, %v3639_v27  ;;  %v3627_v22 = vmul.f32 %v8183_v36, %v9432_v18 }
0x1540   : > { %v8185_v34 = vpop.eup %8184 }
0x1541   : > { %v9476_v60 = vpack.c.bf16 %v9471_v15, %v9469_v26  ;;  %v3629_v31 = vmul.f32 %v8185_v34, %v9435_v47  ;;  %v3640_v6 = vmul.f32 %v6645_v44, %v3627_v22 }
0x1543   : > { %v3641_v41 = vmul.f32 %v6645_v44, %v3629_v31  ;;  %7518 = vmatmul.mubr.msk.bf16.vlgmr.msra.gmra.mrb[156].mxu1 %vm1260_vm3, %v9476_v60  ;;  %7534 = vmatmul.mubr.msk.bf16.vlgmr.msra.gmra.mrb[168].mxu0 %vm1260_vm3, %v9476_v60  ;;  %v9491_v37 = vadd.f32 %v6646_v29, %v3640_v6 }
0x1544   : > { %7521 = vmatprep.mubr.msk.bf16.mxu1 %vm8357_vm1, %v8356_v1  ;;  %7537 = vmatprep.mubr.msk.bf16.mxu0 %vm8357_vm1, %v8356_v1 }
0x1545   : > { %v9487_v13 = vadd.f32 %v6646_v29, %v3641_v41  ;;  %7546 = vmatpush3.bf16.msra.mxu1 %v3811_v24 }
0x1546   : > { %v8187_v18 = vpop.eup %8186  ;;  %7547 = vmatprep.subr.bf16.mxu1 %v8356_v1 }
0x1547   : > { %v3631_v47 = vmul.f32 %v8187_v18, %v9443_v28  ;;  %v9495_v42 = vpack.c.bf16 %v9487_v13, %v9491_v37 }
0x1549   : > { %v3642_v48 = vmul.f32 %v6645_v44, %v3631_v47  ;;  %7548 = vmatpush3.bf16.msra.mxu1 %v3813_v40 }
0x154a   : > { %7579 = vmatprep.subr.bf16.mxu1 %v8356_v1 }
0x154b   : > { %7522 = vmatmul.mubr.msk.bf16.gmra.mrb[160].mxu1 %vm1260_vm3, %v9495_v42  ;;  %7538 = vmatmul.mubr.msk.bf16.gmra.mrb[172].mxu0 %vm1260_vm3, %v9495_v42  ;;  %v9506_v28 = vadd.f32 %v6646_v29, %v3642_v48 }
0x154c   : > { %7525 = vmatprep.mubr.msk.bf16.mxu1 %vm8357_vm1, %v8356_v1  ;;  %7541 = vmatprep.mubr.msk.bf16.mxu0 %vm8357_vm1, %v8356_v1 }
0x154d   : > { %v9510_v0 = vpack.c.bf16 %v9506_v28, %v9506_v28 }
0x1553   : > { %7526 = vmatmul.mubr.msk.bf16.gmra.mrb[164].mxu1 %vm1260_vm3, %v9510_v0  ;;  %7542 = vmatmul.mubr.msk.bf16.gmra.mrb[176].mxu0 %vm1260_vm3, %v9510_v0 }
0x1554   : > { %7549 = vmatprep.mubr.msk.bf16.mxu1 %vm8357_vm1, %v8356_v1  ;;  %7567 = vmatprep.mubr.msk.bf16.mxu0 %vm8357_vm1, %v8356_v1 }
0x155b   : > { %7550 = vmatmul.mubr.msk.bf16.vlgmr.msra.gmra.mrb[168].mxu1 %vm1260_vm3, %v9476_v60 }
0x155c   : > { %7553 = vmatprep.mubr.msk.bf16.mxu1 %vm8357_vm1, %v8356_v1 }
0x1563   : > { %7554 = vmatmul.mubr.msk.bf16.gmra.mrb[172].mxu1 %vm1260_vm3, %v9495_v42 }
0x1564   : > { %7557 = vmatprep.mubr.msk.bf16.mxu1 %vm8357_vm1, %v8356_v1 }
0x156b   : > { %7558 = vmatmul.mubr.msk.bf16.gmra.mrb[176].mxu1 %vm1260_vm3, %v9510_v0 }
0x156c   : > { %7585 = vmatprep.mubr.msk.bf16.mxu1 %vm8357_vm1, %v8356_v1 }
0x1616   : > { %v3723_v30 = vpop.f32.mrb[156].mxu1  ;;  %v3788_v57 = vpop.f32.mrb[168].mxu0 }
0x1617   : > { %v7519_v61 = vpop.f32.mrb[157].mxu1  ;;  %v7535_v10 = vpop.f32.mrb[169].mxu0  ;;  %v3724_v3 = vadd.f32 %v9451_v51, %v3723_v30  ;;  %v3789_v54 = vadd.f32 %v3788_v57, %v9465_v25 }
0x1618   : > { %v3726_v14 = vpop.f32.mrb[158].mxu1  ;;  %v3791_v21 = vpop.f32.mrb[170].mxu0 }
0x1619   : > { %v3727_v62 = vadd.f32 %v9451_v51, %v3726_v14  ;;  %v3792_v39 = vadd.f32 %v3791_v21, %v9465_v25  ;;  %v7520_v20 = vpop.f32.mrb[159].mxu1  ;;  %v7536_v46 = vpop.f32.mrb[171].mxu0 }
0x161b   : > { %v3875_v49 = vpack.c.bf16 %v3727_v62, %v3724_v3  ;;  %v3878_v53 = vpack.c.bf16 %v3792_v39, %v3789_v54 }
0x161d   : > { %v3891_v35 = vsel %vm1074_vm2, %v3878_v53, 0 }
0x161e   : > { %v3731_v63 = vpop.f32.mrb[160].mxu1  ;;  %v3796_v11 = vpop.f32.mrb[172].mxu0  ;;  %7562 = vmatpush3.bf16.xpose.msra.mxu0 %v3891_v35 }
0x161f   : > { %v7523_v50 = vpop.f32.mrb[161].mxu1  ;;  %v7539_v59 = vpop.f32.mrb[173].mxu0  ;;  %7563 = vmatprep.subr.bf16.mxu0 %v8356_v1  ;;  %v3732_v58 = vadd.f32 %v9451_v51, %v3731_v63  ;;  %v3797_v33 = vadd.f32 %v3796_v11, %v9465_v25 }
0x1620   : > { %v3734_v43 = vpop.f32.mrb[162].mxu1  ;;  %v3799_v38 = vpop.f32.mrb[174].mxu0 }
0x1621   : > { %v3735_v17 = vadd.f32 %v9451_v51, %v3734_v43  ;;  %v3800_v5 = vadd.f32 %v3799_v38, %v9465_v25  ;;  %v7524_v23 = vpop.f32.mrb[163].mxu1  ;;  %v7540_v44 = vpop.f32.mrb[175].mxu0 }
0x1623   : > { %v3876_v56 = vpack.c.bf16 %v3735_v17, %v3732_v58  ;;  %v3879_v4 = vpack.c.bf16 %v3800_v5, %v3797_v33 }
0x1625   : > { %v3894_v45 = vsel %vm1074_vm2, %v3879_v4, 0 }
0x1626   : > { %v3739_v9 = vpop.f32.mrb[164].mxu1  ;;  %v3804_v12 = vpop.f32.mrb[176].mxu0  ;;  %7564 = vmatpush3.bf16.xpose.msra.mxu0 %v3894_v45 }
0x1627   : > { %v3805_v16 = vadd.f32 %v3804_v12, %v9465_v25  ;;  %v7527_v29 = vpop.f32.mrb[165].mxu1  ;;  %v7543_v36 = vpop.f32.mrb[177].mxu0  ;;  %7565 = vmatprep.subr.bf16.mxu0 %v8356_v1  ;;  %v3740_v10 = vadd.f32 %v9451_v51, %v3739_v9 }
0x1628   : > { %v3742_v27 = vpop.f32.mrb[166].mxu1  ;;  %v3807_v22 = vpop.f32.mrb[178].mxu0 }
0x1629   : > { %v3880_v34 = vpack.c.bf16 %v3805_v16, %v3805_v16  ;;  %v7528_v24 = vpop.f32.mrb[167].mxu1  ;;  %v7544_v31 = vpop.f32.mrb[179].mxu0  ;;  %v3877_v54 = vpack.c.bf16 %v3740_v10, %v3740_v10 }
0x162b   : > { %v3897_v6 = vsel %vm1074_vm2, %v3880_v34, 0 }
0x162e   : > { %v9546_v41 = vpop.f32.mrb[168].mxu1  ;;  %7566 = vmatpush3.bf16.xpose.msra.mxu0 %v3897_v6 }
0x162f   : > { %v7551_v18 = vpop.f32.mrb[169].mxu1  ;;  %7597 = vmatprep.subr.bf16.mxu0 %v8356_v1 }
0x1630   : > { %v9549_v47 = vpop.f32.mrb[170].mxu1 }
0x1631   : > { %v7552_v25 = vpop.f32.mrb[171].mxu1 }
0x1635   : > { %7568 = vmatmul.mubr.msk.bf16.vlgmr.msra.gmra.mrb[180].mxu0 %vm1074_vm2, %v3875_v49 }
0x1636   : > { %v9552_v40 = vpop.f32.mrb[172].mxu1  ;;  %7571 = vmatprep.mubr.msk.bf16.mxu0 %vm8357_vm1, %v8356_v1 }
0x1637   : > { %v7555_v48 = vpop.f32.mrb[173].mxu1 }
0x1638   : > { %v9556_v30 = vpop.f32.mrb[174].mxu1 }
0x1639   : > { %v7556_v57 = vpop.f32.mrb[175].mxu1 }
0x163d   : > { %7572 = vmatmul.mubr.msk.bf16.gmra.mrb[184].mxu0 %vm1074_vm2, %v3876_v56 }
0x163e   : > { %v9559_v61 = vpop.f32.mrb[176].mxu1  ;;  %7575 = vmatprep.mubr.msk.bf16.mxu0 %vm8357_vm1, %v8356_v1 }
0x163f   : > { %v7559_v14 = vpop.f32.mrb[177].mxu1 }
0x1640   : > { %v3872_v21 = vpop.f32.mrb[178].mxu1 }
0x1641   : > { %v7560_v3 = vpop.f32.mrb[179].mxu1 }
0x1645   : > { %7576 = vmatmul.mubr.msk.bf16.gmra.mrb[188].mxu0 %vm1074_vm2, %v3877_v54 }
0x1646   : > { %7601 = vmatprep.mubr.msk.bf16.mxu0 %vm8357_vm1, %v8356_v1 }
0x1708   : > { %v3933_v62 = vpop.f32.mrb[180].mxu0 }
0x1709   : > { %v3934_v39 = vadd.f32 %v3933_v62, %v8703_v52  ;;  %v7569_v20 = vpop.f32.mrb[181].mxu0 }
0x170a   : > { %v3936_v46 = vpop.f32.mrb[182].mxu0 }
0x170b   : > { %v3937_v49 = vadd.f32 %v3936_v46, %v8705_v55  ;;  %v7570_v53 = vpop.f32.mrb[183].mxu0  ;;  %v3955_v35 = vsel %vm1536_vm6, %v3934_v39, -inf }
0x170c   : > { %3956 = vmax.xlane.f32.xlu0 %v3955_v35 }
0x170d   : > { %v3958_v63 = vsel %vm1536_vm6, %v3937_v49, -inf }
0x170e   : > { %3959 = vmax.xlane.f32.xlu1 %v3958_v63 }
0x1710   : > { %v3941_v11 = vpop.f32.mrb[184].mxu0 }
0x1711   : > { %v3942_v50 = vadd.f32 %v3941_v11, %v8711_v2  ;;  %v7573_v59 = vpop.f32.mrb[185].mxu0 }
0x1712   : > { %v3944_v43 = vpop.f32.mrb[186].mxu0 }
0x1713   : > { %v3945_v38 = vadd.f32 %v3944_v43, %v8713_v8  ;;  %v7574_v58 = vpop.f32.mrb[187].mxu0  ;;  %v3961_v33 = vsel %vm1536_vm6, %v3942_v50, -inf }
0x1714   : > { %3962 = vmax.xlane.f32.xlu0 %v3961_v33 }
0x1715   : > { %v3964_v17 = vsel %vm1536_vm6, %v3945_v38, -inf }
0x1718   : > { %3965 = vmax.xlane.f32.xlu0 %v3964_v17  ;;  %v3949_v5 = vpop.f32.mrb[188].mxu0 }
0x1719   : > { %v3950_v23 = vadd.f32 %v3949_v5, %v8719_v19  ;;  %v7577_v44 = vpop.f32.mrb[189].mxu0 }
0x171a   : > { %v3952_v56 = vpop.f32.mrb[190].mxu0 }
0x171b   : > { %v7578_v4 = vpop.f32.mrb[191].mxu0  ;;  %v3967_v45 = vsel %vm1536_vm6, %v3950_v23, -inf }
0x171c   : > { %3968 = vmax.xlane.f32.xlu0 %v3967_v45 }
0x1799   : > { %v3957_v9 = vpop.xlane.xlu0 %3956 }
0x179a   : > { %v3970_v12 = vsub.f32 %v3934_v39, %v3957_v9 }
0x179b   : > { %v3960_v16 = vpop.xlane.xlu1 %3959 }
0x179c   : > { %v3975_v29 = vmul.f32 1.442695, %v3970_v12  ;;  %v3971_v36 = vsub.f32 %v3937_v49, %v3960_v16 }
0x179e   : > { %8188 = vpow2.f32 %v3975_v29  ;;  %v3977_v27 = vmul.f32 1.442695, %v3971_v36 }
0x17a0   : > { %8190 = vpow2.f32 %v3977_v27 }
0x17a1   : > { %v3963_v22 = vpop.xlane.xlu0 %3962 }
0x17a2   : > { %v3972_v34 = vsub.f32 %v3942_v50, %v3963_v22 }
0x17a4   : > { %v3979_v24 = vmul.f32 1.442695, %v3972_v34 }
0x17a5   : > { %v3966_v31 = vpop.xlane.xlu0 %3965 }
0x17a6   : > { %8192 = vpow2.f32 %v3979_v24  ;;  %v3973_v6 = vsub.f32 %v3945_v38, %v3966_v31 }
0x17a8   : > { %v8189_v18 = vpop.eup %8188  ;;  %v3981_v25 = vmul.f32 1.442695, %v3973_v6 }
0x17a9   : > { %v3969_v48 = vpop.xlane.xlu0 %3968  ;;  %v3985_v57 = vsel %vm1536_vm6, %v8189_v18, 0.0 }
0x17aa   : > { %v8191_v10 = vpop.eup %8190  ;;  %8194 = vpow2.f32 %v3981_v25  ;;  %v3974_v14 = vsub.f32 %v3950_v23, %v3969_v48  ;;  %3986 = vadd.xlane.f32.xlu1 %v3985_v57 }
0x17ab   : > { %v3988_v21 = vsel %vm1536_vm6, %v8191_v10, 0.0 }
0x17ac   : > { %v3983_v3 = vmul.f32 1.442695, %v3974_v14  ;;  %3989 = vadd.xlane.f32.xlu0 %v3988_v21 }
0x17ae   : > { %8196 = vpow2.f32 %v3983_v3 }
0x17b0   : > { %v9579_v54 = vpop.eup %8192 }
0x17b1   : > { %v3991_v62 = vsel %vm1536_vm6, %v9579_v54, 0.0 }
0x17b2   : > { %3992 = vadd.xlane.f32.xlu1 %v3991_v62 }
0x17b4   : > { %v8195_v39 = vpop.eup %8194 }
0x17b5   : > { %v3994_v20 = vsel %vm1536_vm6, %v8195_v39, 0.0 }
0x17b6   : > { %3995 = vadd.xlane.f32.xlu0 %v3994_v20 }
0x17b8   : > { %v9584_v46 = vpop.eup %8196 }
0x17b9   : > { %v3997_v49 = vsel %vm1536_vm6, %v9584_v46, 0.0 }
0x17ba   : > { %3998 = vadd.xlane.f32.xlu0 %v3997_v49 }
0x17c3   : > { %3816 = vrot.lane.b32.xlu1 %v9451_v51, %s8359_s18  ;;  %s10361_s18 = sld [smem:[#allocation5_spill]] }
0x17c7   : > { %4155 = vrot.lane.b32.xlu1 %v9419_v32, %s8361_s22 }
0x17cb   : > { %4088 = vrot.lane.b32.xlu1 %v9414_v7, %s8362_s23 }
0x17cf   : > { %4090 = vrot.lane.b32.xlu1 %v9419_v32, %s8362_s23 }
0x17d0   : > { %4153 = vrot.lane.b32.xlu0 %v9414_v7, %s8361_s22 }
0x17d3   : > { %4159 = vrot.lane.b32.xlu1 %v9451_v51, %s8361_s22  ;;  %s10362_s22 = smov 104  }
0x17d4   : > { %4094 = vrot.lane.b32.xlu0 %v9451_v51, %s8362_s23  ;;  %s10363_s23 = smov 40  }
0x17d7   : > { %4218 = vrot.lane.b32.xlu1 %v9414_v7, %s8363_s26 }
0x17d8   : > { %4220 = vrot.lane.b32.xlu0 %v9419_v32, %s8363_s26 }
0x1837   : > { %v3987_v53 = vpop.xlane.xlu1 %3986 }
0x1839   : > { %v3990_v35 = vpop.xlane.xlu0 %3989 }
0x183a   : > { %8198 = vrcp.f32 %v3990_v35 }
0x183b   : > { %8200 = vrcp.f32 %v3987_v53 }
0x183f   : > { %v3993_v63 = vpop.xlane.xlu1 %3992 }
0x1843   : > { %v3817_v11 = vpop.permute.xlu1 %3816  ;;  %v3996_v58 = vpop.xlane.xlu0 %3995 }
0x1844   : > { %v3854_v50 = vadd.f32 %v9546_v41, %v3817_v11  ;;  %v3857_v59 = vadd.f32 %v9549_v47, %v3817_v11  ;;  %v3862_v43 = vadd.f32 %v9552_v40, %v3817_v11  ;;  %v3865_v38 = vadd.f32 %v9556_v30, %v3817_v11  ;;  %v8199_v5 = vpop.eup %8198 }
0x1845   : > { %v3870_v32 = vadd.f32 %v9559_v61, %v3817_v11  ;;  %8202 = vrcp.f32 %v3996_v58  ;;  %v8201_v47 = vpop.eup %8200  ;;  %v4006_v40 = vmul.f32 %v8199_v5, %v8191_v10 }
0x1846   : > { %v4013_v33 = vpack.c.bf16 %v3857_v59, %v3854_v50  ;;  %v4014_v7 = vpack.c.bf16 %v3865_v38, %v3862_v43  ;;  %8204 = vrcp.f32 %v3993_v63  ;;  %v4005_v56 = vmul.f32 %v8201_v47, %v8189_v18 }
0x1847   : > { %v4156_v17 = vpop.permute.xlu1 %4155  ;;  %v3999_v23 = vpop.xlane.xlu0 %3998  ;;  %v4015_v44 = vpack.c.bf16 %v3870_v32, %v3870_v32 }
0x1848   : > { %7580 = vmatpush3.bf16.msra.mxu1 %v4013_v33  ;;  %8206 = vrcp.f32 %v3999_v23  ;;  %v4010_v45 = vpack.c.bf16 %v4006_v40, %v4005_v56 }
0x1849   : > { %7581 = vmatprep.subr.bf16.mxu1 %v8356_v1  ;;  %v4026_v4 = vsel %vm1084_vm0, %v4015_v44, 0 }
0x184b   : > { %v4089_v41 = vpop.permute.xlu1 %4088  ;;  %v4154_v30 = vpop.permute.xlu0 %4153 }
0x184c   : > { %7582 = vmatpush3.bf16.msra.mxu1 %v4014_v7  ;;  %7598 = vmatpush3.bf16.msra.mxu0 %v4089_v41 }
0x184d   : > { %7583 = vmatprep.subr.bf16.mxu1 %v8356_v1  ;;  %7599 = vmatprep.subr.bf16.mxu0 %v8356_v1 }
0x184f   : > { %v4091_v61 = vpop.permute.xlu1 %4090  ;;  %v8203_v9 = vpop.eup %8202 }
0x1850   : > { %7584 = vmatpush3.bf16.msra.mxu1 %v4026_v4  ;;  %7600 = vmatpush3.bf16.msra.mxu0 %v4091_v61  ;;  %v8205_v16 = vpop.eup %8204  ;;  %v9626_v29 = vpop.permute.xlu0 %4094  ;;  %v4008_v36 = vmul.f32 %v8203_v9, %v8195_v39 }
0x1851   : > { %7613 = vmatprep.subr.bf16.mxu1 %v8356_v1  ;;  %7629 = vmatprep.subr.bf16.mxu0 %v8356_v1  ;;  %v4007_v27 = vmul.f32 %v8205_v16, %v9579_v54 }
0x1852   : > { %v8207_v24 = vpop.eup %8206 }
0x1853   : > { %7586 = vmatmul.mubr.msk.bf16.vlgmr.msra.gmra.mrb[180].mxu1 %vm1536_vm6, %v4010_v45  ;;  %7602 = vmatmul.mubr.msk.bf16.vlgmr.msra.gmra.mrb[192].mxu0 %vm1260_vm3, %v9476_v60  ;;  %v9620_v12 = vpop.permute.xlu1 %4159  ;;  %v4011_v34 = vpack.c.bf16 %v4008_v36, %v4007_v27  ;;  %v4009_v6 = vmul.f32 %v8207_v24, %v9584_v46 }
0x1854   : > { %7589 = vmatprep.mubr.msk.bf16.mxu1 %vm8357_vm1, %v8356_v1  ;;  %7605 = vmatprep.mubr.msk.bf16.mxu0 %vm8357_vm1, %v8356_v1  ;;  %v4221_v31 = vpop.permute.xlu0 %4220 }
0x1855   : > { %7614 = vmatpush3.bf16.msra.mxu1 %v4154_v30  ;;  %v4012_v18 = vpack.c.bf16 %v4009_v6, %v4009_v6 }
0x1856   : > { %7615 = vmatprep.subr.bf16.mxu1 %v8356_v1 }
0x1857   : > { %v4219_v22 = vpop.permute.xlu1 %4218 }
0x1858   : > { %7630 = vmatpush3.bf16.msra.mxu0 %v4219_v22 }
0x1859   : > { %7631 = vmatprep.subr.bf16.mxu0 %v8356_v1  ;;  %7616 = vmatpush3.bf16.msra.mxu1 %v4156_v17 }
0x185a   : > { %7645 = vmatprep.subr.bf16.mxu1 %v8356_v1 }
0x185b   : > { %7590 = vmatmul.mubr.msk.bf16.gmra.mrb[184].mxu1 %vm1536_vm6, %v4011_v34  ;;  %7606 = vmatmul.mubr.msk.bf16.gmra.mrb[196].mxu0 %vm1260_vm3, %v9495_v42 }
0x185c   : > { %7593 = vmatprep.mubr.msk.bf16.mxu1 %vm8357_vm1, %v8356_v1  ;;  %7609 = vmatprep.mubr.msk.bf16.mxu0 %vm8357_vm1, %v8356_v1 }
0x185d   : > { %7632 = vmatpush3.bf16.msra.mxu0 %v4221_v31 }
0x185e   : > { %7663 = vmatprep.subr.bf16.mxu0 %v8356_v1 }
0x1863   : > { %7610 = vmatmul.mubr.msk.bf16.gmra.mrb[200].mxu0 %vm1260_vm3, %v9510_v0  ;;  %7594 = vmatmul.mubr.msk.bf16.gmra.mrb[188].mxu1 %vm1536_vm6, %v4012_v18 }
0x1864   : > { %7617 = vmatprep.mubr.msk.bf16.mxu1 %vm8357_vm1, %v8356_v1  ;;  %7633 = vmatprep.mubr.msk.bf16.mxu0 %vm8357_vm1, %v8356_v1 }
0x186b   : > { %7618 = vmatmul.mubr.msk.bf16.vlgmr.msra.gmra.mrb[192].mxu1 %vm1260_vm3, %v9476_v60  ;;  %7634 = vmatmul.mubr.msk.bf16.vlgmr.msra.gmra.mrb[204].mxu0 %vm1260_vm3, %v9476_v60 }
0x186c   : > { %7621 = vmatprep.mubr.msk.bf16.mxu1 %vm8357_vm1, %v8356_v1  ;;  %7637 = vmatprep.mubr.msk.bf16.mxu0 %vm8357_vm1, %v8356_v1 }
0x1873   : > { %7622 = vmatmul.mubr.msk.bf16.gmra.mrb[196].mxu1 %vm1260_vm3, %v9495_v42  ;;  %7638 = vmatmul.mubr.msk.bf16.gmra.mrb[208].mxu0 %vm1260_vm3, %v9495_v42 }
0x1874   : > { %7625 = vmatprep.mubr.msk.bf16.mxu1 %vm8357_vm1, %v8356_v1  ;;  %7641 = vmatprep.mubr.msk.bf16.mxu0 %vm8357_vm1, %v8356_v1 }
0x187b   : > { %7626 = vmatmul.mubr.msk.bf16.gmra.mrb[200].mxu1 %vm1260_vm3, %v9510_v0  ;;  %7642 = vmatmul.mubr.msk.bf16.gmra.mrb[212].mxu0 %vm1260_vm3, %v9510_v0 }
0x187c   : > { %7651 = vmatprep.mubr.msk.bf16.mxu1 %vm8357_vm1, %v8356_v1  ;;  %7669 = vmatprep.mubr.msk.bf16.mxu0 %vm8357_vm1, %v8356_v1 }
0x1926   : > { %v9672_v25 = vpop.f32.mrb[180].mxu1  ;;  %v4131_v48 = vpop.f32.mrb[192].mxu0 }
0x1927   : > { %v7587_v57 = vpop.f32.mrb[181].mxu1  ;;  %v7603_v10 = vpop.f32.mrb[193].mxu0  ;;  %v9677_v3 = vadd.f32 %v4131_v48, %v9626_v29 }
0x1928   : > { %v9674_v14 = vpop.f32.mrb[182].mxu1  ;;  %v4134_v21 = vpop.f32.mrb[194].mxu0 }
0x1929   : > { %v4084_v54 = vpack.c.bf16 %v9674_v14, %v9672_v25  ;;  %v9682_v62 = vadd.f32 %v4134_v21, %v9626_v29  ;;  %v7588_v39 = vpop.f32.mrb[183].mxu1  ;;  %v7604_v20 = vpop.f32.mrb[195].mxu0 }
0x192b   : > { %v4283_v46 = vpack.c.bf16 %v9682_v62, %v9677_v3 }
0x192e   : > { %v9686_v49 = vpop.f32.mrb[184].mxu1  ;;  %v4139_v53 = vpop.f32.mrb[196].mxu0 }
0x192f   : > { %v7591_v35 = vpop.f32.mrb[185].mxu1  ;;  %v7607_v63 = vpop.f32.mrb[197].mxu0  ;;  %v4140_v59 = vadd.f32 %v4139_v53, %v9626_v29 }
0x1930   : > { %v9688_v11 = vpop.f32.mrb[186].mxu1  ;;  %v4142_v50 = vpop.f32.mrb[198].mxu0 }
0x1931   : > { %v4085_v43 = vpack.c.bf16 %v9688_v11, %v9686_v49  ;;  %v4143_v38 = vadd.f32 %v4142_v50, %v9626_v29  ;;  %v7592_v58 = vpop.f32.mrb[187].mxu1  ;;  %v7608_v33 = vpop.f32.mrb[199].mxu0 }
0x1933   : > { %v4284_v7 = vpack.c.bf16 %v4143_v38, %v4140_v59 }
0x1936   : > { %v9694_v17 = vpop.f32.mrb[188].mxu1  ;;  %v4147_v32 = vpop.f32.mrb[200].mxu0 }
0x1937   : > { %v7595_v5 = vpop.f32.mrb[189].mxu1  ;;  %v7611_v23 = vpop.f32.mrb[201].mxu0  ;;  %v4086_v25 = vpack.c.bf16 %v9694_v17, %v9694_v17 }
0x1938   : > { %v4081_v41 = vpop.f32.mrb[190].mxu1  ;;  %v4150_v44 = vpop.f32.mrb[202].mxu0 }
0x1939   : > { %v7596_v47 = vpop.f32.mrb[191].mxu1  ;;  %v7612_v40 = vpop.f32.mrb[203].mxu0 }
0x193e   : > { %v4196_v30 = vpop.f32.mrb[192].mxu1  ;;  %v9696_v56 = vpop.f32.mrb[204].mxu0 }
0x193f   : > { %v7619_v61 = vpop.f32.mrb[193].mxu1  ;;  %v7635_v4 = vpop.f32.mrb[205].mxu0  ;;  %v4197_v16 = vadd.f32 %v4196_v30, %v9620_v12 }
0x1940   : > { %v4199_v45 = vpop.f32.mrb[194].mxu1  ;;  %v9698_v9 = vpop.f32.mrb[206].mxu0 }
0x1941   : > { %v4200_v36 = vadd.f32 %v4199_v45, %v9620_v12  ;;  %v7620_v27 = vpop.f32.mrb[195].mxu1  ;;  %v7636_v22 = vpop.f32.mrb[207].mxu0 }
0x1943   : > { %v4286_v34 = vpack.c.bf16 %v4200_v36, %v4197_v16 }
0x1945   : > { %v4299_v24 = vsel %vm1074_vm2, %v4286_v34, 0 }
0x1946   : > { %v4204_v31 = vpop.f32.mrb[196].mxu1  ;;  %v9703_v6 = vpop.f32.mrb[208].mxu0  ;;  %7646 = vmatpush3.bf16.xpose.msra.mxu1 %v4299_v24 }
0x1947   : > { %v7623_v18 = vpop.f32.mrb[197].mxu1  ;;  %v7639_v48 = vpop.f32.mrb[209].mxu0  ;;  %7647 = vmatprep.subr.bf16.mxu1 %v8356_v1  ;;  %v4205_v21 = vadd.f32 %v4204_v31, %v9620_v12 }
0x1948   : > { %v4207_v57 = vpop.f32.mrb[198].mxu1  ;;  %v9706_v10 = vpop.f32.mrb[210].mxu0 }
0x1949   : > { %v4208_v3 = vadd.f32 %v4207_v57, %v9620_v12  ;;  %v7624_v62 = vpop.f32.mrb[199].mxu1  ;;  %v7640_v39 = vpop.f32.mrb[211].mxu0 }
0x194b   : > { %v4287_v20 = vpack.c.bf16 %v4208_v3, %v4205_v21 }
0x194d   : > { %v4302_v53 = vsel %vm1074_vm2, %v4287_v20, 0 }
0x194e   : > { %v4212_v35 = vpop.f32.mrb[200].mxu1  ;;  %v9711_v63 = vpop.f32.mrb[212].mxu0  ;;  %7648 = vmatpush3.bf16.xpose.msra.mxu1 %v4302_v53 }
0x194f   : > { %v4213_v50 = vadd.f32 %v4212_v35, %v9620_v12  ;;  %v7627_v59 = vpop.f32.mrb[201].mxu1  ;;  %v7643_v38 = vpop.f32.mrb[213].mxu0  ;;  %7649 = vmatprep.subr.bf16.mxu1 %v8356_v1  ;;  %v4148_v12 = vadd.f32 %v4147_v32, %v9626_v29 }
0x1950   : > { %v4215_v58 = vpop.f32.mrb[202].mxu1  ;;  %v4280_v33 = vpop.f32.mrb[214].mxu0 }
0x1951   : > { %v4288_v5 = vpack.c.bf16 %v4213_v50, %v4213_v50  ;;  %v7628_v23 = vpop.f32.mrb[203].mxu1  ;;  %v7644_v41 = vpop.f32.mrb[215].mxu0  ;;  %v4285_v47 = vpack.c.bf16 %v4148_v12, %v4148_v12 }
0x1953   : > { %v4305_v44 = vsel %vm1074_vm2, %v4288_v5, 0 }
0x1956   : > { %7650 = vmatpush3.bf16.xpose.msra.mxu1 %v4305_v44 }
0x1957   : > { %7681 = vmatprep.subr.bf16.mxu1 %v8356_v1 }
0x195d   : > { %7652 = vmatmul.mubr.msk.bf16.vlgmr.msra.gmra.mrb[204].mxu1 %vm1074_vm2, %v4283_v46 }
0x195e   : > { %7655 = vmatprep.mubr.msk.bf16.mxu1 %vm8357_vm1, %v8356_v1 }
0x1965   : > { %7656 = vmatmul.mubr.msk.bf16.gmra.mrb[208].mxu1 %vm1074_vm2, %v4284_v7 }
0x1966   : > { %7659 = vmatprep.mubr.msk.bf16.mxu1 %vm8357_vm1, %v8356_v1 }
0x196d   : > { %7660 = vmatmul.mubr.msk.bf16.gmra.mrb[212].mxu1 %vm1074_vm2, %v4285_v47 }
0x196e   : > { %7683 = vmatprep.mubr.msk.bf16.mxu1 %vm8357_vm1, %v8356_v1 }
0x1a30   : > { %v4341_v40 = vpop.f32.mrb[204].mxu1 }
0x1a31   : > { %v4342_v30 = vadd.f32 %v4341_v40, %v8703_v52  ;;  %v7653_v46 = vpop.f32.mrb[205].mxu1 }
0x1a32   : > { %v4344_v61 = vpop.f32.mrb[206].mxu1 }
0x1a33   : > { %v4345_v4 = vadd.f32 %v4344_v61, %v8705_v55  ;;  %v7654_v45 = vpop.f32.mrb[207].mxu1  ;;  %v4363_v7 = vsel %vm1536_vm6, %v4342_v30, -inf }
0x1a34   : > { %4364 = vmax.xlane.f32.xlu1 %v4363_v7 }
0x1a35   : > { %v4366_v16 = vsel %vm1536_vm6, %v4345_v4, -inf }
0x1a36   : > { %4367 = vmax.xlane.f32.xlu0 %v4366_v16 }
0x1a38   : > { %v4349_v29 = vpop.f32.mrb[208].mxu1 }
0x1a39   : > { %v4350_v32 = vadd.f32 %v4349_v29, %v8711_v2  ;;  %v7657_v36 = vpop.f32.mrb[209].mxu1 }
0x1a3a   : > { %v4352_v27 = vpop.f32.mrb[210].mxu1  ;;  %v9751_v36 = vld [vmem:[%s8454_s20] sm:$0xff]  }
0x1a3b   : > { %v4353_v22 = vadd.f32 %v4352_v27, %v8713_v8  ;;  %v7658_v34 = vpop.f32.mrb[211].mxu1  ;;  %v4369_v24 = vsel %vm1536_vm6, %v4350_v32, -inf  ;;  %v9758_v27 = vld [vmem:[%s8454_s20 + $0x8] sm:$0xff]  }
0x1a3c   : > { %4370 = vmax.xlane.f32.xlu0 %v4369_v24 }
0x1a3d   : > { %v4372_v31 = vsel %vm1536_vm6, %v4353_v22, -inf }
0x1a40   : > { %4373 = vmax.xlane.f32.xlu0 %v4372_v31  ;;  %v4357_v18 = vpop.f32.mrb[212].mxu1 }
0x1a41   : > { %v4358_v48 = vadd.f32 %v4357_v18, %v8719_v19  ;;  %v7661_v57 = vpop.f32.mrb[213].mxu1 }
0x1a42   : > { %v4360_v21 = vpop.f32.mrb[214].mxu1 }
0x1a43   : > { %v7662_v3 = vpop.f32.mrb[215].mxu1  ;;  %v4375_v62 = vsel %vm1536_vm6, %v4358_v48, -inf }
0x1a44   : > { %4376 = vmax.xlane.f32.xlu1 %v4375_v62 }
0x1ac1   : > { %v4365_v39 = vpop.xlane.xlu1 %4364 }
0x1ac2   : > { %v4378_v20 = vsub.f32 %v4342_v30, %v4365_v39 }
0x1ac3   : > { %v4368_v53 = vpop.xlane.xlu0 %4367 }
0x1ac4   : > { %v4383_v35 = vmul.f32 1.442695, %v4378_v20  ;;  %v4379_v50 = vsub.f32 %v4345_v4, %v4368_v53 }
0x1ac6   : > { %8208 = vpow2.f32 %v4383_v35  ;;  %v4385_v59 = vmul.f32 1.442695, %v4379_v50 }
0x1ac8   : > { %8210 = vpow2.f32 %v4385_v59 }
0x1ac9   : > { %v4371_v38 = vpop.xlane.xlu0 %4370 }
0x1aca   : > { %v4380_v58 = vsub.f32 %v4350_v32, %v4371_v38 }
0x1acc   : > { %v4387_v33 = vmul.f32 1.442695, %v4380_v58 }
0x1acd   : > { %v4374_v5 = vpop.xlane.xlu0 %4373 }
0x1ace   : > { %8212 = vpow2.f32 %v4387_v33  ;;  %v4381_v23 = vsub.f32 %v4353_v22, %v4374_v5  ;;  %v6680_v22 = vld [vmem:[%s10361_s18 + $0x4] sm:$0xf] }
0x1acf   : > { %v4507_v34 = vsel %vm1084_vm0, %v6680_v22, 0 }
0x1ad0   : > { %v8209_v41 = vpop.eup %8208  ;;  %v4389_v44 = vmul.f32 1.442695, %v4381_v23  ;;  %7682 = vmatpush3.bf16.msra.mxu1 %v4507_v34 }
0x1ad1   : > { %v4377_v12 = vpop.xlane.xlu1 %4376  ;;  %v4393_v47 = vsel %vm1536_vm6, %v8209_v41, 0.0  ;;  %7709 = vmatprep.subr.bf16.mxu1 %v8356_v1 }
0x1ad2   : > { %v8211_v40 = vpop.eup %8210  ;;  %8214 = vpow2.f32 %v4389_v44  ;;  %v4382_v30 = vsub.f32 %v4358_v48, %v4377_v12  ;;  %4394 = vadd.xlane.f32.xlu0 %v4393_v47 }
0x1ad3   : > { %v4396_v46 = vsel %vm1536_vm6, %v8211_v40, 0.0 }
0x1ad4   : > { %v4391_v61 = vmul.f32 1.442695, %v4382_v30  ;;  %4397 = vadd.xlane.f32.xlu1 %v4396_v46 }
0x1ad6   : > { %8216 = vpow2.f32 %v4391_v61 }
0x1ad8   : > { %v9739_v4 = vpop.eup %8212 }
0x1ad9   : > { %v4399_v45 = vsel %vm1536_vm6, %v9739_v4, 0.0 }
0x1ada   : > { %4400 = vadd.xlane.f32.xlu0 %v4399_v45 }
0x1adc   : > { %v8215_v7 = vpop.eup %8214 }
0x1add   : > { %v4402_v16 = vsel %vm1536_vm6, %v8215_v7, 0.0 }
0x1ade   : > { %4403 = vadd.xlane.f32.xlu1 %v4402_v16 }
0x1ae0   : > { %v9744_v29 = vpop.eup %8216 }
0x1ae1   : > { %v4405_v32 = vsel %vm1536_vm6, %v9744_v29, 0.0 }
0x1ae2   : > { %4406 = vadd.xlane.f32.xlu1 %v4405_v32 }
0x1af0   : > { %4224 = vrot.lane.b32.xlu0 %v9451_v51, %s8363_s26  ;;  %s10364_s26 = sld [smem:[#allocation6_spill]] }
0x1af3   : > { %4698 = vrot.lane.b32.xlu1 %v9751_v36, %s8364_s28 }
0x1af4   : > { %4633 = vrot.lane.b32.xlu0 %v9751_v36, %s8365_s1 }
0x1af7   : > { %4700 = vrot.lane.b32.xlu1 %v9758_v27, %s8364_s28 }
0x1af8   : > { %4704 = vrot.lane.b32.xlu0 %v9451_v51, %s8364_s28  ;;  %s10365_s28 = sld [smem:[#allocation9_spill]] }
0x1afb   : > { %4635 = vrot.lane.b32.xlu1 %v9758_v27, %s8365_s1 }
0x1afc   : > { %4763 = vrot.lane.b32.xlu0 %v9751_v36, %s8366_s2 }
0x1aff   : > { %4639 = vrot.lane.b32.xlu1 %v9451_v51, %s8365_s1  ;;  %s10366_s1 = sld [smem:[#allocation11_spill]] }
0x1b03   : > { %4765 = vrot.lane.b32.xlu1 %v9758_v27, %s8366_s2 }
0x1b5f   : > { %v4395_v24 = vpop.xlane.xlu0 %4394 }
0x1b61   : > { %v4398_v31 = vpop.xlane.xlu1 %4397 }
0x1b62   : > { %8218 = vrcp.f32 %v4398_v31 }
0x1b63   : > { %8220 = vrcp.f32 %v4395_v24 }
0x1b67   : > { %v4401_v18 = vpop.xlane.xlu0 %4400 }
0x1b6b   : > { %v4225_v48 = vpop.permute.xlu0 %4224  ;;  %v4404_v62 = vpop.xlane.xlu1 %4403 }
0x1b6c   : > { %v4262_v57 = vadd.f32 %v9696_v56, %v4225_v48  ;;  %v4265_v21 = vadd.f32 %v9698_v9, %v4225_v48  ;;  %v4270_v51 = vadd.f32 %v9703_v6, %v4225_v48  ;;  %v4273_v3 = vadd.f32 %v9706_v10, %v4225_v48  ;;  %v8219_v35 = vpop.eup %8218  ;;  %v4087_v6 = vld [vmem:[%s10361_s18] sm:$0xf] }
0x1b6d   : > { %v4278_v53 = vadd.f32 %v9711_v63, %v4225_v48  ;;  %8222 = vrcp.f32 %v4404_v62  ;;  %v8221_v56 = vpop.eup %8220  ;;  %v4414_v9 = vmul.f32 %v8219_v35, %v8211_v40  ;;  %v4575_v58 = vsel %vm1084_vm0, %v4087_v6, 0 }
0x1b6e   : > { %v4421_v39 = vpack.c.bf16 %v4265_v21, %v4262_v57  ;;  %v4422_v20 = vpack.c.bf16 %v4273_v3, %v4270_v51  ;;  %8224 = vrcp.f32 %v4401_v18  ;;  %v4413_v10 = vmul.f32 %v8221_v56, %v8209_v41 }
0x1b6f   : > { %v4423_v50 = vpack.c.bf16 %v4278_v53, %v4278_v53  ;;  %v4407_v59 = vpop.xlane.xlu1 %4406  ;;  %v4634_v17 = vpop.permute.xlu0 %4633 }
0x1b70   : > { %7664 = vmatpush3.bf16.msra.mxu0 %v4421_v39  ;;  %8226 = vrcp.f32 %v4407_v59  ;;  %v4418_v63 = vpack.c.bf16 %v4414_v9, %v4413_v10 }
0x1b71   : > { %7665 = vmatprep.subr.bf16.mxu0 %v8356_v1  ;;  %v4434_v38 = vsel %vm1084_vm0, %v4423_v50, 0 }
0x1b73   : > { %v4699_v30 = vpop.permute.xlu1 %4698  ;;  %v4705_v18 = vpop.permute.xlu0 %4704 }
0x1b74   : > { %7666 = vmatpush3.bf16.msra.mxu0 %v4422_v20 }
0x1b75   : > { %7667 = vmatprep.subr.bf16.mxu0 %v8356_v1 }
0x1b77   : > { %v8223_v33 = vpop.eup %8222  ;;  %v4701_v46 = vpop.permute.xlu1 %4700 }
0x1b78   : > { %7668 = vmatpush3.bf16.msra.mxu0 %v4434_v38  ;;  %v8225_v5 = vpop.eup %8224  ;;  %v4416_v23 = vmul.f32 %v8223_v33, %v8215_v7  ;;  %v4764_v62 = vpop.permute.xlu0 %4763 }
0x1b79   : > { %7695 = vmatprep.subr.bf16.mxu0 %v8356_v1  ;;  %v4415_v41 = vmul.f32 %v8225_v5, %v9739_v4 }
0x1b7a   : > { %v8227_v12 = vpop.eup %8226 }
0x1b7b   : > { %7670 = vmatmul.mubr.msk.bf16.vlgmr.msra.gmra.mrb[216].mxu0 %vm1536_vm6, %v4418_v63  ;;  %v4419_v44 = vpack.c.bf16 %v4416_v23, %v4415_v41  ;;  %v4417_v47 = vmul.f32 %v8227_v12, %v9744_v29  ;;  %v4636_v61 = vpop.permute.xlu1 %4635 }
0x1b7c   : > { %7673 = vmatprep.mubr.msk.bf16.mxu0 %vm8357_vm1, %v8356_v1  ;;  %7696 = vmatpush3.bf16.msra.mxu0 %v4575_v58 }
0x1b7d   : > { %7725 = vmatprep.subr.bf16.mxu0 %v8356_v1  ;;  %v4420_v40 = vpack.c.bf16 %v4417_v47, %v4417_v47 }
0x1b7f   : > { %v9840_v21 = vpop.permute.xlu1 %4639 }
0x1b83   : > { %7674 = vmatmul.mubr.msk.bf16.gmra.mrb[220].mxu0 %vm1536_vm6, %v4419_v44  ;;  %v4766_v39 = vpop.permute.xlu1 %4765 }
0x1b84   : > { %7677 = vmatprep.mubr.msk.bf16.mxu0 %vm8357_vm1, %v8356_v1 }
0x1b8b   : > { %7678 = vmatmul.mubr.msk.bf16.gmra.mrb[224].mxu0 %vm1536_vm6, %v4420_v40 }
0x1b8c   : > { %7697 = vmatprep.mubr.msk.bf16.mxu0 %vm8357_vm1, %v8356_v1 }
0x1b93   : > { %7698 = vmatmul.mubr.msk.bf16.vlgmr.msra.gmra.mrb[228].mxu0 %vm1074_vm2, %v4084_v54 }
0x1b94   : > { %7701 = vmatprep.mubr.msk.bf16.mxu0 %vm8357_vm1, %v8356_v1  ;;  %7726 = vmatpush3.bf16.msra.mxu0 %v4699_v30 }
0x1b95   : > { %7727 = vmatprep.subr.bf16.mxu0 %v8356_v1 }
0x1b98   : > { %7728 = vmatpush3.bf16.msra.mxu0 %v4701_v46 }
0x1b99   : > { %7757 = vmatprep.subr.bf16.mxu0 %v8356_v1 }
0x1b9b   : > { %7702 = vmatmul.mubr.msk.bf16.gmra.mrb[232].mxu0 %vm1074_vm2, %v4085_v43 }
0x1b9c   : > { %7705 = vmatprep.mubr.msk.bf16.mxu0 %vm8357_vm1, %v8356_v1 }
0x1ba3   : > { %7706 = vmatmul.mubr.msk.bf16.gmra.mrb[236].mxu0 %vm1074_vm2, %v4086_v25 }
0x1ba4   : > { %7729 = vmatprep.mubr.msk.bf16.mxu0 %vm8357_vm1, %v8356_v1 }
0x1bab   : > { %7730 = vmatmul.mubr.msk.bf16.vlgmr.msra.gmra.mrb[240].mxu0 %vm1260_vm3, %v9476_v60 }
0x1bac   : > { %7733 = vmatprep.mubr.msk.bf16.mxu0 %vm8357_vm1, %v8356_v1 }
0x1bb3   : > { %7734 = vmatmul.mubr.msk.bf16.gmra.mrb[244].mxu0 %vm1260_vm3, %v9495_v42 }
0x1bb4   : > { %7737 = vmatprep.mubr.msk.bf16.mxu0 %vm8357_vm1, %v8356_v1 }
0x1bbb   : > { %7738 = vmatmul.mubr.msk.bf16.gmra.mrb[248].mxu0 %vm1260_vm3, %v9510_v0 }
0x1bbc   : > { %7763 = vmatprep.mubr.msk.bf16.mxu0 %vm8357_vm1, %v8356_v1 }
0x1c4e   : > { %v4470_v14 = vpop.f32.mrb[216].mxu0 }
0x1c4f   : > { %v7671_v54 = vpop.f32.mrb[217].mxu0 }
0x1c50   : > { %v4473_v49 = vpop.f32.mrb[218].mxu0 }
0x1c51   : > { %v4492_v11 = vpack.c.bf16 %v4473_v49, %v4470_v14  ;;  %v7672_v43 = vpop.f32.mrb[219].mxu0 }
0x1c53   : > { %7684 = vmatmul.mubr.msk.bf16.vlgmr.msra.gmra.mrb[216].mxu1 %vm1074_vm2, %v4492_v11 }
0x1c54   : > { %7687 = vmatprep.mubr.msk.bf16.mxu1 %vm8357_vm1, %v8356_v1  ;;  %7710 = vmatpush3.bf16.msra.mxu1 %v4634_v17 }
0x1c55   : > { %7711 = vmatprep.subr.bf16.mxu1 %v8356_v1 }
0x1c56   : > { %v4478_v4 = vpop.f32.mrb[220].mxu0 }
0x1c57   : > { %v7675_v45 = vpop.f32.mrb[221].mxu0 }
0x1c58   : > { %v4481_v7 = vpop.f32.mrb[222].mxu0  ;;  %7712 = vmatpush3.bf16.msra.mxu1 %v4636_v61 }
0x1c59   : > { %v4493_v16 = vpack.c.bf16 %v4481_v7, %v4478_v4  ;;  %v7676_v29 = vpop.f32.mrb[223].mxu0  ;;  %7741 = vmatprep.subr.bf16.mxu1 %v8356_v1 }
0x1c5b   : > { %7688 = vmatmul.mubr.msk.bf16.gmra.mrb[220].mxu1 %vm1074_vm2, %v4493_v16 }
0x1c5c   : > { %7691 = vmatprep.mubr.msk.bf16.mxu1 %vm8357_vm1, %v8356_v1 }
0x1c5e   : > { %v4486_v32 = vpop.f32.mrb[224].mxu0 }
0x1c5f   : > { %v7679_v22 = vpop.f32.mrb[225].mxu0  ;;  %v4494_v24 = vpack.c.bf16 %v4486_v32, %v4486_v32 }
0x1c60   : > { %v4489_v34 = vpop.f32.mrb[226].mxu0 }
0x1c61   : > { %v7680_v31 = vpop.f32.mrb[227].mxu0 }
0x1c63   : > { %7692 = vmatmul.mubr.msk.bf16.gmra.mrb[224].mxu1 %vm1074_vm2, %v4494_v24 }
0x1c64   : > { %7713 = vmatprep.mubr.msk.bf16.mxu1 %vm8357_vm1, %v8356_v1 }
0x1c66   : > { %v4611_v48 = vpop.f32.mrb[228].mxu0 }
0x1c67   : > { %v7699_v57 = vpop.f32.mrb[229].mxu0 }
0x1c68   : > { %v4614_v51 = vpop.f32.mrb[230].mxu0 }
0x1c69   : > { %v7700_v3 = vpop.f32.mrb[231].mxu0 }
0x1c6b   : > { %7714 = vmatmul.mubr.msk.bf16.vlgmr.msra.gmra.mrb[228].mxu1 %vm1260_vm3, %v9476_v60 }
0x1c6c   : > { %7717 = vmatprep.mubr.msk.bf16.mxu1 %vm8357_vm1, %v8356_v1  ;;  %7742 = vmatpush3.bf16.msra.mxu1 %v4764_v62 }
0x1c6d   : > { %7743 = vmatprep.subr.bf16.mxu1 %v8356_v1 }
0x1c6e   : > { %v4619_v20 = vpop.f32.mrb[232].mxu0 }
0x1c6f   : > { %v7703_v53 = vpop.f32.mrb[233].mxu0 }
0x1c70   : > { %v4622_v35 = vpop.f32.mrb[234].mxu0  ;;  %7744 = vmatpush3.bf16.msra.mxu1 %v4766_v39 }
0x1c71   : > { %v7704_v50 = vpop.f32.mrb[235].mxu0  ;;  %7775 = vmatprep.subr.bf16.mxu1 %v8356_v1 }
0x1c73   : > { %7718 = vmatmul.mubr.msk.bf16.gmra.mrb[232].mxu1 %vm1260_vm3, %v9495_v42 }
0x1c74   : > { %7721 = vmatprep.mubr.msk.bf16.mxu1 %vm8357_vm1, %v8356_v1 }
0x1c76   : > { %v4627_v56 = vpop.f32.mrb[236].mxu0 }
0x1c77   : > { %v7707_v9 = vpop.f32.mrb[237].mxu0 }
0x1c78   : > { %v4630_v59 = vpop.f32.mrb[238].mxu0 }
0x1c79   : > { %v7708_v6 = vpop.f32.mrb[239].mxu0 }
0x1c7b   : > { %7722 = vmatmul.mubr.msk.bf16.gmra.mrb[236].mxu1 %vm1260_vm3, %v9510_v0 }
0x1c7c   : > { %7745 = vmatprep.mubr.msk.bf16.mxu1 %vm8357_vm1, %v8356_v1 }
0x1c7e   : > { %v4741_v10 = vpop.f32.mrb[240].mxu0 }
0x1c7f   : > { %v7731_v38 = vpop.f32.mrb[241].mxu0  ;;  %v4742_v58 = vadd.f32 %v4741_v10, %v4705_v18 }
0x1c80   : > { %v4744_v63 = vpop.f32.mrb[242].mxu0 }
0x1c81   : > { %v4745_v33 = vadd.f32 %v4744_v63, %v4705_v18  ;;  %v7732_v5 = vpop.f32.mrb[243].mxu0 }
0x1c83   : > { %v4831_v23 = vpack.c.bf16 %v4745_v33, %v4742_v58  ;;  %7746 = vmatmul.mubr.msk.bf16.vlgmr.msra.gmra.mrb[240].mxu1 %vm1260_vm3, %v9476_v60 }
0x1c84   : > { %7749 = vmatprep.mubr.msk.bf16.mxu1 %vm8357_vm1, %v8356_v1 }
0x1c85   : > { %v4844_v41 = vsel %vm1074_vm2, %v4831_v23, 0 }
0x1c86   : > { %v4749_v44 = vpop.f32.mrb[244].mxu0  ;;  %7758 = vmatpush3.bf16.xpose.msra.mxu0 %v4844_v41 }
0x1c87   : > { %v7735_v12 = vpop.f32.mrb[245].mxu0  ;;  %7759 = vmatprep.subr.bf16.mxu0 %v8356_v1  ;;  %v4750_v40 = vadd.f32 %v4749_v44, %v4705_v18 }
0x1c88   : > { %v4752_v47 = vpop.f32.mrb[246].mxu0 }
0x1c89   : > { %v4753_v30 = vadd.f32 %v4752_v47, %v4705_v18  ;;  %v7736_v46 = vpop.f32.mrb[247].mxu0 }
0x1c8b   : > { %v4832_v25 = vpack.c.bf16 %v4753_v30, %v4750_v40  ;;  %7750 = vmatmul.mubr.msk.bf16.gmra.mrb[244].mxu1 %vm1260_vm3, %v9495_v42 }
0x1c8c   : > { %7753 = vmatprep.mubr.msk.bf16.mxu1 %vm8357_vm1, %v8356_v1 }
0x1c8d   : > { %v4847_v14 = vsel %vm1074_vm2, %v4832_v25, 0 }
0x1c8e   : > { %v4757_v54 = vpop.f32.mrb[248].mxu0  ;;  %7760 = vmatpush3.bf16.xpose.msra.mxu0 %v4847_v14 }
0x1c8f   : > { %v4758_v49 = vadd.f32 %v4757_v54, %v4705_v18  ;;  %v7739_v11 = vpop.f32.mrb[249].mxu0  ;;  %7761 = vmatprep.subr.bf16.mxu0 %v8356_v1 }
0x1c90   : > { %v4760_v43 = vpop.f32.mrb[250].mxu0 }
0x1c91   : > { %v4833_v17 = vpack.c.bf16 %v4758_v49, %v4758_v49  ;;  %v7740_v61 = vpop.f32.mrb[251].mxu0 }
0x1c93   : > { %7754 = vmatmul.mubr.msk.bf16.gmra.mrb[248].mxu1 %vm1260_vm3, %v9510_v0  ;;  %v4850_v4 = vsel %vm1074_vm2, %v4833_v17, 0 }
0x1c94   : > { %7781 = vmatprep.mubr.msk.bf16.mxu1 %vm8357_vm1, %v8356_v1 }
0x1c96   : > { %7762 = vmatpush3.bf16.xpose.msra.mxu0 %v4850_v4 }
0x1c97   : > { %7793 = vmatprep.subr.bf16.mxu0 %v8356_v1 }
0x1d26   : > { %v4543_v45 = vpop.f32.mrb[216].mxu1 }
0x1d27   : > { %v9874_v7 = vadd.f32 %v4611_v48, %v4543_v45  ;;  %v7685_v16 = vpop.f32.mrb[217].mxu1 }
0x1d28   : > { %v4546_v29 = vpop.f32.mrb[218].mxu1 }
0x1d29   : > { %v9876_v32 = vadd.f32 %v4614_v51, %v4546_v29  ;;  %v7686_v22 = vpop.f32.mrb[219].mxu1 }
0x1d2e   : > { %v4551_v34 = vpop.f32.mrb[220].mxu1 }
0x1d2f   : > { %v9878_v24 = vadd.f32 %v4619_v20, %v4551_v34  ;;  %v7689_v31 = vpop.f32.mrb[221].mxu1 }
0x1d30   : > { %v4554_v18 = vpop.f32.mrb[222].mxu1 }
0x1d31   : > { %v9880_v57 = vadd.f32 %v4622_v35, %v4554_v18  ;;  %v7690_v3 = vpop.f32.mrb[223].mxu1 }
0x1d36   : > { %v4559_v62 = vpop.f32.mrb[224].mxu1 }
0x1d37   : > { %v9882_v39 = vadd.f32 %v4627_v56, %v4559_v62  ;;  %v7693_v53 = vpop.f32.mrb[225].mxu1 }
0x1d38   : > { %v4562_v50 = vpop.f32.mrb[226].mxu1 }
0x1d39   : > { %v7694_v48 = vpop.f32.mrb[227].mxu1 }
0x1d3e   : > { %v4676_v9 = vpop.f32.mrb[228].mxu1 }
0x1d3f   : > { %v7715_v59 = vpop.f32.mrb[229].mxu1  ;;  %v4677_v51 = vadd.f32 %v4676_v9, %v9840_v21 }
0x1d40   : > { %v4679_v6 = vpop.f32.mrb[230].mxu1 }
0x1d41   : > { %v4680_v10 = vadd.f32 %v4679_v6, %v9840_v21  ;;  %v7716_v20 = vpop.f32.mrb[231].mxu1 }
0x1d43   : > { %v4828_v38 = vpack.c.bf16 %v4680_v10, %v4677_v51 }
0x1d45   : > { %7764 = vmatmul.mubr.msk.bf16.vlgmr.msra.gmra.mrb[252].mxu0 %vm1074_vm2, %v4828_v38 }
0x1d46   : > { %v4684_v35 = vpop.f32.mrb[232].mxu1  ;;  %7767 = vmatprep.mubr.msk.bf16.mxu0 %vm8357_vm1, %v8356_v1 }
0x1d47   : > { %v7719_v56 = vpop.f32.mrb[233].mxu1  ;;  %v4685_v58 = vadd.f32 %v4684_v35, %v9840_v21 }
0x1d48   : > { %v4687_v63 = vpop.f32.mrb[234].mxu1 }
0x1d49   : > { %v4688_v33 = vadd.f32 %v4687_v63, %v9840_v21  ;;  %v7720_v5 = vpop.f32.mrb[235].mxu1 }
0x1d4b   : > { %v4829_v23 = vpack.c.bf16 %v4688_v33, %v4685_v58 }
0x1d4d   : > { %7768 = vmatmul.mubr.msk.bf16.gmra.mrb[0].mxu0 %vm1074_vm2, %v4829_v23 }
0x1d4e   : > { %v4692_v41 = vpop.f32.mrb[236].mxu1  ;;  %7771 = vmatprep.mubr.msk.bf16.mxu0 %vm8357_vm1, %v8356_v1 }
0x1d4f   : > { %v4693_v44 = vadd.f32 %v4692_v41, %v9840_v21  ;;  %v7723_v12 = vpop.f32.mrb[237].mxu1 }
0x1d50   : > { %v4695_v47 = vpop.f32.mrb[238].mxu1 }
0x1d51   : > { %v7724_v40 = vpop.f32.mrb[239].mxu1  ;;  %v4830_v30 = vpack.c.bf16 %v4693_v44, %v4693_v44 }
0x1d55   : > { %7772 = vmatmul.mubr.msk.bf16.gmra.mrb[4].mxu0 %vm1074_vm2, %v4830_v30 }
0x1d56   : > { %v9896_v46 = vpop.f32.mrb[240].mxu1  ;;  %7795 = vmatprep.mubr.msk.bf16.mxu0 %vm8357_vm1, %v8356_v1 }
0x1d57   : > { %v7747_v25 = vpop.f32.mrb[241].mxu1 }
0x1d58   : > { %v9900_v14 = vpop.f32.mrb[242].mxu1 }
0x1d59   : > { %v7748_v54 = vpop.f32.mrb[243].mxu1 }
0x1d5e   : > { %v9902_v49 = vpop.f32.mrb[244].mxu1 }
0x1d5f   : > { %v7751_v11 = vpop.f32.mrb[245].mxu1 }
0x1d60   : > { %v9904_v43 = vpop.f32.mrb[246].mxu1 }
0x1d61   : > { %v7752_v21 = vpop.f32.mrb[247].mxu1 }
0x1d66   : > { %v9906_v17 = vpop.f32.mrb[248].mxu1 }
0x1d67   : > { %v7755_v61 = vpop.f32.mrb[249].mxu1 }
0x1d68   : > { %v4825_v4 = vpop.f32.mrb[250].mxu1 }
0x1d69   : > { %v7756_v45 = vpop.f32.mrb[251].mxu1 }
0x1e18   : > { %v4886_v16 = vpop.f32.mrb[252].mxu0 }
0x1e19   : > { %v4887_v29 = vadd.f32 %v4886_v16, %v8703_v52  ;;  %v7765_v22 = vpop.f32.mrb[253].mxu0 }
0x1e1a   : > { %v4889_v34 = vpop.f32.mrb[254].mxu0 }
0x1e1b   : > { %v4890_v31 = vadd.f32 %v4889_v34, %v8705_v55  ;;  %v7766_v18 = vpop.f32.mrb[255].mxu0  ;;  %v4908_v3 = vsel %vm1536_vm6, %v4887_v29, -inf }
0x1e1c   : > { %4909 = vmax.xlane.f32.xlu0 %v4908_v3 }
0x1e1d   : > { %v4911_v62 = vsel %vm1536_vm6, %v4890_v31, -inf }
0x1e1e   : > { %4912 = vmax.xlane.f32.xlu1 %v4911_v62 }
0x1e20   : > { %v4894_v53 = vpop.f32.mrb[0].mxu0 }
0x1e21   : > { %v4895_v50 = vadd.f32 %v4894_v53, %v8711_v2  ;;  %v7769_v48 = vpop.f32.mrb[1].mxu0 }
0x1e22   : > { %v4897_v9 = vpop.f32.mrb[2].mxu0  ;;  %v6702_v48 = vld [vmem:[%s10361_s18 + $0x8] sm:$0xf] }
0x1e23   : > { %v4898_v59 = vadd.f32 %v4897_v9, %v8713_v8  ;;  %v7770_v6 = vpop.f32.mrb[3].mxu0  ;;  %v4914_v51 = vsel %vm1536_vm6, %v4895_v50, -inf  ;;  %v5052_v9 = vsel %vm1084_vm0, %v6702_v48, 0 }
0x1e24   : > { %4915 = vmax.xlane.f32.xlu0 %v4914_v51  ;;  %7794 = vmatpush3.bf16.msra.mxu0 %v5052_v9 }
0x1e25   : > { %v4917_v10 = vsel %vm1536_vm6, %v4898_v59, -inf  ;;  %7823 = vmatprep.subr.bf16.mxu0 %v8356_v1 }
0x1e28   : > { %4918 = vmax.xlane.f32.xlu0 %v4917_v10  ;;  %v4902_v20 = vpop.f32.mrb[4].mxu0 }
0x1e29   : > { %v4903_v38 = vadd.f32 %v4902_v20, %v8719_v19  ;;  %v7773_v35 = vpop.f32.mrb[5].mxu0 }
0x1e2a   : > { %v4905_v56 = vpop.f32.mrb[6].mxu0 }
0x1e2b   : > { %v7774_v63 = vpop.f32.mrb[7].mxu0  ;;  %v4920_v58 = vsel %vm1536_vm6, %v4903_v38, -inf }
0x1e2c   : > { %4921 = vmax.xlane.f32.xlu0 %v4920_v58 }
0x1ea9   : > { %v4910_v33 = vpop.xlane.xlu0 %4909 }
0x1eaa   : > { %v4923_v5 = vsub.f32 %v4887_v29, %v4910_v33 }
0x1eab   : > { %v4913_v23 = vpop.xlane.xlu1 %4912 }
0x1eac   : > { %v4928_v41 = vmul.f32 1.442695, %v4923_v5  ;;  %v4924_v44 = vsub.f32 %v4890_v31, %v4913_v23 }
0x1eae   : > { %8228 = vpow2.f32 %v4928_v41  ;;  %v4930_v12 = vmul.f32 1.442695, %v4924_v44 }
0x1eb0   : > { %8230 = vpow2.f32 %v4930_v12 }
0x1eb1   : > { %v4916_v47 = vpop.xlane.xlu0 %4915 }
0x1eb2   : > { %v4925_v40 = vsub.f32 %v4895_v50, %v4916_v47  ;;  %v9930_v50 = vld [vmem:[%s10358_s16] ss:$0 sm:$0xff] }
0x1eb4   : > { %v4932_v30 = vmul.f32 1.442695, %v4925_v40 }
0x1eb5   : > { %v4919_v25 = vpop.xlane.xlu0 %4918 }
0x1eb6   : > { %8232 = vpow2.f32 %v4932_v30  ;;  %v4926_v54 = vsub.f32 %v4898_v59, %v4919_v25 }
0x1eb8   : > { %v8229_v11 = vpop.eup %8228  ;;  %v4934_v21 = vmul.f32 1.442695, %v4926_v54 }
0x1eb9   : > { %v4922_v61 = vpop.xlane.xlu0 %4921  ;;  %v4938_v4 = vsel %vm1536_vm6, %v8229_v11, 0.0 }
0x1eba   : > { %v8231_v45 = vpop.eup %8230  ;;  %8234 = vpow2.f32 %v4934_v21  ;;  %v4927_v16 = vsub.f32 %v4903_v38, %v4922_v61  ;;  %4939 = vadd.xlane.f32.xlu1 %v4938_v4 }
0x1ebb   : > { %v4941_v29 = vsel %vm1536_vm6, %v8231_v45, 0.0 }
0x1ebc   : > { %v4936_v22 = vmul.f32 1.442695, %v4927_v16  ;;  %4942 = vadd.xlane.f32.xlu0 %v4941_v29 }
0x1ebe   : > { %8236 = vpow2.f32 %v4936_v22 }
0x1ec0   : > { %v9920_v34 = vpop.eup %8232 }
0x1ec1   : > { %v4944_v31 = vsel %vm1536_vm6, %v9920_v34, 0.0 }
0x1ec2   : > { %4945 = vadd.xlane.f32.xlu1 %v4944_v31 }
0x1ec4   : > { %v8235_v18 = vpop.eup %8234 }
0x1ec5   : > { %v4947_v3 = vsel %vm1536_vm6, %v8235_v18, 0.0 }
0x1ec6   : > { %4948 = vadd.xlane.f32.xlu0 %v4947_v3 }
0x1ec8   : > { %v9925_v62 = vpop.eup %8236 }
0x1ec9   : > { %v4950_v53 = vsel %vm1536_vm6, %v9925_v62, 0.0 }
0x1eca   : > { %4951 = vadd.xlane.f32.xlu0 %v4950_v53 }
0x1ed3   : > { %4769 = vrot.lane.b32.xlu1 %v9930_v50, %s8366_s2  ;;  %s10367_s2 = sld [smem:[#allocation7_spill]] }
0x1ed7   : > { %5182 = vrot.lane.b32.xlu1 %v9758_v27, %s8367_s0 }
0x1edb   : > { %5115 = vrot.lane.b32.xlu1 %v9751_v36, %s10362_s22 }
0x1edf   : > { %5117 = vrot.lane.b32.xlu1 %v9758_v27, %s10362_s22 }
0x1ee0   : > { %5180 = vrot.lane.b32.xlu0 %v9751_v36, %s8367_s0 }
0x1ee3   : > { %5186 = vrot.lane.b32.xlu1 %v9930_v50, %s8367_s0  ;;  %s10368_s0 = sld [smem:[#allocation8_spill]] }
0x1ee4   : > { %5121 = vrot.lane.b32.xlu0 %v9930_v50, %s10362_s22  ;;  %s10371_s22 = sld [smem:[#allocation17_spill]] }
0x1ee7   : > { %5245 = vrot.lane.b32.xlu1 %v9751_v36, %s10363_s23 }
0x1ee8   : > { %5247 = vrot.lane.b32.xlu0 %v9758_v27, %s10363_s23 }
0x1f47   : > { %v4940_v59 = vpop.xlane.xlu1 %4939 }
0x1f49   : > { %v4943_v6 = vpop.xlane.xlu0 %4942 }
0x1f4a   : > { %8238 = vrcp.f32 %v4943_v6 }
0x1f4b   : > { %8240 = vrcp.f32 %v4940_v59 }
0x1f4f   : > { %v4946_v51 = vpop.xlane.xlu1 %4945 }
0x1f53   : > { %v4770_v10 = vpop.permute.xlu1 %4769  ;;  %v4949_v35 = vpop.xlane.xlu0 %4948 }
0x1f54   : > { %v4807_v20 = vadd.f32 %v9896_v46, %v4770_v10  ;;  %v4810_v38 = vadd.f32 %v9900_v14, %v4770_v10  ;;  %v4815_v36 = vadd.f32 %v9902_v49, %v4770_v10  ;;  %v4818_v27 = vadd.f32 %v9904_v43, %v4770_v10  ;;  %v8239_v5 = vpop.eup %8238 }
0x1f55   : > { %v4823_v58 = vadd.f32 %v9906_v17, %v4770_v10  ;;  %8242 = vrcp.f32 %v4949_v35  ;;  %v8241_v23 = vpop.eup %8240  ;;  %v4959_v14 = vmul.f32 %v8239_v5, %v8231_v45 }
0x1f56   : > { %v4966_v56 = vpack.c.bf16 %v4810_v38, %v4807_v20  ;;  %v4967_v63 = vpack.c.bf16 %v4818_v27, %v4815_v36  ;;  %8244 = vrcp.f32 %v4946_v51  ;;  %v4958_v43 = vmul.f32 %v8241_v23, %v8229_v11 }
0x1f57   : > { %v9959_v33 = vpop.permute.xlu1 %5182  ;;  %v4968_v46 = vpack.c.bf16 %v4823_v58, %v4823_v58  ;;  %v4952_v49 = vpop.xlane.xlu0 %4951 }
0x1f58   : > { %7776 = vmatpush3.bf16.msra.mxu1 %v4966_v56  ;;  %8246 = vrcp.f32 %v4952_v49  ;;  %v4963_v17 = vpack.c.bf16 %v4959_v14, %v4958_v43 }
0x1f59   : > { %7777 = vmatprep.subr.bf16.mxu1 %v8356_v1  ;;  %v4979_v41 = vsel %vm1084_vm0, %v4968_v46, 0 }
0x1f5b   : > { %v5116_v44 = vpop.permute.xlu1 %5115  ;;  %v5181_v4 = vpop.permute.xlu0 %5180 }
0x1f5c   : > { %7778 = vmatpush3.bf16.msra.mxu1 %v4967_v63 }
0x1f5d   : > { %7779 = vmatprep.subr.bf16.mxu1 %v8356_v1 }
0x1f5f   : > { %v8243_v12 = vpop.eup %8242  ;;  %v5118_v30 = vpop.permute.xlu1 %5117 }
0x1f60   : > { %7780 = vmatpush3.bf16.msra.mxu1 %v4979_v41  ;;  %v8245_v47 = vpop.eup %8244  ;;  %v4961_v40 = vmul.f32 %v8243_v12, %v8235_v18  ;;  %v9979_v16 = vpop.permute.xlu0 %5121 }
0x1f61   : > { %7807 = vmatprep.subr.bf16.mxu1 %v8356_v1  ;;  %v4960_v25 = vmul.f32 %v8245_v47, %v9920_v34 }
0x1f62   : > { %v8247_v11 = vpop.eup %8246 }
0x1f63   : > { %7782 = vmatmul.mubr.msk.bf16.vlgmr.msra.gmra.mrb[252].mxu1 %vm1536_vm6, %v4963_v17  ;;  %v4964_v54 = vpack.c.bf16 %v4961_v40, %v4960_v25  ;;  %v4962_v21 = vmul.f32 %v8247_v11, %v9925_v62  ;;  %v9975_v45 = vpop.permute.xlu1 %5186 }
0x1f64   : > { %7785 = vmatprep.mubr.msk.bf16.mxu1 %vm8357_vm1, %v8356_v1  ;;  %7808 = vmatpush3.bf16.msra.mxu1 %v5116_v44  ;;  %v5248_v22 = vpop.permute.xlu0 %5247 }
0x1f65   : > { %7809 = vmatprep.subr.bf16.mxu1 %v8356_v1  ;;  %v4965_v61 = vpack.c.bf16 %v4962_v21, %v4962_v21 }
0x1f67   : > { %v5246_v29 = vpop.permute.xlu1 %5245 }
0x1f68   : > { %7810 = vmatpush3.bf16.msra.mxu1 %v5118_v30 }
0x1f69   : > { %7839 = vmatprep.subr.bf16.mxu1 %v8356_v1 }
0x1f6b   : > { %7786 = vmatmul.mubr.msk.bf16.gmra.mrb[0].mxu1 %vm1536_vm6, %v4964_v54 }
0x1f6c   : > { %7789 = vmatprep.mubr.msk.bf16.mxu1 %vm8357_vm1, %v8356_v1 }
0x1f73   : > { %7790 = vmatmul.mubr.msk.bf16.gmra.mrb[4].mxu1 %vm1536_vm6, %v4965_v61 }
0x1f74   : > { %7811 = vmatprep.mubr.msk.bf16.mxu1 %vm8357_vm1, %v8356_v1 }
0x1f7b   : > { %7812 = vmatmul.mubr.msk.bf16.vlgmr.msra.gmra.mrb[8].mxu1 %vm1260_vm3, %v9476_v60 }
0x1f7c   : > { %7815 = vmatprep.mubr.msk.bf16.mxu1 %vm8357_vm1, %v8356_v1  ;;  %7840 = vmatpush3.bf16.msra.mxu1 %v5246_v29 }
0x1f7d   : > { %7841 = vmatprep.subr.bf16.mxu1 %v8356_v1 }
0x1f80   : > { %7842 = vmatpush3.bf16.msra.mxu1 %v5248_v22 }
0x1f81   : > { %7873 = vmatprep.subr.bf16.mxu1 %v8356_v1 }
0x1f83   : > { %7816 = vmatmul.mubr.msk.bf16.gmra.mrb[12].mxu1 %vm1260_vm3, %v9495_v42 }
0x1f84   : > { %7819 = vmatprep.mubr.msk.bf16.mxu1 %vm8357_vm1, %v8356_v1 }
0x1f8b   : > { %7820 = vmatmul.mubr.msk.bf16.gmra.mrb[16].mxu1 %vm1260_vm3, %v9510_v0 }
0x1f8c   : > { %7843 = vmatprep.mubr.msk.bf16.mxu1 %vm8357_vm1, %v8356_v1 }
0x1f93   : > { %7844 = vmatmul.mubr.msk.bf16.vlgmr.msra.gmra.mrb[20].mxu1 %vm1260_vm3, %v9476_v60 }
0x1f94   : > { %7847 = vmatprep.mubr.msk.bf16.mxu1 %vm8357_vm1, %v8356_v1 }
0x1f9b   : > { %7848 = vmatmul.mubr.msk.bf16.gmra.mrb[24].mxu1 %vm1260_vm3, %v9495_v42 }
0x1f9c   : > { %7851 = vmatprep.mubr.msk.bf16.mxu1 %vm8357_vm1, %v8356_v1 }
0x1fa3   : > { %7852 = vmatmul.mubr.msk.bf16.gmra.mrb[28].mxu1 %vm1260_vm3, %v9510_v0 }
0x1fa4   : > { %7879 = vmatprep.mubr.msk.bf16.mxu1 %vm8357_vm1, %v8356_v1 }
0x2036   : > { %v5015_v34 = vpop.f32.mrb[252].mxu1 }
0x2037   : > { %v7783_v31 = vpop.f32.mrb[253].mxu1 }
0x2038   : > { %v5018_v18 = vpop.f32.mrb[254].mxu1 }
0x2039   : > { %v5037_v3 = vpack.c.bf16 %v5018_v18, %v5015_v34  ;;  %v7784_v62 = vpop.f32.mrb[255].mxu1 }
0x203b   : > { %7796 = vmatmul.mubr.msk.bf16.vlgmr.msra.gmra.mrb[8].mxu0 %vm1074_vm2, %v5037_v3 }
0x203c   : > { %7799 = vmatprep.mubr.msk.bf16.mxu0 %vm8357_vm1, %v8356_v1  ;;  %7824 = vmatpush3.bf16.msra.mxu0 %v5181_v4 }
0x203d   : > { %7825 = vmatprep.subr.bf16.mxu0 %v8356_v1 }
0x203e   : > { %v5023_v53 = vpop.f32.mrb[0].mxu1 }
0x203f   : > { %v7787_v48 = vpop.f32.mrb[1].mxu1 }
0x2040   : > { %v5026_v9 = vpop.f32.mrb[2].mxu1  ;;  %7826 = vmatpush3.bf16.msra.mxu0 %v9959_v33 }
0x2041   : > { %v5038_v59 = vpack.c.bf16 %v5026_v9, %v5023_v53  ;;  %v7788_v6 = vpop.f32.mrb[3].mxu1  ;;  %7855 = vmatprep.subr.bf16.mxu0 %v8356_v1 }
0x2043   : > { %7800 = vmatmul.mubr.msk.bf16.gmra.mrb[12].mxu0 %vm1074_vm2, %v5038_v59 }
0x2044   : > { %7803 = vmatprep.mubr.msk.bf16.mxu0 %vm8357_vm1, %v8356_v1 }
0x2046   : > { %v5031_v51 = vpop.f32.mrb[4].mxu1 }
0x2047   : > { %v7791_v10 = vpop.f32.mrb[5].mxu1  ;;  %v5039_v38 = vpack.c.bf16 %v5031_v51, %v5031_v51 }
0x2048   : > { %v5034_v20 = vpop.f32.mrb[6].mxu1 }
0x2049   : > { %v7792_v36 = vpop.f32.mrb[7].mxu1 }
0x204b   : > { %7804 = vmatmul.mubr.msk.bf16.gmra.mrb[16].mxu0 %vm1074_vm2, %v5039_v38 }
0x204c   : > { %7827 = vmatprep.mubr.msk.bf16.mxu0 %vm8357_vm1, %v8356_v1 }
0x204e   : > { %v5158_v27 = vpop.f32.mrb[8].mxu1 }
0x204f   : > { %v7813_v35 = vpop.f32.mrb[9].mxu1  ;;  %v10020_v63 = vadd.f32 %v5158_v27, %v9979_v16 }
0x2050   : > { %v5161_v56 = vpop.f32.mrb[10].mxu1 }
0x2051   : > { %v10023_v58 = vadd.f32 %v5161_v56, %v9979_v16  ;;  %v7814_v33 = vpop.f32.mrb[11].mxu1 }
0x2053   : > { %v5310_v5 = vpack.c.bf16 %v10023_v58, %v10020_v63  ;;  %7828 = vmatmul.mubr.msk.bf16.vlgmr.msra.gmra.mrb[20].mxu0 %vm1260_vm3, %v9476_v60 }
0x2054   : > { %7831 = vmatprep.mubr.msk.bf16.mxu0 %vm8357_vm1, %v8356_v1 }
0x2056   : > { %v5166_v46 = vpop.f32.mrb[12].mxu1 }
0x2057   : > { %v7817_v23 = vpop.f32.mrb[13].mxu1  ;;  %v10032_v49 = vadd.f32 %v5166_v46, %v9979_v16 }
0x2058   : > { %v5169_v14 = vpop.f32.mrb[14].mxu1 }
0x2059   : > { %v10035_v43 = vadd.f32 %v5169_v14, %v9979_v16  ;;  %v7818_v41 = vpop.f32.mrb[15].mxu1 }
0x205b   : > { %v5311_v44 = vpack.c.bf16 %v10035_v43, %v10032_v49  ;;  %7832 = vmatmul.mubr.msk.bf16.gmra.mrb[24].mxu0 %vm1260_vm3, %v9495_v42 }
0x205c   : > { %7835 = vmatprep.mubr.msk.bf16.mxu0 %vm8357_vm1, %v8356_v1 }
0x205e   : > { %v10043_v60 = vpop.f32.mrb[16].mxu1 }
0x205f   : > { %v7821_v17 = vpop.f32.mrb[17].mxu1 }
0x2060   : > { %v5177_v12 = vpop.f32.mrb[18].mxu1 }
0x2061   : > { %v7822_v47 = vpop.f32.mrb[19].mxu1 }
0x2063   : > { %7836 = vmatmul.mubr.msk.bf16.gmra.mrb[28].mxu0 %vm1260_vm3, %v9510_v0 }
0x2064   : > { %7861 = vmatprep.mubr.msk.bf16.mxu0 %vm8357_vm1, %v8356_v1 }
0x2066   : > { %v10049_v40 = vpop.f32.mrb[20].mxu1 }
0x2067   : > { %v7845_v30 = vpop.f32.mrb[21].mxu1 }
0x2068   : > { %v10051_v25 = vpop.f32.mrb[22].mxu1 }
0x2069   : > { %v7846_v42 = vpop.f32.mrb[23].mxu1 }
0x206e   : > { %v10053_v54 = vpop.f32.mrb[24].mxu1 }
0x206f   : > { %v7849_v11 = vpop.f32.mrb[25].mxu1 }
0x2070   : > { %v10055_v21 = vpop.f32.mrb[26].mxu1 }
0x2071   : > { %v7850_v61 = vpop.f32.mrb[27].mxu1 }
0x2076   : > { %v10057_v4 = vpop.f32.mrb[28].mxu1 }
0x2077   : > { %v7853_v29 = vpop.f32.mrb[29].mxu1 }
0x2078   : > { %v5307_v22 = vpop.f32.mrb[30].mxu1 }
0x2079   : > { %v7854_v0 = vpop.f32.mrb[31].mxu1 }
0x210e   : > { %v5088_v34 = vpop.f32.mrb[8].mxu0 }
0x210f   : > { %v10060_v31 = vadd.f32 %v5088_v34, %v9874_v7  ;;  %v7797_v18 = vpop.f32.mrb[9].mxu0 }
0x2110   : > { %v5091_v3 = vpop.f32.mrb[10].mxu0 }
0x2111   : > { %v10063_v62 = vadd.f32 %v5091_v3, %v9876_v32  ;;  %v7798_v53 = vpop.f32.mrb[11].mxu0 }
0x2116   : > { %v5096_v48 = vpop.f32.mrb[12].mxu0 }
0x2117   : > { %v10066_v9 = vadd.f32 %v5096_v48, %v9878_v24  ;;  %v7801_v59 = vpop.f32.mrb[13].mxu0 }
0x2118   : > { %v5099_v6 = vpop.f32.mrb[14].mxu0 }
0x2119   : > { %v10069_v51 = vadd.f32 %v5099_v6, %v9880_v57  ;;  %v7802_v10 = vpop.f32.mrb[15].mxu0 }
0x211e   : > { %v5104_v20 = vpop.f32.mrb[16].mxu0 }
0x211f   : > { %v10072_v7 = vadd.f32 %v5104_v20, %v9882_v39  ;;  %v7805_v38 = vpop.f32.mrb[17].mxu0 }
0x2120   : > { %v5107_v36 = vpop.f32.mrb[18].mxu0 }
0x2121   : > { %v7806_v27 = vpop.f32.mrb[19].mxu0 }
0x2126   : > { %v5223_v32 = vpop.f32.mrb[20].mxu0 }
0x2127   : > { %v7829_v35 = vpop.f32.mrb[21].mxu0  ;;  %v5224_v33 = vadd.f32 %v5223_v32, %v9975_v45 }
0x2128   : > { %v5226_v56 = vpop.f32.mrb[22].mxu0 }
0x2129   : > { %v5227_v24 = vadd.f32 %v5226_v56, %v9975_v45  ;;  %v7830_v46 = vpop.f32.mrb[23].mxu0 }
0x212b   : > { %v5313_v23 = vpack.c.bf16 %v5227_v24, %v5224_v33 }
0x212d   : > { %v5326_v57 = vsel %vm1074_vm2, %v5313_v23, 0 }
0x212e   : > { %v5231_v14 = vpop.f32.mrb[24].mxu0  ;;  %7856 = vmatpush3.bf16.xpose.msra.mxu0 %v5326_v57 }
0x212f   : > { %v7833_v41 = vpop.f32.mrb[25].mxu0  ;;  %7857 = vmatprep.subr.bf16.mxu0 %v8356_v1  ;;  %v5232_v17 = vadd.f32 %v5231_v14, %v9975_v45 }
0x2130   : > { %v5234_v39 = vpop.f32.mrb[26].mxu0 }
0x2131   : > { %v5235_v12 = vadd.f32 %v5234_v39, %v9975_v45  ;;  %v7834_v47 = vpop.f32.mrb[27].mxu0 }
0x2133   : > { %v5314_v30 = vpack.c.bf16 %v5235_v12, %v5232_v17 }
0x2135   : > { %v5329_v42 = vsel %vm1074_vm2, %v5314_v30, 0 }
0x2136   : > { %v5239_v11 = vpop.f32.mrb[28].mxu0  ;;  %7858 = vmatpush3.bf16.xpose.msra.mxu0 %v5329_v42 }
0x2137   : > { %v5240_v61 = vadd.f32 %v5239_v11, %v9975_v45  ;;  %v7837_v29 = vpop.f32.mrb[29].mxu0  ;;  %7859 = vmatprep.subr.bf16.mxu0 %v8356_v1  ;;  %v5175_v45 = vadd.f32 %v10043_v60, %v9979_v16 }
0x2138   : > { %v5242_v22 = vpop.f32.mrb[30].mxu0 }
0x2139   : > { %v5315_v0 = vpack.c.bf16 %v5240_v61, %v5240_v61  ;;  %v7838_v34 = vpop.f32.mrb[31].mxu0  ;;  %v5312_v3 = vpack.c.bf16 %v5175_v45, %v5175_v45 }
0x213b   : > { %v5332_v18 = vsel %vm1074_vm2, %v5315_v0, 0 }
0x213e   : > { %7860 = vmatpush3.bf16.xpose.msra.mxu0 %v5332_v18 }
0x213f   : > { %7891 = vmatprep.subr.bf16.mxu0 %v8356_v1 }
0x2145   : > { %7862 = vmatmul.mubr.msk.bf16.vlgmr.msra.gmra.mrb[32].mxu0 %vm1074_vm2, %v5310_v5 }
0x2146   : > { %7865 = vmatprep.mubr.msk.bf16.mxu0 %vm8357_vm1, %v8356_v1 }
0x214d   : > { %7866 = vmatmul.mubr.msk.bf16.gmra.mrb[36].mxu0 %vm1074_vm2, %v5311_v44 }
0x214e   : > { %7869 = vmatprep.mubr.msk.bf16.mxu0 %vm8357_vm1, %v8356_v1 }
0x2155   : > { %7870 = vmatmul.mubr.msk.bf16.gmra.mrb[40].mxu0 %vm1074_vm2, %v5312_v3 }
0x2156   : > { %7893 = vmatprep.mubr.msk.bf16.mxu0 %vm8357_vm1, %v8356_v1 }
0x2218   : > { %v5368_v63 = vpop.f32.mrb[32].mxu0 }
0x2219   : > { %v5369_v58 = vadd.f32 %v5368_v63, %v8703_v52  ;;  %v7863_v5 = vpop.f32.mrb[33].mxu0  ;;  %v6721_v63 = vld [vmem:[%s10361_s18 + $0xc] sm:$0xf] }
0x221a   : > { %v5371_v53 = vpop.f32.mrb[34].mxu0 }
0x221b   : > { %v5372_v49 = vadd.f32 %v5371_v53, %v8705_v55  ;;  %v7864_v43 = vpop.f32.mrb[35].mxu0  ;;  %v5390_v44 = vsel %vm1536_vm6, %v5369_v58, -inf }
0x221c   : > { %5391 = vmax.xlane.f32.xlu1 %v5390_v44 }
0x221d   : > { %v5393_v48 = vsel %vm1536_vm6, %v5372_v49, -inf }
0x221e   : > { %5394 = vmax.xlane.f32.xlu0 %v5393_v48 }
0x2220   : > { %v5376_v16 = vpop.f32.mrb[36].mxu0 }
0x2221   : > { %v5377_v60 = vadd.f32 %v5376_v16, %v8711_v2  ;;  %v7867_v59 = vpop.f32.mrb[37].mxu0 }
0x2222   : > { %v5379_v6 = vpop.f32.mrb[38].mxu0 }
0x2223   : > { %v5380_v10 = vadd.f32 %v5379_v6, %v8713_v8  ;;  %v7868_v20 = vpop.f32.mrb[39].mxu0  ;;  %v5396_v52 = vsel %vm1536_vm6, %v5377_v60, -inf }
0x2224   : > { %5397 = vmax.xlane.f32.xlu0 %v5396_v52 }
0x2225   : > { %v5399_v55 = vsel %vm1536_vm6, %v5380_v10, -inf }
0x2228   : > { %5400 = vmax.xlane.f32.xlu0 %v5399_v55  ;;  %v5384_v38 = vpop.f32.mrb[40].mxu0 }
0x2229   : > { %v5385_v36 = vadd.f32 %v5384_v38, %v8719_v19  ;;  %v7871_v27 = vpop.f32.mrb[41].mxu0 }
0x222a   : > { %v5387_v32 = vpop.f32.mrb[42].mxu0 }
0x222b   : > { %v7872_v35 = vpop.f32.mrb[43].mxu0  ;;  %v5402_v56 = vsel %vm1536_vm6, %v5385_v36, -inf }
0x222c   : > { %5403 = vmax.xlane.f32.xlu1 %v5402_v56 }
0x22a9   : > { %v5392_v2 = vpop.xlane.xlu1 %5391 }
0x22aa   : > { %v5405_v33 = vsub.f32 %v5369_v58, %v5392_v2  ;;  %v5534_v58 = vsel %vm1084_vm0, %v6721_v63, 0 }
0x22ab   : > { %v5395_v24 = vpop.xlane.xlu0 %5394  ;;  %7892 = vmatpush3.bf16.msra.mxu0 %v5534_v58 }
0x22ac   : > { %v5410_v8 = vmul.f32 1.442695, %v5405_v33  ;;  %v5406_v46 = vsub.f32 %v5372_v49, %v5395_v24  ;;  %7921 = vmatprep.subr.bf16.mxu0 %v8356_v1 }
0x22ae   : > { %8248 = vpow2.f32 %v5410_v8  ;;  %v5412_v23 = vmul.f32 1.442695, %v5406_v46 }
0x22b0   : > { %8250 = vpow2.f32 %v5412_v23 }
0x22b1   : > { %v5398_v57 = vpop.xlane.xlu0 %5397 }
0x22b2   : > { %v5407_v14 = vsub.f32 %v5377_v60, %v5398_v57 }
0x22b4   : > { %v5414_v41 = vmul.f32 1.442695, %v5407_v14 }
0x22b5   : > { %v5401_v39 = vpop.xlane.xlu0 %5400 }
0x22b6   : > { %8252 = vpow2.f32 %v5414_v41  ;;  %v5408_v19 = vsub.f32 %v5380_v10, %v5401_v39 }
0x22b8   : > { %v8249_v17 = vpop.eup %8248  ;;  %v5416_v12 = vmul.f32 1.442695, %v5408_v19 }
0x22b9   : > { %v5404_v47 = vpop.xlane.xlu1 %5403  ;;  %v5420_v30 = vsel %vm1536_vm6, %v8249_v17, 0.0 }
0x22ba   : > { %v8251_v42 = vpop.eup %8250  ;;  %8254 = vpow2.f32 %v5416_v12  ;;  %v5409_v11 = vsub.f32 %v5385_v36, %v5404_v47  ;;  %5421 = vadd.xlane.f32.xlu0 %v5420_v30 }
0x22bb   : > { %v5423_v61 = vsel %vm1536_vm6, %v8251_v42, 0.0 }
0x22bc   : > { %v5418_v29 = vmul.f32 1.442695, %v5409_v11  ;;  %5424 = vadd.xlane.f32.xlu1 %v5423_v61 }
0x22be   : > { %8256 = vpow2.f32 %v5418_v29  ;;  %v6725_v29 = vld [vmem:[%s10364_s26] ss:$0 sm:$0xff] }
0x22c0   : > { %v8253_v22 = vpop.eup %8252 }
0x22c1   : > { %v5426_v0 = vsel %vm1536_vm6, %v8253_v22, 0.0 }
0x22c2   : > { %5427 = vadd.xlane.f32.xlu1 %v5426_v0 }
0x22c4   : > { %v8255_v34 = vpop.eup %8254 }
0x22c5   : > { %v5429_v18 = vsel %vm1536_vm6, %v8255_v34, 0.0 }
0x22c6   : > { %5430 = vadd.xlane.f32.xlu1 %v5429_v18 }
0x22c8   : > { %v8257_v45 = vpop.eup %8256 }
0x22c9   : > { %v5432_v3 = vsel %vm1536_vm6, %v8257_v45, 0.0 }
0x22ca   : > { %5433 = vadd.xlane.f32.xlu1 %v5432_v3 }
0x22d0   : > { %5251 = vrot.lane.b32.xlu0 %v9930_v50, %s10363_s23  ;;  %s10289_s23 = sshll.u32 %s10379_s10, 3  ;;  %s10372_s10 = sld [smem:[#allocation13_spill]] }
0x22d1   : > { %s1040_s26 = scalar_lea.vmem %s8534_s6, %s10289_s23 }
0x2347   : > { %v5422_v5 = vpop.xlane.xlu0 %5421 }
0x2348   : > { %8258 = vrcp.f32 %v5422_v5 }
0x2349   : > { %v5425_v53 = vpop.xlane.xlu1 %5424 }
0x234a   : > { %8260 = vrcp.f32 %v5425_v53 }
0x234b   : > { %v5252_v49 = vpop.permute.xlu0 %5251 }
0x234c   : > { %v5289_v43 = vadd.f32 %v10049_v40, %v5252_v49  ;;  %v5292_v44 = vadd.f32 %v10051_v25, %v5252_v49  ;;  %v5297_v48 = vadd.f32 %v10053_v54, %v5252_v49  ;;  %v5300_v16 = vadd.f32 %v10055_v21, %v5252_v49 }
0x234d   : > { %v5305_v6 = vadd.f32 %v10057_v4, %v5252_v49 }
0x234e   : > { %v5448_v50 = vpack.c.bf16 %v5292_v44, %v5289_v43  ;;  %v5449_v60 = vpack.c.bf16 %v5300_v16, %v5297_v48 }
0x234f   : > { %v5428_v59 = vpop.xlane.xlu1 %5427  ;;  %v5450_v52 = vpack.c.bf16 %v5305_v6, %v5305_v6 }
0x2350   : > { %7874 = vmatpush3.bf16.msra.mxu1 %v5448_v50  ;;  %8262 = vrcp.f32 %v5428_v59 }
0x2351   : > { %7875 = vmatprep.subr.bf16.mxu1 %v8356_v1  ;;  %v5461_v21 = vsel %vm1084_vm0, %v5450_v52, 0 }
0x2352   : > { %v8259_v10 = vpop.eup %8258 }
0x2353   : > { %v5431_v20 = vpop.xlane.xlu1 %5430  ;;  %v5440_v25 = vmul.f32 %v8259_v10, %v8249_v17 }
0x2354   : > { %v8261_v55 = vpop.eup %8260  ;;  %8264 = vrcp.f32 %v5431_v20  ;;  %7876 = vmatpush3.bf16.msra.mxu1 %v5449_v60 }
0x2355   : > { %v5441_v40 = vmul.f32 %v8261_v55, %v8251_v42  ;;  %7877 = vmatprep.subr.bf16.mxu1 %v8356_v1 }
0x2357   : > { %v5434_v54 = vpop.xlane.xlu1 %5433  ;;  %v5445_v4 = vpack.c.bf16 %v5441_v40, %v5440_v25 }
0x2358   : > { %8266 = vrcp.f32 %v5434_v54  ;;  %7878 = vmatpush3.bf16.msra.mxu1 %v5461_v21 }
0x2359   : > { %7905 = vmatprep.subr.bf16.mxu1 %v8356_v1 }
0x235a   : > { %v8263_v38 = vpop.eup %8262 }
0x235b   : > { %7880 = vmatmul.mubr.msk.bf16.vlgmr.msra.gmra.mrb[32].mxu1 %vm1536_vm6, %v5445_v4  ;;  %v5442_v27 = vmul.f32 %v8263_v38, %v8253_v22 }
0x235c   : > { %7883 = vmatprep.mubr.msk.bf16.mxu1 %vm8357_vm1, %v8356_v1 }
0x235e   : > { %v8265_v36 = vpop.eup %8264 }
0x235f   : > { %v5443_v32 = vmul.f32 %v8265_v36, %v8255_v34 }
0x2361   : > { %v5446_v35 = vpack.c.bf16 %v5443_v32, %v5442_v27 }
0x2362   : > { %v8267_v56 = vpop.eup %8266 }
0x2363   : > { %7884 = vmatmul.mubr.msk.bf16.gmra.mrb[36].mxu1 %vm1536_vm6, %v5446_v35  ;;  %v5444_v2 = vmul.f32 %v8267_v56, %v8257_v45 }
0x2364   : > { %7887 = vmatprep.mubr.msk.bf16.mxu1 %vm8357_vm1, %v8356_v1 }
0x2365   : > { %v5447_v33 = vpack.c.bf16 %v5444_v2, %v5444_v2 }
0x236b   : > { %7888 = vmatmul.mubr.msk.bf16.gmra.mrb[40].mxu1 %vm1536_vm6, %v5447_v33 }
0x236c   : > { %7909 = vmatprep.mubr.msk.bf16.mxu1 %vm8357_vm1, %v8356_v1 }
0x242e   : > { %v5497_v24 = vpop.f32.mrb[32].mxu1 }
0x242f   : > { %v7881_v8 = vpop.f32.mrb[33].mxu1 }
0x2430   : > { %v5500_v46 = vpop.f32.mrb[34].mxu1 }
0x2431   : > { %v5519_v23 = vpack.c.bf16 %v5500_v46, %v5497_v24  ;;  %v7882_v57 = vpop.f32.mrb[35].mxu1 }
0x2433   : > { %7894 = vmatmul.mubr.msk.bf16.vlgmr.msra.gmra.mrb[44].mxu0 %vm1074_vm2, %v5519_v23 }
0x2434   : > { %7897 = vmatprep.mubr.msk.bf16.mxu0 %vm8357_vm1, %v8356_v1 }
0x2436   : > { %v5505_v14 = vpop.f32.mrb[36].mxu1 }
0x2437   : > { %v7885_v41 = vpop.f32.mrb[37].mxu1 }
0x2438   : > { %v5508_v39 = vpop.f32.mrb[38].mxu1 }
0x2439   : > { %v5520_v19 = vpack.c.bf16 %v5508_v39, %v5505_v14  ;;  %v7886_v17 = vpop.f32.mrb[39].mxu1 }
0x243b   : > { %7898 = vmatmul.mubr.msk.bf16.gmra.mrb[48].mxu0 %vm1074_vm2, %v5520_v19 }
0x243c   : > { %7901 = vmatprep.mubr.msk.bf16.mxu0 %vm8357_vm1, %v8356_v1 }
0x243e   : > { %v5513_v12 = vpop.f32.mrb[40].mxu1 }
0x243f   : > { %v7889_v47 = vpop.f32.mrb[41].mxu1  ;;  %v5521_v42 = vpack.c.bf16 %v5513_v12, %v5513_v12  ;;  %v8052_v12 = vld [vmem:[%s10365_s28] sm:$0xff]  }
0x2440   : > { %v5516_v30 = vpop.f32.mrb[42].mxu1  ;;  %7906 = vmatpush3.bf16.msra.mxu1 %v8052_v12  ;;  %v8053_v47 = vld [vmem:[%s10365_s28 + $0x8] sm:$0xff]  }
0x2441   : > { %v7890_v11 = vpop.f32.mrb[43].mxu1  ;;  %7907 = vmatprep.subr.bf16.mxu1 %v8356_v1  ;;  %v8054_v30 = vld [vmem:[%s10366_s1] sm:$0xff]  }
0x2442   : > { %7922 = vmatpush3.bf16.msra.mxu0 %v8054_v30 }
0x2443   : > { %7902 = vmatmul.mubr.msk.bf16.gmra.mrb[52].mxu0 %vm1074_vm2, %v5521_v42  ;;  %v8055_v42 = vld [vmem:[%s10366_s1 + $0x8] sm:$0xff]   ;;  %7923 = vmatprep.subr.bf16.mxu0 %v8356_v1 }
0x2444   : > { %7929 = vmatprep.mubr.msk.bf16.mxu0 %vm8357_vm1, %v8356_v1  ;;  %7908 = vmatpush3.bf16.msra.mxu1 %v8053_v47 }
0x2445   : > { %7941 = vmatprep.subr.bf16.mxu1 %v8356_v1 }
0x2446   : > { %7924 = vmatpush3.bf16.msra.mxu0 %v8055_v42 }
0x2447   : > { %7925 = vmatprep.subr.bf16.mxu0 %v8356_v1 }
0x2506   : > { %v5570_v61 = vpop.f32.mrb[44].mxu0 }
0x2507   : > { %v5592_v22 = vadd.f32 %v5570_v61, %v10060_v31  ;;  %v7895_v0 = vpop.f32.mrb[45].mxu0 }
0x2508   : > { %v5573_v34 = vpop.f32.mrb[46].mxu0 }
0x2509   : > { %v5604_v18 = vadd.f32 %v6725_v29, %v5592_v22  ;;  %v5593_v45 = vadd.f32 %v5573_v34, %v10063_v62  ;;  %v7896_v3 = vpop.f32.mrb[47].mxu0 }
0x250b   : > { %v5605_v63 = vadd.f32 %v6725_v29, %v5593_v45  ;;  %v5609_v58 = vadd.f32 %v5604_v18, %v9469_v26 }
0x250d   : > { %v5616_v5 = vsel %vm1260_vm3, %v5609_v58, 0.0  ;;  %v5610_v53 = vadd.f32 %v5605_v63, %v9471_v15 }
0x250e   : > { %5617 = vadd.xlane.f32.xlu1 %v5616_v5  ;;  %v5578_v49 = vpop.f32.mrb[48].mxu0 }
0x250f   : > { %v5594_v43 = vadd.f32 %v5578_v49, %v10066_v9  ;;  %v7899_v44 = vpop.f32.mrb[49].mxu0  ;;  %v5619_v62 = vsel %vm1260_vm3, %v5610_v53, 0.0 }
0x2510   : > { %v5581_v48 = vpop.f32.mrb[50].mxu0 }
0x2511   : > { %v5606_v31 = vadd.f32 %v6725_v29, %v5594_v43  ;;  %v5595_v16 = vadd.f32 %v5581_v48, %v10069_v51  ;;  %v7900_v50 = vpop.f32.mrb[51].mxu0 }
0x2512   : > { %5620 = vadd.xlane.f32.xlu1 %v5619_v62 }
0x2513   : > { %v5607_v60 = vadd.f32 %v6725_v29, %v5595_v16  ;;  %v5611_v26 = vadd.f32 %v5606_v31, %v9491_v37 }
0x2515   : > { %v5622_v59 = vsel %vm1260_vm3, %v5611_v26, 0.0  ;;  %v5612_v15 = vadd.f32 %v5607_v60, %v9487_v13 }
0x2516   : > { %5623 = vadd.xlane.f32.xlu1 %v5622_v59  ;;  %v5586_v6 = vpop.f32.mrb[52].mxu0 }
0x2517   : > { %v5596_v9 = vadd.f32 %v5586_v6, %v10072_v7  ;;  %v7903_v10 = vpop.f32.mrb[53].mxu0  ;;  %v5625_v20 = vsel %vm1260_vm3, %v5612_v15, 0.0 }
0x2518   : > { %5626 = vadd.xlane.f32.xlu0 %v5625_v20  ;;  %v5589_v51 = vpop.f32.mrb[54].mxu0 }
0x2519   : > { %v5608_v52 = vadd.f32 %v6725_v29, %v5596_v9  ;;  %v7904_v55 = vpop.f32.mrb[55].mxu0 }
0x251b   : > { %v5613_v40 = vadd.f32 %v5608_v52, %v9506_v28 }
0x251d   : > { %v5628_v25 = vsel %vm1260_vm3, %v5613_v40, 0.0 }
0x251e   : > { %5629 = vadd.xlane.f32.xlu1 %v5628_v25 }
0x259b   : > { %v5618_v37 = vpop.xlane.xlu1 %5617 }
0x259c   : > { %v5631_v54 = vmul.f32 0.03125, %v5618_v37 }
0x259e   : > { %v10165_v21 = vsub.f32 %v5609_v58, %v5631_v54 }
0x259f   : > { %v5621_v13 = vpop.xlane.xlu1 %5620 }
0x25a0   : > { %v5632_v4 = vmul.f32 0.03125, %v5621_v13  ;;  %v5641_v7 = vmul.f32 %v10165_v21, %v10165_v21 }
0x25a2   : > { %v10169_v38 = vsub.f32 %v5610_v53, %v5632_v4  ;;  %v5646_v36 = vsel %vm1260_vm3, %v5641_v7, 0.0 }
0x25a3   : > { %v5624_v27 = vpop.xlane.xlu1 %5623  ;;  %5647 = vadd.xlane.f32.xlu1 %v5646_v36  ;;  %v6726_v36 = vld [vmem:[%s10367_s2] ss:$0 sm:$0xff]  ;;  %s1044_s2 = scalar_lea.vmem %s8539_s27, %s10289_s23 }
0x25a4   : > { %v5633_v32 = vmul.f32 0.03125, %v5624_v27  ;;  %v5642_v28 = vmul.f32 %v10169_v38, %v10169_v38 }
0x25a5   : > { %v5627_v35 = vpop.xlane.xlu0 %5626 }
0x25a6   : > { %v10174_v56 = vsub.f32 %v5611_v26, %v5633_v32  ;;  %v5634_v2 = vmul.f32 0.03125, %v5627_v35  ;;  %v5649_v33 = vsel %vm1260_vm3, %v5642_v28, 0.0 }
0x25a7   : > { %5650 = vadd.xlane.f32.xlu1 %v5649_v33 }
0x25a8   : > { %v10177_v24 = vsub.f32 %v5612_v15, %v5634_v2  ;;  %v5643_v8 = vmul.f32 %v10174_v56, %v10174_v56 }
0x25aa   : > { %v5652_v46 = vsel %vm1260_vm3, %v5643_v8, 0.0  ;;  %v5644_v23 = vmul.f32 %v10177_v24, %v10177_v24  ;;  %v6727_v8 = vld [vmem:[%s10368_s0] ss:$0 sm:$0xff]  ;;  %s10373_s0 = sld [smem:[#allocation14_spill]] }
0x25ab   : > { %5653 = vadd.xlane.f32.xlu1 %v5652_v46  ;;  %v5630_v57 = vpop.xlane.xlu1 %5629 }
0x25ac   : > { %v5635_v14 = vmul.f32 0.03125, %v5630_v57  ;;  %v5655_v39 = vsel %vm1260_vm3, %v5644_v23, 0.0 }
0x25ae   : > { %v10184_v41 = vsub.f32 %v5613_v40, %v5635_v14 }
0x25af   : > { %5656 = vadd.xlane.f32.xlu1 %v5655_v39 }
0x25b0   : > { %v5645_v19 = vmul.f32 %v10184_v41, %v10184_v41 }
0x25b2   : > { %v5658_v17 = vsel %vm1260_vm3, %v5645_v19, 0.0 }
0x25b3   : > { %5659 = vadd.xlane.f32.xlu1 %v5658_v17 }
0x2630   : > { %v5648_v11 = vpop.xlane.xlu1 %5647 }
0x2631   : > { %v5661_v61 = vmul.f32 0.03125, %v5648_v11 }
0x2633   : > { %v5666_v29 = vadd.f32 1e-05, %v5661_v61 }
0x2634   : > { %v5651_v22 = vpop.xlane.xlu1 %5650 }
0x2635   : > { %8268 = vrsqrt.f32 %v5666_v29  ;;  %v5662_v0 = vmul.f32 0.03125, %v5651_v22  ;;  %vm5673_vm0 = vcmp.eq.f32.partialorder %v5666_v29, inf  ;;  %v5676_v44 = vand.u32 2147483648, %v5666_v29  ;;  %v8057_v22 = vld [vmem:[%s10366_s1 + $0x18] sm:$0xff]  }
0x2636   : > { %vm5675_vm2 = vcmp.eq.f32.partialorder %v5666_v29, 0.0 }
0x2637   : > { %v5667_v34 = vadd.f32 1e-05, %v5662_v0  ;;  %v6728_v0 = vld [vmem:[%s10369_s15] ss:$0 sm:$0xff]  ;;  %s10374_s15 = sld [smem:[#allocation15_spill]] }
0x2638   : > { %v5654_v18 = vpop.xlane.xlu1 %5653 }
0x2639   : > { %v5663_v45 = vmul.f32 0.03125, %v5654_v18  ;;  %8270 = vrsqrt.f32 %v5667_v34  ;;  %vm5680_vm6 = vcmp.eq.f32.partialorder %v5667_v34, inf  ;;  %v5683_v26 = vand.u32 2147483648, %v5667_v34 }
0x263a   : > { %vm5682_vm10 = vcmp.eq.f32.partialorder %v5667_v34, 0.0 }
0x263b   : > { %v5668_v3 = vadd.f32 1e-05, %v5663_v45 }
0x263c   : > { %v5657_v63 = vpop.xlane.xlu1 %5656 }
0x263d   : > { %8272 = vrsqrt.f32 %v5668_v3  ;;  %v5664_v58 = vmul.f32 0.03125, %v5657_v63  ;;  %vm5687_vm11 = vcmp.eq.f32.partialorder %v5668_v3, inf  ;;  %v5690_v10 = vand.u32 2147483648, %v5668_v3 }
0x263e   : > { %vm5689_vm12 = vcmp.eq.f32.partialorder %v5668_v3, 0.0 }
0x263f   : > { %v8269_v5 = vpop.eup %8268  ;;  %v5669_v49 = vadd.f32 1e-05, %v5664_v58 }
0x2640   : > { %v5672_v53 = vmul.f32 %v8269_v5, %v5666_v29  ;;  %v5660_v43 = vpop.xlane.xlu1 %5659 }
0x2641   : > { %v5665_v48 = vmul.f32 0.03125, %v5660_v43  ;;  %8274 = vrsqrt.f32 %v5669_v49  ;;  %vm5694_vm13 = vcmp.eq.f32.partialorder %v5669_v49, inf  ;;  %v5697_v25 = vand.u32 2147483648, %v5669_v49 }
0x2642   : > { %v5674_v31 = vsel %vm5673_vm0, %v5666_v29, %v5672_v53  ;;  %vm5696_vm14 = vcmp.eq.f32.partialorder %v5669_v49, 0.0 }
0x2643   : > { %v5677_v16 = vsel %vm5675_vm2, %v5676_v44, %v5674_v31  ;;  %v5670_v50 = vadd.f32 1e-05, %v5665_v48  ;;  %v8271_v62 = vpop.eup %8270 }
0x2644   : > { %8276 = vrcp.f32 %v5677_v16  ;;  %v5679_v60 = vmul.f32 %v8271_v62, %v5667_v34 }
0x2645   : > { %8278 = vrsqrt.f32 %v5670_v50  ;;  %vm5701_vm15 = vcmp.eq.f32.partialorder %v5670_v50, inf  ;;  %v5704_v27 = vand.u32 2147483648, %v5670_v50  ;;  %vm5703_vm4 = vcmp.eq.f32.partialorder %v5670_v50, 0.0 }
0x2646   : > { %v5681_v15 = vsel %vm5680_vm6, %v5667_v34, %v5679_v60 }
0x2647   : > { %v8273_v59 = vpop.eup %8272  ;;  %v5684_v6 = vsel %vm5682_vm10, %v5683_v26, %v5681_v15 }
0x2648   : > { %v5686_v9 = vmul.f32 %v8273_v59, %v5668_v3  ;;  %8280 = vrcp.f32 %v5684_v6 }
0x264a   : > { %v5688_v20 = vsel %vm5687_vm11, %v5668_v3, %v5686_v9 }
0x264b   : > { %v5691_v51 = vsel %vm5689_vm12, %v5690_v10, %v5688_v20  ;;  %v8275_v52 = vpop.eup %8274 }
0x264c   : > { %8282 = vrcp.f32 %v5691_v51  ;;  %v5693_v55 = vmul.f32 %v8275_v52, %v5669_v49  ;;  %v6734_v52 = vld [vmem:[%s10370_s11] ss:$0 sm:$0xff]  ;;  %s10375_s11 = sld [smem:[#allocation16_spill]] }
0x264e   : > { %v8277_v40 = vpop.eup %8276  ;;  %v5695_v54 = vsel %vm5694_vm13, %v5669_v49, %v5693_v55 }
0x264f   : > { %v8279_v37 = vpop.eup %8278  ;;  %v5707_v13 = vmul.f32 %v8277_v40, %v10165_v21  ;;  %v5698_v4 = vsel %vm5696_vm14, %v5697_v25, %v5695_v54 }
0x2650   : > { %v5700_v7 = vmul.f32 %v8279_v37, %v5670_v50  ;;  %8284 = vrcp.f32 %v5698_v4 }
0x2651   : > { %v5722_v2 = vmul.f32 %v6726_v36, %v5707_v13 }
0x2652   : > { %v5702_v32 = vsel %vm5701_vm15, %v5670_v50, %v5700_v7  ;;  %v8281_v28 = vpop.eup %8280 }
0x2653   : > { %v5705_v35 = vsel %vm5703_vm4, %v5704_v27, %v5702_v32  ;;  %v5709_v33 = vmul.f32 %v8281_v28, %v10169_v38  ;;  %v10202_v57 = vadd.f32 %v6727_v8, %v5722_v2 }
0x2654   : > { %8286 = vrcp.f32 %v5705_v35 }
0x2655   : > { %v5723_v23 = vmul.f32 %v6726_v36, %v5709_v33 }
0x2656   : > { %v8283_v46 = vpop.eup %8282 }
0x2657   : > { %v10204_v21 = vadd.f32 %v6727_v8, %v5723_v23  ;;  %v5711_v14 = vmul.f32 %v8283_v46, %v10174_v56 }
0x2659   : > { %v5738_v39 = vpack.c.bf16 %v10204_v21, %v10202_v57  ;;  %v5724_v17 = vmul.f32 %v6726_v36, %v5711_v14 }
0x265a   : > { %v8285_v19 = vpop.eup %8284 }
0x265b   : > { %v5713_v12 = vmul.f32 %v8285_v19, %v10177_v24  ;;  %7910 = vmatmul.mubr.msk.bf16.vlgmr.msra.gmra.mrb[44].mxu1 %vm1260_vm3, %v5738_v39  ;;  %v10214_v42 = vadd.f32 %v6727_v8, %v5724_v17 }
0x265c   : > { %7913 = vmatprep.mubr.msk.bf16.mxu1 %vm8357_vm1, %v8356_v1 }
0x265d   : > { %v5725_v47 = vmul.f32 %v6726_v36, %v5713_v12 }
0x265e   : > { %v8287_v38 = vpop.eup %8286 }
0x265f   : > { %v5715_v30 = vmul.f32 %v8287_v38, %v10184_v41  ;;  %v10216_v56 = vadd.f32 %v6727_v8, %v5725_v47  ;;  %v8056_v41 = vld [vmem:[%s10366_s1 + $0x10] sm:$0xff]  }
0x2660   : > { %7926 = vmatpush3.bf16.msra.mxu0 %v8056_v41 }
0x2661   : > { %v5726_v11 = vmul.f32 %v6726_v36, %v5715_v30  ;;  %v5739_v24 = vpack.c.bf16 %v10216_v56, %v10214_v42  ;;  %7927 = vmatprep.subr.bf16.mxu0 %v8356_v1 }
0x2663   : > { %7914 = vmatmul.mubr.msk.bf16.gmra.mrb[48].mxu1 %vm1260_vm3, %v5739_v24  ;;  %v10223_v61 = vadd.f32 %v6727_v8, %v5726_v11 }
0x2664   : > { %7917 = vmatprep.mubr.msk.bf16.mxu1 %vm8357_vm1, %v8356_v1  ;;  %7928 = vmatpush3.bf16.msra.mxu0 %v8057_v22 }
0x2665   : > { %v5740_v29 = vpack.c.bf16 %v10223_v61, %v10223_v61  ;;  %7965 = vmatprep.subr.bf16.mxu0 %v8356_v1 }
0x266b   : > { %7918 = vmatmul.mubr.msk.bf16.gmra.mrb[52].mxu1 %vm1260_vm3, %v5740_v29 }
0x266c   : > { %7945 = vmatprep.mubr.msk.bf16.mxu1 %vm8357_vm1, %v8356_v1 }
0x272e   : > { %v5807_v34 = vpop.f32.mrb[44].mxu1 }
0x272f   : > { %v5808_v18 = vadd.f32 %v6728_v0, %v5807_v34  ;;  %v7911_v45 = vpop.f32.mrb[45].mxu1 }
0x2730   : > { %v5810_v3 = vpop.f32.mrb[46].mxu1 }
0x2731   : > { %v5811_v63 = vadd.f32 %v6728_v0, %v5810_v3  ;;  %v7912_v58 = vpop.f32.mrb[47].mxu1  ;;  %v5829_v5 = vmax.f32 %v5808_v18, 0.0 }
0x2733   : > { %v5830_v53 = vmax.f32 %v5811_v63, 0.0 }
0x2735   : > { %v5834_v49 = vpack.c.bf16 %v5830_v53, %v5829_v5 }
0x2736   : > { %v5815_v43 = vpop.f32.mrb[48].mxu1 }
0x2737   : > { %v5816_v44 = vadd.f32 %v6728_v0, %v5815_v43  ;;  %v7915_v48 = vpop.f32.mrb[49].mxu1  ;;  %7930 = vmatmul.mubr.msk.bf16.vlgmr.msra.gmra.mrb[56].mxu0 %vm3459_vm9, %v5834_v49 }
0x2738   : > { %v5818_v31 = vpop.f32.mrb[50].mxu1  ;;  %7933 = vmatprep.mubr.msk.bf16.mxu0 %vm8357_vm1, %v8356_v1 }
0x2739   : > { %v5819_v16 = vadd.f32 %v6728_v0, %v5818_v31  ;;  %v7916_v50 = vpop.f32.mrb[51].mxu1  ;;  %v5831_v62 = vmax.f32 %v5816_v44, 0.0 }
0x273b   : > { %v5832_v60 = vmax.f32 %v5819_v16, 0.0 }
0x273d   : > { %v5835_v26 = vpack.c.bf16 %v5832_v60, %v5831_v62  ;;  %v8058_v62 = vld [vmem:[%s10371_s22 + $0x10] sm:$0xff]   ;;  %v8059_v60 = vld [vmem:[%s10371_s22 + $0x18] sm:$0xff]  }
0x273e   : > { %v5823_v59 = vpop.f32.mrb[52].mxu1  ;;  %7942 = vmatpush3.bf16.msra.mxu1 %v8058_v62 }
0x273f   : > { %v5824_v15 = vadd.f32 %v6728_v0, %v5823_v59  ;;  %v7919_v6 = vpop.f32.mrb[53].mxu1  ;;  %7934 = vmatmul.mubr.msk.bf16.gmra.mrb[60].mxu0 %vm3459_vm9, %v5835_v26  ;;  %7943 = vmatprep.subr.bf16.mxu1 %v8356_v1  ;;  %v8061_v26 = vld [vmem:[%s10371_s22 + $0x30] sm:$0xff]   ;;  %v8063_v59 = vld [vmem:[%s10371_s22 + $0x38] sm:$0xff]  }
0x2740   : > { %v5826_v9 = vpop.f32.mrb[54].mxu1  ;;  %7937 = vmatprep.mubr.msk.bf16.mxu0 %vm8357_vm1, %v8356_v1  ;;  %7966 = vmatpush3.bf16.msra.mxu0 %v8061_v26  ;;  %v6409_v6 = vld [vmem:[%s1040_s26] sm:$0xff]  ;;  %s1048_s26 = scalar_lea.vmem %s8544_s4, %s10289_s23 }
0x2741   : > { %v5833_v10 = vmax.f32 %v5824_v15, 0.0  ;;  %v7920_v20 = vpop.f32.mrb[55].mxu1  ;;  %7967 = vmatprep.subr.bf16.mxu0 %v8356_v1  ;;  %v8370_v15 = vmov 0   ;;  %v6416_v9 = vld [vmem:[%s1044_s2] sm:$0xff] }
0x2742   : > { %7944 = vmatpush3.bf16.msra.mxu1 %v8059_v60  ;;  %8037 = vset.pattern.permute.xlu0 %v8370_v15 }
0x2743   : > { %v5836_v51 = vpack.c.bf16 %v5833_v10, %v5833_v10  ;;  %7949 = vmatprep.subr.bf16.mxu1 %v8356_v1  ;;  %8038 = vset.pattern.permute.xlu1 %v8370_v15 }
0x2744   : > { %7968 = vmatpush3.bf16.msra.mxu0 %v8063_v59 }
0x2747   : > { %7938 = vmatmul.mubr.msk.bf16.gmra.mrb[64].mxu0 %vm3459_vm9, %v5836_v51 }
0x2748   : > { %7969 = vmatprep.mubr.msk.bf16.mxu0 %vm8357_vm1, %v8356_v1 }
0x280a   : > { %v5919_v55 = vpop.f32.mrb[56].mxu0 }
0x280b   : > { %v7931_v40 = vpop.f32.mrb[57].mxu0  ;;  %v5920_v37 = vadd.f32 %v6734_v52, %v5919_v55 }
0x280c   : > { %v5922_v25 = vpop.f32.mrb[58].mxu0 }
0x280d   : > { %v5923_v54 = vadd.f32 %v6734_v52, %v5922_v25  ;;  %v7932_v13 = vpop.f32.mrb[59].mxu0  ;;  %v5941_v7 = vadd.f32 %v5920_v37, %v10202_v57 }
0x280f   : > { %v5942_v4 = vadd.f32 %v5923_v54, %v10204_v21  ;;  %v5948_v46 = vsel %vm1260_vm3, %v5941_v7, 0.0 }
0x2811   : > { %v5951_v36 = vsel %vm1260_vm3, %v5942_v4, 0.0 }
0x2812   : > { %5952 = vadd.xlane.f32.xlu1 %v5951_v36  ;;  %v5927_v27 = vpop.f32.mrb[60].mxu0 }
0x2813   : > { %v5928_v32 = vadd.f32 %v6734_v52, %v5927_v27  ;;  %v7935_v28 = vpop.f32.mrb[61].mxu0 }
0x2814   : > { %v5930_v35 = vpop.f32.mrb[62].mxu0 }
0x2815   : > { %v5943_v2 = vadd.f32 %v5928_v32, %v10214_v42  ;;  %v5931_v33 = vadd.f32 %v6734_v52, %v5930_v35  ;;  %v7936_v8 = vpop.f32.mrb[63].mxu0 }
0x2816   : > { %5949 = vadd.xlane.f32.xlu1 %v5948_v46 }
0x2817   : > { %v5944_v23 = vadd.f32 %v5931_v33, %v10216_v56  ;;  %v5954_v21 = vsel %vm1260_vm3, %v5943_v2, 0.0 }
0x2818   : > { %5955 = vadd.xlane.f32.xlu0 %v5954_v21 }
0x2819   : > { %v5957_v57 = vsel %vm1260_vm3, %v5944_v23, 0.0 }
0x281a   : > { %5958 = vadd.xlane.f32.xlu1 %v5957_v57  ;;  %v5935_v14 = vpop.f32.mrb[64].mxu0 }
0x281b   : > { %v5936_v39 = vadd.f32 %v6734_v52, %v5935_v14  ;;  %v7939_v19 = vpop.f32.mrb[65].mxu0 }
0x281c   : > { %v5938_v17 = vpop.f32.mrb[66].mxu0 }
0x281d   : > { %v5945_v12 = vadd.f32 %v5936_v39, %v10223_v61  ;;  %v7940_v38 = vpop.f32.mrb[67].mxu0 }
0x281f   : > { %v5960_v47 = vsel %vm1260_vm3, %v5945_v12, 0.0 }
0x2820   : > { %5961 = vadd.xlane.f32.xlu0 %v5960_v47 }
0x289f   : > { %v5953_v30 = vpop.xlane.xlu1 %5952 }
0x28a0   : > { %v5964_v42 = vmul.f32 0.03125, %v5953_v30 }
0x28a2   : > { %v10255_v11 = vsub.f32 %v5942_v4, %v5964_v42 }
0x28a3   : > { %v5950_v56 = vpop.xlane.xlu1 %5949 }
0x28a4   : > { %v5963_v24 = vmul.f32 0.03125, %v5950_v56  ;;  %v5974_v29 = vmul.f32 %v10255_v11, %v10255_v11 }
0x28a5   : > { %v5956_v41 = vpop.xlane.xlu0 %5955 }
0x28a6   : > { %v10259_v22 = vsub.f32 %v5941_v7, %v5963_v24  ;;  %v5965_v0 = vmul.f32 0.03125, %v5956_v41  ;;  %v5981_v34 = vsel %vm1260_vm3, %v5974_v29, 0.0 }
0x28a7   : > { %5982 = vadd.xlane.f32.xlu1 %v5981_v34  ;;  %v5959_v61 = vpop.xlane.xlu1 %5958 }
0x28a8   : > { %v10262_v18 = vsub.f32 %v5943_v2, %v5965_v0  ;;  %v5966_v45 = vmul.f32 0.03125, %v5959_v61  ;;  %v5973_v3 = vmul.f32 %v10259_v22, %v10259_v22  ;;  %v6742_v0 = vld [vmem:[%s10372_s10] ss:$0 sm:$0xff] }
0x28aa   : > { %v10266_v63 = vsub.f32 %v5944_v23, %v5966_v45  ;;  %v5978_v58 = vsel %vm1260_vm3, %v5973_v3, 0.0  ;;  %v5975_v5 = vmul.f32 %v10262_v18, %v10262_v18  ;;  %v6743_v3 = vld [vmem:[%s10373_s0] ss:$0 sm:$0xff] }
0x28ab   : > { %5979 = vadd.xlane.f32.xlu0 %v5978_v58 }
0x28ac   : > { %v5984_v53 = vsel %vm1260_vm3, %v5975_v5, 0.0  ;;  %v5976_v49 = vmul.f32 %v10266_v63, %v10266_v63 }
0x28ad   : > { %5985 = vadd.xlane.f32.xlu1 %v5984_v53  ;;  %v5962_v43 = vpop.xlane.xlu0 %5961 }
0x28ae   : > { %v5967_v44 = vmul.f32 0.03125, %v5962_v43  ;;  %v5987_v48 = vsel %vm1260_vm3, %v5976_v49, 0.0  ;;  %v6744_v49 = vld [vmem:[%s10374_s15] ss:$0 sm:$0xff] }
0x28af   : > { %5988 = vadd.xlane.f32.xlu0 %v5987_v48 }
0x28b0   : > { %v10275_v31 = vsub.f32 %v5945_v12, %v5967_v44 }
0x28b2   : > { %v5977_v16 = vmul.f32 %v10275_v31, %v10275_v31 }
0x28b4   : > { %v5990_v50 = vsel %vm1260_vm3, %v5977_v16, 0.0  ;;  %v6745_v16 = vld [vmem:[%s10375_s11] ss:$0 sm:$0xff] }
0x28b5   : > { %5991 = vadd.xlane.f32.xlu1 %v5990_v50 }
0x28c5   : > { %6412 = vperm.xlu0 %8037, %v6409_v6  }
0x28c6   : > { %6419 = vperm.xlu1 %8038, %v6416_v9   ;;  %v8060_v9 = vld [vmem:[%s10371_s22] sm:$0xff]  }
0x2934   : > { %v5983_v10 = vpop.xlane.xlu1 %5982 }
0x2935   : > { %v5994_v20 = vmul.f32 0.03125, %v5983_v10 }
0x2937   : > { %v5999_v51 = vadd.f32 1e-05, %v5994_v20 }
0x2938   : > { %v5980_v52 = vpop.xlane.xlu0 %5979 }
0x2939   : > { %8288 = vrsqrt.f32 %v5999_v51  ;;  %v5993_v55 = vmul.f32 0.03125, %v5980_v52  ;;  %vm6012_vm9 = vcmp.eq.f32.partialorder %v5999_v51, inf  ;;  %v6015_v35 = vand.u32 2147483648, %v5999_v51 }
0x293a   : > { %v5986_v40 = vpop.xlane.xlu1 %5985  ;;  %vm6014_vm5 = vcmp.eq.f32.partialorder %v5999_v51, 0.0 }
0x293b   : > { %v5995_v25 = vmul.f32 0.03125, %v5986_v40  ;;  %v5998_v37 = vadd.f32 1e-05, %v5993_v55  ;;  %v8062_v40 = vld [vmem:[%s10371_s22 + $0x8] sm:$0xff]  }
0x293c   : > { %v5989_v54 = vpop.xlane.xlu0 %5988 }
0x293d   : > { %v6000_v13 = vadd.f32 1e-05, %v5995_v25  ;;  %v5996_v4 = vmul.f32 0.03125, %v5989_v54  ;;  %8290 = vrsqrt.f32 %v5998_v37  ;;  %vm6005_vm7 = vcmp.eq.f32.partialorder %v5998_v37, inf }
0x293e   : > { %v6008_v57 = vand.u32 2147483648, %v5998_v37  ;;  %vm6007_vm8 = vcmp.eq.f32.partialorder %v5998_v37, 0.0 }
0x293f   : > { %8292 = vrsqrt.f32 %v6000_v13  ;;  %v6001_v7 = vadd.f32 1e-05, %v5996_v4  ;;  %vm6019_vm0 = vcmp.eq.f32.partialorder %v6000_v13, inf  ;;  %v6022_v19 = vand.u32 2147483648, %v6000_v13 }
0x2940   : > { %vm6021_vm2 = vcmp.eq.f32.partialorder %v6000_v13, 0.0 }
0x2941   : > { %8294 = vrsqrt.f32 %v6001_v7  ;;  %vm6026_vm6 = vcmp.eq.f32.partialorder %v6001_v7, inf  ;;  %v6029_v42 = vand.u32 2147483648, %v6001_v7  ;;  %vm6028_vm10 = vcmp.eq.f32.partialorder %v6001_v7, 0.0 }
0x2942   : > { %v5992_v36 = vpop.xlane.xlu1 %5991 }
0x2943   : > { %v8289_v27 = vpop.eup %8288  ;;  %v5997_v32 = vmul.f32 0.03125, %v5992_v36 }
0x2944   : > { %v6011_v28 = vmul.f32 %v8289_v27, %v5999_v51 }
0x2945   : > { %v6002_v2 = vadd.f32 1e-05, %v5997_v32 }
0x2946   : > { %v6013_v33 = vsel %vm6012_vm9, %v5999_v51, %v6011_v28 }
0x2947   : > { %v6016_v8 = vsel %vm6014_vm5, %v6015_v35, %v6013_v33  ;;  %8296 = vrsqrt.f32 %v6002_v2  ;;  %v8291_v46 = vpop.eup %8290  ;;  %vm6033_vm11 = vcmp.eq.f32.partialorder %v6002_v2, inf  ;;  %v6036_v45 = vand.u32 2147483648, %v6002_v2  ;;  %v8066_v35 = vld [vmem:[%s10371_s22 + $0x40] sm:$0xff]  }
0x2948   : > { %8298 = vrcp.f32 %v6016_v8  ;;  %v6004_v21 = vmul.f32 %v8291_v46, %v5998_v37  ;;  %vm6035_vm12 = vcmp.eq.f32.partialorder %v6002_v2, 0.0  ;;  %v8067_v8 = vld [vmem:[%s10371_s22 + $0x48] sm:$0xff]  }
0x2949   : > { %v8293_v23 = vpop.eup %8292 }
0x294a   : > { %v6018_v14 = vmul.f32 %v8293_v23, %v6000_v13  ;;  %v6006_v39 = vsel %vm6005_vm7, %v5998_v37, %v6004_v21 }
0x294b   : > { %v8295_v17 = vpop.eup %8294  ;;  %v6009_v12 = vsel %vm6007_vm8, %v6008_v57, %v6006_v39 }
0x294c   : > { %v6020_v38 = vsel %vm6019_vm0, %v6000_v13, %v6018_v14  ;;  %8300 = vrcp.f32 %v6009_v12  ;;  %v6025_v30 = vmul.f32 %v8295_v17, %v6001_v7  ;;  %v8064_v13 = vld [vmem:[%s10371_s22 + $0x20] sm:$0xff]  }
0x294d   : > { %v6023_v47 = vsel %vm6021_vm2, %v6022_v19, %v6020_v38 }
0x294e   : > { %8302 = vrcp.f32 %v6023_v47  ;;  %v6027_v56 = vsel %vm6026_vm6, %v6001_v7, %v6025_v30 }
0x294f   : > { %v6030_v24 = vsel %vm6028_vm10, %v6029_v42, %v6027_v56 }
0x2950   : > { %8304 = vrcp.f32 %v6030_v24 }
0x2951   : > { %v8297_v29 = vpop.eup %8296 }
0x2952   : > { %v8299_v41 = vpop.eup %8298  ;;  %v6032_v34 = vmul.f32 %v8297_v29, %v6002_v2 }
0x2953   : > { %v6041_v61 = vmul.f32 %v8299_v41, %v10255_v11 }
0x2954   : > { %v6034_v58 = vsel %vm6033_vm11, %v6002_v2, %v6032_v34 }
0x2955   : > { %v6055_v5 = vmul.f32 %v6742_v0, %v6041_v61  ;;  %v6037_v53 = vsel %vm6035_vm12, %v6036_v45, %v6034_v58 }
0x2956   : > { %8306 = vrcp.f32 %v6037_v53  ;;  %v8301_v43 = vpop.eup %8300 }
0x2957   : > { %v6066_v44 = vadd.f32 %v6743_v3, %v6055_v5  ;;  %v6039_v50 = vmul.f32 %v8301_v43, %v10259_v22 }
0x2958   : > { %v8303_v48 = vpop.eup %8302 }
0x2959   : > { %v6078_v62 = vmul.f32 %v6744_v49, %v6066_v44  ;;  %v6043_v11 = vmul.f32 %v8303_v48, %v10262_v18  ;;  %v6054_v60 = vmul.f32 %v6742_v0, %v6039_v50  ;;  %v6420_v48 = vpop.permute.xlu1 %6419 }
0x295a   : > { %v8305_v26 = vpop.eup %8304 }
0x295b   : > { %v6090_v59 = vadd.f32 %v6745_v16, %v6078_v62  ;;  %v6065_v15 = vadd.f32 %v6743_v3, %v6054_v60  ;;  %v6045_v6 = vmul.f32 %v8305_v26, %v10266_v63  ;;  %v6056_v20 = vmul.f32 %v6742_v0, %v6043_v11 }
0x295d   : > { %v6099_v10 = vpack.c.bf16 %v6090_v59, %v6090_v59  ;;  %v6077_v51 = vmul.f32 %v6744_v49, %v6065_v15  ;;  %v6057_v52 = vmul.f32 %v6742_v0, %v6045_v6  ;;  %v6067_v18 = vadd.f32 %v6743_v3, %v6056_v20 }
0x295f   : > { %7946 = vmatmul.mubr.msk.bf16.vlgmr.msra.gmra.mrb[56].mxu1 %vm1260_vm3, %v6099_v10  ;;  %v6068_v22 = vadd.f32 %v6743_v3, %v6057_v52  ;;  %v6089_v63 = vadd.f32 %v6745_v16, %v6077_v51  ;;  %v6079_v4 = vmul.f32 %v6744_v49, %v6067_v18 }
0x2960   : > { %v8307_v55 = vpop.eup %8306  ;;  %7950 = vmatpush3.bf16.msra.mxu1 %v8060_v9  ;;  %7953 = vmatprep.mubr.msk.bf16.mxu1 %vm8357_vm1, %v8356_v1 }
0x2961   : > { %v6047_v25 = vmul.f32 %v8307_v55, %v10275_v31  ;;  %7951 = vmatprep.subr.bf16.mxu1 %v8356_v1  ;;  %v6080_v37 = vmul.f32 %v6744_v49, %v6068_v22  ;;  %v6094_v36 = vpack.c.bf16 %v6089_v63, %v6089_v63  ;;  %v8065_v31 = vld [vmem:[%s10371_s22 + $0x28] sm:$0xff]   ;;  %v6091_v28 = vadd.f32 %v6745_v16, %v6079_v4 }
0x2963   : > { %v6092_v54 = vadd.f32 %v6745_v16, %v6080_v37  ;;  %v6058_v7 = vmul.f32 %v6742_v0, %v6047_v25  ;;  %v6215_v33 = vpack.c.bf16 %v6091_v28, %v6091_v28 }
0x2964   : > { %7952 = vmatpush3.bf16.msra.mxu1 %v8062_v40 }
0x2965   : > { %7957 = vmatprep.subr.bf16.mxu1 %v8356_v1  ;;  %v6277_v27 = vpack.c.bf16 %v6092_v54, %v6092_v54  ;;  %v6069_v32 = vadd.f32 %v6743_v3, %v6058_v7  ;;  %v6777_v3 = vld [vmem:[%s8529_s12] ss:$0 sm:$0xff] }
0x2967   : > { %7954 = vmatmul.mubr.msk.bf16.vlgmr.msra.gmra.mrb[60].mxu1 %vm1260_vm3, %v6094_v36  ;;  %7970 = vmatmul.mubr.msk.bf16.vlgmr.msra.gmra.mrb[68].mxu0 %vm1260_vm3, %v6277_v27  ;;  %v6081_v2 = vmul.f32 %v6744_v49, %v6069_v32  ;;  %v6413_v49 = vpop.permute.xlu0 %6412 }
0x2968   : > { %7958 = vmatpush3.bf16.msra.mxu1 %v8064_v13  ;;  %7961 = vmatprep.mubr.msk.bf16.mxu1 %vm8357_vm1, %v8356_v1 }
0x2969   : > { %7959 = vmatprep.subr.bf16.mxu1 %v8356_v1  ;;  %v6093_v46 = vadd.f32 %v6745_v16, %v6081_v2 }
0x296b   : > { %v6339_v23 = vpack.c.bf16 %v6093_v46, %v6093_v46 }
0x296c   : > { %7960 = vmatpush3.bf16.msra.mxu1 %v8065_v31 }
0x296d   : > { %7973 = vmatprep.subr.bf16.mxu1 %v8356_v1 }
0x296f   : > { %7962 = vmatmul.mubr.msk.bf16.vlgmr.msra.gmra.mrb[64].mxu1 %vm1260_vm3, %v6215_v33 }
0x2970   : > { %7974 = vmatpush3.bf16.msra.mxu1 %v8066_v35  ;;  %7977 = vmatprep.mubr.msk.bf16.mxu1 %vm8357_vm1, %v8356_v1  ;;  %vm6423_vm1 = vcmask 130048  }
0x2971   : > { %7975 = vmatprep.subr.bf16.mxu1 %v8356_v1 }
0x2974   : > { %7976 = vmatpush3.bf16.msra.mxu1 %v8067_v8 }
0x2977   : > { %7978 = vmatmul.mubr.msk.bf16.vlgmr.msra.gmra.mrb[68].mxu1 %vm1260_vm3, %v6339_v23 }
0x2a32   : > { %v6154_v21 = vpop.f32.mrb[56].mxu1 }
0x2a33   : > { %v7947_v57 = vpop.f32.mrb[57].mxu1 }
0x2a34   : > { %v6157_v14 = vpop.f32.mrb[58].mxu1 }
0x2a35   : > { %v7948_v39 = vpop.f32.mrb[59].mxu1 }
0x2a3a   : > { %v6209_v19 = vpop.f32.mrb[60].mxu1  ;;  %v6332_v12 = vpop.f32.mrb[68].mxu0 }
0x2a3b   : > { %v6210_v17 = vadd.f32 %v6209_v19, %v6154_v21  ;;  %v7955_v38 = vpop.f32.mrb[61].mxu1  ;;  %v7971_v47 = vpop.f32.mrb[69].mxu0 }
0x2a3c   : > { %v6212_v30 = vpop.f32.mrb[62].mxu1  ;;  %v6335_v42 = vpop.f32.mrb[70].mxu0 }
0x2a3d   : > { %v7956_v56 = vpop.f32.mrb[63].mxu1  ;;  %v7972_v24 = vpop.f32.mrb[71].mxu0 }
0x2a42   : > { %v6270_v1 = vpop.f32.mrb[64].mxu1 }
0x2a43   : > { %v6276_v29 = vadd.f32 %v6270_v1, %v6210_v17  ;;  %v7963_v41 = vpop.f32.mrb[65].mxu1 }
0x2a44   : > { %v6273_v0 = vpop.f32.mrb[66].mxu1 }
0x2a45   : > { %v7964_v34 = vpop.f32.mrb[67].mxu1  ;;  %v6338_v61 = vadd.f32 %v6332_v12, %v6276_v29 }
0x2a4a   : > { %v6394_v45 = vpop.f32.mrb[68].mxu1 }
0x2a4b   : > { %v6400_v58 = vadd.f32 %v6394_v45, %v6338_v61  ;;  %v7979_v5 = vpop.f32.mrb[69].mxu1 }
0x2a4c   : > { %v6397_v53 = vpop.f32.mrb[70].mxu1 }
0x2a4d   : > { %v7980_v43 = vpop.f32.mrb[71].mxu1  ;;  %v6408_v44 = vadd.f32 %v6777_v3, %v6400_v58 }
0x2a4f   : > { %v6415_v16 = vmul.f32 %v6413_v49, %v6408_v44 }
0x2a51   : > { %v6422_v50 = vadd.f32 %v6420_v48, %v6415_v16 }
0x2a53   : > { %6424 = vst.msk [vmem:[%s1048_s26] sm:$0xff] %vm6423_vm1, %v6422_v50 }
0x2a54 PF: > { %s77_s7 = sadd.s32 1, %s8321_s7  }
0x2a55   : > { %p74_p5 = scmp.ge.s32.totalorder %s77_s7, 4  }
0x2a57   :  { %76 = sbr.rel (!%p74_p5) target bundleno = 55 (0x37), region = 231 }

</bundles_post_ra>
